<compile_context>
chip_gen: v5e
topology: v5e:2x2
jax: 0.10.0
libtpu: 0.0.40
codegen_flags: <defaults>
</compile_context>

<pallas_src>
import functools

import numpy as np

import jax
import jax.numpy as jnp
from jax import lax
from jax.experimental import pallas as pl
from jax.experimental.pallas import tpu as pltpu


# ----------------------------------------------------------------------------
# pallas_call plumbing: every array is small, so each kernel runs as a single
# full-extent block (grid=(1,)), which satisfies the TPU (8,128)-or-full-dim
# BlockSpec rule and keeps everything VMEM resident.
# ----------------------------------------------------------------------------
def _full_spec(shape):
  nd = len(shape)
  return pl.BlockSpec(shape, lambda i, nd=nd: (0,) * nd)


def _pallas(kernel, out_shape, *inputs):
  return pl.pallas_call(
      kernel,
      out_shape=jax.ShapeDtypeStruct(out_shape, jnp.float32),
      grid=(1,),
      in_specs=[_full_spec(x.shape) for x in inputs],
      out_specs=_full_spec(out_shape),
      compiler_params=pltpu.CompilerParams(dimension_semantics=("arbitrary",)),
  )(*inputs)


# ----------------------------------------------------------------------------
# Static forward-pass plan (time extents per block, dead-code elision).
# ----------------------------------------------------------------------------
def _plan(cfg, in_dim):
  routing = list(cfg["R_routing"])
  ks = list(cfg["T_ks"])
  dil = int(cfg["T_dilation"])
  max_k = max(ks)
  rf = 1 + routing.count("T") * (max_k - 1) * dil
  span = max(in_dim, rf)
  blocks = []
  t = span
  for blk in routing:
    t_in = t
    if blk == "T":
      t = t_in - dil * (max_k - 1)
    blocks.append(dict(kind=blk, t_in=t_in, t_out=t))
  # Only blocks 0..4 can reach the returned tensor: the reference forward
  # builds `skip` in a hard-coded i == 5 branch from skip_Input +
  # skip_list[0:5], and x after block 4's residual adds / block 5 is dead.
  n_live = min(len(routing), 5)
  return dict(routing=routing, ks=ks, dil=dil, max_k=max_k, rf=rf, span=span,
              blocks=blocks, n_live=n_live)


# ----------------------------------------------------------------------------
# Pallas kernel 1: G_MTGNN graph learning (pre-topk part).
# ----------------------------------------------------------------------------
def _graph_kernel(alpha, e1_ref, w1_ref, b1_ref, e2_ref, w2_ref, b2_ref, o_ref):
  n1 = jnp.tanh(alpha * (jnp.dot(e1_ref[...], w1_ref[...],
                                 preferred_element_type=jnp.float32)
                         + b1_ref[...]))
  n2 = jnp.tanh(alpha * (jnp.dot(e2_ref[...], w2_ref[...],
                                 preferred_element_type=jnp.float32)
                         + b2_ref[...]))
  a = pl.dot(n1, n2, trans_b=True) - pl.dot(n2, n1, trans_b=True)
  o_ref[...] = jnp.maximum(jnp.tanh(alpha * a), 0.0)


# ----------------------------------------------------------------------------
# Pallas kernel 2: the whole rest of the forward, fused.
# Canonical activation layout: (C*N, T*B), sublane = c*N + n, lane = t*B + b.
# ----------------------------------------------------------------------------
def make_forward_kernel(cfg, n_nodes, batch, in_c, in_dim, out_dim):
  plan = _plan(cfg, in_dim)
  mid = int(cfg["mid_channel"])
  skip_c = int(cfg["skip_channel"])
  end_c = int(cfg["end_channel"])
  hop = int(cfg["S_hop"])
  dil = plan["dil"]
  max_k = plan["max_k"]
  span = plan["span"]
  enc = cfg["R_skip_enc"]
  n_live = plan["n_live"]
  enc_off = [0, 1, 3, 6, 10]

  N = n_nodes
  B = batch
  CN = mid * N
  SN = skip_c * N
  f32 = jnp.float32

  def kernel(x_ref, adjA_ref, adjB_ref,
             repN_ref, selN_ref, cmask_ref, s64t_ref, mask4_ref, eyeb_ref,
             startW_ref, tapW_ref, sW_ref, skipW_ref, end1W_ref, end2W_ref,
             lnG_ref, lnB_ref,
             bmisc_ref, btap_ref, bskip_ref, bs_ref,
             out_ref):

    def mm(a, b):
      return jnp.dot(a, b, preferred_element_type=f32)

    # ---- adjacency operators (hoisted: built once per forward) -------------
    adjA = adjA_ref[...]                               # (2N, N): adj0+I ; adj0^T+I
    adjB = adjB_ref[...]                               # (2N, N): adj1+I ; adj1^T+I
    adjA = adjA / jnp.sum(adjA, axis=1, keepdims=True)
    adjB = adjB / jnp.sum(adjB, axis=1, keepdims=True)
    a_stack = jnp.concatenate([adjA, adjB], axis=0)    # (4N, N) normalised
    # kstack[i*CN:(i+1)*CN] = kron(I_mid, A_norm_i): hop-1 of all 4 MixHop
    # instances in ONE matmul.  Built from two tiny matmuls + a mask.
    kstack = mm(mm(repN_ref[...], a_stack), selN_ref[...]) * cmask_ref[...]
    bd4 = None
    if hop >= 2:
      # block-diagonal form: hop>=2 of all 4 instances in ONE matmul.
      bd4 = mm(kstack, s64t_ref[...]) * mask4_ref[...]

    eye_b = eyeb_ref[...]                              # (B, B)

    # ---- fused sub-ops ------------------------------------------------------
    def time_conv(act, t, w_row, width, b_row):
      # Conv2d(cin, skip_c, (1, t)) over the full window as ONE matmul:
      # stack the t time slices along sublanes (K = t * rows(act)).
      stk = jnp.concatenate([act[:, k * B:(k + 1) * B] for k in range(t)],
                            axis=0)
      w = skipW_ref[w_row:w_row + SN, :width]
      b = bskip_ref[b_row:b_row + SN, :]
      return mm(w, stk) + b

    def t_block(x, t_in, i_t):
      # T_Inception: every tap of every kernel size and both (f, g) gate
      # branches fused into ONE matmul via sublane im2col + a host-folded
      # zero-padded block weight.
      t_out = t_in - dil * (max_k - 1)
      taps = jnp.concatenate(
          [x[:, (m * dil) * B:(m * dil + t_out) * B] for m in range(max_k)],
          axis=0)                                       # (max_k*CN, t_out*B)
      w = tapW_ref[i_t * 2 * CN:(i_t + 1) * 2 * CN, :]
      b = btap_ref[i_t * 2 * CN:(i_t + 1) * 2 * CN, :]
      y = mm(w, taps) + b
      fpart = y[:CN]
      gpart = y[CN:]
      # sigmoid via tanh (same EUP slot, better numerics than exp+recip)
      return jnp.tanh(fpart) * (0.5 * (1.0 + jnp.tanh(0.5 * gpart))), t_out

    def s_block(x, i_s):
      # S_MixHop (fusion='concat'): hop propagation with the stacked /
      # block-diagonal adjacency operators, channel mixing of all 4 MixHop
      # instances + G_mix composed host-side into one matmul.
      slabs = [x]
      p = mm(kstack, x)                                 # all 4 instances, hop 1
      slabs.append(p)
      for _ in range(2, hop + 1):
        p = mm(bd4, p)                                  # all 4 instances, hop j
        slabs.append(p)
      slab = jnp.concatenate(slabs, axis=0)             # (CN*(1+4*hop), t*B)
      w = sW_ref[i_s * CN:(i_s + 1) * CN, :]
      b = bs_ref[i_s * CN:(i_s + 1) * CN, :]
      return mm(w, slab) + b

    def layer_norm(x, t, i_s):
      # torch nn.LayerNorm((mid, N, t)) on (B, mid, N, t): biased per-batch
      # stats.  Per-batch lane selection done with tiny selection matmuls.
      selb = jnp.concatenate([eye_b] * t, axis=0)       # (t*B, B)
      selbT = jnp.concatenate([eye_b] * t, axis=1)      # (B, t*B)
      inv_cnt = 1.0 / float(CN * t)
      mean = mm(mm(jnp.sum(x, axis=0, keepdims=True), selb) * inv_cnt, selbT)
      xc = x - mean
      var = mm(mm(jnp.sum(xc * xc, axis=0, keepdims=True), selb) * inv_cnt,
               selbT)
      g = lnG_ref[i_s * CN:(i_s + 1) * CN, :t * B]
      bb = lnB_ref[i_s * CN:(i_s + 1) * CN, :t * B]
      return xc * lax.rsqrt(var + 1e-5) * g + bb

    # ---- forward ------------------------------------------------------------
    x_in = x_ref[...]                                   # (in_c*N, span*B)

    # dropout p == 0 -> identity everywhere self.do() appears in the reference.
    if enc[15] == "1":
      skip = time_conv(x_in, span, w_row=0, width=span * in_c * N, b_row=0)
    else:
      skip = jnp.zeros((SN, B), f32)

    # start 1x1 conv == one matmul with the kron(W, I_N) weight
    x = mm(startW_ref[...], x_in) + bmisc_ref[0:CN, :]

    res = []
    i_t = 0
    i_s = 0
    for i in range(n_live):
      blk = plan["blocks"][i]
      t_in = blk["t_in"]
      res.append((x, t_in))
      if blk["kind"] == "T":
        x, t_cur = t_block(x, t_in, i_t)
        if enc[16 + i] == "1":
          skip = skip + time_conv(x, t_cur, w_row=(1 + i) * SN,
                                  width=t_cur * CN, b_row=(1 + i) * SN)
        i_t += 1
      else:
        t_cur = t_in
        xs = s_block(x, i_s)
        if enc[16 + i] == "1":                          # skip taken pre-norm
          skip = skip + time_conv(xs, t_cur, w_row=(1 + i) * SN,
                                  width=t_cur * CN, b_row=(1 + i) * SN)
        x = layer_norm(xs, t_cur, i_s)
        i_s += 1
      if i <= 3:                 # residual adds after block 4 are dead code
        for j in range(i + 1):
          if enc[enc_off[i] + j] == "1":
            r, t_r = res[j]
            x = x + r[:, (t_r - t_cur) * B:]            # last t_cur steps

    # end MLP on the skip path: relu -> 1x1 -> relu -> 1x1
    y = jnp.maximum(skip, 0.0)
    y = jnp.maximum(mm(end1W_ref[...], y) + bmisc_ref[CN:CN + end_c * N, :],
                    0.0)
    off = CN + end_c * N
    y = mm(end2W_ref[...], y) + bmisc_ref[off:off + out_dim * N, :]
    out_ref[...] = y                                     # (out_dim*N, B)

  return kernel


# ----------------------------------------------------------------------------
# Host-side parameter packing: fold / compose / kron-expand everything ONCE so
# the kernel does nothing but slices, concats and single matmuls.
# ----------------------------------------------------------------------------
def _compose_mixhop(out_w, out_b, mlp_w, mlp_b, hop, alpha):
  """MixHop(fusion='concat') collapsed to: out = sum_j M_j (A^j x) + bias."""
  mid = out_w.shape[0]
  Wk = [out_w[:, k * mid:(k + 1) * mid] for k in range(hop + 1)]
  Ck = [Wk[k] @ mlp_w[k - 1] for k in range(1, hop + 1)]
  coef = [np.array([1.0], np.float64)]
  for k in range(1, hop + 1):
    c = np.zeros(k + 1, np.float64)
    c[0] = alpha
    c[1:] = (1.0 - alpha) * coef[k - 1]
    coef.append(c)
  M = [np.zeros((mid, mid), np.float32) for _ in range(hop + 1)]
  M[0] = Wk[0].astype(np.float32).copy()
  bias = out_b.astype(np.float32).copy()
  for k in range(1, hop + 1):
    for j in range(k + 1):
      M[j] = M[j] + np.float32(coef[k][j]) * Ck[k - 1]
    bias = bias + Wk[k] @ mlp_b[k - 1]
  return M, bias


def pack_params(params, cfg, n_nodes, batch, in_dim):
  plan = _plan(cfg, in_dim)
  mid = int(cfg["mid_channel"])
  skip_c = int(cfg["skip_channel"])
  hop = int(cfg["S_hop"])
  hopalpha = float(cfg["S_hopalpha"])
  gmix = float(cfg["G_mix"])
  ks = plan["ks"]
  max_k = plan["max_k"]
  span = plan["span"]
  N = n_nodes
  B = batch
  CN = mid * N
  cok = mid // len(ks)
  eyeN = np.eye(N, dtype=np.float32)

  def kronN(m):
    return np.kron(np.asarray(m, np.float32), eyeN)

  def repN(v):
    return np.repeat(np.asarray(v, np.float32), N)[:, None]

  pk = {}
  # graph-learning params (separate small kernel)
  gc = params["gc"]
  pk["gc_emb1"] = jnp.asarray(gc["emb1"], jnp.float32)
  pk["gc_emb2"] = jnp.asarray(gc["emb2"], jnp.float32)
  pk["gc_lin1_wT"] = jnp.asarray(gc["lin1_wT"], jnp.float32)
  pk["gc_lin1_b"] = jnp.asarray(gc["lin1_b"], jnp.float32)
  pk["gc_lin2_wT"] = jnp.asarray(gc["lin2_wT"], jnp.float32)
  pk["gc_lin2_b"] = jnp.asarray(gc["lin2_b"], jnp.float32)

  # static adjacency, eye-added and stacked with its transpose
  adj0 = np.asarray(params["adj"], np.float32)
  pk["adjA"] = jnp.asarray(
      np.concatenate([adj0 + eyeN, adj0.T + eyeN], axis=0), jnp.float32)

  # constants for the in-kernel kron(I_C, A) construction
  pk["repN"] = jnp.asarray(
      np.kron(np.eye(4, dtype=np.float32),
              np.kron(np.ones((mid, 1), np.float32), eyeN)), jnp.float32)
  pk["selN"] = jnp.asarray(np.kron(np.ones((1, mid), np.float32), eyeN),
                           jnp.float32)
  pk["cmask"] = jnp.asarray(
      np.kron(np.ones((4, 1), np.float32),
              np.kron(np.eye(mid, dtype=np.float32),
                      np.ones((N, N), np.float32))), jnp.float32)
  pk["s64t"] = jnp.asarray(
      np.kron(np.ones((1, 4), np.float32), np.eye(CN, dtype=np.float32)),
      jnp.float32)
  pk["mask4"] = jnp.asarray(
      np.kron(np.eye(4, dtype=np.float32), np.ones((CN, CN), np.float32)),
      jnp.float32)
  pk["eye_b"] = jnp.asarray(np.eye(B, dtype=np.float32), jnp.float32)

  # start / end 1x1 convs, kron-expanded for the (C*N, T*B) layout
  pk["startW"] = jnp.asarray(kronN(params["start_w"]))
  pk["end1W"] = jnp.asarray(kronN(params["end1_w"]))
  pk["end2W"] = jnp.asarray(kronN(params["end2_w"]))
  pk["bias_misc"] = jnp.asarray(np.concatenate(
      [repN(params["start_b"]), repN(params["end1_b"]),
       repN(params["end2_b"])], axis=0))

  # skip convs: fold (skip_c, ci, t) -> kron((skip_c, t*ci), I_N)
  def fold_skip(w):
    w = np.asarray(w, np.float32)
    wr = np.transpose(w, (0, 2, 1)).reshape(w.shape[0], -1)
    return kronN(wr)

  skip_ws = [fold_skip(params["skipInput_w"])]
  skip_bs = [repN(params["skipInput_b"])]

  tap_ws, tap_bs = [], []
  s_ws, s_bs, ln_gs, ln_bs = [], [], [], []
  gvec = [1.0 - gmix, 1.0 - gmix, gmix, gmix]

  for i in range(plan["n_live"]):
    bp = params["blocks"][i]
    blk = plan["blocks"][i]
    skip_ws.append(fold_skip(bp["skip_w"]))
    skip_bs.append(repN(bp["skip_b"]))
    if blk["kind"] == "T":
      # fold every tap of every branch and both gates into one block weight
      wc = np.zeros((2 * mid, max_k * mid), np.float32)
      bc = np.zeros((2 * mid,), np.float32)
      row = 0
      for gate in ("f", "g"):
        for bi, k in enumerate(ks):
          w = np.asarray(bp["w" + gate][bi], np.float32)     # (cok, mid, k)
          b = np.asarray(bp["b" + gate][bi], np.float32)     # (cok,)
          for j in range(k):
            m = max_k - k + j
            wc[row:row + cok, m * mid:(m + 1) * mid] = w[:, :, j]
          bc[row:row + cok] = b
          row += cok
      tap_ws.append(kronN(wc))
      tap_bs.append(repN(bc))
    else:
      # compose the 4 MixHop instances + G_mix into one channel matmul
      m_sum0 = np.zeros((mid, mid), np.float32)
      m_hops = [[None] * 4 for _ in range(hop)]
      bias_tot = np.zeros((mid,), np.float32)
      for inst in range(4):
        M, bvec = _compose_mixhop(
            np.asarray(bp["out_w"][inst], np.float32),
            np.asarray(bp["out_b"][inst], np.float32),
            np.asarray(bp["mlp_w"][inst], np.float32),
            np.asarray(bp["mlp_b"][inst], np.float32), hop, hopalpha)
        m_sum0 += gvec[inst] * M[0]
        for j in range(1, hop + 1):
          m_hops[j - 1][inst] = gvec[inst] * M[j]
        bias_tot += gvec[inst] * bvec
      cols = [kronN(m_sum0)]
      for j in range(hop):
        for inst in range(4):
          cols.append(kronN(m_hops[j][inst]))
      s_ws.append(np.concatenate(cols, axis=1))
      s_bs.append(repN(bias_tot))
      t_out = blk["t_out"]
      ln_gs.append(np.repeat(
          np.asarray(bp["ln_g"], np.float32).reshape(CN, t_out), B, axis=1))
      ln_bs.append(np.repeat(
          np.asarray(bp["ln_b"], np.float32).reshape(CN, t_out), B, axis=1))

  wmax = max(w.shape[1] for w in skip_ws)
  skip_ws = [np.pad(w, ((0, 0), (0, wmax - w.shape[1]))) for w in skip_ws]
  pk["skipW"] = jnp.asarray(np.concatenate(skip_ws, axis=0))
  pk["bias_skip"] = jnp.asarray(np.concatenate(skip_bs, axis=0))
  pk["tapW"] = jnp.asarray(np.concatenate(tap_ws, axis=0))
  pk["bias_tap"] = jnp.asarray(np.concatenate(tap_bs, axis=0))
  pk["sW"] = jnp.asarray(np.concatenate(s_ws, axis=0))
  pk["bias_s"] = jnp.asarray(np.concatenate(s_bs, axis=0))
  lmax = max(a.shape[1] for a in ln_gs)
  ln_gs = [np.pad(a, ((0, 0), (0, lmax - a.shape[1]))) for a in ln_gs]
  ln_bs = [np.pad(a, ((0, 0), (0, lmax - a.shape[1]))) for a in ln_bs]
  pk["lnG"] = jnp.asarray(np.concatenate(ln_gs, axis=0))
  pk["lnB"] = jnp.asarray(np.concatenate(ln_bs, axis=0))
  return pk


# ----------------------------------------------------------------------------
# Forward (JAX glue: input permute/pad, top-k edge masking, 2 pallas_calls).
# ----------------------------------------------------------------------------
def stgnn_forward(packed, cfg, x_raw, noise_key):
  B, in_c, in_dim, N = x_raw.shape
  plan = _plan(cfg, in_dim)
  span = plan["span"]
  out_dim = packed["end2W"].shape[0] // N

  # reference: input.permute(0,1,3,2) -> (B, in_c, N, T), pad T left to rf.
  x = jnp.transpose(x_raw.astype(jnp.float32), (0, 1, 3, 2))
  if in_dim < plan["rf"]:
    x = jnp.pad(x, ((0, 0), (0, 0), (0, 0), (plan["rf"] - in_dim, 0)))
  # single boundary transpose into the kernel's (C*N, T*B) layout
  x_k = jnp.transpose(x, (1, 2, 3, 0)).reshape(in_c * N, span * B)

  # --- graph learning: Pallas kernel + plain-JAX top-k edge masking ---------
  adj_raw = _pallas(functools.partial(_graph_kernel, float(cfg["G_alpha"])),
                    (N, N),
                    packed["gc_emb1"], packed["gc_lin1_wT"], packed["gc_lin1_b"],
                    packed["gc_emb2"], packed["gc_lin2_wT"], packed["gc_lin2_b"])
  # TODO(synk): top-k + scatter edge masking (and its PRNG tie-break noise)
  # has no clean Pallas mapping; kept in plain JAX between the two calls.
  noise = jax.random.uniform(noise_key, (N, N), jnp.float32) * 0.01
  _, topk_idx = jax.lax.top_k(adj_raw + noise, int(cfg["G_k"]))
  mask = jnp.zeros((N, N), jnp.float32).at[
      jnp.arange(N)[:, None], topk_idx].set(1.0)
  adj1e = adj_raw * mask + jnp.eye(N, dtype=jnp.float32)
  adjB = jnp.concatenate([adj1e, adj1e.T], axis=0)   # row-normalised in-kernel

  # --- one fused Pallas kernel for the entire rest of the forward -----------
  kernel = make_forward_kernel(cfg, N, B, in_c, in_dim, out_dim)
  inputs = [x_k, packed["adjA"], adjB,
            packed["repN"], packed["selN"], packed["cmask"],
            packed["s64t"], packed["mask4"], packed["eye_b"],
            packed["startW"], packed["tapW"], packed["sW"], packed["skipW"],
            packed["end1W"], packed["end2W"], packed["lnG"], packed["lnB"],
            packed["bias_misc"], packed["bias_tap"], packed["bias_skip"],
            packed["bias_s"]]
  out2 = _pallas(kernel, (out_dim * N, B), *inputs)
  # reference: x.squeeze().permute(1, 0, 2) -> (out_dim, B, N)
  return jnp.transpose(out2.reshape(out_dim, N, B), (0, 2, 1))


# ----------------------------------------------------------------------------
# Deterministic parameter init (raw, module-like shapes; pack_params folds
# them into the kernel-ready layout).
# ----------------------------------------------------------------------------
def init_params(key, cfg, n_nodes, in_c, in_dim, out_dim):
  plan = _plan(cfg, in_dim)
  mid = int(cfg["mid_channel"])
  skip_c = int(cfg["skip_channel"])
  end_c = int(cfg["end_channel"])
  hop = int(cfg["S_hop"])
  gdim = int(cfg["G_dim"])
  ks = plan["ks"]
  span = plan["span"]
  cok = mid // len(ks)

  it = iter(jax.random.split(key, 512))

  def rnd(shape, scale=0.1):
    return (scale * jax.random.normal(next(it), shape)).astype(jnp.float32)

  p = {}
  p["gc"] = dict(emb1=rnd((n_nodes, gdim)), emb2=rnd((n_nodes, gdim)),
                 lin1_wT=rnd((gdim, gdim)), lin1_b=rnd((1, gdim)),
                 lin2_wT=rnd((gdim, gdim)), lin2_b=rnd((1, gdim)))
  p["start_w"], p["start_b"] = rnd((mid, in_c)), rnd((mid,))
  p["skipInput_w"] = rnd((skip_c, in_c, span))
  p["skipInput_b"] = rnd((skip_c,))
  p["end1_w"], p["end1_b"] = rnd((end_c, skip_c)), rnd((end_c,))
  p["end2_w"], p["end2_b"] = rnd((out_dim, end_c)), rnd((out_dim,))

  blocks = []
  for blk in plan["blocks"]:
    kt = blk["t_out"]
    if blk["kind"] == "T":
      blocks.append(dict(
          wf=[rnd((cok, mid, k)) for k in ks], bf=[rnd((cok,)) for _ in ks],
          wg=[rnd((cok, mid, k)) for k in ks], bg=[rnd((cok,)) for _ in ks],
          skip_w=rnd((skip_c, mid, kt)), skip_b=rnd((skip_c,))))
    else:
      blocks.append(dict(
          mlp_w=rnd((4, hop, mid, mid)), mlp_b=rnd((4, hop, mid)),
          out_w=rnd((4, mid, (hop + 1) * mid)), out_b=rnd((4, mid)),
          skip_w=rnd((skip_c, mid, kt)), skip_b=rnd((skip_c,)),
          ln_g=jnp.ones((mid, n_nodes, kt), jnp.float32)
               + rnd((mid, n_nodes, kt), 0.05),
          ln_b=rnd((mid, n_nodes, kt), 0.05)))
  p["blocks"] = blocks
  return p


# ----------------------------------------------------------------------------
if __name__ == "__main__":
  N, B, IN_C, IN_DIM, OUT_DIM = 8, 2, 2, 12, 12

  cfg = dict(
      G_method="mtgnn", G_k=4, G_dim=8, G_alpha=3.0, G_mix=0.5,
      mid_channel=8, skip_channel=8, end_channel=16,
      dropout=0.0,
      R_routing="TSTSTS",
      T_ks=[2, 3], T_dilation=1,
      S_hop=2, S_hopalpha=0.05, S_fusion="concat",
      R_skip=True, R_residual=True,
      R_skip_enc="1" * 21,
  )
  assert cfg["S_fusion"] == "concat"

  key = jax.random.PRNGKey(0)
  k_par, k_adj, k_x, k_noise = jax.random.split(key, 4)

  params = init_params(k_par, cfg, N, IN_C, IN_DIM, OUT_DIM)
  params["adj"] = jax.random.uniform(k_adj, (N, N), dtype=jnp.float32)

  # host-side packing/composition: done ONCE, outside jit (arrays only ->
  # fixes the previous "str passed to jit" failure and cuts DMA count ~3x)
  packed = pack_params(params, cfg, N, B, IN_DIM)

  # original forward expects (B, in_c, T, N) and permutes to (B, in_c, N, T)
  x = jax.random.normal(k_x, (B, IN_C, IN_DIM, N), dtype=jnp.float32)

  fwd = jax.jit(lambda p, xr, nk: stgnn_forward(p, cfg, xr, nk))
  out = jax.block_until_ready(fwd(packed, x, k_noise))

  assert out.shape == (OUT_DIM, B, N), out.shape
  assert bool(jnp.all(jnp.isfinite(out)))
  print("KERNEL_OK")
</pallas_src>

<mosaic_0001>
module attributes {stable_mosaic.version = 11 : i64} {
  func.func @_graph_kernel(%arg0: i32, %arg1: memref<8x8xf32, #tpu.memory_space<vmem>>, %arg2: memref<8x8xf32, #tpu.memory_space<vmem>>, %arg3: memref<1x8xf32, #tpu.memory_space<vmem>>, %arg4: memref<8x8xf32, #tpu.memory_space<vmem>>, %arg5: memref<8x8xf32, #tpu.memory_space<vmem>>, %arg6: memref<1x8xf32, #tpu.memory_space<vmem>>, %arg7: memref<8x8xf32, #tpu.memory_space<vmem>>) attributes {dimension_semantics = [#tpu.dimension_semantics<arbitrary>], iteration_bounds = array<i64: 1>, scalar_prefetch = 0 : i64, scratch_operands = 0 : i64, tpu.core_type = #tpu.core_type<tc>, window_params = [{pipeline_mode = #tpu.pipeline_mode<synchronous>, transform_indices = @transform_0, window_bounds = array<i64: 8, 8>}, {pipeline_mode = #tpu.pipeline_mode<synchronous>, transform_indices = @transform_1, window_bounds = array<i64: 8, 8>}, {pipeline_mode = #tpu.pipeline_mode<synchronous>, transform_indices = @transform_2, window_bounds = array<i64: 1, 8>}, {pipeline_mode = #tpu.pipeline_mode<synchronous>, transform_indices = @transform_3, window_bounds = array<i64: 8, 8>}, {pipeline_mode = #tpu.pipeline_mode<synchronous>, transform_indices = @transform_4, window_bounds = array<i64: 8, 8>}, {pipeline_mode = #tpu.pipeline_mode<synchronous>, transform_indices = @transform_5, window_bounds = array<i64: 1, 8>}, {pipeline_mode = #tpu.pipeline_mode<synchronous>, transform_indices = @transform_6, window_bounds = array<i64: 8, 8>}]} {
    %c0 = arith.constant 0 : index
    %c0_0 = arith.constant 0 : index
    %0 = vector.load %arg1[%c0, %c0_0] : memref<8x8xf32, #tpu.memory_space<vmem>>, vector<8x8xf32>
    %c0_1 = arith.constant 0 : index
    %c0_2 = arith.constant 0 : index
    %1 = vector.load %arg2[%c0_1, %c0_2] : memref<8x8xf32, #tpu.memory_space<vmem>>, vector<8x8xf32>
    %cst = arith.constant dense<0.000000e+00> : vector<8x8xf32>
    %2 = tpu.matmul %0, %1, %cst {dimension_numbers = #tpu.dot_dimension_numbers<[1], [0], [0], [1], [0, 0, 1, 1], [], []>} : vector<8x8xf32>, vector<8x8xf32>, vector<8x8xf32> -> vector<8x8xf32>
    %c0_3 = arith.constant 0 : index
    %c0_4 = arith.constant 0 : index
    %3 = vector.load %arg3[%c0_3, %c0_4] : memref<1x8xf32, #tpu.memory_space<vmem>>, vector<1x8xf32>
    %4 = vector.broadcast %3 : vector<1x8xf32> to vector<8x8xf32>
    %5 = arith.addf %2, %4 : vector<8x8xf32>
    %cst_5 = arith.constant 3.000000e+00 : f32
    %6 = vector.broadcast %cst_5 : f32 to vector<8x8xf32>
    %7 = arith.mulf %6, %5 : vector<8x8xf32>
    %8 = math.tanh %7 : vector<8x8xf32>
    %c0_6 = arith.constant 0 : index
    %c0_7 = arith.constant 0 : index
    %9 = vector.load %arg4[%c0_6, %c0_7] : memref<8x8xf32, #tpu.memory_space<vmem>>, vector<8x8xf32>
    %c0_8 = arith.constant 0 : index
    %c0_9 = arith.constant 0 : index
    %10 = vector.load %arg5[%c0_8, %c0_9] : memref<8x8xf32, #tpu.memory_space<vmem>>, vector<8x8xf32>
    %cst_10 = arith.constant dense<0.000000e+00> : vector<8x8xf32>
    %11 = tpu.matmul %9, %10, %cst_10 {dimension_numbers = #tpu.dot_dimension_numbers<[1], [0], [0], [1], [0, 0, 1, 1], [], []>} : vector<8x8xf32>, vector<8x8xf32>, vector<8x8xf32> -> vector<8x8xf32>
    %c0_11 = arith.constant 0 : index
    %c0_12 = arith.constant 0 : index
    %12 = vector.load %arg6[%c0_11, %c0_12] : memref<1x8xf32, #tpu.memory_space<vmem>>, vector<1x8xf32>
    %13 = vector.broadcast %12 : vector<1x8xf32> to vector<8x8xf32>
    %14 = arith.addf %11, %13 : vector<8x8xf32>
    %cst_13 = arith.constant 3.000000e+00 : f32
    %15 = vector.broadcast %cst_13 : f32 to vector<8x8xf32>
    %16 = arith.mulf %15, %14 : vector<8x8xf32>
    %17 = math.tanh %16 : vector<8x8xf32>
    %cst_14 = arith.constant dense<0.000000e+00> : vector<8x8xf32>
    %18 = tpu.matmul %8, %17, %cst_14 {dimension_numbers = #tpu.dot_dimension_numbers<[1], [1], [0], [0], [0, 0, 1, 0], [], []>} : vector<8x8xf32>, vector<8x8xf32>, vector<8x8xf32> -> vector<8x8xf32>
    %cst_15 = arith.constant dense<0.000000e+00> : vector<8x8xf32>
    %19 = tpu.matmul %17, %8, %cst_15 {dimension_numbers = #tpu.dot_dimension_numbers<[1], [1], [0], [0], [0, 0, 1, 0], [], []>} : vector<8x8xf32>, vector<8x8xf32>, vector<8x8xf32> -> vector<8x8xf32>
    %20 = arith.subf %18, %19 : vector<8x8xf32>
    %cst_16 = arith.constant 3.000000e+00 : f32
    %21 = vector.broadcast %cst_16 : f32 to vector<8x8xf32>
    %22 = arith.mulf %21, %20 : vector<8x8xf32>
    %23 = math.tanh %22 : vector<8x8xf32>
    %cst_17 = arith.constant 0.000000e+00 : f32
    %24 = vector.broadcast %cst_17 : f32 to vector<8x8xf32>
    %25 = arith.maximumf %23, %24 : vector<8x8xf32>
    %c0_18 = arith.constant 0 : index
    %c0_19 = arith.constant 0 : index
    %26 = vector.load %arg7[%c0_18, %c0_19] : memref<8x8xf32, #tpu.memory_space<vmem>>, vector<8x8xf32>
    tpu.vector_store %arg7[%c0_18, %c0_19], %25 {strides = array<i32>} : memref<8x8xf32, #tpu.memory_space<vmem>>, vector<8x8xf32>,
    return
  }
  func.func @transform_0(%arg0: i32) -> (i32, i32) {
    %c0_i32 = arith.constant 0 : i32
    %c0_i32_0 = arith.constant 0 : i32
    %c0_i32_1 = arith.constant 0 : i32
    return %c0_i32, %c0_i32_0 : i32, i32
  }
  func.func @transform_1(%arg0: i32) -> (i32, i32) {
    %c0_i32 = arith.constant 0 : i32
    %c0_i32_0 = arith.constant 0 : i32
    %c0_i32_1 = arith.constant 0 : i32
    return %c0_i32, %c0_i32_0 : i32, i32
  }
  func.func @transform_2(%arg0: i32) -> (i32, i32) {
    %c0_i32 = arith.constant 0 : i32
    %c0_i32_0 = arith.constant 0 : i32
    %c0_i32_1 = arith.constant 0 : i32
    return %c0_i32, %c0_i32_0 : i32, i32
  }
  func.func @transform_3(%arg0: i32) -> (i32, i32) {
    %c0_i32 = arith.constant 0 : i32
    %c0_i32_0 = arith.constant 0 : i32
    %c0_i32_1 = arith.constant 0 : i32
    return %c0_i32, %c0_i32_0 : i32, i32
  }
  func.func @transform_4(%arg0: i32) -> (i32, i32) {
    %c0_i32 = arith.constant 0 : i32
    %c0_i32_0 = arith.constant 0 : i32
    %c0_i32_1 = arith.constant 0 : i32
    return %c0_i32, %c0_i32_0 : i32, i32
  }
  func.func @transform_5(%arg0: i32) -> (i32, i32) {
    %c0_i32 = arith.constant 0 : i32
    %c0_i32_0 = arith.constant 0 : i32
    %c0_i32_1 = arith.constant 0 : i32
    return %c0_i32, %c0_i32_0 : i32, i32
  }
  func.func @transform_6(%arg0: i32) -> (i32, i32) {
    %c0_i32 = arith.constant 0 : i32
    %c0_i32_0 = arith.constant 0 : i32
    %c0_i32_1 = arith.constant 0 : i32
    return %c0_i32, %c0_i32_0 : i32, i32
  }
}

module attributes {stable_mosaic.version = 11 : i64} {
  func.func @kernel(%arg0: i32, %arg1: memref<16x24xf32, #tpu.memory_space<vmem>>, %arg2: memref<16x8xf32, #tpu.memory_space<vmem>>, %arg3: memref<16x8xf32, #tpu.memory_space<vmem>>, %arg4: memref<256x32xf32, #tpu.memory_space<vmem>>, %arg5: memref<8x64xf32, #tpu.memory_space<vmem>>, %arg6: memref<256x64xf32, #tpu.memory_space<vmem>>, %arg7: memref<64x256xf32, #tpu.memory_space<vmem>>, %arg8: memref<256x256xf32, #tpu.memory_space<vmem>>, %arg9: memref<2x2xf32, #tpu.memory_space<vmem>>, %arg10: memref<64x16xf32, #tpu.memory_space<vmem>>, %arg11: memref<384x192xf32, #tpu.memory_space<vmem>>, %arg12: memref<128x576xf32, #tpu.memory_space<vmem>>, %arg13: memref<384x640xf32, #tpu.memory_space<vmem>>, %arg14: memref<128x64xf32, #tpu.memory_space<vmem>>, %arg15: memref<96x128xf32, #tpu.memory_space<vmem>>, %arg16: memref<128x20xf32, #tpu.memory_space<vmem>>, %arg17: memref<128x20xf32, #tpu.memory_space<vmem>>, %arg18: memref<288x1xf32, #tpu.memory_space<vmem>>, %arg19: memref<384x1xf32, #tpu.memory_space<vmem>>, %arg20: memref<384x1xf32, #tpu.memory_space<vmem>>, %arg21: memref<128x1xf32, #tpu.memory_space<vmem>>, %arg22: memref<96x2xf32, #tpu.memory_space<vmem>>) attributes {dimension_semantics = [#tpu.dimension_semantics<arbitrary>], iteration_bounds = array<i64: 1>, scalar_prefetch = 0 : i64, scratch_operands = 0 : i64, tpu.core_type = #tpu.core_type<tc>, window_params = [{pipeline_mode = #tpu.pipeline_mode<synchronous>, transform_indices = @transform_0, window_bounds = array<i64: 16, 24>}, {pipeline_mode = #tpu.pipeline_mode<synchronous>, transform_indices = @transform_1, window_bounds = array<i64: 16, 8>}, {pipeline_mode = #tpu.pipeline_mode<synchronous>, transform_indices = @transform_2, window_bounds = array<i64: 16, 8>}, {pipeline_mode = #tpu.pipeline_mode<synchronous>, transform_indices = @transform_3, window_bounds = array<i64: 256, 32>}, {pipeline_mode = #tpu.pipeline_mode<synchronous>, transform_indices = @transform_4, window_bounds = array<i64: 8, 64>}, {pipeline_mode = #tpu.pipeline_mode<synchronous>, transform_indices = @transform_5, window_bounds = array<i64: 256, 64>}, {pipeline_mode = #tpu.pipeline_mode<synchronous>, transform_indices = @transform_6, window_bounds = array<i64: 64, 256>}, {pipeline_mode = #tpu.pipeline_mode<synchronous>, transform_indices = @transform_7, window_bounds = array<i64: 256, 256>}, {pipeline_mode = #tpu.pipeline_mode<synchronous>, transform_indices = @transform_8, window_bounds = array<i64: 2, 2>}, {pipeline_mode = #tpu.pipeline_mode<synchronous>, transform_indices = @transform_9, window_bounds = array<i64: 64, 16>}, {pipeline_mode = #tpu.pipeline_mode<synchronous>, transform_indices = @transform_10, window_bounds = array<i64: 384, 192>}, {pipeline_mode = #tpu.pipeline_mode<synchronous>, transform_indices = @transform_11, window_bounds = array<i64: 128, 576>}, {pipeline_mode = #tpu.pipeline_mode<synchronous>, transform_indices = @transform_12, window_bounds = array<i64: 384, 640>}, {pipeline_mode = #tpu.pipeline_mode<synchronous>, transform_indices = @transform_13, window_bounds = array<i64: 128, 64>}, {pipeline_mode = #tpu.pipeline_mode<synchronous>, transform_indices = @transform_14, window_bounds = array<i64: 96, 128>}, {pipeline_mode = #tpu.pipeline_mode<synchronous>, transform_indices = @transform_15, window_bounds = array<i64: 128, 20>}, {pipeline_mode = #tpu.pipeline_mode<synchronous>, transform_indices = @transform_16, window_bounds = array<i64: 128, 20>}, {pipeline_mode = #tpu.pipeline_mode<synchronous>, transform_indices = @transform_17, window_bounds = array<i64: 288, 1>}, {pipeline_mode = #tpu.pipeline_mode<synchronous>, transform_indices = @transform_18, window_bounds = array<i64: 384, 1>}, {pipeline_mode = #tpu.pipeline_mode<synchronous>, transform_indices = @transform_19, window_bounds = array<i64: 384, 1>}, {pipeline_mode = #tpu.pipeline_mode<synchronous>, transform_indices = @transform_20, window_bounds = array<i64: 128, 1>}, {pipeline_mode = #tpu.pipeline_mode<synchronous>, transform_indices = @transform_21, window_bounds = array<i64: 96, 2>}]} {
    %c0 = arith.constant 0 : index
    %c0_0 = arith.constant 0 : index
    %0 = vector.load %arg2[%c0, %c0_0] : memref<16x8xf32, #tpu.memory_space<vmem>>, vector<16x8xf32>
    %c0_1 = arith.constant 0 : index
    %c0_2 = arith.constant 0 : index
    %1 = vector.load %arg3[%c0_1, %c0_2] : memref<16x8xf32, #tpu.memory_space<vmem>>, vector<16x8xf32>
    %cst = arith.constant dense<0.000000e+00> : vector<16xf32>
    %2 = vector.multi_reduction <add>, %0, %cst [1] : vector<16x8xf32> to vector<16xf32>
    %3 = vector.shape_cast %2 : vector<16xf32> to vector<16x1xf32>
    %4 = vector.broadcast %3 : vector<16x1xf32> to vector<16x8xf32>
    %5 = arith.divf %0, %4 : vector<16x8xf32>
    %cst_3 = arith.constant dense<0.000000e+00> : vector<16xf32>
    %6 = vector.multi_reduction <add>, %1, %cst_3 [1] : vector<16x8xf32> to vector<16xf32>
    %7 = vector.shape_cast %6 : vector<16xf32> to vector<16x1xf32>
    %8 = vector.broadcast %7 : vector<16x1xf32> to vector<16x8xf32>
    %9 = arith.divf %1, %8 : vector<16x8xf32>
    %10 = tpu.concatenate %5, %9 in 0 : vector<16x8xf32>, vector<16x8xf32> -> vector<32x8xf32>
    %c0_4 = arith.constant 0 : index
    %c0_5 = arith.constant 0 : index
    %11 = vector.load %arg4[%c0_4, %c0_5] : memref<256x32xf32, #tpu.memory_space<vmem>>, vector<256x32xf32>
    %cst_6 = arith.constant dense<0.000000e+00> : vector<256x8xf32>
    %12 = tpu.matmul %11, %10, %cst_6 {dimension_numbers = #tpu.dot_dimension_numbers<[1], [0], [0], [1], [0, 0, 1, 1], [], []>} : vector<256x32xf32>, vector<32x8xf32>, vector<256x8xf32> -> vector<256x8xf32>
    %c0_7 = arith.constant 0 : index
    %c0_8 = arith.constant 0 : index
    %13 = vector.load %arg5[%c0_7, %c0_8] : memref<8x64xf32, #tpu.memory_space<vmem>>, vector<8x64xf32>
    %cst_9 = arith.constant dense<0.000000e+00> : vector<256x64xf32>
    %14 = tpu.matmul %12, %13, %cst_9 {dimension_numbers = #tpu.dot_dimension_numbers<[1], [0], [0], [1], [0, 0, 1, 1], [], []>} : vector<256x8xf32>, vector<8x64xf32>, vector<256x64xf32> -> vector<256x64xf32>
    %c0_10 = arith.constant 0 : index
    %c0_11 = arith.constant 0 : index
    %15 = vector.load %arg6[%c0_10, %c0_11] : memref<256x64xf32, #tpu.memory_space<vmem>>, vector<256x64xf32>
    %16 = arith.mulf %14, %15 : vector<256x64xf32>
    %c0_12 = arith.constant 0 : index
    %c0_13 = arith.constant 0 : index
    %17 = vector.load %arg7[%c0_12, %c0_13] : memref<64x256xf32, #tpu.memory_space<vmem>>, vector<64x256xf32>
    %cst_14 = arith.constant dense<0.000000e+00> : vector<256x256xf32>
    %18 = tpu.matmul %16, %17, %cst_14 {dimension_numbers = #tpu.dot_dimension_numbers<[1], [0], [0], [1], [0, 0, 1, 1], [], []>} : vector<256x64xf32>, vector<64x256xf32>, vector<256x256xf32> -> vector<256x256xf32>
    %c0_15 = arith.constant 0 : index
    %c0_16 = arith.constant 0 : index
    %19 = vector.load %arg8[%c0_15, %c0_16] : memref<256x256xf32, #tpu.memory_space<vmem>>, vector<256x256xf32>
    %20 = arith.mulf %18, %19 : vector<256x256xf32>
    %c0_17 = arith.constant 0 : index
    %c0_18 = arith.constant 0 : index
    %21 = vector.load %arg9[%c0_17, %c0_18] : memref<2x2xf32, #tpu.memory_space<vmem>>, vector<2x2xf32>
    %c0_19 = arith.constant 0 : index
    %c0_20 = arith.constant 0 : index
    %22 = vector.load %arg1[%c0_19, %c0_20] : memref<16x24xf32, #tpu.memory_space<vmem>>, vector<16x24xf32>
    %23 = vector.extract_strided_slice %22 {offsets = [0, 0], sizes = [16, 2], strides = [1, 1]} : vector<16x24xf32> to vector<16x2xf32>
    %24 = vector.extract_strided_slice %22 {offsets = [0, 2], sizes = [16, 2], strides = [1, 1]} : vector<16x24xf32> to vector<16x2xf32>
    %25 = vector.extract_strided_slice %22 {offsets = [0, 4], sizes = [16, 2], strides = [1, 1]} : vector<16x24xf32> to vector<16x2xf32>
    %26 = vector.extract_strided_slice %22 {offsets = [0, 6], sizes = [16, 2], strides = [1, 1]} : vector<16x24xf32> to vector<16x2xf32>
    %27 = vector.extract_strided_slice %22 {offsets = [0, 8], sizes = [16, 2], strides = [1, 1]} : vector<16x24xf32> to vector<16x2xf32>
    %28 = vector.extract_strided_slice %22 {offsets = [0, 10], sizes = [16, 2], strides = [1, 1]} : vector<16x24xf32> to vector<16x2xf32>
    %29 = vector.extract_strided_slice %22 {offsets = [0, 12], sizes = [16, 2], strides = [1, 1]} : vector<16x24xf32> to vector<16x2xf32>
    %30 = vector.extract_strided_slice %22 {offsets = [0, 14], sizes = [16, 2], strides = [1, 1]} : vector<16x24xf32> to vector<16x2xf32>
    %31 = vector.extract_strided_slice %22 {offsets = [0, 16], sizes = [16, 2], strides = [1, 1]} : vector<16x24xf32> to vector<16x2xf32>
    %32 = vector.extract_strided_slice %22 {offsets = [0, 18], sizes = [16, 2], strides = [1, 1]} : vector<16x24xf32> to vector<16x2xf32>
    %33 = vector.extract_strided_slice %22 {offsets = [0, 20], sizes = [16, 2], strides = [1, 1]} : vector<16x24xf32> to vector<16x2xf32>
    %34 = vector.extract_strided_slice %22 {offsets = [0, 22], sizes = [16, 2], strides = [1, 1]} : vector<16x24xf32> to vector<16x2xf32>
    %35 = tpu.concatenate %23, %24, %25, %26, %27, %28, %29, %30, %31, %32, %33, %34 in 0 : vector<16x2xf32>, vector<16x2xf32>, vector<16x2xf32>, vector<16x2xf32>, vector<16x2xf32>, vector<16x2xf32>, vector<16x2xf32>, vector<16x2xf32>, vector<16x2xf32>, vector<16x2xf32>, vector<16x2xf32>, vector<16x2xf32> -> vector<192x2xf32>
    %c0_21 = arith.constant 0 : index
    %c0_22 = arith.constant 0 : index
    %36 = vector.load %arg13[%c0_21, %c0_22] : memref<384x640xf32, #tpu.memory_space<vmem>>, vector<64x192xf32>
    %c0_23 = arith.constant 0 : index
    %c0_24 = arith.constant 0 : index
    %37 = vector.load %arg20[%c0_23, %c0_24] : memref<384x1xf32, #tpu.memory_space<vmem>>, vector<64x1xf32>
    %cst_25 = arith.constant dense<0.000000e+00> : vector<64x2xf32>
    %38 = tpu.matmul %36, %35, %cst_25 {dimension_numbers = #tpu.dot_dimension_numbers<[1], [0], [0], [1], [0, 0, 1, 1], [], []>} : vector<64x192xf32>, vector<192x2xf32>, vector<64x2xf32> -> vector<64x2xf32>
    %39 = vector.broadcast %37 : vector<64x1xf32> to vector<64x2xf32>
    %40 = arith.addf %38, %39 : vector<64x2xf32>
    %c0_26 = arith.constant 0 : index
    %c0_27 = arith.constant 0 : index
    %41 = vector.load %arg10[%c0_26, %c0_27] : memref<64x16xf32, #tpu.memory_space<vmem>>, vector<64x16xf32>
    %cst_28 = arith.constant dense<0.000000e+00> : vector<64x24xf32>
    %42 = tpu.matmul %41, %22, %cst_28 {dimension_numbers = #tpu.dot_dimension_numbers<[1], [0], [0], [1], [0, 0, 1, 1], [], []>} : vector<64x16xf32>, vector<16x24xf32>, vector<64x24xf32> -> vector<64x24xf32>
    %c0_29 = arith.constant 0 : index
    %c0_30 = arith.constant 0 : index
    %43 = vector.load %arg18[%c0_29, %c0_30] : memref<288x1xf32, #tpu.memory_space<vmem>>, vector<64x1xf32>
    %44 = vector.broadcast %43 : vector<64x1xf32> to vector<64x24xf32>
    %45 = arith.addf %42, %44 : vector<64x24xf32>
    %46 = vector.extract_strided_slice %45 {offsets = [0, 0], sizes = [64, 20], strides = [1, 1]} : vector<64x24xf32> to vector<64x20xf32>
    %47 = vector.extract_strided_slice %45 {offsets = [0, 2], sizes = [64, 20], strides = [1, 1]} : vector<64x24xf32> to vector<64x20xf32>
    %48 = vector.extract_strided_slice %45 {offsets = [0, 4], sizes = [64, 20], strides = [1, 1]} : vector<64x24xf32> to vector<64x20xf32>
    %49 = tpu.concatenate %46, %47, %48 in 0 : vector<64x20xf32>, vector<64x20xf32>, vector<64x20xf32> -> vector<192x20xf32>
    %c0_31 = arith.constant 0 : index
    %c0_32 = arith.constant 0 : index
    %50 = vector.load %arg11[%c0_31, %c0_32] : memref<384x192xf32, #tpu.memory_space<vmem>>, vector<128x192xf32>
    %c0_33 = arith.constant 0 : index
    %c0_34 = arith.constant 0 : index
    %51 = vector.load %arg19[%c0_33, %c0_34] : memref<384x1xf32, #tpu.memory_space<vmem>>, vector<128x1xf32>
    %cst_35 = arith.constant dense<0.000000e+00> : vector<128x20xf32>
    %52 = tpu.matmul %50, %49, %cst_35 {dimension_numbers = #tpu.dot_dimension_numbers<[1], [0], [0], [1], [0, 0, 1, 1], [], []>} : vector<128x192xf32>, vector<192x20xf32>, vector<128x20xf32> -> vector<128x20xf32>
    %53 = vector.broadcast %51 : vector<128x1xf32> to vector<128x20xf32>
    %54 = arith.addf %52, %53 : vector<128x20xf32>
    %55 = vector.extract_strided_slice %54 {offsets = [0, 0], sizes = [64, 20], strides = [1, 1]} : vector<128x20xf32> to vector<64x20xf32>
    %56 = vector.extract_strided_slice %54 {offsets = [64, 0], sizes = [64, 20], strides = [1, 1]} : vector<128x20xf32> to vector<64x20xf32>
    %57 = math.tanh %55 : vector<64x20xf32>
    %cst_36 = arith.constant 5.000000e-01 : f32
    %58 = vector.broadcast %cst_36 : f32 to vector<64x20xf32>
    %59 = arith.mulf %58, %56 : vector<64x20xf32>
    %60 = math.tanh %59 : vector<64x20xf32>
    %cst_37 = arith.constant 1.000000e+00 : f32
    %61 = vector.broadcast %cst_37 : f32 to vector<64x20xf32>
    %62 = arith.addf %61, %60 : vector<64x20xf32>
    %cst_38 = arith.constant 5.000000e-01 : f32
    %63 = vector.broadcast %cst_38 : f32 to vector<64x20xf32>
    %64 = arith.mulf %63, %62 : vector<64x20xf32>
    %65 = arith.mulf %57, %64 : vector<64x20xf32>
    %66 = vector.extract_strided_slice %65 {offsets = [0, 0], sizes = [64, 2], strides = [1, 1]} : vector<64x20xf32> to vector<64x2xf32>
    %67 = vector.extract_strided_slice %65 {offsets = [0, 2], sizes = [64, 2], strides = [1, 1]} : vector<64x20xf32> to vector<64x2xf32>
    %68 = vector.extract_strided_slice %65 {offsets = [0, 4], sizes = [64, 2], strides = [1, 1]} : vector<64x20xf32> to vector<64x2xf32>
    %69 = vector.extract_strided_slice %65 {offsets = [0, 6], sizes = [64, 2], strides = [1, 1]} : vector<64x20xf32> to vector<64x2xf32>
    %70 = vector.extract_strided_slice %65 {offsets = [0, 8], sizes = [64, 2], strides = [1, 1]} : vector<64x20xf32> to vector<64x2xf32>
    %71 = vector.extract_strided_slice %65 {offsets = [0, 10], sizes = [64, 2], strides = [1, 1]} : vector<64x20xf32> to vector<64x2xf32>
    %72 = vector.extract_strided_slice %65 {offsets = [0, 12], sizes = [64, 2], strides = [1, 1]} : vector<64x20xf32> to vector<64x2xf32>
    %73 = vector.extract_strided_slice %65 {offsets = [0, 14], sizes = [64, 2], strides = [1, 1]} : vector<64x20xf32> to vector<64x2xf32>
    %74 = vector.extract_strided_slice %65 {offsets = [0, 16], sizes = [64, 2], strides = [1, 1]} : vector<64x20xf32> to vector<64x2xf32>
    %75 = vector.extract_strided_slice %65 {offsets = [0, 18], sizes = [64, 2], strides = [1, 1]} : vector<64x20xf32> to vector<64x2xf32>
    %76 = tpu.concatenate %66, %67, %68, %69, %70, %71, %72, %73, %74, %75 in 0 : vector<64x2xf32>, vector<64x2xf32>, vector<64x2xf32>, vector<64x2xf32>, vector<64x2xf32>, vector<64x2xf32>, vector<64x2xf32>, vector<64x2xf32>, vector<64x2xf32>, vector<64x2xf32> -> vector<640x2xf32>
    %c64 = arith.constant 64 : index
    %c0_39 = arith.constant 0 : index
    %77 = vector.load %arg13[%c64, %c0_39] : memref<384x640xf32, #tpu.memory_space<vmem>>, vector<64x640xf32>
    %c64_40 = arith.constant 64 : index
    %c0_41 = arith.constant 0 : index
    %78 = vector.load %arg20[%c64_40, %c0_41] : memref<384x1xf32, #tpu.memory_space<vmem>>, vector<64x1xf32>
    %cst_42 = arith.constant dense<0.000000e+00> : vector<64x2xf32>
    %79 = tpu.matmul %77, %76, %cst_42 {dimension_numbers = #tpu.dot_dimension_numbers<[1], [0], [0], [1], [0, 0, 1, 1], [], []>} : vector<64x640xf32>, vector<640x2xf32>, vector<64x2xf32> -> vector<64x2xf32>
    %80 = vector.broadcast %78 : vector<64x1xf32> to vector<64x2xf32>
    %81 = arith.addf %79, %80 : vector<64x2xf32>
    %82 = arith.addf %40, %81 : vector<64x2xf32>
    %83 = vector.extract_strided_slice %45 {offsets = [0, 4], sizes = [64, 20], strides = [1, 1]} : vector<64x24xf32> to vector<64x20xf32>
    %84 = arith.addf %65, %83 : vector<64x20xf32>
    %cst_43 = arith.constant dense<0.000000e+00> : vector<256x20xf32>
    %85 = tpu.matmul %16, %84, %cst_43 {dimension_numbers = #tpu.dot_dimension_numbers<[1], [0], [0], [1], [0, 0, 1, 1], [], []>} : vector<256x64xf32>, vector<64x20xf32>, vector<256x20xf32> -> vector<256x20xf32>
    %cst_44 = arith.constant dense<0.000000e+00> : vector<256x20xf32>
    %86 = tpu.matmul %20, %85, %cst_44 {dimension_numbers = #tpu.dot_dimension_numbers<[1], [0], [0], [1], [0, 0, 1, 1], [], []>} : vector<256x256xf32>, vector<256x20xf32>, vector<256x20xf32> -> vector<256x20xf32>
    %87 = tpu.concatenate %84, %85, %86 in 0 : vector<64x20xf32>, vector<256x20xf32>, vector<256x20xf32> -> vector<576x20xf32>
    %c0_45 = arith.constant 0 : index
    %c0_46 = arith.constant 0 : index
    %88 = vector.load %arg12[%c0_45, %c0_46] : memref<128x576xf32, #tpu.memory_space<vmem>>, vector<64x576xf32>
    %c0_47 = arith.constant 0 : index
    %c0_48 = arith.constant 0 : index
    %89 = vector.load %arg21[%c0_47, %c0_48] : memref<128x1xf32, #tpu.memory_space<vmem>>, vector<64x1xf32>
    %cst_49 = arith.constant dense<0.000000e+00> : vector<64x20xf32>
    %90 = tpu.matmul %88, %87, %cst_49 {dimension_numbers = #tpu.dot_dimension_numbers<[1], [0], [0], [1], [0, 0, 1, 1], [], []>} : vector<64x576xf32>, vector<576x20xf32>, vector<64x20xf32> -> vector<64x20xf32>
    %91 = vector.broadcast %89 : vector<64x1xf32> to vector<64x20xf32>
    %92 = arith.addf %90, %91 : vector<64x20xf32>
    %93 = vector.extract_strided_slice %92 {offsets = [0, 0], sizes = [64, 2], strides = [1, 1]} : vector<64x20xf32> to vector<64x2xf32>
    %94 = vector.extract_strided_slice %92 {offsets = [0, 2], sizes = [64, 2], strides = [1, 1]} : vector<64x20xf32> to vector<64x2xf32>
    %95 = vector.extract_strided_slice %92 {offsets = [0, 4], sizes = [64, 2], strides = [1, 1]} : vector<64x20xf32> to vector<64x2xf32>
    %96 = vector.extract_strided_slice %92 {offsets = [0, 6], sizes = [64, 2], strides = [1, 1]} : vector<64x20xf32> to vector<64x2xf32>
    %97 = vector.extract_strided_slice %92 {offsets = [0, 8], sizes = [64, 2], strides = [1, 1]} : vector<64x20xf32> to vector<64x2xf32>
    %98 = vector.extract_strided_slice %92 {offsets = [0, 10], sizes = [64, 2], strides = [1, 1]} : vector<64x20xf32> to vector<64x2xf32>
    %99 = vector.extract_strided_slice %92 {offsets = [0, 12], sizes = [64, 2], strides = [1, 1]} : vector<64x20xf32> to vector<64x2xf32>
    %100 = vector.extract_strided_slice %92 {offsets = [0, 14], sizes = [64, 2], strides = [1, 1]} : vector<64x20xf32> to vector<64x2xf32>
    %101 = vector.extract_strided_slice %92 {offsets = [0, 16], sizes = [64, 2], strides = [1, 1]} : vector<64x20xf32> to vector<64x2xf32>
    %102 = vector.extract_strided_slice %92 {offsets = [0, 18], sizes = [64, 2], strides = [1, 1]} : vector<64x20xf32> to vector<64x2xf32>
    %103 = tpu.concatenate %93, %94, %95, %96, %97, %98, %99, %100, %101, %102 in 0 : vector<64x2xf32>, vector<64x2xf32>, vector<64x2xf32>, vector<64x2xf32>, vector<64x2xf32>, vector<64x2xf32>, vector<64x2xf32>, vector<64x2xf32>, vector<64x2xf32>, vector<64x2xf32> -> vector<640x2xf32>
    %c128 = arith.constant 128 : index
    %c0_50 = arith.constant 0 : index
    %104 = vector.load %arg13[%c128, %c0_50] : memref<384x640xf32, #tpu.memory_space<vmem>>, vector<64x640xf32>
    %c128_51 = arith.constant 128 : index
    %c0_52 = arith.constant 0 : index
    %105 = vector.load %arg20[%c128_51, %c0_52] : memref<384x1xf32, #tpu.memory_space<vmem>>, vector<64x1xf32>
    %cst_53 = arith.constant dense<0.000000e+00> : vector<64x2xf32>
    %106 = tpu.matmul %104, %103, %cst_53 {dimension_numbers = #tpu.dot_dimension_numbers<[1], [0], [0], [1], [0, 0, 1, 1], [], []>} : vector<64x640xf32>, vector<640x2xf32>, vector<64x2xf32> -> vector<64x2xf32>
    %107 = vector.broadcast %105 : vector<64x1xf32> to vector<64x2xf32>
    %108 = arith.addf %106, %107 : vector<64x2xf32>
    %109 = arith.addf %82, %108 : vector<64x2xf32>
    %110 = tpu.concatenate %21, %21, %21, %21, %21, %21, %21, %21, %21, %21 in 0 : vector<2x2xf32>, vector<2x2xf32>, vector<2x2xf32>, vector<2x2xf32>, vector<2x2xf32>, vector<2x2xf32>, vector<2x2xf32>, vector<2x2xf32>, vector<2x2xf32>, vector<2x2xf32> -> vector<20x2xf32>
    %111 = tpu.concatenate %21, %21, %21, %21, %21, %21, %21, %21, %21, %21 in 1 : vector<2x2xf32>, vector<2x2xf32>, vector<2x2xf32>, vector<2x2xf32>, vector<2x2xf32>, vector<2x2xf32>, vector<2x2xf32>, vector<2x2xf32>, vector<2x2xf32>, vector<2x2xf32> -> vector<2x20xf32>
    %cst_54 = arith.constant dense<0.000000e+00> : vector<20xf32>
    %112 = vector.multi_reduction <add>, %92, %cst_54 [0] : vector<64x20xf32> to vector<20xf32>
    %113 = vector.shape_cast %112 : vector<20xf32> to vector<1x20xf32>
    %cst_55 = arith.constant dense<0.000000e+00> : vector<1x2xf32>
    %114 = tpu.matmul %113, %110, %cst_55 {dimension_numbers = #tpu.dot_dimension_numbers<[1], [0], [0], [1], [0, 0, 1, 1], [], []>} : vector<1x20xf32>, vector<20x2xf32>, vector<1x2xf32> -> vector<1x2xf32>
    %cst_56 = arith.constant 1.562500e-03 : f32
    %115 = vector.broadcast %cst_56 : f32 to vector<1x2xf32>
    %116 = arith.mulf %114, %115 : vector<1x2xf32>
    %cst_57 = arith.constant dense<0.000000e+00> : vector<1x20xf32>
    %117 = tpu.matmul %116, %111, %cst_57 {dimension_numbers = #tpu.dot_dimension_numbers<[1], [0], [0], [1], [0, 0, 1, 1], [], []>} : vector<1x2xf32>, vector<2x20xf32>, vector<1x20xf32> -> vector<1x20xf32>
    %118 = vector.broadcast %117 : vector<1x20xf32> to vector<64x20xf32>
    %119 = arith.subf %92, %118 : vector<64x20xf32>
    %120 = arith.mulf %119, %119 : vector<64x20xf32>
    %cst_58 = arith.constant dense<0.000000e+00> : vector<20xf32>
    %121 = vector.multi_reduction <add>, %120, %cst_58 [0] : vector<64x20xf32> to vector<20xf32>
    %122 = vector.shape_cast %121 : vector<20xf32> to vector<1x20xf32>
    %cst_59 = arith.constant dense<0.000000e+00> : vector<1x2xf32>
    %123 = tpu.matmul %122, %110, %cst_59 {dimension_numbers = #tpu.dot_dimension_numbers<[1], [0], [0], [1], [0, 0, 1, 1], [], []>} : vector<1x20xf32>, vector<20x2xf32>, vector<1x2xf32> -> vector<1x2xf32>
    %cst_60 = arith.constant 1.562500e-03 : f32
    %124 = vector.broadcast %cst_60 : f32 to vector<1x2xf32>
    %125 = arith.mulf %123, %124 : vector<1x2xf32>
    %cst_61 = arith.constant dense<0.000000e+00> : vector<1x20xf32>
    %126 = tpu.matmul %125, %111, %cst_61 {dimension_numbers = #tpu.dot_dimension_numbers<[1], [0], [0], [1], [0, 0, 1, 1], [], []>} : vector<1x2xf32>, vector<2x20xf32>, vector<1x20xf32> -> vector<1x20xf32>
    %c0_62 = arith.constant 0 : index
    %c0_63 = arith.constant 0 : index
    %127 = vector.load %arg16[%c0_62, %c0_63] : memref<128x20xf32, #tpu.memory_space<vmem>>, vector<64x20xf32>
    %c0_64 = arith.constant 0 : index
    %c0_65 = arith.constant 0 : index
    %128 = vector.load %arg17[%c0_64, %c0_65] : memref<128x20xf32, #tpu.memory_space<vmem>>, vector<64x20xf32>
    %cst_66 = arith.constant 9.99999974E-6 : f32
    %129 = vector.broadcast %cst_66 : f32 to vector<1x20xf32>
    %130 = arith.addf %126, %129 : vector<1x20xf32>
    %131 = math.rsqrt %130 : vector<1x20xf32>
    %132 = vector.broadcast %131 : vector<1x20xf32> to vector<64x20xf32>
    %133 = arith.mulf %119, %132 : vector<64x20xf32>
    %134 = arith.mulf %133, %127 : vector<64x20xf32>
    %135 = arith.addf %134, %128 : vector<64x20xf32>
    %136 = vector.extract_strided_slice %45 {offsets = [0, 4], sizes = [64, 20], strides = [1, 1]} : vector<64x24xf32> to vector<64x20xf32>
    %137 = arith.addf %135, %136 : vector<64x20xf32>
    %138 = arith.addf %137, %84 : vector<64x20xf32>
    %139 = vector.extract_strided_slice %138 {offsets = [0, 0], sizes = [64, 16], strides = [1, 1]} : vector<64x20xf32> to vector<64x16xf32>
    %140 = vector.extract_strided_slice %138 {offsets = [0, 2], sizes = [64, 16], strides = [1, 1]} : vector<64x20xf32> to vector<64x16xf32>
    %141 = vector.extract_strided_slice %138 {offsets = [0, 4], sizes = [64, 16], strides = [1, 1]} : vector<64x20xf32> to vector<64x16xf32>
    %142 = tpu.concatenate %139, %140, %141 in 0 : vector<64x16xf32>, vector<64x16xf32>, vector<64x16xf32> -> vector<192x16xf32>
    %c128_67 = arith.constant 128 : index
    %c0_68 = arith.constant 0 : index
    %143 = vector.load %arg11[%c128_67, %c0_68] : memref<384x192xf32, #tpu.memory_space<vmem>>, vector<128x192xf32>
    %c128_69 = arith.constant 128 : index
    %c0_70 = arith.constant 0 : index
    %144 = vector.load %arg19[%c128_69, %c0_70] : memref<384x1xf32, #tpu.memory_space<vmem>>, vector<128x1xf32>
    %cst_71 = arith.constant dense<0.000000e+00> : vector<128x16xf32>
    %145 = tpu.matmul %143, %142, %cst_71 {dimension_numbers = #tpu.dot_dimension_numbers<[1], [0], [0], [1], [0, 0, 1, 1], [], []>} : vector<128x192xf32>, vector<192x16xf32>, vector<128x16xf32> -> vector<128x16xf32>
    %146 = vector.broadcast %144 : vector<128x1xf32> to vector<128x16xf32>
    %147 = arith.addf %145, %146 : vector<128x16xf32>
    %148 = vector.extract_strided_slice %147 {offsets = [0, 0], sizes = [64, 16], strides = [1, 1]} : vector<128x16xf32> to vector<64x16xf32>
    %149 = vector.extract_strided_slice %147 {offsets = [64, 0], sizes = [64, 16], strides = [1, 1]} : vector<128x16xf32> to vector<64x16xf32>
    %150 = math.tanh %148 : vector<64x16xf32>
    %cst_72 = arith.constant 5.000000e-01 : f32
    %151 = vector.broadcast %cst_72 : f32 to vector<64x16xf32>
    %152 = arith.mulf %151, %149 : vector<64x16xf32>
    %153 = math.tanh %152 : vector<64x16xf32>
    %cst_73 = arith.constant 1.000000e+00 : f32
    %154 = vector.broadcast %cst_73 : f32 to vector<64x16xf32>
    %155 = arith.addf %154, %153 : vector<64x16xf32>
    %cst_74 = arith.constant 5.000000e-01 : f32
    %156 = vector.broadcast %cst_74 : f32 to vector<64x16xf32>
    %157 = arith.mulf %156, %155 : vector<64x16xf32>
    %158 = arith.mulf %150, %157 : vector<64x16xf32>
    %159 = vector.extract_strided_slice %158 {offsets = [0, 0], sizes = [64, 2], strides = [1, 1]} : vector<64x16xf32> to vector<64x2xf32>
    %160 = vector.extract_strided_slice %158 {offsets = [0, 2], sizes = [64, 2], strides = [1, 1]} : vector<64x16xf32> to vector<64x2xf32>
    %161 = vector.extract_strided_slice %158 {offsets = [0, 4], sizes = [64, 2], strides = [1, 1]} : vector<64x16xf32> to vector<64x2xf32>
    %162 = vector.extract_strided_slice %158 {offsets = [0, 6], sizes = [64, 2], strides = [1, 1]} : vector<64x16xf32> to vector<64x2xf32>
    %163 = vector.extract_strided_slice %158 {offsets = [0, 8], sizes = [64, 2], strides = [1, 1]} : vector<64x16xf32> to vector<64x2xf32>
    %164 = vector.extract_strided_slice %158 {offsets = [0, 10], sizes = [64, 2], strides = [1, 1]} : vector<64x16xf32> to vector<64x2xf32>
    %165 = vector.extract_strided_slice %158 {offsets = [0, 12], sizes = [64, 2], strides = [1, 1]} : vector<64x16xf32> to vector<64x2xf32>
    %166 = vector.extract_strided_slice %158 {offsets = [0, 14], sizes = [64, 2], strides = [1, 1]} : vector<64x16xf32> to vector<64x2xf32>
    %167 = tpu.concatenate %159, %160, %161, %162, %163, %164, %165, %166 in 0 : vector<64x2xf32>, vector<64x2xf32>, vector<64x2xf32>, vector<64x2xf32>, vector<64x2xf32>, vector<64x2xf32>, vector<64x2xf32>, vector<64x2xf32> -> vector<512x2xf32>
    %c192 = arith.constant 192 : index
    %c0_75 = arith.constant 0 : index
    %168 = vector.load %arg13[%c192, %c0_75] : memref<384x640xf32, #tpu.memory_space<vmem>>, vector<64x512xf32>
    %c192_76 = arith.constant 192 : index
    %c0_77 = arith.constant 0 : index
    %169 = vector.load %arg20[%c192_76, %c0_77] : memref<384x1xf32, #tpu.memory_space<vmem>>, vector<64x1xf32>
    %cst_78 = arith.constant dense<0.000000e+00> : vector<64x2xf32>
    %170 = tpu.matmul %168, %167, %cst_78 {dimension_numbers = #tpu.dot_dimension_numbers<[1], [0], [0], [1], [0, 0, 1, 1], [], []>} : vector<64x512xf32>, vector<512x2xf32>, vector<64x2xf32> -> vector<64x2xf32>
    %171 = vector.broadcast %169 : vector<64x1xf32> to vector<64x2xf32>
    %172 = arith.addf %170, %171 : vector<64x2xf32>
    %173 = arith.addf %109, %172 : vector<64x2xf32>
    %174 = vector.extract_strided_slice %45 {offsets = [0, 8], sizes = [64, 16], strides = [1, 1]} : vector<64x24xf32> to vector<64x16xf32>
    %175 = arith.addf %158, %174 : vector<64x16xf32>
    %176 = vector.extract_strided_slice %84 {offsets = [0, 4], sizes = [64, 16], strides = [1, 1]} : vector<64x20xf32> to vector<64x16xf32>
    %177 = arith.addf %175, %176 : vector<64x16xf32>
    %178 = vector.extract_strided_slice %138 {offsets = [0, 4], sizes = [64, 16], strides = [1, 1]} : vector<64x20xf32> to vector<64x16xf32>
    %179 = arith.addf %177, %178 : vector<64x16xf32>
    %cst_79 = arith.constant dense<0.000000e+00> : vector<256x16xf32>
    %180 = tpu.matmul %16, %179, %cst_79 {dimension_numbers = #tpu.dot_dimension_numbers<[1], [0], [0], [1], [0, 0, 1, 1], [], []>} : vector<256x64xf32>, vector<64x16xf32>, vector<256x16xf32> -> vector<256x16xf32>
    %cst_80 = arith.constant dense<0.000000e+00> : vector<256x16xf32>
    %181 = tpu.matmul %20, %180, %cst_80 {dimension_numbers = #tpu.dot_dimension_numbers<[1], [0], [0], [1], [0, 0, 1, 1], [], []>} : vector<256x256xf32>, vector<256x16xf32>, vector<256x16xf32> -> vector<256x16xf32>
    %182 = tpu.concatenate %179, %180, %181 in 0 : vector<64x16xf32>, vector<256x16xf32>, vector<256x16xf32> -> vector<576x16xf32>
    %c64_81 = arith.constant 64 : index
    %c0_82 = arith.constant 0 : index
    %183 = vector.load %arg12[%c64_81, %c0_82] : memref<128x576xf32, #tpu.memory_space<vmem>>, vector<64x576xf32>
    %c64_83 = arith.constant 64 : index
    %c0_84 = arith.constant 0 : index
    %184 = vector.load %arg21[%c64_83, %c0_84] : memref<128x1xf32, #tpu.memory_space<vmem>>, vector<64x1xf32>
    %cst_85 = arith.constant dense<0.000000e+00> : vector<64x16xf32>
    %185 = tpu.matmul %183, %182, %cst_85 {dimension_numbers = #tpu.dot_dimension_numbers<[1], [0], [0], [1], [0, 0, 1, 1], [], []>} : vector<64x576xf32>, vector<576x16xf32>, vector<64x16xf32> -> vector<64x16xf32>
    %186 = vector.broadcast %184 : vector<64x1xf32> to vector<64x16xf32>
    %187 = arith.addf %185, %186 : vector<64x16xf32>
    %188 = vector.extract_strided_slice %187 {offsets = [0, 0], sizes = [64, 2], strides = [1, 1]} : vector<64x16xf32> to vector<64x2xf32>
    %189 = vector.extract_strided_slice %187 {offsets = [0, 2], sizes = [64, 2], strides = [1, 1]} : vector<64x16xf32> to vector<64x2xf32>
    %190 = vector.extract_strided_slice %187 {offsets = [0, 4], sizes = [64, 2], strides = [1, 1]} : vector<64x16xf32> to vector<64x2xf32>
    %191 = vector.extract_strided_slice %187 {offsets = [0, 6], sizes = [64, 2], strides = [1, 1]} : vector<64x16xf32> to vector<64x2xf32>
    %192 = vector.extract_strided_slice %187 {offsets = [0, 8], sizes = [64, 2], strides = [1, 1]} : vector<64x16xf32> to vector<64x2xf32>
    %193 = vector.extract_strided_slice %187 {offsets = [0, 10], sizes = [64, 2], strides = [1, 1]} : vector<64x16xf32> to vector<64x2xf32>
    %194 = vector.extract_strided_slice %187 {offsets = [0, 12], sizes = [64, 2], strides = [1, 1]} : vector<64x16xf32> to vector<64x2xf32>
    %195 = vector.extract_strided_slice %187 {offsets = [0, 14], sizes = [64, 2], strides = [1, 1]} : vector<64x16xf32> to vector<64x2xf32>
    %196 = tpu.concatenate %188, %189, %190, %191, %192, %193, %194, %195 in 0 : vector<64x2xf32>, vector<64x2xf32>, vector<64x2xf32>, vector<64x2xf32>, vector<64x2xf32>, vector<64x2xf32>, vector<64x2xf32>, vector<64x2xf32> -> vector<512x2xf32>
    %c256 = arith.constant 256 : index
    %c0_86 = arith.constant 0 : index
    %197 = vector.load %arg13[%c256, %c0_86] : memref<384x640xf32, #tpu.memory_space<vmem>>, vector<64x512xf32>
    %c256_87 = arith.constant 256 : index
    %c0_88 = arith.constant 0 : index
    %198 = vector.load %arg20[%c256_87, %c0_88] : memref<384x1xf32, #tpu.memory_space<vmem>>, vector<64x1xf32>
    %cst_89 = arith.constant dense<0.000000e+00> : vector<64x2xf32>
    %199 = tpu.matmul %197, %196, %cst_89 {dimension_numbers = #tpu.dot_dimension_numbers<[1], [0], [0], [1], [0, 0, 1, 1], [], []>} : vector<64x512xf32>, vector<512x2xf32>, vector<64x2xf32> -> vector<64x2xf32>
    %200 = vector.broadcast %198 : vector<64x1xf32> to vector<64x2xf32>
    %201 = arith.addf %199, %200 : vector<64x2xf32>
    %202 = arith.addf %173, %201 : vector<64x2xf32>
    %203 = tpu.concatenate %21, %21, %21, %21, %21, %21, %21, %21 in 0 : vector<2x2xf32>, vector<2x2xf32>, vector<2x2xf32>, vector<2x2xf32>, vector<2x2xf32>, vector<2x2xf32>, vector<2x2xf32>, vector<2x2xf32> -> vector<16x2xf32>
    %204 = tpu.concatenate %21, %21, %21, %21, %21, %21, %21, %21 in 1 : vector<2x2xf32>, vector<2x2xf32>, vector<2x2xf32>, vector<2x2xf32>, vector<2x2xf32>, vector<2x2xf32>, vector<2x2xf32>, vector<2x2xf32> -> vector<2x16xf32>
    %cst_90 = arith.constant dense<0.000000e+00> : vector<16xf32>
    %205 = vector.multi_reduction <add>, %187, %cst_90 [0] : vector<64x16xf32> to vector<16xf32>
    %206 = vector.shape_cast %205 : vector<16xf32> to vector<1x16xf32>
    %cst_91 = arith.constant dense<0.000000e+00> : vector<1x2xf32>
    %207 = tpu.matmul %206, %203, %cst_91 {dimension_numbers = #tpu.dot_dimension_numbers<[1], [0], [0], [1], [0, 0, 1, 1], [], []>} : vector<1x16xf32>, vector<16x2xf32>, vector<1x2xf32> -> vector<1x2xf32>
    %cst_92 = arith.constant 0.001953125 : f32
    %208 = vector.broadcast %cst_92 : f32 to vector<1x2xf32>
    %209 = arith.mulf %207, %208 : vector<1x2xf32>
    %cst_93 = arith.constant dense<0.000000e+00> : vector<1x16xf32>
    %210 = tpu.matmul %209, %204, %cst_93 {dimension_numbers = #tpu.dot_dimension_numbers<[1], [0], [0], [1], [0, 0, 1, 1], [], []>} : vector<1x2xf32>, vector<2x16xf32>, vector<1x16xf32> -> vector<1x16xf32>
    %211 = vector.broadcast %210 : vector<1x16xf32> to vector<64x16xf32>
    %212 = arith.subf %187, %211 : vector<64x16xf32>
    %213 = arith.mulf %212, %212 : vector<64x16xf32>
    %cst_94 = arith.constant dense<0.000000e+00> : vector<16xf32>
    %214 = vector.multi_reduction <add>, %213, %cst_94 [0] : vector<64x16xf32> to vector<16xf32>
    %215 = vector.shape_cast %214 : vector<16xf32> to vector<1x16xf32>
    %cst_95 = arith.constant dense<0.000000e+00> : vector<1x2xf32>
    %216 = tpu.matmul %215, %203, %cst_95 {dimension_numbers = #tpu.dot_dimension_numbers<[1], [0], [0], [1], [0, 0, 1, 1], [], []>} : vector<1x16xf32>, vector<16x2xf32>, vector<1x2xf32> -> vector<1x2xf32>
    %cst_96 = arith.constant 0.001953125 : f32
    %217 = vector.broadcast %cst_96 : f32 to vector<1x2xf32>
    %218 = arith.mulf %216, %217 : vector<1x2xf32>
    %cst_97 = arith.constant dense<0.000000e+00> : vector<1x16xf32>
    %219 = tpu.matmul %218, %204, %cst_97 {dimension_numbers = #tpu.dot_dimension_numbers<[1], [0], [0], [1], [0, 0, 1, 1], [], []>} : vector<1x2xf32>, vector<2x16xf32>, vector<1x16xf32> -> vector<1x16xf32>
    %c64_98 = arith.constant 64 : index
    %c0_99 = arith.constant 0 : index
    %220 = vector.load %arg16[%c64_98, %c0_99] : memref<128x20xf32, #tpu.memory_space<vmem>>, vector<64x16xf32>
    %c64_100 = arith.constant 64 : index
    %c0_101 = arith.constant 0 : index
    %221 = vector.load %arg17[%c64_100, %c0_101] : memref<128x20xf32, #tpu.memory_space<vmem>>, vector<64x16xf32>
    %cst_102 = arith.constant 9.99999974E-6 : f32
    %222 = vector.broadcast %cst_102 : f32 to vector<1x16xf32>
    %223 = arith.addf %219, %222 : vector<1x16xf32>
    %224 = math.rsqrt %223 : vector<1x16xf32>
    %225 = vector.broadcast %224 : vector<1x16xf32> to vector<64x16xf32>
    %226 = arith.mulf %212, %225 : vector<64x16xf32>
    %227 = arith.mulf %226, %220 : vector<64x16xf32>
    %228 = arith.addf %227, %221 : vector<64x16xf32>
    %229 = vector.extract_strided_slice %45 {offsets = [0, 8], sizes = [64, 16], strides = [1, 1]} : vector<64x24xf32> to vector<64x16xf32>
    %230 = arith.addf %228, %229 : vector<64x16xf32>
    %231 = vector.extract_strided_slice %84 {offsets = [0, 4], sizes = [64, 16], strides = [1, 1]} : vector<64x20xf32> to vector<64x16xf32>
    %232 = arith.addf %230, %231 : vector<64x16xf32>
    %233 = vector.extract_strided_slice %138 {offsets = [0, 4], sizes = [64, 16], strides = [1, 1]} : vector<64x20xf32> to vector<64x16xf32>
    %234 = arith.addf %232, %233 : vector<64x16xf32>
    %235 = arith.addf %234, %179 : vector<64x16xf32>
    %236 = vector.extract_strided_slice %235 {offsets = [0, 0], sizes = [64, 12], strides = [1, 1]} : vector<64x16xf32> to vector<64x12xf32>
    %237 = vector.extract_strided_slice %235 {offsets = [0, 2], sizes = [64, 12], strides = [1, 1]} : vector<64x16xf32> to vector<64x12xf32>
    %238 = vector.extract_strided_slice %235 {offsets = [0, 4], sizes = [64, 12], strides = [1, 1]} : vector<64x16xf32> to vector<64x12xf32>
    %239 = tpu.concatenate %236, %237, %238 in 0 : vector<64x12xf32>, vector<64x12xf32>, vector<64x12xf32> -> vector<192x12xf32>
    %c256_103 = arith.constant 256 : index
    %c0_104 = arith.constant 0 : index
    %240 = vector.load %arg11[%c256_103, %c0_104] : memref<384x192xf32, #tpu.memory_space<vmem>>, vector<128x192xf32>
    %c256_105 = arith.constant 256 : index
    %c0_106 = arith.constant 0 : index
    %241 = vector.load %arg19[%c256_105, %c0_106] : memref<384x1xf32, #tpu.memory_space<vmem>>, vector<128x1xf32>
    %cst_107 = arith.constant dense<0.000000e+00> : vector<128x12xf32>
    %242 = tpu.matmul %240, %239, %cst_107 {dimension_numbers = #tpu.dot_dimension_numbers<[1], [0], [0], [1], [0, 0, 1, 1], [], []>} : vector<128x192xf32>, vector<192x12xf32>, vector<128x12xf32> -> vector<128x12xf32>
    %243 = vector.broadcast %241 : vector<128x1xf32> to vector<128x12xf32>
    %244 = arith.addf %242, %243 : vector<128x12xf32>
    %245 = vector.extract_strided_slice %244 {offsets = [0, 0], sizes = [64, 12], strides = [1, 1]} : vector<128x12xf32> to vector<64x12xf32>
    %246 = vector.extract_strided_slice %244 {offsets = [64, 0], sizes = [64, 12], strides = [1, 1]} : vector<128x12xf32> to vector<64x12xf32>
    %247 = math.tanh %245 : vector<64x12xf32>
    %cst_108 = arith.constant 5.000000e-01 : f32
    %248 = vector.broadcast %cst_108 : f32 to vector<64x12xf32>
    %249 = arith.mulf %248, %246 : vector<64x12xf32>
    %250 = math.tanh %249 : vector<64x12xf32>
    %cst_109 = arith.constant 1.000000e+00 : f32
    %251 = vector.broadcast %cst_109 : f32 to vector<64x12xf32>
    %252 = arith.addf %251, %250 : vector<64x12xf32>
    %cst_110 = arith.constant 5.000000e-01 : f32
    %253 = vector.broadcast %cst_110 : f32 to vector<64x12xf32>
    %254 = arith.mulf %253, %252 : vector<64x12xf32>
    %255 = arith.mulf %247, %254 : vector<64x12xf32>
    %256 = vector.extract_strided_slice %255 {offsets = [0, 0], sizes = [64, 2], strides = [1, 1]} : vector<64x12xf32> to vector<64x2xf32>
    %257 = vector.extract_strided_slice %255 {offsets = [0, 2], sizes = [64, 2], strides = [1, 1]} : vector<64x12xf32> to vector<64x2xf32>
    %258 = vector.extract_strided_slice %255 {offsets = [0, 4], sizes = [64, 2], strides = [1, 1]} : vector<64x12xf32> to vector<64x2xf32>
    %259 = vector.extract_strided_slice %255 {offsets = [0, 6], sizes = [64, 2], strides = [1, 1]} : vector<64x12xf32> to vector<64x2xf32>
    %260 = vector.extract_strided_slice %255 {offsets = [0, 8], sizes = [64, 2], strides = [1, 1]} : vector<64x12xf32> to vector<64x2xf32>
    %261 = vector.extract_strided_slice %255 {offsets = [0, 10], sizes = [64, 2], strides = [1, 1]} : vector<64x12xf32> to vector<64x2xf32>
    %262 = tpu.concatenate %256, %257, %258, %259, %260, %261 in 0 : vector<64x2xf32>, vector<64x2xf32>, vector<64x2xf32>, vector<64x2xf32>, vector<64x2xf32>, vector<64x2xf32> -> vector<384x2xf32>
    %c320 = arith.constant 320 : index
    %c0_111 = arith.constant 0 : index
    %263 = vector.load %arg13[%c320, %c0_111] : memref<384x640xf32, #tpu.memory_space<vmem>>, vector<64x384xf32>
    %c320_112 = arith.constant 320 : index
    %c0_113 = arith.constant 0 : index
    %264 = vector.load %arg20[%c320_112, %c0_113] : memref<384x1xf32, #tpu.memory_space<vmem>>, vector<64x1xf32>
    %cst_114 = arith.constant dense<0.000000e+00> : vector<64x2xf32>
    %265 = tpu.matmul %263, %262, %cst_114 {dimension_numbers = #tpu.dot_dimension_numbers<[1], [0], [0], [1], [0, 0, 1, 1], [], []>} : vector<64x384xf32>, vector<384x2xf32>, vector<64x2xf32> -> vector<64x2xf32>
    %266 = vector.broadcast %264 : vector<64x1xf32> to vector<64x2xf32>
    %267 = arith.addf %265, %266 : vector<64x2xf32>
    %268 = arith.addf %202, %267 : vector<64x2xf32>
    %cst_115 = arith.constant 0.000000e+00 : f32
    %269 = vector.broadcast %cst_115 : f32 to vector<64x2xf32>
    %270 = arith.maximumf %268, %269 : vector<64x2xf32>
    %c0_116 = arith.constant 0 : index
    %c0_117 = arith.constant 0 : index
    %271 = vector.load %arg14[%c0_116, %c0_117] : memref<128x64xf32, #tpu.memory_space<vmem>>, vector<128x64xf32>
    %cst_118 = arith.constant dense<0.000000e+00> : vector<128x2xf32>
    %272 = tpu.matmul %271, %270, %cst_118 {dimension_numbers = #tpu.dot_dimension_numbers<[1], [0], [0], [1], [0, 0, 1, 1], [], []>} : vector<128x64xf32>, vector<64x2xf32>, vector<128x2xf32> -> vector<128x2xf32>
    %c64_119 = arith.constant 64 : index
    %c0_120 = arith.constant 0 : index
    %273 = vector.load %arg18[%c64_119, %c0_120] : memref<288x1xf32, #tpu.memory_space<vmem>>, vector<128x1xf32>
    %274 = vector.broadcast %273 : vector<128x1xf32> to vector<128x2xf32>
    %275 = arith.addf %272, %274 : vector<128x2xf32>
    %cst_121 = arith.constant 0.000000e+00 : f32
    %276 = vector.broadcast %cst_121 : f32 to vector<128x2xf32>
    %277 = arith.maximumf %275, %276 : vector<128x2xf32>
    %c0_122 = arith.constant 0 : index
    %c0_123 = arith.constant 0 : index
    %278 = vector.load %arg15[%c0_122, %c0_123] : memref<96x128xf32, #tpu.memory_space<vmem>>, vector<96x128xf32>
    %cst_124 = arith.constant dense<0.000000e+00> : vector<96x2xf32>
    %279 = tpu.matmul %278, %277, %cst_124 {dimension_numbers = #tpu.dot_dimension_numbers<[1], [0], [0], [1], [0, 0, 1, 1], [], []>} : vector<96x128xf32>, vector<128x2xf32>, vector<96x2xf32> -> vector<96x2xf32>
    %c192_125 = arith.constant 192 : index
    %c0_126 = arith.constant 0 : index
    %280 = vector.load %arg18[%c192_125, %c0_126] : memref<288x1xf32, #tpu.memory_space<vmem>>, vector<96x1xf32>
    %281 = vector.broadcast %280 : vector<96x1xf32> to vector<96x2xf32>
    %282 = arith.addf %279, %281 : vector<96x2xf32>
    %c0_127 = arith.constant 0 : index
    %c0_128 = arith.constant 0 : index
    %283 = vector.load %arg22[%c0_127, %c0_128] : memref<96x2xf32, #tpu.memory_space<vmem>>, vector<96x2xf32>
    tpu.vector_store %arg22[%c0_127, %c0_128], %282 {strides = array<i32>} : memref<96x2xf32, #tpu.memory_space<vmem>>, vector<96x2xf32>,
    return
  }
  func.func @transform_0(%arg0: i32) -> (i32, i32) {
    %c0_i32 = arith.constant 0 : i32
    %c0_i32_0 = arith.constant 0 : i32
    %c0_i32_1 = arith.constant 0 : i32
    return %c0_i32, %c0_i32_0 : i32, i32
  }
  func.func @transform_1(%arg0: i32) -> (i32, i32) {
    %c0_i32 = arith.constant 0 : i32
    %c0_i32_0 = arith.constant 0 : i32
    %c0_i32_1 = arith.constant 0 : i32
    return %c0_i32, %c0_i32_0 : i32, i32
  }
  func.func @transform_2(%arg0: i32) -> (i32, i32) {
    %c0_i32 = arith.constant 0 : i32
    %c0_i32_0 = arith.constant 0 : i32
    %c0_i32_1 = arith.constant 0 : i32
    return %c0_i32, %c0_i32_0 : i32, i32
  }
  func.func @transform_3(%arg0: i32) -> (i32, i32) {
    %c0_i32 = arith.constant 0 : i32
    %c0_i32_0 = arith.constant 0 : i32
    %c0_i32_1 = arith.constant 0 : i32
    return %c0_i32, %c0_i32_0 : i32, i32
  }
  func.func @transform_4(%arg0: i32) -> (i32, i32) {
    %c0_i32 = arith.constant 0 : i32
    %c0_i32_0 = arith.constant 0 : i32
    %c0_i32_1 = arith.constant 0 : i32
    return %c0_i32, %c0_i32_0 : i32, i32
  }
  func.func @transform_5(%arg0: i32) -> (i32, i32) {
    %c0_i32 = arith.constant 0 : i32
    %c0_i32_0 = arith.constant 0 : i32
    %c0_i32_1 = arith.constant 0 : i32
    return %c0_i32, %c0_i32_0 : i32, i32
  }
  func.func @transform_6(%arg0: i32) -> (i32, i32) {
    %c0_i32 = arith.constant 0 : i32
    %c0_i32_0 = arith.constant 0 : i32
    %c0_i32_1 = arith.constant 0 : i32
    return %c0_i32, %c0_i32_0 : i32, i32
  }
  func.func @transform_7(%arg0: i32) -> (i32, i32) {
    %c0_i32 = arith.constant 0 : i32
    %c0_i32_0 = arith.constant 0 : i32
    %c0_i32_1 = arith.constant 0 : i32
    return %c0_i32, %c0_i32_0 : i32, i32
  }
  func.func @transform_8(%arg0: i32) -> (i32, i32) {
    %c0_i32 = arith.constant 0 : i32
    %c0_i32_0 = arith.constant 0 : i32
    %c0_i32_1 = arith.constant 0 : i32
    return %c0_i32, %c0_i32_0 : i32, i32
  }
  func.func @transform_9(%arg0: i32) -> (i32, i32) {
    %c0_i32 = arith.constant 0 : i32
    %c0_i32_0 = arith.constant 0 : i32
    %c0_i32_1 = arith.constant 0 : i32
    return %c0_i32, %c0_i32_0 : i32, i32
  }
  func.func @transform_10(%arg0: i32) -> (i32, i32) {
    %c0_i32 = arith.constant 0 : i32
    %c0_i32_0 = arith.constant 0 : i32
    %c0_i32_1 = arith.constant 0 : i32
    return %c0_i32, %c0_i32_0 : i32, i32
  }
  func.func @transform_11(%arg0: i32) -> (i32, i32) {
    %c0_i32 = arith.constant 0 : i32
    %c0_i32_0 = arith.constant 0 : i32
    %c0_i32_1 = arith.constant 0 : i32
    return %c0_i32, %c0_i32_0 : i32, i32
  }
  func.func @transform_12(%arg0: i32) -> (i32, i32) {
    %c0_i32 = arith.constant 0 : i32
    %c0_i32_0 = arith.constant 0 : i32
    %c0_i32_1 = arith.constant 0 : i32
    return %c0_i32, %c0_i32_0 : i32, i32
  }
  func.func @transform_13(%arg0: i32) -> (i32, i32) {
    %c0_i32 = arith.constant 0 : i32
    %c0_i32_0 = arith.constant 0 : i32
    %c0_i32_1 = arith.constant 0 : i32
    return %c0_i32, %c0_i32_0 : i32, i32
  }
  func.func @transform_14(%arg0: i32) -> (i32, i32) {
    %c0_i32 = arith.constant 0 : i32
    %c0_i32_0 = arith.constant 0 : i32
    %c0_i32_1 = arith.constant 0 : i32
    return %c0_i32, %c0_i32_0 : i32, i32
  }
  func.func @transform_15(%arg0: i32) -> (i32, i32) {
    %c0_i32 = arith.constant 0 : i32
    %c0_i32_0 = arith.constant 0 : i32
    %c0_i32_1 = arith.constant 0 : i32
    return %c0_i32, %c0_i32_0 : i32, i32
  }
  func.func @transform_16(%arg0: i32) -> (i32, i32) {
    %c0_i32 = arith.constant 0 : i32
    %c0_i32_0 = arith.constant 0 : i32
    %c0_i32_1 = arith.constant 0 : i32
    return %c0_i32, %c0_i32_0 : i32, i32
  }
  func.func @transform_17(%arg0: i32) -> (i32, i32) {
    %c0_i32 = arith.constant 0 : i32
    %c0_i32_0 = arith.constant 0 : i32
    %c0_i32_1 = arith.constant 0 : i32
    return %c0_i32, %c0_i32_0 : i32, i32
  }
  func.func @transform_18(%arg0: i32) -> (i32, i32) {
    %c0_i32 = arith.constant 0 : i32
    %c0_i32_0 = arith.constant 0 : i32
    %c0_i32_1 = arith.constant 0 : i32
    return %c0_i32, %c0_i32_0 : i32, i32
  }
  func.func @transform_19(%arg0: i32) -> (i32, i32) {
    %c0_i32 = arith.constant 0 : i32
    %c0_i32_0 = arith.constant 0 : i32
    %c0_i32_1 = arith.constant 0 : i32
    return %c0_i32, %c0_i32_0 : i32, i32
  }
  func.func @transform_20(%arg0: i32) -> (i32, i32) {
    %c0_i32 = arith.constant 0 : i32
    %c0_i32_0 = arith.constant 0 : i32
    %c0_i32_1 = arith.constant 0 : i32
    return %c0_i32, %c0_i32_0 : i32, i32
  }
  func.func @transform_21(%arg0: i32) -> (i32, i32) {
    %c0_i32 = arith.constant 0 : i32
    %c0_i32_0 = arith.constant 0 : i32
    %c0_i32_1 = arith.constant 0 : i32
    return %c0_i32, %c0_i32_0 : i32, i32
  }
}

</mosaic_0001>

<bundles_post_ra>
// kernel: _lambda_.2
= control target key start
LH: loop header
LB: loop body
LE: loop exit
PB: predicated region body
PF: predicated region fallthrough
CT: control target
= control target key end

     0   :  { %11 = vsyncpa [#allocation3], 0  ;;  %s304_s0 = inlined_call_operand.vmem [shape: f32[8,8], index: 0, kind: input, shape index: {}]   ;;  %s305_s1 = inlined_call_operand.hbm [shape: f32[8,8], index: 1, kind: input, shape index: {}]   ;;  %s306_s2 = inlined_call_operand.vmem [shape: f32[1,8], index: 2, kind: input, shape index: {}]   ;;  %s307_s3 = inlined_call_operand.hbm [shape: f32[8,8], index: 3, kind: input, shape index: {}]   ;;  %s308_s4 = inlined_call_operand.vmem [shape: f32[8,8], index: 4, kind: input, shape index: {}]   ;;  %s309_s5 = inlined_call_operand.vmem [shape: f32[1,8], index: 5, kind: input, shape index: {}]   ;;  %s310_s6 = inlined_call_operand.vmem [shape: f32[8,8], index: 6, kind: output, shape index: {}]  }
   0x1   :  { %s20_s23 = sshll.u32 %s305_s1, 4  ;;  %s21_s23 = int_to_ptr.hbm [resolvable:$true] %s20_s23 }
   0x2   :  { %12 = vsyncpa [#allocation5], 0  ;;  %s239_s24 = smov [#allocation2]   ;;  %s33_s28 = sshll.u32 %s307_s3, 4  ;;  %s34_s28 = int_to_ptr.hbm [resolvable:$true] %s33_s28 }
   0x3   :  { %s22_s25 = sshll.u32 %s239_s24, 4  ;;  %s240_s29 = smov [#allocation4]   ;;  %s23_s25 = int_to_ptr.vmem [resolvable:$true] %s22_s25 }
   0x4   :  { %25 = dma.hbm_to_vmem [thread:$0]  %s21_s23, 128, %s23_s25, [#allocation3]  }
   0x5   :  { %s35_s30 = sshll.u32 %s240_s29, 4  ;;  %s36_s30 = int_to_ptr.vmem [resolvable:$true] %s35_s30 }
   0x6   :  { %38 = dma.hbm_to_vmem [thread:$0]  %s34_s28, 128, %s36_s30, [#allocation5]  }
   0x7   :  { %235 = dma.done.wait [#allocation3], 128  }
   0x8   :  { %236 = vsyncadd [#allocation3], 4294967168 }
   0x9   :  { %237 = dma.done.wait [#allocation5], 128  }
   0xa   :  { %238 = vsyncadd [#allocation5], 4294967168  ;;  %vm57_vm0 = vcmask 64512   ;;  %v52_v0 = vld [vmem:[#allocation2] sm:$0xff]  ;;  %v83_v3 = vld [vmem:[#allocation4] sm:$0xff] }
   0xb   :  { %v84_v1 = vld [vmem:[%s308_s4] sm:$0xff]  ;;  %76 = vmatpush.msra.mxu0 %v52_v0 }
   0xc   :  { %v51_v2 = vld [vmem:[%s304_s0] sm:$0xff]  ;;  %107 = vmatpush.msra.mxu1 %v84_v1 }
   0xd   :  { %171 = vmatmul.msk.f32.vlgmr.msra.gmra.mxu0 %vm57_vm0, %v51_v2  ;;  %172 = vmatmul.msk.f32.vlgmr.msra.gmra.mxu1 %vm57_vm0, %v83_v3  ;;  %v179_v4 = vld [vmem:[%s306_s2] ss:$0 sm:$0xff] }
   0xe   :  { %v180_v5 = vld [vmem:[%s309_s5] ss:$0 sm:$0xff] }
  0x8a   :  { %v78_v6 = vpop.f32.mrf.mxu0  ;;  %v109_v7 = vpop.f32.mrf.mxu1 }
  0x8b   :  { %v79_v8 = vadd.f32 %v179_v4, %v78_v6  ;;  %v110_v9 = vadd.f32 %v180_v5, %v109_v7 }
  0x8d   :  { %v81_v10 = vmul.f32 3.0, %v79_v8  ;;  %v112_v11 = vmul.f32 3.0, %v110_v9 }
  0x8f   :  { %181 = vtanh.f32 %v81_v10 }
  0x90   :  { %183 = vtanh.f32 %v112_v11 }
  0x95   :  { %v182_v12 = vpop.eup %181 }
  0x96   :  { %v184_v13 = vpop.eup %183  ;;  %175 = vmatpush.xpose.msk.msra.mxu3 %vm57_vm0, %v182_v12 }
  0x97   :  { %173 = vmatpush.xpose.msk.msra.mxu2 %vm57_vm0, %v184_v13 }
  0x99   :  { %176 = vmatmul.msk.f32.vlgmr.msra.gmra.mxu3 %vm57_vm0, %v184_v13 }
  0x9a   :  { %174 = vmatmul.msk.f32.vlgmr.msra.gmra.mxu2 %vm57_vm0, %v182_v12 }
 0x11c   :  { %v157_v14 = vpop.f32.mrf.mxu3 }
 0x11d   :  { %v137_v15 = vpop.f32.mrf.mxu2 }
 0x11e   :  { %v160_v16 = vsub.f32 %v137_v15, %v157_v14 }
 0x120   :  { %v161_v17 = vmul.f32 3.0, %v160_v16 }
 0x122   :  { %185 = vtanh.f32 %v161_v17 }
 0x128   :  { %v186_v18 = vpop.eup %185 }
 0x129   :  { %v163_v19 = vmax.f32 %v186_v18, 0.0 }
 0x12b   :  { %164 = vst.msk [vmem:[%s310_s6] sm:$0xff] %vm57_vm0, %v163_v19 }
 0x12c   :  { %169 = vsyncpa [#allocation3], 1 }
 0x12d   :  { %170 = vsyncpa [#allocation5], 1 }

// kernel: _lambda_.3
= control target key start
LH: loop header
LB: loop body
LE: loop exit
PB: predicated region body
PF: predicated region fallthrough
CT: control target
= control target key end

     0   :  { %vm72_vm0 = vcmask 64512   ;;  %s8601_s25 = smov 114   ;;  %s14585_s30 = smov 122   ;;  %s14424_s2 = inlined_call_operand.vmem [shape: f32[16,8], index: 2, kind: input, shape index: {}]   ;;  %s14425_s1 = inlined_call_operand.vmem [shape: f32[16,8], index: 1, kind: input, shape index: {}]   ;;  %s14426_s3 = inlined_call_operand.vmem [shape: f32[256,32], index: 3, kind: input, shape index: {}]   ;;  %s14427_s4 = inlined_call_operand.vmem [shape: f32[8,64], index: 4, kind: input, shape index: {}]   ;;  %s14428_s6 = inlined_call_operand.vmem [shape: f32[64,256], index: 6, kind: input, shape index: {}]   ;;  %s14429_s5 = inlined_call_operand.vmem [shape: f32[256,64], index: 5, kind: input, shape index: {}]   ;;  %s14430_s0 = inlined_call_operand.vmem [shape: f32[16,24], index: 0, kind: input, shape index: {}]   ;;  %s14431_s17 = inlined_call_operand.vmem [shape: f32[288,1], index: 17, kind: input, shape index: {}]   ;;  %s14432_s9 = inlined_call_operand.vmem [shape: f32[64,16], index: 9, kind: input, shape index: {}]   ;;  %s14433_s18 = inlined_call_operand.vmem [shape: f32[384,1], index: 18, kind: input, shape index: {}]   ;;  %s14434_s12 = inlined_call_operand.vmem [shape: f32[384,640], index: 12, kind: input, shape index: {}]   ;;  %s14435_s10 = inlined_call_operand.vmem [shape: f32[384,192], index: 10, kind: input, shape index: {}]   ;;  %s14436_s20 = inlined_call_operand.vmem [shape: f32[128,1], index: 20, kind: input, shape index: {}]   ;;  %s14437_s11 = inlined_call_operand.vmem [shape: f32[128,576], index: 11, kind: input, shape index: {}]   ;;  %s14438_s7 = inlined_call_operand.vmem [shape: f32[256,256], index: 7, kind: input, shape index: {}]   ;;  %s14439_s8 = inlined_call_operand.vmem [shape: f32[2,2], index: 8, kind: input, shape index: {}]   ;;  %s14440_s15 = inlined_call_operand.vmem [shape: f32[128,20], index: 15, kind: input, shape index: {}]   ;;  %s14441_s16 = inlined_call_operand.vmem [shape: f32[128,20], index: 16, kind: input, shape index: {}]   ;;  %s14442_s19 = inlined_call_operand.vmem [shape: f32[384,1], index: 19, kind: input, shape index: {}]   ;;  %s14443_s13 = inlined_call_operand.vmem [shape: f32[128,64], index: 13, kind: input, shape index: {}]   ;;  %s14444_s14 = inlined_call_operand.vmem [shape: f32[96,128], index: 14, kind: input, shape index: {}]   ;;  %s14445_s21 = inlined_call_operand.vmem [shape: f32[96,2], index: 21, kind: output, shape index: {}]  }
   0x1   :  { %14637 = sst [smem:[#allocation201_spill]] %s14424_s2  ;;  %s8607_s29 = smov 124  }
   0x2   :  { %14638 = sst [smem:[#allocation202_spill]] %s14425_s1  ;;  %s8610_s22 = smov 106  }
   0x3   :  { %14639 = sst [smem:[#allocation203_spill]] %s14426_s3  ;;  %s14587_s1 = smov 112  }
   0x4   :  { %14640 = sst [smem:[#allocation204_spill]] %s14427_s4  ;;  %s8612_s4 = smov 2  }
   0x5   :  { %14641 = sst [smem:[#allocation205_spill]] %s14428_s6  ;;  %s8605_s6 = smov 118  }
   0x6   :  { %14642 = sst [smem:[#allocation206_spill]] %s14429_s5 }
   0x7   :  { %s14643_s26 = sld [smem:[#allocation201_spill]] }
   0x8   :  { %s14644_s28 = sld [smem:[#allocation202_spill]] }
   0x9   :  { %s14647_s23 = sld [smem:[#allocation203_spill]] }
   0xa   :  { %s14648_s5 = sld [smem:[#allocation204_spill]] }
   0xb   :  { %s14649_s24 = sld [smem:[#allocation205_spill]] }
   0xc   :  { %s14650_s3 = sld [smem:[#allocation206_spill]] }
   0xd   :  { %v71_v0 = vld [vmem:[%s14643_s26 + $0x8] sm:$0xff]  ;;  %v8745_v4 = vld [vmem:[%s14643_s26] sm:$0xff] }
   0xe   :  { %v8737_v1 = vld [vmem:[%s14644_s28 + $0x8] sm:$0xff]  ;;  %v112_v2 = vsel %vm72_vm0, %v71_v0, 0.0  ;;  %v8750_v5 = vld [vmem:[%s14644_s28] sm:$0xff]  ;;  %v109_v6 = vsel %vm72_vm0, %v8745_v4, 0.0  ;;  %s8604_s28 = smov 126  }
   0xf   :  { %v76_v3 = vsel %vm72_vm0, %v8737_v1, 0.0  ;;  %113 = vadd.xlane.f32.xlu0 %v112_v2  ;;  %v73_v7 = vsel %vm72_vm0, %v8750_v5, 0.0  ;;  %v145_v57 = vld [vmem:[%s14647_s23] sm:$0xff]  ;;  %v146_v58 = vld [vmem:[%s14647_s23 + $0x8] sm:$0xff]  ;;  %v147_v59 = vld [vmem:[%s14647_s23 + $0x10] sm:$0xff] }
  0x10   :  { %77 = vadd.xlane.f32.xlu1 %v76_v3  ;;  %v148_v60 = vld [vmem:[%s14647_s23 + $0x18] sm:$0xff]  ;;  %v149_v61 = vld [vmem:[%s14647_s23 + $0x20] sm:$0xff]  ;;  %v150_v62 = vld [vmem:[%s14647_s23 + $0x28] sm:$0xff] }
  0x11   :  { %v151_v63 = vld [vmem:[%s14647_s23 + $0x30] sm:$0xff]  ;;  %v154_v2 = vld [vmem:[%s14647_s23 + $0x48] sm:$0xff] }
  0x12   :  { %v155_v3 = vld [vmem:[%s14647_s23 + $0x50] sm:$0xff]  ;;  %v666_v39 = vld [vmem:[%s14649_s24 + $0x28] sm:$0xff] }
  0x17   :  { %110 = vadd.xlane.f32.xlu0 %v109_v6  ;;  %v387_v6 = vld [vmem:[%s14648_s5] sm:$0xff]  ;;  %s8609_s5 = smov 110  }
  0x18   :  { %74 = vadd.xlane.f32.xlu1 %v73_v7  ;;  %499 = vmatpush.msra.mxu1 %v387_v6  ;;  %v158_v7 = vld [vmem:[%s14647_s23 + $0x68] sm:$0xff] }
  0x19   :  { %7584 = vmatpush.msra.mxu2 %v387_v6  ;;  %v602_v6 = vld [vmem:[%s14650_s3 + $0x28] sm:$0xff] }
  0x82   :  { %v114_v8 = vpop.xlane.xlu0 %113 }
  0x83   :  { %v78_v9 = vpop.xlane.xlu1 %77  ;;  %8492 = vrcp.f32 %v114_v8  ;;  %v141_v18 = vand.u32 2147483648, %v114_v8  ;;  %v139_v20 = vand.u32 2147483647, %v114_v8  ;;  %vm135_vm2 = vweird.f32 %v114_v8 }
  0x84   :  { %8494 = vrcp.f32 %v78_v9  ;;  %vm99_vm6 = vweird.f32 %v78_v9  ;;  %v105_v35 = vand.u32 2147483648, %v78_v9  ;;  %v103_v38 = vand.u32 2147483647, %v78_v9 }
  0x85   :  { %v142_v24 = vor.u32 1.1754944e-38, %v141_v18  ;;  %vm140_vm4 = vcmp.eq.f32.partialorder %v139_v20, 8.507059e+37 }
  0x86   :  { %v106_v46 = vor.u32 1.1754944e-38, %v105_v35  ;;  %vm104_vm14 = vcmp.eq.f32.partialorder %v103_v38, 8.507059e+37  ;;  %v172_v35 = vld [vmem:[%s14647_s23 + $0xd8] sm:$0xff] }
  0x87   :  { %v668_v38 = vld [vmem:[%s14649_s24 + $0x38] sm:$0xff] }
  0x89   :  { %v8493_v10 = vpop.eup %8492 }
  0x8a   :  { %v8495_v11 = vpop.eup %8494  ;;  %v131_v12 = vmul.f32 %v8493_v10, %v114_v8  ;;  %v111_v13 = vpop.xlane.xlu0 %110  ;;  %vm136_vm1 = vweird.f32 %v8493_v10  ;;  %v159_v8 = vld [vmem:[%s14647_s23 + $0x70] sm:$0xff] }
  0x8b   :  { %v75_v14 = vpop.xlane.xlu1 %74  ;;  %v95_v15 = vmul.f32 %v8495_v11, %v78_v9  ;;  %8496 = vrcp.f32 %v111_v13  ;;  %vm137_vm3 = vmor %vm135_vm2, %vm136_vm1  ;;  %vm100_vm5 = vweird.f32 %v8495_v11  ;;  %v126_v34 = vand.u32 2147483648, %v111_v13  ;;  %v160_v9 = vld [vmem:[%s14647_s23 + $0x78] sm:$0xff] }
  0x8c   :  { %8498 = vrcp.f32 %v75_v14  ;;  %v132_v16 = vsub.f32 1.0, %v131_v12  ;;  %v124_v37 = vand.u32 2147483647, %v111_v13  ;;  %vm8756_vm8 = vmor %vm99_vm6, %vm100_vm5  ;;  %v90_v41 = vand.u32 2147483648, %v75_v14 }
  0x8d   :  { %v96_v17 = vsub.f32 1.0, %v95_v15  ;;  %vm120_vm10 = vweird.f32 %v111_v13  ;;  %v88_v44 = vand.u32 2147483647, %v75_v14  ;;  %v127_v45 = vor.u32 1.1754944e-38, %v126_v34  ;;  %v163_v15 = vld [vmem:[%s14647_s23 + $0x90] sm:$0xff] }
  0x8e   :  { %v133_v19 = vmul.f32 %v8493_v10, %v132_v16  ;;  %vm84_vm12 = vweird.f32 %v75_v14  ;;  %vm125_vm13 = vcmp.eq.f32.partialorder %v124_v37, 8.507059e+37  ;;  %v91_v52 = vor.u32 1.1754944e-38, %v90_v41  ;;  %v670_v37 = vld [vmem:[%s14649_s24 + $0x48] sm:$0xff]  ;;  %v173_v41 = vld [vmem:[%s14647_s23 + $0xe0] sm:$0xff] }
  0x8f   :  { %v97_v22 = vmul.f32 %v8495_v11, %v96_v17  ;;  %vm89_vm1 = vcmp.eq.f32.partialorder %v88_v44, 8.507059e+37  ;;  %vm177_vm2 = vcmask 261120   ;;  %v164_v17 = vld [vmem:[%s14647_s23 + $0x98] sm:$0xff]  ;;  %vm3671_vm5 = vcmask 162816  }
  0x90   :  { %v134_v21 = vadd.f32 %v8493_v10, %v133_v19  ;;  %v165_v19 = vld [vmem:[%s14647_s23 + $0xa0] sm:$0xff]  ;;  %vm3622_vm6 = vcmask 1041408  }
  0x91   :  { %v8497_v23 = vpop.eup %8496  ;;  %v98_v32 = vadd.f32 %v8495_v11, %v97_v22 }
  0x92   :  { %v8499_v25 = vpop.eup %8498  ;;  %v116_v26 = vmul.f32 %v8497_v23, %v111_v13  ;;  %v138_v27 = vsel %vm137_vm3, %v8493_v10, %v134_v21  ;;  %vm121_vm7 = vweird.f32 %v8497_v23  ;;  %v162_v13 = vld [vmem:[%s14647_s23 + $0x88] sm:$0xff]  ;;  %vm677_vm3 = vcmask 523264  }
  0x93   :  { %v80_v28 = vmul.f32 %v8499_v25, %v75_v14  ;;  %v143_v29 = vsel %vm140_vm4, %v142_v24, %v138_v27  ;;  %vm85_vm9 = vweird.f32 %v8499_v25  ;;  %v102_v43 = vsel %vm8756_vm8, %v8495_v11, %v98_v32  ;;  %vm122_vm11 = vmor %vm120_vm10, %vm121_vm7  ;;  %v161_v11 = vld [vmem:[%s14647_s23 + $0x80] sm:$0xff]  ;;  %v166_v21 = vld [vmem:[%s14647_s23 + $0xa8] sm:$0xff] }
  0x94   :  { %v117_v30 = vsub.f32 1.0, %v116_v26  ;;  %v144_v31 = vmul.f32 %v143_v29, %v71_v0  ;;  %vm86_vm15 = vmor %vm84_vm12, %vm85_vm9  ;;  %v107_v50 = vsel %vm104_vm14, %v106_v46, %v102_v43  ;;  %v152_v0 = vld [vmem:[%s14647_s23 + $0x38] sm:$0xff]  ;;  %v169_v27 = vld [vmem:[%s14647_s23 + $0xc0] sm:$0xff]  ;;  %vm1425_vm4 = vcmask 130048  }
  0x95   :  { %v81_v33 = vsub.f32 1.0, %v80_v28  ;;  %v108_v55 = vmul.f32 %v107_v50, %v8737_v1  ;;  %v153_v1 = vld [vmem:[%s14647_s23 + $0x40] sm:$0xff]  ;;  %v170_v29 = vld [vmem:[%s14647_s23 + $0xc8] sm:$0xff]  ;;  %v676_v32 = vld [vmem:[%s14649_s24 + $0x78] sm:$0xff]  ;;  %vm3624_vm7 = vcmask 1043456   ;;  %vm3626_vm8 = vcmask 1045504  }
  0x96   :  { %286 = vmatpush.msra.mxu0 %v144_v31  ;;  %v118_v36 = vmul.f32 %v8497_v23, %v117_v30  ;;  %v171_v31 = vld [vmem:[%s14647_s23 + $0xd0] sm:$0xff]  ;;  %7585 = vmatpush.msra.mxu3 %v676_v32  ;;  %v662_v43 = vld [vmem:[%s14649_s24 + $0x8] sm:$0xff]  ;;  %vm3655_vm9 = vcmask 15360   ;;  %vm3657_vm10 = vcmask 31744   ;;  %vm3662_vm12 = vcmask 80896  }
  0x97   :  { %v82_v40 = vmul.f32 %v8499_v25, %v81_v33  ;;  %v674_v33 = vld [vmem:[%s14649_s24 + $0x68] sm:$0xff]  ;;  %vm3666_vm14 = vcmask 113664  }
  0x98   :  { %v119_v42 = vadd.f32 %v8497_v23, %v118_v36  ;;  %7586 = vmatpush.msra.mxu3 %v674_v33  ;;  %v672_v36 = vld [vmem:[%s14649_s24 + $0x58] sm:$0xff] }
  0x99   :  { %v83_v47 = vadd.f32 %v8499_v25, %v82_v40 }
  0x9a   :  { %v123_v48 = vsel %vm122_vm11, %v8497_v23, %v119_v42  ;;  %v167_v23 = vld [vmem:[%s14647_s23 + $0xb0] sm:$0xff]  ;;  %7587 = vmatpush.msra.mxu3 %v672_v36  ;;  %v664_v42 = vld [vmem:[%s14649_s24 + $0x18] sm:$0xff]  ;;  %vm3659_vm11 = vcmask 48128  }
  0x9b   :  { %v128_v49 = vsel %vm125_vm13, %v127_v45, %v123_v48  ;;  %v87_v51 = vsel %vm86_vm15, %v8499_v25, %v83_v47  ;;  %v168_v25 = vld [vmem:[%s14647_s23 + $0xb8] sm:$0xff]  ;;  %v174_v45 = vld [vmem:[%s14647_s23 + $0xe8] sm:$0xff]  ;;  %v175_v47 = vld [vmem:[%s14647_s23 + $0xf0] sm:$0xff]  ;;  %vm3664_vm13 = vcmask 97280   ;;  %vm3669_vm15 = vcmask 146432  }
  0x9c   :  { %v129_v53 = vmul.f32 %v128_v49, %v8745_v4  ;;  %v92_v54 = vsel %vm89_vm1, %v91_v52, %v87_v51  ;;  %v156_v4 = vld [vmem:[%s14647_s23 + $0x58] sm:$0xff]  ;;  %7588 = vmatpush.msra.mxu3 %v670_v37  ;;  %v597_v51 = vld [vmem:[%s14650_s3] sm:$0xff] }
  0x9d   :  { %v93_v56 = vmul.f32 %v92_v54, %v8750_v5  ;;  %v157_v5 = vld [vmem:[%s14647_s23 + $0x60] sm:$0xff]  ;;  %v176_v49 = vld [vmem:[%s14647_s23 + $0xf8] sm:$0xff]  ;;  %s8600_s23 = smov 120  }
  0x9e   :  { %287 = vmatpush.msra.mxu0 %v129_v53  ;;  %7589 = vmatpush.msra.mxu3 %v668_v38 }
  0xa0   :  { %288 = vmatpush.msra.mxu0 %v108_v55  ;;  %7590 = vmatpush.msra.mxu3 %v666_v39  ;;  %v598_v55 = vld [vmem:[%s14650_s3 + $0x8] sm:$0xff] }
  0xa2   :  { %289 = vmatpush.msra.mxu0 %v93_v56  ;;  %7591 = vmatpush.msra.mxu3 %v664_v42 }
  0xa3   :  { %7282 = vmatmul.msk.f32.vlgmr.msra.gmra.mxu0 %vm177_vm2, %v145_v57 }
  0xa4   :  { %895 = vmatpush.msrb.mxu0 %v676_v32  ;;  %7592 = vmatpush.msra.mxu3 %v662_v43  ;;  %v608_v32 = vld [vmem:[%s14650_s3 + $0x58] sm:$0xff] }
  0xa6   :  { %896 = vmatpush.msrb.mxu0 %v674_v33 }
  0xa8   :  { %897 = vmatpush.msrb.mxu0 %v672_v36 }
  0xaa   :  { %898 = vmatpush.msrb.mxu0 %v670_v37  ;;  %v669_v37 = vld [vmem:[%s14649_s24 + $0x40] sm:$0xff] }
  0xab   :  { %7283 = vmatmul.msk.f32.gmra.mxu0 %vm177_vm2, %v146_v58 }
  0xac   :  { %899 = vmatpush.msrb.mxu0 %v668_v38  ;;  %v667_v38 = vld [vmem:[%s14649_s24 + $0x30] sm:$0xff] }
  0xae   :  { %900 = vmatpush.msrb.mxu0 %v666_v39  ;;  %v665_v39 = vld [vmem:[%s14649_s24 + $0x20] sm:$0xff] }
  0xb0   :  { %901 = vmatpush.msrb.mxu0 %v664_v42 }
  0xb2   :  { %902 = vmatpush.msrb.mxu0 %v662_v43  ;;  %v663_v43 = vld [vmem:[%s14649_s24 + $0x10] sm:$0xff] }
  0xb3   :  { %7284 = vmatmul.msk.f32.gmra.mxu0 %vm177_vm2, %v147_v59  ;;  %v599_v59 = vld [vmem:[%s14650_s3 + $0x10] sm:$0xff] }
  0xbb   :  { %7285 = vmatmul.msk.f32.gmra.mxu0 %vm177_vm2, %v148_v60 }
  0xc3   :  { %7286 = vmatmul.msk.f32.gmra.mxu0 %vm177_vm2, %v149_v61 }
  0xcb   :  { %7287 = vmatmul.msk.f32.gmra.mxu0 %vm177_vm2, %v150_v62 }
  0xd3   :  { %7288 = vmatmul.msk.f32.gmra.mxu0 %vm177_vm2, %v151_v63  ;;  %v600_v63 = vld [vmem:[%s14650_s3 + $0x18] sm:$0xff] }
  0xdb   :  { %7289 = vmatmul.msk.f32.gmra.mxu0 %vm177_vm2, %v152_v0 }
  0xe3   :  { %7290 = vmatmul.msk.f32.gmra.mxu0 %vm177_vm2, %v153_v1 }
  0xeb   :  { %7291 = vmatmul.msk.f32.gmra.mxu0 %vm177_vm2, %v154_v2  ;;  %v601_v2 = vld [vmem:[%s14650_s3 + $0x20] sm:$0xff] }
  0xf3   :  { %7292 = vmatmul.msk.f32.gmra.mxu0 %vm177_vm2, %v155_v3 }
  0xfb   :  { %7293 = vmatmul.msk.f32.gmra.mxu0 %vm177_vm2, %v156_v4 }
 0x103   :  { %7294 = vmatmul.msk.f32.gmra.mxu0 %vm177_vm2, %v157_v5 }
 0x10b   :  { %7295 = vmatmul.msk.f32.gmra.mxu0 %vm177_vm2, %v158_v7 }
 0x113   :  { %7296 = vmatmul.msk.f32.gmra.mxu0 %vm177_vm2, %v159_v8 }
 0x11b   :  { %7297 = vmatmul.msk.f32.gmra.mxu0 %vm177_vm2, %v160_v9 }
 0x120   :  { %v291_v10 = vpop.f32.mrf.mxu0 }
 0x121   :  { %7314 = vmatmul.msk.f32.vlgmr.msra.gmra.mxu1 %vm72_vm0, %v291_v10  ;;  %v603_v10 = vld [vmem:[%s14650_s3 + $0x30] sm:$0xff] }
 0x123   :  { %7298 = vmatmul.msk.f32.gmra.mxu0 %vm177_vm2, %v161_v11 }
 0x128   :  { %v294_v12 = vpop.f32.mrf.mxu0 }
 0x129   :  { %7315 = vmatmul.msk.f32.gmra.mxu1 %vm72_vm0, %v294_v12 }
 0x12b   :  { %7299 = vmatmul.msk.f32.gmra.mxu0 %vm177_vm2, %v162_v13 }
 0x130   :  { %v297_v14 = vpop.f32.mrf.mxu0 }
 0x131   :  { %7316 = vmatmul.msk.f32.gmra.mxu1 %vm72_vm0, %v297_v14  ;;  %v604_v14 = vld [vmem:[%s14650_s3 + $0x38] sm:$0xff] }
 0x133   :  { %7300 = vmatmul.msk.f32.gmra.mxu0 %vm177_vm2, %v163_v15 }
 0x138   :  { %v300_v16 = vpop.f32.mrf.mxu0 }
 0x139   :  { %7317 = vmatmul.msk.f32.gmra.mxu1 %vm72_vm0, %v300_v16 }
 0x13b   :  { %7301 = vmatmul.msk.f32.gmra.mxu0 %vm177_vm2, %v164_v17 }
 0x140   :  { %v303_v18 = vpop.f32.mrf.mxu0 }
 0x141   :  { %7318 = vmatmul.msk.f32.gmra.mxu1 %vm72_vm0, %v303_v18  ;;  %v605_v18 = vld [vmem:[%s14650_s3 + $0x40] sm:$0xff] }
 0x143   :  { %7302 = vmatmul.msk.f32.gmra.mxu0 %vm177_vm2, %v165_v19 }
 0x148   :  { %v306_v20 = vpop.f32.mrf.mxu0 }
 0x149   :  { %7319 = vmatmul.msk.f32.gmra.mxu1 %vm72_vm0, %v306_v20 }
 0x14b   :  { %7303 = vmatmul.msk.f32.gmra.mxu0 %vm177_vm2, %v166_v21 }
 0x150   :  { %v309_v22 = vpop.f32.mrf.mxu0 }
 0x151   :  { %7320 = vmatmul.msk.f32.gmra.mxu1 %vm72_vm0, %v309_v22  ;;  %v606_v22 = vld [vmem:[%s14650_s3 + $0x48] sm:$0xff] }
 0x153   :  { %7304 = vmatmul.msk.f32.gmra.mxu0 %vm177_vm2, %v167_v23 }
 0x158   :  { %v312_v24 = vpop.f32.mrf.mxu0 }
 0x159   :  { %7321 = vmatmul.msk.f32.gmra.mxu1 %vm72_vm0, %v312_v24 }
 0x15b   :  { %7305 = vmatmul.msk.f32.gmra.mxu0 %vm177_vm2, %v168_v25 }
 0x160   :  { %v315_v26 = vpop.f32.mrf.mxu0 }
 0x161   :  { %7322 = vmatmul.msk.f32.gmra.mxu1 %vm72_vm0, %v315_v26  ;;  %v607_v26 = vld [vmem:[%s14650_s3 + $0x50] sm:$0xff] }
 0x163   :  { %7306 = vmatmul.msk.f32.gmra.mxu0 %vm177_vm2, %v169_v27 }
 0x168   :  { %v318_v28 = vpop.f32.mrf.mxu0 }
 0x169   :  { %7323 = vmatmul.msk.f32.gmra.mxu1 %vm72_vm0, %v318_v28 }
 0x16b   :  { %7307 = vmatmul.msk.f32.gmra.mxu0 %vm177_vm2, %v170_v29 }
 0x170   :  { %v321_v30 = vpop.f32.mrf.mxu0 }
 0x171   :  { %7324 = vmatmul.msk.f32.gmra.mxu1 %vm72_vm0, %v321_v30  ;;  %v675_v30 = vld [vmem:[%s14649_s24 + $0x70] sm:$0xff] }
 0x172   :  { %782 = vmatpush.msrb.mxu2 %v675_v30 }
 0x173   :  { %7308 = vmatmul.msk.f32.gmra.mxu0 %vm177_vm2, %v171_v31  ;;  %v673_v31 = vld [vmem:[%s14649_s24 + $0x60] sm:$0xff] }
 0x174   :  { %783 = vmatpush.msrb.mxu2 %v673_v31 }
 0x178   :  { %v324_v34 = vpop.f32.mrf.mxu0 }
 0x179   :  { %7325 = vmatmul.msk.f32.gmra.mxu1 %vm72_vm0, %v324_v34 }
 0x17b   :  { %7309 = vmatmul.msk.f32.gmra.mxu0 %vm177_vm2, %v172_v35  ;;  %v671_v35 = vld [vmem:[%s14649_s24 + $0x50] sm:$0xff] }
 0x17c   :  { %784 = vmatpush.msrb.mxu2 %v671_v35 }
 0x17e   :  { %785 = vmatpush.msrb.mxu2 %v669_v37 }
 0x180   :  { %v327_v40 = vpop.f32.mrf.mxu0  ;;  %786 = vmatpush.msrb.mxu2 %v667_v38 }
 0x181   :  { %7326 = vmatmul.msk.f32.gmra.mxu1 %vm72_vm0, %v327_v40  ;;  %v609_v40 = vld [vmem:[%s14650_s3 + $0x60] sm:$0xff] }
 0x182   :  { %787 = vmatpush.msrb.mxu2 %v665_v39  ;;  %v624_v39 = vld [vmem:[%s14650_s3 + $0xd8] sm:$0xff] }
 0x183   :  { %7310 = vmatmul.msk.f32.gmra.mxu0 %vm177_vm2, %v173_v41 }
 0x184   :  { %788 = vmatpush.msrb.mxu2 %v663_v43 }
 0x188   :  { %v330_v44 = vpop.f32.mrf.mxu0 }
 0x189   :  { %7327 = vmatmul.msk.f32.gmra.mxu1 %vm72_vm0, %v330_v44  ;;  %v661_v44 = vld [vmem:[%s14649_s24] sm:$0xff]  ;;  %s8603_s24 = smov 116  }
 0x18a   :  { %789 = vmatpush.msrb.mxu2 %v661_v44  ;;  %v625_v44 = vld [vmem:[%s14650_s3 + $0xe0] sm:$0xff] }
 0x18b   :  { %7311 = vmatmul.msk.f32.gmra.mxu0 %vm177_vm2, %v174_v45 }
 0x190   :  { %v333_v46 = vpop.f32.mrf.mxu0 }
 0x191   :  { %7328 = vmatmul.msk.f32.gmra.mxu1 %vm72_vm0, %v333_v46  ;;  %v610_v46 = vld [vmem:[%s14650_s3 + $0x68] sm:$0xff] }
 0x193   :  { %7312 = vmatmul.msk.f32.gmra.mxu0 %vm177_vm2, %v175_v47 }
 0x198   :  { %v336_v48 = vpop.f32.mrf.mxu0 }
 0x199   :  { %7329 = vmatmul.msk.f32.gmra.mxu1 %vm72_vm0, %v336_v48 }
 0x19b   :  { %7313 = vmatmul.msk.f32.gmra.mxu0 %vm177_vm2, %v176_v49 }
 0x19e   :  { %v501_v50 = vpop.f32.mrf.mxu1 }
 0x19f   :  { %v8939_v53 = vmul.f32 %v597_v51, %v501_v50  ;;  %v611_v50 = vld [vmem:[%s14650_s3 + $0x70] sm:$0xff] }
 0x1a0   :  { %v339_v52 = vpop.f32.mrf.mxu0 }
 0x1a1   :  { %14651 = vst [vmem:[#allocation2_spill] sm:$0xff] %v8939_v53  ;;  %7330 = vmatmul.msk.f32.gmra.mxu1 %vm72_vm0, %v339_v52 }
 0x1a3   :  { %7378 = vmatmul.msk.f32.vlgmr.msrb.gmra.mxu0 %vm677_vm3, %v8939_v53 }
 0x1a6   :  { %v504_v54 = vpop.f32.mrf.mxu1 }
 0x1a7   :  { %v8947_v57 = vmul.f32 %v598_v55, %v504_v54  ;;  %v612_v55 = vld [vmem:[%s14650_s3 + $0x78] sm:$0xff] }
 0x1a8   :  { %v342_v56 = vpop.f32.mrf.mxu0 }
 0x1a9   :  { %14652 = vst [vmem:[#allocation3_spill] sm:$0xff] %v8947_v57  ;;  %7331 = vmatmul.msk.f32.gmra.mxu1 %vm72_vm0, %v342_v56 }
 0x1ab   :  { %7379 = vmatmul.msk.f32.gmra.mxu0 %vm677_vm3, %v8947_v57 }
 0x1ae   :  { %v507_v58 = vpop.f32.mrf.mxu1 }
 0x1af   :  { %v8955_v61 = vmul.f32 %v599_v59, %v507_v58 }
 0x1b0   :  { %v345_v60 = vpop.f32.mrf.mxu0 }
 0x1b1   :  { %14653 = vst [vmem:[#allocation4_spill] sm:$0xff] %v8955_v61  ;;  %7332 = vmatmul.msk.f32.gmra.mxu1 %vm72_vm0, %v345_v60  ;;  %v613_v60 = vld [vmem:[%s14650_s3 + $0x80] sm:$0xff] }
 0x1b3   :  { %7380 = vmatmul.msk.f32.gmra.mxu0 %vm677_vm3, %v8955_v61 }
 0x1b6   :  { %v510_v62 = vpop.f32.mrf.mxu1 }
 0x1b7   :  { %v8963_v1 = vmul.f32 %v600_v63, %v510_v62 }
 0x1b8   :  { %v348_v0 = vpop.f32.mrf.mxu0 }
 0x1b9   :  { %14654 = vst [vmem:[#allocation5_spill] sm:$0xff] %v8963_v1  ;;  %7333 = vmatmul.msk.f32.gmra.mxu1 %vm72_vm0, %v348_v0  ;;  %v614_v0 = vld [vmem:[%s14650_s3 + $0x88] sm:$0xff] }
 0x1bb   :  { %7381 = vmatmul.msk.f32.gmra.mxu0 %vm677_vm3, %v8963_v1 }
 0x1be   :  { %v513_v3 = vpop.f32.mrf.mxu1 }
 0x1bf   :  { %v8971_v4 = vmul.f32 %v601_v2, %v513_v3 }
 0x1c0   :  { %v351_v5 = vpop.f32.mrf.mxu0 }
 0x1c1   :  { %14655 = vst [vmem:[#allocation6_spill] sm:$0xff] %v8971_v4  ;;  %7334 = vmatmul.msk.f32.gmra.mxu1 %vm72_vm0, %v351_v5  ;;  %7382 = vmatmul.msk.f32.vlgmr.msra.gmra.mxu3 %vm677_vm3, %v8971_v4  ;;  %v615_v5 = vld [vmem:[%s14650_s3 + $0x90] sm:$0xff] }
 0x1c6   :  { %v516_v7 = vpop.f32.mrf.mxu1 }
 0x1c7   :  { %v8979_v8 = vmul.f32 %v602_v6, %v516_v7 }
 0x1c8   :  { %v354_v9 = vpop.f32.mrf.mxu0 }
 0x1c9   :  { %14656 = vst [vmem:[#allocation7_spill] sm:$0xff] %v8979_v8  ;;  %7335 = vmatmul.msk.f32.gmra.mxu1 %vm72_vm0, %v354_v9  ;;  %7383 = vmatmul.msk.f32.gmra.mxu3 %vm677_vm3, %v8979_v8  ;;  %v616_v9 = vld [vmem:[%s14650_s3 + $0x98] sm:$0xff] }
 0x1ce   :  { %v519_v11 = vpop.f32.mrf.mxu1 }
 0x1cf   :  { %v8987_v12 = vmul.f32 %v603_v10, %v519_v11 }
 0x1d0   :  { %v357_v13 = vpop.f32.mrf.mxu0 }
 0x1d1   :  { %14657 = vst [vmem:[#allocation8_spill] sm:$0xff] %v8987_v12  ;;  %7336 = vmatmul.msk.f32.gmra.mxu1 %vm72_vm0, %v357_v13  ;;  %7384 = vmatmul.msk.f32.gmra.mxu3 %vm677_vm3, %v8987_v12  ;;  %v617_v13 = vld [vmem:[%s14650_s3 + $0xa0] sm:$0xff] }
 0x1d6   :  { %v522_v15 = vpop.f32.mrf.mxu1 }
 0x1d7   :  { %v8995_v16 = vmul.f32 %v604_v14, %v522_v15 }
 0x1d8   :  { %v360_v17 = vpop.f32.mrf.mxu0 }
 0x1d9   :  { %14658 = vst [vmem:[#allocation9_spill] sm:$0xff] %v8995_v16  ;;  %7337 = vmatmul.msk.f32.gmra.mxu1 %vm72_vm0, %v360_v17  ;;  %7385 = vmatmul.msk.f32.gmra.mxu3 %vm677_vm3, %v8995_v16  ;;  %v618_v17 = vld [vmem:[%s14650_s3 + $0xa8] sm:$0xff] }
 0x1de   :  { %v525_v19 = vpop.f32.mrf.mxu1 }
 0x1df   :  { %v9003_v20 = vmul.f32 %v605_v18, %v525_v19 }
 0x1e0   :  { %v363_v21 = vpop.f32.mrf.mxu0 }
 0x1e1   :  { %14659 = vst [vmem:[#allocation10_spill] sm:$0xff] %v9003_v20  ;;  %7338 = vmatmul.msk.f32.gmra.mxu1 %vm72_vm0, %v363_v21  ;;  %7386 = vmatmul.msk.f32.gmra.mxu3 %vm677_vm3, %v9003_v20  ;;  %v619_v21 = vld [vmem:[%s14650_s3 + $0xb0] sm:$0xff] }
 0x1e6   :  { %v528_v23 = vpop.f32.mrf.mxu1 }
 0x1e7   :  { %v9011_v24 = vmul.f32 %v606_v22, %v528_v23 }
 0x1e8   :  { %v366_v25 = vpop.f32.mrf.mxu0 }
 0x1e9   :  { %14660 = vst [vmem:[#allocation11_spill] sm:$0xff] %v9011_v24  ;;  %7339 = vmatmul.msk.f32.gmra.mxu1 %vm72_vm0, %v366_v25  ;;  %7387 = vmatmul.msk.f32.gmra.mxu3 %vm677_vm3, %v9011_v24  ;;  %v620_v25 = vld [vmem:[%s14650_s3 + $0xb8] sm:$0xff] }
 0x1ee   :  { %v531_v27 = vpop.f32.mrf.mxu1 }
 0x1ef   :  { %v9019_v28 = vmul.f32 %v607_v26, %v531_v27 }
 0x1f0   :  { %v369_v29 = vpop.f32.mrf.mxu0 }
 0x1f1   :  { %14661 = vst [vmem:[#allocation12_spill] sm:$0xff] %v9019_v28  ;;  %7340 = vmatmul.msk.f32.gmra.mxu1 %vm72_vm0, %v369_v29  ;;  %7388 = vmatmul.msk.f32.gmra.mxu3 %vm677_vm3, %v9019_v28  ;;  %v621_v29 = vld [vmem:[%s14650_s3 + $0xc0] sm:$0xff] }
 0x1f6   :  { %v534_v33 = vpop.f32.mrf.mxu1 }
 0x1f7   :  { %v9033_v34 = vmul.f32 %v608_v32, %v534_v33  ;;  %v622_v32 = vld [vmem:[%s14650_s3 + $0xc8] sm:$0xff] }
 0x1f8   :  { %v372_v36 = vpop.f32.mrf.mxu0 }
 0x1f9   :  { %14662 = vst [vmem:[#allocation13_spill] sm:$0xff] %v9033_v34  ;;  %7341 = vmatmul.msk.f32.vlgmr.msra.gmra.mxu2 %vm72_vm0, %v372_v36  ;;  %7389 = vmatmul.msk.f32.gmra.mxu3 %vm677_vm3, %v9033_v34  ;;  %v623_v36 = vld [vmem:[%s14650_s3 + $0xd0] sm:$0xff] }
 0x1fe   :  { %v537_v41 = vpop.f32.mrf.mxu1 }
 0x1ff   :  { %v9053_v42 = vmul.f32 %v609_v40, %v537_v41 }
 0x200   :  { %v375_v45 = vpop.f32.mrf.mxu0 }
 0x201   :  { %14663 = vst [vmem:[#allocation14_spill] sm:$0xff] %v9053_v42  ;;  %7342 = vmatmul.msk.f32.gmra.mxu2 %vm72_vm0, %v375_v45  ;;  %7390 = vmatmul.msk.f32.gmra.mxu3 %vm677_vm3, %v9053_v42 }
 0x206   :  { %v540_v47 = vpop.f32.mrf.mxu1 }
 0x207   :  { %v9067_v48 = vmul.f32 %v610_v46, %v540_v47  ;;  %v626_v47 = vld [vmem:[%s14650_s3 + $0xe8] sm:$0xff] }
 0x208   :  { %v378_v49 = vpop.f32.mrf.mxu0 }
 0x209   :  { %14664 = vst [vmem:[#allocation15_spill] sm:$0xff] %v9067_v48  ;;  %7343 = vmatmul.msk.f32.gmra.mxu2 %vm72_vm0, %v378_v49  ;;  %7391 = vmatmul.msk.f32.gmra.mxu3 %vm677_vm3, %v9067_v48 }
 0x20e   :  { %v543_v51 = vpop.f32.mrf.mxu1 }
 0x20f   :  { %v9075_v52 = vmul.f32 %v611_v50, %v543_v51 }
 0x210   :  { %v381_v54 = vpop.f32.mrf.mxu0 }
 0x211   :  { %14665 = vst [vmem:[#allocation16_spill] sm:$0xff] %v9075_v52  ;;  %7344 = vmatmul.msk.f32.gmra.mxu2 %vm72_vm0, %v381_v54  ;;  %7392 = vmatmul.msk.f32.gmra.mxu3 %vm677_vm3, %v9075_v52  ;;  %v627_v54 = vld [vmem:[%s14650_s3 + $0xf0] sm:$0xff] }
 0x216   :  { %v546_v56 = vpop.f32.mrf.mxu1 }
 0x217   :  { %v9083_v58 = vmul.f32 %v612_v55, %v546_v56 }
 0x218   :  { %v384_v59 = vpop.f32.mrf.mxu0 }
 0x219   :  { %14666 = vst [vmem:[#allocation17_spill] sm:$0xff] %v9083_v58  ;;  %7345 = vmatmul.msk.f32.gmra.mxu2 %vm72_vm0, %v384_v59  ;;  %7393 = vmatmul.msk.f32.gmra.mxu3 %vm677_vm3, %v9083_v58 }
 0x21e   :  { %v549_v62 = vpop.f32.mrf.mxu1 }
 0x21f   :  { %v9091_v63 = vmul.f32 %v613_v60, %v549_v62  ;;  %v628_v60 = vld [vmem:[%s14650_s3 + $0xf8] sm:$0xff]  ;;  %s8608_s3 = smov 108  }
 0x221   :  { %14667 = vst [vmem:[#allocation18_spill] sm:$0xff] %v9091_v63  ;;  %7346 = vmatmul.msk.f32.vlgmr.msrb.gmra.mxu2 %vm677_vm3, %v8939_v53  ;;  %7394 = vmatmul.msk.f32.gmra.mxu3 %vm677_vm3, %v9091_v63 }
 0x226   :  { %v552_v2 = vpop.f32.mrf.mxu1 }
 0x227   :  { %v9100_v3 = vmul.f32 %v614_v0, %v552_v2 }
 0x229   :  { %14668 = vst [vmem:[#allocation19_spill] sm:$0xff] %v9100_v3  ;;  %7347 = vmatmul.msk.f32.gmra.mxu2 %vm677_vm3, %v8947_v57  ;;  %7395 = vmatmul.msk.f32.gmra.mxu3 %vm677_vm3, %v9100_v3 }
 0x22e   :  { %v555_v6 = vpop.f32.mrf.mxu1 }
 0x22f   :  { %v9109_v7 = vmul.f32 %v615_v5, %v555_v6 }
 0x231   :  { %14669 = vst [vmem:[#allocation20_spill] sm:$0xff] %v9109_v7  ;;  %7348 = vmatmul.msk.f32.gmra.mxu2 %vm677_vm3, %v8955_v61  ;;  %7396 = vmatmul.msk.f32.gmra.mxu3 %vm677_vm3, %v9109_v7 }
 0x236   :  { %v558_v10 = vpop.f32.mrf.mxu1 }
 0x237   :  { %v9118_v11 = vmul.f32 %v616_v9, %v558_v10 }
 0x239   :  { %14670 = vst [vmem:[#allocation21_spill] sm:$0xff] %v9118_v11  ;;  %7349 = vmatmul.msk.f32.gmra.mxu2 %vm677_vm3, %v8963_v1  ;;  %7397 = vmatmul.msk.f32.gmra.mxu3 %vm677_vm3, %v9118_v11 }
 0x23e   :  { %v561_v14 = vpop.f32.mrf.mxu1 }
 0x23f   :  { %v9127_v15 = vmul.f32 %v617_v13, %v561_v14 }
 0x241   :  { %14671 = vst [vmem:[#allocation22_spill] sm:$0xff] %v9127_v15  ;;  %7350 = vmatmul.msk.f32.gmra.mxu2 %vm677_vm3, %v8971_v4  ;;  %7398 = vmatmul.msk.f32.gmra.mxu3 %vm677_vm3, %v9127_v15 }
 0x244   :  { %v9196_v43 = vpop.f32.mrf.mxu3 }
 0x245   :  { %14679 = vst [vmem:[#allocation30_spill] sm:$0xff] %v9196_v43 }
 0x246   :  { %v564_v18 = vpop.f32.mrf.mxu1 }
 0x247   :  { %v9136_v19 = vmul.f32 %v618_v17, %v564_v18 }
 0x249   :  { %14672 = vst [vmem:[#allocation23_spill] sm:$0xff] %v9136_v19  ;;  %7351 = vmatmul.msk.f32.gmra.mxu2 %vm677_vm3, %v8979_v8  ;;  %7399 = vmatmul.msk.f32.gmra.mxu3 %vm677_vm3, %v9136_v19 }
 0x24c   :  { %v9212_v49 = vpop.f32.mrf.mxu3 }
 0x24d   :  { %14681 = vst [vmem:[#allocation32_spill] sm:$0xff] %v9212_v49 }
 0x24e   :  { %v567_v22 = vpop.f32.mrf.mxu1 }
 0x24f   :  { %v9145_v23 = vmul.f32 %v619_v21, %v567_v22 }
 0x251   :  { %14673 = vst [vmem:[#allocation24_spill] sm:$0xff] %v9145_v23  ;;  %7352 = vmatmul.msk.f32.gmra.mxu2 %vm677_vm3, %v8987_v12  ;;  %7400 = vmatmul.msk.f32.gmra.mxu3 %vm677_vm3, %v9145_v23 }
 0x254   :  { %v9223_v56 = vpop.f32.mrf.mxu3 }
 0x255   :  { %14683 = vst [vmem:[#allocation34_spill] sm:$0xff] %v9223_v56 }
 0x256   :  { %v570_v26 = vpop.f32.mrf.mxu1 }
 0x257   :  { %v9154_v27 = vmul.f32 %v620_v25, %v570_v26  ;;  %v9285_v25 = vld [vmem:[%s14430_s0 + $0x8] sm:$0xff] }
 0x258   :  { %1464 = vmatpush.msra.mxu2 %v9285_v25 }
 0x259   :  { %14674 = vst [vmem:[#allocation25_spill] sm:$0xff] %v9154_v27  ;;  %7353 = vmatmul.msk.f32.gmra.mxu2 %vm677_vm3, %v8995_v16  ;;  %7401 = vmatmul.msk.f32.gmra.mxu3 %vm677_vm3, %v9154_v27 }
 0x25c   :  { %v9236_v2 = vpop.f32.mrf.mxu3 }
 0x25d   :  { %14686 = vst [vmem:[#allocation37_spill] sm:$0xff] %v9236_v2 }
 0x25e   :  { %v573_v30 = vpop.f32.mrf.mxu1 }
 0x25f   :  { %v9163_v31 = vmul.f32 %v621_v29, %v573_v30  ;;  %v9293_v29 = vld [vmem:[%s14430_s0] sm:$0xff]  ;;  %s8617_s0 = smov 12  }
 0x260   :  { %1465 = vmatpush.msra.mxu2 %v9293_v29  ;;  %v9300_v30 = vpack.i.bf16 %v9293_v29, %v9285_v25 }
 0x261   :  { %14675 = vst [vmem:[#allocation26_spill] sm:$0xff] %v9163_v31  ;;  %7354 = vmatmul.msk.f32.gmra.mxu2 %vm677_vm3, %v9003_v20  ;;  %7402 = vmatmul.msk.f32.gmra.mxu3 %vm677_vm3, %v9163_v31 }
 0x262   :  { %7630 = vrot.lane.b32.xlu1 %v9300_v30, %s8600_s23  ;;  %7615 = vrot.lane.b32.xlu2 %v9300_v30, %s8601_s25 }
 0x263   :  { %7625 = vrot.lane.b32.xlu0 %v9300_v30, %s8605_s6 }
 0x266   :  { %v576_v33 = vpop.f32.mrf.mxu1 }
 0x267   :  { %v9172_v35 = vmul.f32 %v622_v32, %v576_v33  ;;  %v8602_v33 = vmov 0  }
 0x268   :  { %7646 = vset.pattern.permute.xlu1 %v8602_v33  ;;  %7634 = vset.pattern.permute.xlu2 %v8602_v33 }
 0x269   :  { %14676 = vst [vmem:[#allocation27_spill] sm:$0xff] %v9172_v35  ;;  %7355 = vmatmul.msk.f32.gmra.mxu2 %vm677_vm3, %v9011_v24  ;;  %7403 = vmatmul.msk.f32.gmra.mxu3 %vm677_vm3, %v9172_v35 }
 0x26a   :  { %7640 = vset.pattern.permute.xlu0 %v8602_v33  ;;  %7620 = vrot.lane.b32.xlu2 %v9300_v30, %s8603_s24  ;;  %v1370_v33 = vld [vmem:[%s14432_s9 + $0x8] sm:$0xff] }
 0x26e   :  { %v579_v37 = vpop.f32.mrf.mxu1 }
 0x26f   :  { %v9181_v38 = vmul.f32 %v623_v36, %v579_v37  ;;  %v1381_v36 = vld [vmem:[%s14431_s17 + $0x20] sm:$0xff] }
 0x270   :  { %1407 = vperm.xlu1 %7646, %v1381_v36   ;;  %v1380_v36 = vld [vmem:[%s14431_s17 + $0x18] sm:$0xff] }
 0x271   :  { %14677 = vst [vmem:[#allocation28_spill] sm:$0xff] %v9181_v38  ;;  %7356 = vmatmul.msk.f32.gmra.mxu2 %vm677_vm3, %v9019_v28  ;;  %7404 = vmatmul.msk.f32.gmra.mxu3 %vm677_vm3, %v9181_v38 }
 0x278   :  { %7648 = vrot.lane.b32.xlu1 %v9300_v30, %s8604_s28 }
 0x279   :  { %7357 = vmatmul.msk.f32.gmra.mxu2 %vm677_vm3, %v9033_v34 }
 0x27c   :  { %v582_v40 = vpop.f32.mrf.mxu2 }
 0x27d   :  { %v9192_v41 = vmul.f32 %v624_v39, %v582_v40  ;;  %v1384_v39 = vld [vmem:[%s14431_s17 + $0x38] sm:$0xff] }
 0x27e   :  { %1422 = vperm.xlu2 %7634, %v1384_v39  }
 0x27f   :  { %14678 = vst [vmem:[#allocation29_spill] sm:$0xff] %v9192_v41  ;;  %7405 = vmatmul.msk.f32.gmra.mxu3 %vm677_vm3, %v9192_v41 }
 0x281   :  { %7358 = vmatmul.msk.f32.gmra.mxu2 %vm677_vm3, %v9053_v42 }
 0x284   :  { %v585_v45 = vpop.f32.mrf.mxu2 }
 0x285   :  { %v9203_v46 = vmul.f32 %v625_v44, %v585_v45  ;;  %v1377_v44 = vld [vmem:[%s14431_s17] sm:$0xff] }
 0x286   :  { %1387 = vperm.xlu1 %7646, %v1377_v44   ;;  %7636 = vrot.lane.b32.xlu2 %v9300_v30, %s14585_s30  ;;  %v1371_v44 = vld [vmem:[%s14432_s9 + $0x10] sm:$0xff] }
 0x287   :  { %14680 = vst [vmem:[#allocation31_spill] sm:$0xff] %v9203_v46  ;;  %7406 = vmatmul.msk.f32.gmra.mxu3 %vm677_vm3, %v9203_v46 }
 0x289   :  { %7359 = vmatmul.msk.f32.gmra.mxu2 %vm677_vm3, %v9067_v48 }
 0x28c   :  { %v588_v50 = vpop.f32.mrf.mxu2 }
 0x28d   :  { %v9214_v51 = vmul.f32 %v626_v47, %v588_v50  ;;  %v1382_v47 = vld [vmem:[%s14431_s17 + $0x28] sm:$0xff]  ;;  %v1383_v50 = vld [vmem:[%s14431_s17 + $0x30] sm:$0xff] }
 0x28e   :  { %1412 = vperm.xlu0 %7640, %v1382_v47   ;;  %1417 = vperm.xlu2 %7634, %v1383_v50   ;;  %v1378_v47 = vld [vmem:[%s14431_s17 + $0x8] sm:$0xff] }
 0x28f   :  { %14682 = vst [vmem:[#allocation33_spill] sm:$0xff] %v9214_v51  ;;  %7407 = vmatmul.msk.f32.gmra.mxu3 %vm677_vm3, %v9214_v51 }
 0x291   :  { %7360 = vmatmul.msk.f32.gmra.mxu2 %vm677_vm3, %v9075_v52 }
 0x294   :  { %v591_v55 = vpop.f32.mrf.mxu2 }
 0x295   :  { %v9225_v59 = vmul.f32 %v627_v54, %v591_v55  ;;  %v1369_v55 = vld [vmem:[%s14432_s9] sm:$0xff] }
 0x296   :  { %7642 = vrot.lane.b32.xlu2 %v9300_v30, %s8607_s29 }
 0x297   :  { %14684 = vst [vmem:[#allocation35_spill] sm:$0xff] %v9225_v59  ;;  %7408 = vmatmul.msk.f32.gmra.mxu3 %vm677_vm3, %v9225_v59 }
 0x299   :  { %7361 = vmatmul.msk.f32.gmra.mxu2 %vm677_vm3, %v9083_v58 }
 0x29c   :  { %v594_v62 = vpop.f32.mrf.mxu2 }
 0x29d   :  { %v9234_v0 = vmul.f32 %v628_v60, %v594_v62  ;;  %v1379_v60 = vld [vmem:[%s14431_s17 + $0x10] sm:$0xff] }
 0x29e   :  { %1397 = vperm.xlu0 %7640, %v1379_v60   ;;  %1402 = vperm.xlu2 %7634, %v1380_v36  }
 0x29f   :  { %14685 = vst [vmem:[#allocation36_spill] sm:$0xff] %v9234_v0  ;;  %7409 = vmatmul.msk.f32.gmra.mxu3 %vm677_vm3, %v9234_v0 }
 0x2a1   :  { %7362 = vmatmul.msk.f32.gmra.mxu2 %vm677_vm3, %v9091_v63 }
 0x2a4   :  { %v9242_v5 = vpop.f32.mrf.mxu2 }
 0x2a5   :  { %14687 = vst [vmem:[#allocation38_spill] sm:$0xff] %v9242_v5 }
 0x2a6   :  { %1392 = vperm.xlu2 %7634, %v1378_v47  }
 0x2a9   :  { %7363 = vmatmul.msk.f32.gmra.mxu2 %vm677_vm3, %v9100_v3 }
 0x2ac   :  { %v9246_v6 = vpop.f32.mrf.mxu2 }
 0x2ad   :  { %14688 = vst [vmem:[#allocation39_spill] sm:$0xff] %v9246_v6 }
 0x2b1   :  { %7364 = vmatmul.msk.f32.gmra.mxu2 %vm677_vm3, %v9109_v7 }
 0x2b4   :  { %v9250_v9 = vpop.f32.mrf.mxu2 }
 0x2b5   :  { %14689 = vst [vmem:[#allocation40_spill] sm:$0xff] %v9250_v9 }
 0x2b9   :  { %7365 = vmatmul.msk.f32.gmra.mxu2 %vm677_vm3, %v9118_v11 }
 0x2bc   :  { %v9254_v10 = vpop.f32.mrf.mxu2 }
 0x2bd   :  { %14690 = vst [vmem:[#allocation41_spill] sm:$0xff] %v9254_v10 }
 0x2c1   :  { %7366 = vmatmul.msk.f32.gmra.mxu2 %vm677_vm3, %v9127_v15 }
 0x2c4   :  { %v9258_v13 = vpop.f32.mrf.mxu2 }
 0x2c5   :  { %14691 = vst [vmem:[#allocation42_spill] sm:$0xff] %v9258_v13 }
 0x2c9   :  { %7367 = vmatmul.msk.f32.gmra.mxu2 %vm677_vm3, %v9136_v19 }
 0x2cc   :  { %v9262_v14 = vpop.f32.mrf.mxu2 }
 0x2cd   :  { %14692 = vst [vmem:[#allocation43_spill] sm:$0xff] %v9262_v14 }
 0x2d1   :  { %7368 = vmatmul.msk.f32.gmra.mxu2 %vm677_vm3, %v9145_v23 }
 0x2d4   :  { %v9266_v17 = vpop.f32.mrf.mxu2 }
 0x2d5   :  { %14693 = vst [vmem:[#allocation44_spill] sm:$0xff] %v9266_v17 }
 0x2d9   :  { %7369 = vmatmul.msk.f32.gmra.mxu2 %vm677_vm3, %v9154_v27 }
 0x2dc   :  { %v9270_v18 = vpop.f32.mrf.mxu2 }
 0x2dd   :  { %14694 = vst [vmem:[#allocation45_spill] sm:$0xff] %v9270_v18 }
 0x2e1   :  { %7370 = vmatmul.msk.f32.gmra.mxu2 %vm677_vm3, %v9163_v31 }
 0x2e4   :  { %v9274_v21 = vpop.f32.mrf.mxu2 }
 0x2e5   :  { %14695 = vst [vmem:[#allocation46_spill] sm:$0xff] %v9274_v21 }
 0x2e9   :  { %7371 = vmatmul.msk.f32.gmra.mxu2 %vm677_vm3, %v9172_v35 }
 0x2ec   :  { %v9278_v22 = vpop.f32.mrf.mxu2 }
 0x2ed   :  { %14696 = vst [vmem:[#allocation47_spill] sm:$0xff] %v9278_v22 }
 0x2f1   :  { %7372 = vmatmul.msk.f32.gmra.mxu2 %vm677_vm3, %v9181_v38 }
 0x2f4   :  { %v9287_v26 = vpop.f32.mrf.mxu2 }
 0x2f5   :  { %14697 = vst [vmem:[#allocation48_spill] sm:$0xff] %v9287_v26 }
 0x2f9   :  { %7373 = vmatmul.msk.f32.gmra.mxu2 %vm677_vm3, %v9192_v41 }
 0x2fc   :  { %v9302_v32 = vpop.f32.mrf.mxu2 }
 0x2fd   :  { %14698 = vst [vmem:[#allocation49_spill] sm:$0xff] %v9302_v32 }
 0x301   :  { %7374 = vmatmul.msk.f32.gmra.mxu2 %vm677_vm3, %v9203_v46 }
 0x304   :  { %v9313_v37 = vpop.f32.mrf.mxu2 }
 0x305   :  { %14699 = vst [vmem:[#allocation50_spill] sm:$0xff] %v9313_v37 }
 0x309   :  { %7375 = vmatmul.msk.f32.gmra.mxu2 %vm677_vm3, %v9214_v51 }
 0x30c   :  { %v9322_v40 = vpop.f32.mrf.mxu2 }
 0x30d   :  { %14700 = vst [vmem:[#allocation51_spill] sm:$0xff] %v9322_v40 }
 0x311   :  { %7376 = vmatmul.msk.f32.gmra.mxu2 %vm677_vm3, %v9225_v59 }
 0x314   :  { %v9333_v45 = vpop.f32.mrf.mxu2 }
 0x315   :  { %14701 = vst [vmem:[#allocation52_spill] sm:$0xff] %v9333_v45 }
 0x319   :  { %7377 = vmatmul.msk.f32.gmra.mxu2 %vm677_vm3, %v9234_v0 }
 0x31c   :  { %v9345_v54 = vpop.f32.mrf.mxu2 }
 0x31d   :  { %14702 = vst [vmem:[#allocation53_spill] sm:$0xff] %v9345_v54 }
 0x321   :  { %7418 = vmatmul.msk.f32.vlgmr.msra.gmra.mxu2 %vm1425_vm4, %v1369_v55  ;;  %v1372_v55 = vld [vmem:[%s14432_s9 + $0x18] sm:$0xff] }
 0x324   :  { %v9354_v62 = vpop.f32.mrf.mxu2 }
 0x325   :  { %14703 = vst [vmem:[#allocation54_spill] sm:$0xff] %v9354_v62 }
 0x329   :  { %7419 = vmatmul.msk.f32.gmra.mxu2 %vm1425_vm4, %v1370_v33  ;;  %v1373_v33 = vld [vmem:[%s14432_s9 + $0x20] sm:$0xff] }
 0x32c   :  { %v9365_v39 = vpop.f32.mrf.mxu2 }
 0x32d   :  { %14704 = vst [vmem:[#allocation55_spill] sm:$0xff] %v9365_v39 }
 0x331   :  { %7420 = vmatmul.msk.f32.gmra.mxu2 %vm1425_vm4, %v1371_v44  ;;  %v1374_v44 = vld [vmem:[%s14432_s9 + $0x28] sm:$0xff] }
 0x334   :  { %v9374_v50 = vpop.f32.mrf.mxu2 }
 0x335   :  { %14705 = vst [vmem:[#allocation56_spill] sm:$0xff] %v9374_v50 }
 0x339   :  { %7421 = vmatmul.msk.f32.gmra.mxu2 %vm1425_vm4, %v1372_v55  ;;  %v1375_v55 = vld [vmem:[%s14432_s9 + $0x30] sm:$0xff] }
 0x33c   :  { %v9380_v60 = vpop.f32.mrf.mxu2 }
 0x33d   :  { %14706 = vst [vmem:[#allocation57_spill] sm:$0xff] %v9380_v60 }
 0x341   :  { %7422 = vmatmul.msk.f32.gmra.mxu2 %vm1425_vm4, %v1373_v33  ;;  %v1376_v33 = vld [vmem:[%s14432_s9 + $0x38] sm:$0xff]  ;;  %s8614_s9 = smov 6  }
 0x344   :  { %v9386_v36 = vpop.f32.mrf.mxu2 }
 0x345   :  { %14707 = vst [vmem:[#allocation58_spill] sm:$0xff] %v9386_v36  ;;  %v7616_v36 = vpop.permute.xlu2 %7615 }
 0x346   :  { %v7617_v50 = vunpack.i.l.bf16 %v7616_v36  ;;  %v7618_v39 = vunpack.i.h.bf16 %v7616_v36 }
 0x348   :  { %1287 = vmatpush.msrb.mxu1 %v7617_v50 }
 0x349   :  { %7423 = vmatmul.msk.f32.gmra.mxu2 %vm1425_vm4, %v1374_v44 }
 0x34a   :  { %1288 = vmatpush.msrb.mxu1 %v7618_v39 }
 0x34c   :  { %v9392_v47 = vpop.f32.mrf.mxu2 }
 0x34d   :  { %14708 = vst [vmem:[#allocation59_spill] sm:$0xff] %v9392_v47 }
 0x351   :  { %7424 = vmatmul.msk.f32.gmra.mxu2 %vm1425_vm4, %v1375_v55 }
 0x354   :  { %v9398_v2 = vpop.f32.mrf.mxu2 }
 0x355   :  { %14709 = vst [vmem:[#allocation60_spill] sm:$0xff] %v9398_v2  ;;  %v7621_v2 = vpop.permute.xlu2 %7620 }
 0x356   :  { %v7623_v62 = vunpack.i.h.bf16 %v7621_v2 }
 0x359   :  { %7425 = vmatmul.msk.f32.gmra.mxu2 %vm1425_vm4, %v1376_v33 }
 0x35c   :  { %v9404_v56 = vpop.f32.mrf.mxu2 }
 0x35d   :  { %14710 = vst [vmem:[#allocation61_spill] sm:$0xff] %v9404_v56  ;;  %v1423_v33 = vpop.permute.xlu2 %1422 }
 0x364   :  { %v9406_v49 = vpop.f32.mrf.mxu2 }
 0x365   :  { %14711 = vst [vmem:[#allocation62_spill] sm:$0xff] %v9406_v49  ;;  %v7622_v49 = vunpack.i.l.bf16 %v7621_v2  ;;  %v7637_v54 = vpop.permute.xlu2 %7636 }
 0x366   :  { %v7638_v39 = vunpack.i.l.bf16 %v7637_v54 }
 0x367   :  { %1289 = vmatpush.msrb.mxu1 %v7622_v49 }
 0x369   :  { %1290 = vmatpush.msrb.mxu1 %v7623_v62 }
 0x36c   :  { %v9408_v44 = vpop.f32.mrf.mxu2 }
 0x36d   :  { %14712 = vst [vmem:[#allocation63_spill] sm:$0xff] %v9408_v44  ;;  %v1418_v40 = vpop.permute.xlu2 %1417 }
 0x374   :  { %v9410_v47 = vpop.f32.mrf.mxu2 }
 0x375   :  { %14713 = vst [vmem:[#allocation64_spill] sm:$0xff] %v9410_v47  ;;  %v7643_v62 = vpop.permute.xlu2 %7642 }
 0x376   :  { %v7644_v32 = vunpack.i.l.bf16 %v7643_v62 }
 0x37c   :  { %v9412_v43 = vpop.f32.mrf.mxu2 }
 0x37d   :  { %14714 = vst [vmem:[#allocation65_spill] sm:$0xff] %v9412_v43  ;;  %v7626_v43 = vpop.permute.xlu0 %7625 }
 0x37e   :  { %v7627_v44 = vunpack.i.l.bf16 %v7626_v43 }
 0x380   :  { %1291 = vmatpush.msrb.mxu1 %v7627_v44  ;;  %v7645_v44 = vunpack.i.h.bf16 %v7643_v62 }
 0x384   :  { %v9414_v55 = vpop.f32.mrf.mxu2 }
 0x385   :  { %14715 = vst [vmem:[#allocation66_spill] sm:$0xff] %v9414_v55  ;;  %v7628_v55 = vunpack.i.h.bf16 %v7626_v43  ;;  %v1413_v2 = vpop.permute.xlu0 %1412 }
 0x387   :  { %1292 = vmatpush.msrb.mxu1 %v7628_v55  ;;  %v1403_v55 = vpop.permute.xlu2 %1402 }
 0x38c   :  { %v9416_v60 = vpop.f32.mrf.mxu2 }
 0x38d   :  { %14716 = vst [vmem:[#allocation67_spill] sm:$0xff] %v9416_v60  ;;  %v7631_v60 = vpop.permute.xlu1 %7630  ;;  %v1398_v43 = vpop.permute.xlu0 %1397 }
 0x38e   :  { %v7632_v36 = vunpack.i.l.bf16 %v7631_v60  ;;  %v7633_v50 = vunpack.i.h.bf16 %v7631_v60 }
 0x390   :  { %1293 = vmatpush.msrb.mxu1 %v7632_v36 }
 0x392   :  { %1294 = vmatpush.msrb.mxu1 %v7633_v50 }
 0x394   :  { %v9418_v56 = vpop.f32.mrf.mxu2  ;;  %1295 = vmatpush.msrb.mxu1 %v7638_v39 }
 0x395   :  { %14717 = vst [vmem:[#allocation68_spill] sm:$0xff] %v9418_v56  ;;  %v7639_v56 = vunpack.i.h.bf16 %v7637_v54 }
 0x397   :  { %1296 = vmatpush.msrb.mxu1 %v7639_v56 }
 0x399   :  { %1297 = vmatpush.msrb.mxu1 %v7644_v32 }
 0x39b   :  { %1298 = vmatpush.msrb.mxu1 %v7645_v44 }
 0x39c   :  { %v9420_v47 = vpop.f32.mrf.mxu2 }
 0x39d   :  { %14718 = vst [vmem:[#allocation69_spill] sm:$0xff] %v9420_v47  ;;  %v1408_v47 = vpop.permute.xlu1 %1407 }
 0x3a4   :  { %v1467_v45 = vpop.f32.mrf.mxu2 }
 0x3a5   :  { %v7649_v50 = vpop.permute.xlu1 %7648 }
 0x3a6   :  { %v7650_v56 = vunpack.i.l.bf16 %v7649_v50  ;;  %v7651_v39 = vunpack.i.h.bf16 %v7649_v50 }
 0x3a8   :  { %1299 = vmatpush.msrb.mxu1 %v7650_v56  ;;  %v1592_v56 = vld [vmem:[%s14433_s18 + $0x68] sm:$0xff] }
 0x3aa   :  { %1300 = vmatpush.msrb.mxu1 %v7651_v39  ;;  %v1591_v39 = vld [vmem:[%s14433_s18 + $0x60] sm:$0xff] }
 0x3ac   :  { %v1470_v49 = vpop.f32.mrf.mxu2  ;;  %1301 = vmatpush.msrb.mxu1 %v9285_v25 }
 0x3ae   :  { %1302 = vmatpush.msrb.mxu1 %v9293_v29 }
 0x3b4   :  { %v1473_v37 = vpop.f32.mrf.mxu2 }
 0x3b5   :  { %v9422_v60 = vadd.f32 %v1473_v37, %v1398_v43 }
 0x3b7   :  { %14719 = vst [vmem:[#allocation70_spill] sm:$0xff] %v9422_v60 }
 0x3bc   :  { %v1476_v26 = vpop.f32.mrf.mxu2 }
 0x3bd   :  { %v9424_v36 = vadd.f32 %v1476_v26, %v1403_v55 }
 0x3bf   :  { %14720 = vst [vmem:[#allocation71_spill] sm:$0xff] %v9424_v36  ;;  %v7662_v54 = vpack.i.bf16 %v9422_v60, %v9424_v36 }
 0x3c1   :  { %7663 = vrot.lane.b32.xlu1 %v7662_v54, %s8604_s28 }
 0x3c4   :  { %v1479_v62 = vpop.f32.mrf.mxu2 }
 0x3c5   :  { %v9431_v37 = vadd.f32 %v1479_v62, %v1408_v47  ;;  %v1393_v47 = vpop.permute.xlu2 %1392  ;;  %v1589_v62 = vld [vmem:[%s14433_s18 + $0x50] sm:$0xff] }
 0x3c7   :  { %14721 = vst [vmem:[#allocation72_spill] sm:$0xff] %v9431_v37 }
 0x3cc   :  { %v1482_v32 = vpop.f32.mrf.mxu2 }
 0x3cd   :  { %v9433_v26 = vadd.f32 %v1482_v32, %v1413_v2  ;;  %v9451_v2 = vadd.f32 %v1470_v49, %v1393_v47  ;;  %v1585_v49 = vld [vmem:[%s14433_s18 + $0x30] sm:$0xff]  ;;  %v1594_v32 = vld [vmem:[%s14433_s18 + $0x78] sm:$0xff]  ;;  %v1588_v47 = vld [vmem:[%s14433_s18 + $0x48] sm:$0xff] }
 0x3cf   :  { %14722 = vst [vmem:[#allocation73_spill] sm:$0xff] %v9433_v26  ;;  %v7657_v44 = vpack.i.bf16 %v9431_v37, %v9433_v26 }
 0x3d0   :  { %14725 = vst [vmem:[#allocation76_spill] sm:$0xff] %v9451_v2 }
 0x3d1   :  { %7658 = vrot.lane.b32.xlu2 %v7657_v44, %s8604_s28  ;;  %v1584_v44 = vld [vmem:[%s14433_s18 + $0x28] sm:$0xff] }
 0x3d4   :  { %v1485_v43 = vpop.f32.mrf.mxu2 }
 0x3d5   :  { %v9438_v55 = vadd.f32 %v1485_v43, %v1418_v40  ;;  %v1388_v40 = vpop.permute.xlu1 %1387  ;;  %v1582_v43 = vld [vmem:[%s14433_s18 + $0x18] sm:$0xff] }
 0x3d6   :  { %v9453_v54 = vadd.f32 %v1467_v45, %v1388_v40  ;;  %v1593_v45 = vld [vmem:[%s14433_s18 + $0x70] sm:$0xff]  ;;  %v1580_v40 = vld [vmem:[%s14433_s18 + $0x8] sm:$0xff] }
 0x3d7   :  { %14723 = vst [vmem:[#allocation74_spill] sm:$0xff] %v9438_v55  ;;  %1535 = vrot.lane.b32.xlu1 %v9438_v55, %s8607_s29 }
 0x3d8   :  { %14726 = vst [vmem:[#allocation77_spill] sm:$0xff] %v9453_v54 }
 0x3dc   :  { %v1488_v50 = vpop.f32.mrf.mxu2 }
 0x3dd   :  { %v9442_v25 = vadd.f32 %v1488_v50, %v1423_v33  ;;  %v7667_v33 = vpack.i.bf16 %v9453_v54, %v9451_v2  ;;  %v1586_v50 = vld [vmem:[%s14433_s18 + $0x38] sm:$0xff] }
 0x3df   :  { %14724 = vst [vmem:[#allocation75_spill] sm:$0xff] %v9442_v25  ;;  %1537 = vrot.lane.b32.xlu2 %v9442_v25, %s8607_s29  ;;  %1529 = vrot.lane.b32.xlu1 %v9424_v36, %s8607_s29  ;;  %v7652_v29 = vpack.i.bf16 %v9438_v55, %v9442_v25 }
 0x3e1   :  { %7653 = vrot.lane.b32.xlu0 %v7652_v29, %s8604_s28  ;;  %v9495_v29 = vpop.f32.mrf.mxu3 }
 0x3e2   :  { %14727 = vst [vmem:[#allocation78_spill] sm:$0xff] %v9495_v29 }
 0x3e7   :  { %1531 = vrot.lane.b32.xlu2 %v9431_v37, %s8607_s29  ;;  %1523 = vrot.lane.b32.xlu1 %v9453_v54, %s8607_s29 }
 0x3e9   :  { %7668 = vrot.lane.b32.xlu0 %v7667_v33, %s8604_s28  ;;  %v1590_v33 = vld [vmem:[%s14433_s18 + $0x58] sm:$0xff] }
 0x3ef   :  { %1525 = vrot.lane.b32.xlu2 %v9451_v2, %s8607_s29  ;;  %1662 = vperm.xlu1 %7646, %v1592_v56   ;;  %v1581_v56 = vld [vmem:[%s14433_s18 + $0x10] sm:$0xff] }
 0x3f1   :  { %1533 = vrot.lane.b32.xlu0 %v9433_v26, %s8607_s29 }
 0x3f7   :  { %1667 = vperm.xlu2 %7634, %v1593_v45   ;;  %1627 = vperm.xlu1 %7646, %v1585_v49   ;;  %v9509_v45 = vpop.f32.mrf.mxu3  ;;  %v1583_v49 = vld [vmem:[%s14433_s18 + $0x20] sm:$0xff] }
 0x3f8   :  { %14728 = vst [vmem:[#allocation79_spill] sm:$0xff] %v9509_v45 }
 0x3f9   :  { %1527 = vrot.lane.b32.xlu0 %v9422_v60, %s8607_s29 }
 0x3ff   :  { %1657 = vperm.xlu2 %7634, %v1591_v39   ;;  %1647 = vperm.xlu1 %7646, %v1589_v62   ;;  %v1199_v39 = vld [vmem:[%s14434_s12] sm:$0xff] }
 0x400   :  { %1303 = vmatmul.f32.vlgmr.msrb.gmra.mxu1 %v1199_v39  ;;  %v1587_v62 = vld [vmem:[%s14433_s18 + $0x40] sm:$0xff] }
 0x401   :  { %1672 = vperm.xlu0 %7640, %v1594_v32   ;;  %v9520_v32 = vpop.f32.mrf.mxu3  ;;  %v1207_v39 = vld [vmem:[%s14434_s12 + $0xa0] sm:$0xff] }
 0x402   :  { %14729 = vst [vmem:[#allocation80_spill] sm:$0xff] %v9520_v32  ;;  %v1213_v32 = vld [vmem:[%s14434_s12 + $0x118] sm:$0xff] }
 0x407   :  { %1622 = vperm.xlu2 %7634, %v1584_v44   ;;  %1612 = vperm.xlu1 %7646, %v1582_v43   ;;  %v1201_v44 = vld [vmem:[%s14434_s12 + $0x28] sm:$0xff]  ;;  %v1579_v43 = vld [vmem:[%s14433_s18] sm:$0xff] }
 0x408   :  { %1306 = vmatmul.f32.gmra.mxu1 %v1201_v44 }
 0x409   :  { %1632 = vperm.xlu0 %7640, %v1586_v50   ;;  %v9528_v50 = vpop.f32.mrf.mxu3 }
 0x40a   :  { %14730 = vst [vmem:[#allocation81_spill] sm:$0xff] %v9528_v50 }
 0x40f   :  { %1642 = vperm.xlu2 %7634, %v1588_v47   ;;  %1602 = vperm.xlu1 %7646, %v1580_v40   ;;  %v1203_v47 = vld [vmem:[%s14434_s12 + $0x50] sm:$0xff] }
 0x410   :  { %1309 = vmatmul.f32.gmra.mxu1 %v1203_v47 }
 0x411   :  { %1652 = vperm.xlu0 %7640, %v1590_v33   ;;  %v1205_v33 = vld [vmem:[%s14434_s12 + $0x78] sm:$0xff] }
 0x417   :  { %1607 = vperm.xlu2 %7634, %v1581_v56   ;;  %v9536_v56 = vpop.f32.mrf.mxu3  ;;  %7678 = vrot.lane.b32.xlu1 %v9300_v30, %s8608_s3 }
 0x418   :  { %14731 = vst [vmem:[#allocation82_spill] sm:$0xff] %v9536_v56  ;;  %1312 = vmatmul.f32.gmra.mxu1 %v1205_v33  ;;  %v1211_v56 = vld [vmem:[%s14434_s12 + $0xf0] sm:$0xff] }
 0x419   :  { %1617 = vperm.xlu0 %7640, %v1583_v49  }
 0x41f   :  { %7673 = vrot.lane.b32.xlu2 %v9300_v30, %s8610_s22  ;;  %s8616_s22 = smov 10  }
 0x420   :  { %1315 = vmatmul.f32.gmra.mxu1 %v1207_v39 }
 0x421   :  { %1637 = vperm.xlu0 %7640, %v1587_v62   ;;  %v9544_v62 = vpop.f32.mrf.mxu3 }
 0x422   :  { %14732 = vst [vmem:[#allocation83_spill] sm:$0xff] %v9544_v62 }
 0x427   :  { %7688 = vrot.lane.b32.xlu2 %v9300_v30, %s14587_s1 }
 0x429   :  { %1597 = vperm.xlu0 %7640, %v1579_v43   ;;  %v1209_v43 = vld [vmem:[%s14434_s12 + $0xc8] sm:$0xff]  ;;  %v9549_v47 = vpop.f32.mrf.mxu3 }
 0x42a   :  { %1318 = vmatmul.f32.gmra.mxu1 %v1209_v43  ;;  %14733 = vst [vmem:[#allocation84_spill] sm:$0xff] %v9549_v47 }
 0x42b   :  { %v7659_v40 = vpop.permute.xlu2 %7658 }
 0x42c   :  { %v7660_v47 = vunpack.i.l.bf16 %v7659_v40  ;;  %v7661_v45 = vunpack.i.h.bf16 %v7659_v40 }
 0x431   :  { %v9557_v39 = vpop.f32.mrf.mxu3  ;;  %7683 = vrot.lane.b32.xlu0 %v9300_v30, %s8609_s5 }
 0x432   :  { %1321 = vmatmul.f32.gmra.mxu1 %v1211_v56  ;;  %14734 = vst [vmem:[#allocation85_spill] sm:$0xff] %v9557_v39 }
 0x433   :  { %v7664_v44 = vpop.permute.xlu1 %7663 }
 0x434   :  { %v7665_v56 = vunpack.i.l.bf16 %v7664_v44  ;;  %v7666_v39 = vunpack.i.h.bf16 %v7664_v44  ;;  %v1547_v44 = vld [vmem:[%s14435_s10] sm:$0xff] }
 0x439   :  { %v9538_v49 = vpop.permute.xlu2 %1537  ;;  %v9562_v22 = vpop.f32.mrf.mxu3 }
 0x43a   :  { %1796 = vmatpush.msra.mxu1 %v9538_v49  ;;  %14735 = vst [vmem:[#allocation86_spill] sm:$0xff] %v9562_v22 }
 0x43b   :  { %1324 = vmatmul.f32.gmra.mxu1 %v1213_v32 }
 0x441   :  { %v9564_v17 = vpop.permute.xlu2 %1531  ;;  %v9571_v40 = vpop.f32.mrf.mxu3 }
 0x442   :  { %14736 = vst [vmem:[#allocation87_spill] sm:$0xff] %v9571_v40 }
 0x449   :  { %v9551_v33 = vpop.permute.xlu1 %1535 }
 0x44a   :  { %1797 = vmatpush.msra.mxu1 %v9551_v33 }
 0x453   :  { %v7654_v62 = vpop.permute.xlu0 %7653 }
 0x454   :  { %v7655_v50 = vunpack.i.l.bf16 %v7654_v62  ;;  %v7656_v43 = vunpack.i.h.bf16 %v7654_v62  ;;  %v9591_v62 = vpop.f32.mrf.mxu3 }
 0x455   :  { %14737 = vst [vmem:[#allocation88_spill] sm:$0xff] %v9591_v62 }
 0x456   :  { %1723 = vmatpush.msrb.mxu3 %v7655_v50  ;;  %v9569_v50 = vpop.permute.xlu1 %1529 }
 0x458   :  { %1724 = vmatpush.msrb.mxu3 %v7656_v43  ;;  %v1549_v43 = vld [vmem:[%s14435_s10 + $0x10] sm:$0xff] }
 0x45a   :  { %1725 = vmatpush.msrb.mxu3 %v7660_v47  ;;  %v1550_v47 = vld [vmem:[%s14435_s10 + $0x18] sm:$0xff] }
 0x45b   :  { %v7669_v29 = vpop.permute.xlu0 %7668 }
 0x45c   :  { %1726 = vmatpush.msrb.mxu3 %v7661_v45  ;;  %v7670_v21 = vunpack.i.l.bf16 %v7669_v29  ;;  %v7671_v18 = vunpack.i.h.bf16 %v7669_v29  ;;  %v1548_v29 = vld [vmem:[%s14435_s10 + $0x8] sm:$0xff] }
 0x45e   :  { %1727 = vmatpush.msrb.mxu3 %v7665_v56  ;;  %v9589_v45 = vpop.permute.xlu1 %1523  ;;  %v1552_v56 = vld [vmem:[%s14435_s10 + $0x28] sm:$0xff] }
 0x460   :  { %1728 = vmatpush.msrb.mxu3 %v7666_v39  ;;  %v9605_v39 = vpop.f32.mrf.mxu3 }
 0x461   :  { %14738 = vst [vmem:[#allocation89_spill] sm:$0xff] %v9605_v39 }
 0x462   :  { %1729 = vmatpush.msrb.mxu3 %v7670_v21 }
 0x463   :  { %v9566_v32 = vpop.permute.xlu0 %1533 }
 0x464   :  { %1730 = vmatpush.msrb.mxu3 %v7671_v18  ;;  %1798 = vmatpush.msra.mxu1 %v9566_v32  ;;  %v9582_v18 = vpop.permute.xlu2 %1525 }
 0x466   :  { %1731 = vmatpush.msrb.mxu3 %v9442_v25  ;;  %1799 = vmatpush.msra.mxu1 %v9564_v17  ;;  %v1663_v46 = vpop.permute.xlu1 %1662 }
 0x468   :  { %1732 = vmatpush.msrb.mxu3 %v9438_v55  ;;  %1800 = vmatpush.msra.mxu1 %v9569_v50  ;;  %v1567_v55 = vld [vmem:[%s14435_s10 + $0xa0] sm:$0xff] }
 0x46a   :  { %1733 = vmatpush.msrb.mxu3 %v9433_v26  ;;  %v1566_v26 = vld [vmem:[%s14435_s10 + $0x98] sm:$0xff] }
 0x46b   :  { %v9578_v21 = vpop.permute.xlu0 %1527 }
 0x46c   :  { %1734 = vmatpush.msrb.mxu3 %v9431_v37  ;;  %1801 = vmatpush.msra.mxu1 %v9578_v21  ;;  %v1564_v37 = vld [vmem:[%s14435_s10 + $0x88] sm:$0xff]  ;;  %v1668_v59 = vpop.permute.xlu2 %1667 }
 0x46e   :  { %1735 = vmatpush.msrb.mxu3 %v9424_v36  ;;  %1802 = vmatpush.msra.mxu1 %v9582_v18  ;;  %v1559_v36 = vld [vmem:[%s14435_s10 + $0x60] sm:$0xff]  ;;  %v1628_v23 = vpop.permute.xlu1 %1627 }
 0x470   :  { %1736 = vmatpush.msrb.mxu3 %v9422_v60  ;;  %1803 = vmatpush.msra.mxu1 %v9589_v45 }
 0x471   :  { %7426 = vmatmul.msk.f32.vlgmr.msra.gmra.mxu1 %vm677_vm3, %v1548_v29  ;;  %v1551_v29 = vld [vmem:[%s14435_s10 + $0x20] sm:$0xff] }
 0x472   :  { %1737 = vmatpush.msrb.mxu3 %v9451_v2 }
 0x473   :  { %v9776_v6 = vpop.permute.xlu0 %1672 }
 0x474   :  { %1738 = vmatpush.msrb.mxu3 %v9453_v54  ;;  %v1658_v35 = vpop.permute.xlu2 %1657 }
 0x475   :  { %1739 = vmatmul.f32.vlgmr.msrb.gmra.mxu3 %v1547_v44  ;;  %v9617_v44 = vpop.f32.mrf.mxu3 }
 0x476   :  { %14739 = vst [vmem:[#allocation90_spill] sm:$0xff] %v9617_v44  ;;  %v1648_v42 = vpop.permute.xlu1 %1647 }
 0x479   :  { %7427 = vmatmul.msk.f32.gmra.mxu1 %vm677_vm3, %v1550_v47  ;;  %v1554_v47 = vld [vmem:[%s14435_s10 + $0x38] sm:$0xff] }
 0x47b   :  { %v9781_v51 = vpop.permute.xlu0 %1632 }
 0x47c   :  { %v1623_v3 = vpop.permute.xlu2 %1622 }
 0x47d   :  { %1742 = vmatmul.f32.gmra.mxu3 %v1549_v43  ;;  %v1553_v43 = vld [vmem:[%s14435_s10 + $0x30] sm:$0xff]  ;;  %v9626_v54 = vpop.f32.mrf.mxu3  ;;  %v9647_v60 = vpop.f32.mrf.mxu1 }
 0x47e   :  { %14740 = vst [vmem:[#allocation91_spill] sm:$0xff] %v9626_v54 }
 0x47f   :  { %14742 = vst [vmem:[#allocation93_spill] sm:$0xff] %v9647_v60  ;;  %v1561_v60 = vld [vmem:[%s14435_s10 + $0x70] sm:$0xff] }
 0x481   :  { %7428 = vmatmul.msk.f32.gmra.mxu1 %vm677_vm3, %v1552_v56  ;;  %v1556_v56 = vld [vmem:[%s14435_s10 + $0x48] sm:$0xff] }
 0x483   :  { %v1653_v31 = vpop.permute.xlu0 %1652 }
 0x485   :  { %1745 = vmatmul.f32.gmra.mxu3 %v1551_v29  ;;  %v1555_v29 = vld [vmem:[%s14435_s10 + $0x40] sm:$0xff]  ;;  %v9638_v2 = vpop.f32.mrf.mxu3 }
 0x486   :  { %14741 = vst [vmem:[#allocation92_spill] sm:$0xff] %v9638_v2 }
 0x489   :  { %7429 = vmatmul.msk.f32.gmra.mxu1 %vm677_vm3, %v1554_v47  ;;  %v1558_v47 = vld [vmem:[%s14435_s10 + $0x58] sm:$0xff] }
 0x48b   :  { %v1618_v58 = vpop.permute.xlu0 %1617 }
 0x48d   :  { %1748 = vmatmul.f32.gmra.mxu3 %v1553_v43  ;;  %v1557_v43 = vld [vmem:[%s14435_s10 + $0x50] sm:$0xff] }
 0x491   :  { %7430 = vmatmul.msk.f32.gmra.mxu1 %vm677_vm3, %v1556_v56  ;;  %v1560_v56 = vld [vmem:[%s14435_s10 + $0x68] sm:$0xff] }
 0x493   :  { %v1638_v4 = vpop.permute.xlu0 %1637 }
 0x495   :  { %1751 = vmatmul.f32.gmra.mxu3 %v1555_v29  ;;  %v9650_v29 = vpop.f32.mrf.mxu3 }
 0x496   :  { %14743 = vst [vmem:[#allocation94_spill] sm:$0xff] %v9650_v29 }
 0x499   :  { %7431 = vmatmul.msk.f32.gmra.mxu1 %vm677_vm3, %v1558_v47  ;;  %v1562_v47 = vld [vmem:[%s14435_s10 + $0x78] sm:$0xff] }
 0x49d   :  { %1754 = vmatmul.f32.gmra.mxu3 %v1557_v43  ;;  %v9658_v43 = vpop.f32.mrf.mxu1 }
 0x49e   :  { %14744 = vst [vmem:[#allocation95_spill] sm:$0xff] %v9658_v43 }
 0x4a1   :  { %7432 = vmatmul.msk.f32.gmra.mxu1 %vm677_vm3, %v1560_v56  ;;  %v9664_v56 = vpop.f32.mrf.mxu3 }
 0x4a2   :  { %14745 = vst [vmem:[#allocation96_spill] sm:$0xff] %v9664_v56 }
 0x4a5   :  { %1757 = vmatmul.f32.gmra.mxu3 %v1559_v36  ;;  %v1563_v36 = vld [vmem:[%s14435_s10 + $0x80] sm:$0xff]  ;;  %v9673_v43 = vpop.f32.mrf.mxu1 }
 0x4a6   :  { %14746 = vst [vmem:[#allocation97_spill] sm:$0xff] %v9673_v43  ;;  %v1568_v43 = vld [vmem:[%s14435_s10 + $0xa8] sm:$0xff] }
 0x4a9   :  { %7433 = vmatmul.msk.f32.gmra.mxu1 %vm677_vm3, %v1562_v47  ;;  %v9675_v47 = vpop.f32.mrf.mxu3 }
 0x4aa   :  { %14747 = vst [vmem:[#allocation98_spill] sm:$0xff] %v9675_v47 }
 0x4ad   :  { %1760 = vmatmul.f32.gmra.mxu3 %v1561_v60  ;;  %v1565_v60 = vld [vmem:[%s14435_s10 + $0x90] sm:$0xff] }
 0x4b1   :  { %7434 = vmatmul.msk.f32.gmra.mxu1 %vm677_vm3, %v1564_v37  ;;  %v9684_v37 = vpop.f32.mrf.mxu1 }
 0x4b2   :  { %14748 = vst [vmem:[#allocation99_spill] sm:$0xff] %v9684_v37  ;;  %v1569_v37 = vld [vmem:[%s14435_s10 + $0xb0] sm:$0xff] }
 0x4b5   :  { %1763 = vmatmul.f32.gmra.mxu3 %v1563_v36  ;;  %v9689_v36 = vpop.f32.mrf.mxu3 }
 0x4b6   :  { %14749 = vst [vmem:[#allocation100_spill] sm:$0xff] %v9689_v36 }
 0x4b9   :  { %7435 = vmatmul.msk.f32.gmra.mxu1 %vm677_vm3, %v1566_v26  ;;  %v1570_v26 = vld [vmem:[%s14435_s10 + $0xb8] sm:$0xff]  ;;  %v9698_v25 = vpop.f32.mrf.mxu1 }
 0x4ba   :  { %14750 = vst [vmem:[#allocation101_spill] sm:$0xff] %v9698_v25  ;;  %v1571_v25 = vld [vmem:[%s14435_s10 + $0xc0] sm:$0xff] }
 0x4bd   :  { %1766 = vmatmul.f32.gmra.mxu3 %v1565_v60  ;;  %v9700_v60 = vpop.f32.mrf.mxu3 }
 0x4be   :  { %14751 = vst [vmem:[#allocation102_spill] sm:$0xff] %v9700_v60 }
 0x4c1   :  { %7436 = vmatmul.msk.f32.gmra.mxu1 %vm677_vm3, %v1568_v43  ;;  %v1572_v43 = vld [vmem:[%s14435_s10 + $0xc8] sm:$0xff] }
 0x4c5   :  { %1769 = vmatmul.f32.gmra.mxu3 %v1567_v55  ;;  %v9709_v55 = vpop.f32.mrf.mxu1  ;;  %v9712_v36 = vpop.f32.mrf.mxu3 }
 0x4c6   :  { %14752 = vst [vmem:[#allocation103_spill] sm:$0xff] %v9709_v55 }
 0x4c7   :  { %14753 = vst [vmem:[#allocation104_spill] sm:$0xff] %v9712_v36  ;;  %v1576_v36 = vld [vmem:[%s14435_s10 + $0xe8] sm:$0xff] }
 0x4c9   :  { %7437 = vmatmul.msk.f32.gmra.mxu1 %vm677_vm3, %v1570_v26  ;;  %v1574_v26 = vld [vmem:[%s14435_s10 + $0xd8] sm:$0xff] }
 0x4cd   :  { %1772 = vmatmul.f32.gmra.mxu3 %v1569_v37  ;;  %v1573_v37 = vld [vmem:[%s14435_s10 + $0xd0] sm:$0xff]  ;;  %v9724_v55 = vpop.f32.mrf.mxu1 }
 0x4ce   :  { %14754 = vst [vmem:[#allocation105_spill] sm:$0xff] %v9724_v55  ;;  %v1578_v55 = vld [vmem:[%s14435_s10 + $0xf8] sm:$0xff] }
 0x4d1   :  { %7438 = vmatmul.msk.f32.gmra.mxu1 %vm677_vm3, %v1572_v43  ;;  %v9726_v43 = vpop.f32.mrf.mxu3 }
 0x4d2   :  { %14755 = vst [vmem:[#allocation106_spill] sm:$0xff] %v9726_v43 }
 0x4d5   :  { %1775 = vmatmul.f32.gmra.mxu3 %v1571_v25  ;;  %v1575_v25 = vld [vmem:[%s14435_s10 + $0xe0] sm:$0xff] }
 0x4d9   :  { %7439 = vmatmul.msk.f32.gmra.mxu1 %vm677_vm3, %v1574_v26  ;;  %v9735_v26 = vpop.f32.mrf.mxu1  ;;  %v9737_v60 = vpop.f32.mrf.mxu3 }
 0x4da   :  { %14756 = vst [vmem:[#allocation107_spill] sm:$0xff] %v9735_v26 }
 0x4db   :  { %14757 = vst [vmem:[#allocation108_spill] sm:$0xff] %v9737_v60 }
 0x4dd   :  { %1778 = vmatmul.f32.gmra.mxu3 %v1573_v37  ;;  %v1577_v37 = vld [vmem:[%s14435_s10 + $0xf0] sm:$0xff] }
 0x4e1   :  { %7440 = vmatmul.msk.f32.gmra.mxu1 %vm677_vm3, %v1576_v36  ;;  %v9748_v43 = vpop.f32.mrf.mxu3 }
 0x4e2   :  { %14758 = vst [vmem:[#allocation109_spill] sm:$0xff] %v9748_v43 }
 0x4e5   :  { %1781 = vmatmul.f32.gmra.mxu3 %v1575_v25 }
 0x4e9   :  { %7441 = vmatmul.msk.f32.gmra.mxu1 %vm677_vm3, %v1578_v55 }
 0x4ed   :  { %1784 = vmatmul.f32.gmra.mxu3 %v1577_v37 }
 0x4ee   :  { %v9746_v36 = vpop.f32.mrf.mxu1 }
 0x4f6   :  { %v9750_v47 = vpop.f32.mrf.mxu1 }
 0x4f8   :  { %v9752_v25 = vpop.f32.mrf.mxu3 }
 0x4fe   :  { %v9754_v26 = vpop.f32.mrf.mxu1 }
 0x500   :  { %v9756_v60 = vpop.f32.mrf.mxu3 }
 0x506   :  { %v9758_v56 = vpop.f32.mrf.mxu1 }
 0x508   :  { %v9760_v55 = vpop.f32.mrf.mxu3 }
 0x50e   :  { %v1817_v29 = vpop.f32.mrf.mxu1 }
 0x510   :  { %v9762_v2 = vpop.f32.mrf.mxu3 }
 0x516   :  { %v1820_v37 = vpop.f32.mrf.mxu1 }
 0x518   :  { %v1752_v54 = vpop.f32.mrf.mxu3 }
 0x519   :  { %v1753_v48 = vadd.f32 %v1752_v54, %v1618_v58 }
 0x51b   :  { %v1818_v20 = vadd.f32 %v1817_v29, %v1753_v48 }
 0x51e   :  { %v9764_v44 = vpop.f32.mrf.mxu1 }
 0x520   :  { %v1755_v43 = vpop.f32.mrf.mxu3 }
 0x521   :  { %v1756_v34 = vadd.f32 %v1755_v43, %v1623_v3  ;;  %v1613_v3 = vpop.permute.xlu1 %1612 }
 0x526   :  { %v9766_v39 = vpop.f32.mrf.mxu1 }
 0x528   :  { %v9768_v62 = vpop.f32.mrf.mxu3 }
 0x529   :  { %v1603_v43 = vpop.permute.xlu1 %1602 }
 0x52e   :  { %v9770_v40 = vpop.f32.mrf.mxu1 }
 0x530   :  { %v9772_v22 = vpop.f32.mrf.mxu3 }
 0x536   :  { %v1832_v14 = vpop.f32.mrf.mxu1 }
 0x538   :  { %v1764_v13 = vpop.f32.mrf.mxu3 }
 0x539   :  { %v1765_v58 = vadd.f32 %v1764_v13, %v1638_v4 }
 0x53b   :  { %v1830_v54 = vadd.f32 %v9770_v40, %v1765_v58 }
 0x53d   :  { %v1861_v13 = vmul.f32 0.5, %v1830_v54 }
 0x53e   :  { %v9774_v10 = vpop.f32.mrf.mxu1 }
 0x540   :  { %v1767_v9 = vpop.f32.mrf.mxu3 }
 0x546   :  { %v1838_v0 = vpop.f32.mrf.mxu1 }
 0x548   :  { %v1770_v5 = vpop.f32.mrf.mxu3 }
 0x54e   :  { %v1841_v38 = vpop.f32.mrf.mxu1 }
 0x550   :  { %v1773_v41 = vpop.f32.mrf.mxu3 }
 0x551   :  { %v1774_v8 = vadd.f32 %v1773_v41, %v1653_v31 }
 0x556   :  { %v1844_v11 = vpop.f32.mrf.mxu1 }
 0x558   :  { %v1776_v27 = vpop.f32.mrf.mxu3 }
 0x559   :  { %v1777_v19 = vadd.f32 %v1776_v27, %v1658_v35 }
 0x55b   :  { %v1842_v15 = vadd.f32 %v1841_v38, %v1777_v19  ;;  %v1821_v19 = vadd.f32 %v1820_v37, %v1756_v34  ;;  %v1744_v37 = vadd.f32 %v9756_v60, %v1603_v43 }
 0x55d   :  { %v1865_v7 = vmul.f32 0.5, %v1842_v15  ;;  %v1643_v15 = vpop.permute.xlu2 %1642 }
 0x55e   :  { %v1847_v16 = vpop.f32.mrf.mxu1  ;;  %v1768_v38 = vadd.f32 %v1767_v9, %v1643_v15 }
 0x55f   :  { %8500 = vtanh.f32 %v1865_v7 }
 0x560   :  { %v1779_v63 = vpop.f32.mrf.mxu3 }
 0x561   :  { %v1780_v52 = vadd.f32 %v1779_v63, %v1663_v46 }
 0x563   :  { %v1845_v28 = vadd.f32 %v1844_v11, %v1780_v52  ;;  %v1833_v52 = vadd.f32 %v1832_v14, %v1768_v38  ;;  %v1839_v11 = vadd.f32 %v1838_v0, %v1774_v8  ;;  %v1762_v0 = vadd.f32 %v9772_v22, %v9781_v51 }
 0x565   :  { %v1866_v24 = vmul.f32 0.5, %v1845_v28  ;;  %v8501_v27 = vpop.eup %8500  ;;  %v1771_v28 = vadd.f32 %v1770_v5, %v1648_v42  ;;  %v1862_v41 = vmul.f32 0.5, %v1833_v52  ;;  %v1827_v22 = vadd.f32 %v9766_v39, %v1762_v0 }
 0x566   :  { %v1881_v30 = vadd.f32 1.0, %v8501_v27  ;;  %v1750_v27 = vadd.f32 %v9762_v2, %v1613_v3 }
 0x567   :  { %8502 = vtanh.f32 %v1866_v24  ;;  %v1836_v29 = vadd.f32 %v9774_v10, %v1771_v28 }
 0x568   :  { %v1782_v35 = vpop.f32.mrf.mxu3  ;;  %8504 = vtanh.f32 %v1818_v20  ;;  %v1889_v46 = vmul.f32 0.5, %v1881_v30  ;;  %v1850_v20 = vpop.f32.mrf.mxu1 }
 0x569   :  { %v1783_v12 = vadd.f32 %v1782_v35, %v1668_v59  ;;  %8506 = vtanh.f32 %v1821_v19  ;;  %v1863_v10 = vmul.f32 0.5, %v1836_v29  ;;  %v1608_v19 = vpop.permute.xlu2 %1607 }
 0x56a   :  { %v1747_v38 = vadd.f32 %v9760_v55, %v1608_v19  ;;  %v14760_v19 = vld [vmem:[#allocation6_spill] sm:$0xff] }
 0x56b   :  { %v1848_v63 = vadd.f32 %v1847_v16, %v1783_v12  ;;  %v1759_v12 = vadd.f32 %v9768_v62, %v1628_v23  ;;  %v1864_v16 = vmul.f32 0.5, %v1839_v11 }
 0x56c   :  { %v1812_v3 = vadd.f32 %v9754_v26, %v1747_v38 }
 0x56d   :  { %v8503_v7 = vpop.eup %8502  ;;  %v1867_v48 = vmul.f32 0.5, %v1848_v63  ;;  %v1824_v23 = vadd.f32 %v9764_v44, %v1759_v12  ;;  %v1815_v63 = vadd.f32 %v9758_v56, %v1750_v27 }
 0x56e   :  { %v1882_v34 = vadd.f32 1.0, %v8503_v7  ;;  %v8505_v24 = vpop.eup %8504 }
 0x56f   :  { %v8507_v31 = vpop.eup %8506  ;;  %8508 = vtanh.f32 %v1867_v48  ;;  %v9790_v42 = vmul.f32 %v8505_v24, %v1889_v46 }
 0x570   :  { %v1890_v9 = vmul.f32 0.5, %v1882_v34  ;;  %v1785_v59 = vpop.f32.mrf.mxu3  ;;  %8510 = vtanh.f32 %v1862_v41 }
 0x571   :  { %v1786_v4 = vadd.f32 %v1785_v59, %v9776_v6  ;;  %v1598_v6 = vpop.permute.xlu0 %1597  ;;  %8512 = vtanh.f32 %v1864_v16 }
 0x572   :  { %v9792_v8 = vmul.f32 %v8507_v31, %v1890_v9  ;;  %v1741_v51 = vadd.f32 %v9752_v25, %v1598_v6  ;;  %v1809_v25 = vadd.f32 %v9750_v47, %v1744_v37 }
 0x573   :  { %v1851_v5 = vadd.f32 %v1850_v20, %v1786_v4 }
 0x574   :  { %v9798_v14 = vpack.i.bf16 %v9790_v42, %v9792_v8  ;;  %v1806_v35 = vadd.f32 %v9746_v36, %v1741_v51  ;;  %v9844_v16 = vadd.f32 %v9792_v8, %v9566_v32 }
 0x575   :  { %v1868_v40 = vmul.f32 0.5, %v1851_v5  ;;  %v8509_v62 = vpop.eup %8508 }
 0x576   :  { %7693 = vrot.lane.b32.xlu0 %v9798_v14, %s14585_s30  ;;  %v1883_v44 = vadd.f32 1.0, %v8509_v62  ;;  %v8511_v15 = vpop.eup %8510 }
 0x577   :  { %8514 = vtanh.f32 %v1868_v40  ;;  %v8513_v30 = vpop.eup %8512  ;;  %v1878_v36 = vadd.f32 1.0, %v8511_v15 }
 0x578   :  { %8516 = vtanh.f32 %v1861_v13  ;;  %v1891_v58 = vmul.f32 0.5, %v1883_v44  ;;  %v1880_v52 = vadd.f32 1.0, %v8513_v30  ;;  %v7679_v44 = vpop.permute.xlu1 %7678 }
 0x579   :  { %8518 = vtanh.f32 %v1863_v10  ;;  %v1886_v34 = vmul.f32 0.5, %v1878_v36  ;;  %v9853_v10 = vadd.f32 %v9790_v42, %v9564_v17  ;;  %v7681_v15 = vunpack.i.h.bf16 %v7679_v44  ;;  %v7684_v38 = vpop.permute.xlu0 %7683  ;;  %v1202_v36 = vld [vmem:[%s14434_s12 + $0x30] sm:$0xff] }
 0x57a   :  { %8520 = vtanh.f32 %v1824_v23  ;;  %v1888_v24 = vmul.f32 0.5, %v1880_v52  ;;  %v7686_v30 = vunpack.i.h.bf16 %v7684_v38  ;;  %v2819_v52 = vld [vmem:[%s14436_s20 + $0x30] sm:$0xff] }
 0x57b   :  { %8522 = vtanh.f32 %v1827_v22  ;;  %v7674_v22 = vpop.permute.xlu2 %7673 }
 0x57c   :  { %8524 = vtanh.f32 %v1806_v35  ;;  %v7675_v37 = vunpack.i.l.bf16 %v7674_v22  ;;  %v7676_v27 = vunpack.i.h.bf16 %v7674_v22  ;;  %v7680_v35 = vunpack.i.l.bf16 %v7679_v44  ;;  %v14767_v22 = vld [vmem:[#allocation13_spill] sm:$0xff] }
 0x57d   :  { %v8515_v39 = vpop.eup %8514  ;;  %8526 = vtanh.f32 %v1809_v25  ;;  %v7685_v25 = vunpack.i.l.bf16 %v7684_v38  ;;  %v2814_v38 = vld [vmem:[%s14436_s20 + $0x8] sm:$0xff] }
 0x57e   :  { %v8517_v60 = vpop.eup %8516  ;;  %v1884_v7 = vadd.f32 1.0, %v8515_v39  ;;  %7708 = vrot.lane.b32.xlu0 %v9798_v14, %s8604_s28  ;;  %8528 = vtanh.f32 %v1815_v63  ;;  %1336 = vmatpush.msra.mxu0 %v7675_v37  ;;  %v14761_v39 = vld [vmem:[#allocation7_spill] sm:$0xff] }
 0x57f   :  { %v8519_v2 = vpop.eup %8518  ;;  %v1877_v47 = vadd.f32 1.0, %v8517_v60  ;;  %8530 = vtanh.f32 %v1812_v3  ;;  %v14763_v3 = vld [vmem:[#allocation9_spill] sm:$0xff] }
 0x580   :  { %v8521_v55 = vpop.eup %8520  ;;  %v1892_v28 = vmul.f32 0.5, %v1884_v7  ;;  %v1879_v11 = vadd.f32 1.0, %v8519_v2  ;;  %1337 = vmatpush.msra.mxu0 %v7676_v27  ;;  %v14762_v7 = vld [vmem:[#allocation8_spill] sm:$0xff]  ;;  %v1200_v2 = vld [vmem:[%s14434_s12 + $0x8] sm:$0xff] }
 0x581   :  { %v8523_v48 = vpop.eup %8522  ;;  %v9814_v56 = vmul.f32 %v8521_v55, %v1891_v58  ;;  %v1885_v20 = vmul.f32 0.5, %v1877_v47  ;;  %v14764_v55 = vld [vmem:[#allocation10_spill] sm:$0xff]  ;;  %v14765_v47 = vld [vmem:[#allocation11_spill] sm:$0xff] }
 0x582   :  { %v9816_v46 = vmul.f32 %v8523_v48, %v1892_v28  ;;  %v8525_v9 = vpop.eup %8524  ;;  %v1887_v31 = vmul.f32 0.5, %v1879_v11  ;;  %1338 = vmatpush.msra.mxu0 %v7680_v35  ;;  %v1204_v28 = vld [vmem:[%s14434_s12 + $0x58] sm:$0xff] }
 0x583   :  { %v8527_v59 = vpop.eup %8526  ;;  %v9831_v41 = vadd.f32 %v9814_v56, %v9551_v33  ;;  %v9846_v5 = vmul.f32 %v8525_v9, %v1885_v20  ;;  %v7689_v63 = vpop.permute.xlu2 %7688  ;;  %v2816_v48 = vld [vmem:[%s14436_s20 + $0x18] sm:$0xff]  ;;  %v2818_v9 = vld [vmem:[%s14436_s20 + $0x28] sm:$0xff]  ;;  %v14766_v20 = vld [vmem:[#allocation12_spill] sm:$0xff] }
 0x584   :  { %v9820_v54 = vadd.f32 %v9816_v46, %v9538_v49  ;;  %v9824_v26 = vpack.i.bf16 %v9814_v56, %v9816_v46  ;;  %v8529_v29 = vpop.eup %8528  ;;  %v9837_v4 = vmul.f32 %v8527_v59, %v1886_v34  ;;  %1339 = vmatpush.msra.mxu0 %v7681_v15  ;;  %v7690_v60 = vunpack.i.l.bf16 %v7689_v63  ;;  %v2820_v59 = vld [vmem:[%s14436_s20 + $0x38] sm:$0xff]  ;;  %v1210_v15 = vld [vmem:[%s14434_s12 + $0xd0] sm:$0xff] }
 0x585   :  { %v9839_v12 = vmul.f32 %v8529_v29, %v1888_v24  ;;  %v8531_v0 = vpop.eup %8530  ;;  %v9887_v51 = vadd.f32 %v9846_v5, %v9589_v45  ;;  %v7691_v58 = vunpack.i.h.bf16 %v7689_v63  ;;  %v1206_v24 = vld [vmem:[%s14434_s12 + $0x80] sm:$0xff] }
 0x586   :  { %2442 = vmatpush.msrb.mxu1 %v9820_v54  ;;  %7713 = vrot.lane.b32.xlu2 %v9824_v26, %s8604_s28  ;;  %v9848_v13 = vmul.f32 %v8531_v0, %v1887_v31  ;;  %v9862_v6 = vpack.i.bf16 %v9846_v5, %v9837_v4  ;;  %v9882_v43 = vadd.f32 %v9837_v4, %v9582_v18  ;;  %v1208_v0 = vld [vmem:[%s14434_s12 + $0xa8] sm:$0xff] }
 0x587   :  { %7698 = vrot.lane.b32.xlu1 %v9824_v26, %s14585_s30  ;;  %7738 = vrot.lane.b32.xlu0 %v9824_v26, %s8607_s29  ;;  %v9858_v40 = vadd.f32 %v9839_v12, %v9569_v50 }
 0x588   :  { %2443 = vmatpush.msrb.mxu1 %v9831_v41  ;;  %v9866_v23 = vpack.i.bf16 %v9848_v13, %v9839_v12  ;;  %v9873_v62 = vadd.f32 %v9848_v13, %v9578_v21  ;;  %14759 = vst [vmem:[#allocation110_spill] sm:$0xff] %v9882_v43  ;;  %1340 = vmatpush.msra.mxu0 %v7685_v25 }
 0x58a   :  { %2444 = vmatpush.msrb.mxu1 %v9844_v16  ;;  %1341 = vmatpush.msra.mxu0 %v7686_v30  ;;  %v14768_v30 = vld [vmem:[#allocation14_spill] sm:$0xff] }
 0x58c   :  { %2445 = vmatpush.msrb.mxu1 %v9853_v10  ;;  %1342 = vmatpush.msra.mxu0 %v7690_v60 }
 0x58e   :  { %2446 = vmatpush.msrb.mxu1 %v9858_v40  ;;  %7718 = vrot.lane.b32.xlu2 %v9862_v6, %s14585_s30 }
 0x58f   :  { %7743 = vrot.lane.b32.xlu0 %v9866_v23, %s8607_s29  ;;  %7703 = vrot.lane.b32.xlu1 %v9866_v23, %s14585_s30 }
 0x590   :  { %2447 = vmatpush.msrb.mxu1 %v9873_v62  ;;  %1343 = vmatpush.msra.mxu0 %v7691_v58 }
 0x591   :  { %7410 = vmatmul.msk.f32.vlgmr.msra.gmra.mxu0 %vm677_vm3, %v1200_v2  ;;  %v1212_v2 = vld [vmem:[%s14434_s12 + $0xf8] sm:$0xff] }
 0x592   :  { %2448 = vmatpush.msrb.mxu1 %v9882_v43 }
 0x594   :  { %2449 = vmatpush.msrb.mxu1 %v9887_v51 }
 0x595   :  { %7442 = vmatmul.msk.f32.vlgmr.msrb.gmra.mxu1 %vm677_vm3, %v8939_v53 }
 0x596   :  { %7728 = vrot.lane.b32.xlu2 %v9862_v6, %s8604_s28 }
 0x597   :  { %7753 = vrot.lane.b32.xlu0 %v9798_v14, %s8601_s25  ;;  %7723 = vrot.lane.b32.xlu1 %v9866_v23, %s8604_s28 }
 0x599   :  { %7411 = vmatmul.msk.f32.gmra.mxu0 %vm677_vm3, %v1202_v36 }
 0x59d   :  { %7443 = vmatmul.msk.f32.gmra.mxu1 %vm677_vm3, %v8947_v57 }
 0x59e   :  { %7748 = vrot.lane.b32.xlu2 %v9862_v6, %s8607_s29 }
 0x59f   :  { %7768 = vrot.lane.b32.xlu0 %v9798_v14, %s8605_s6  ;;  %7733 = vrot.lane.b32.xlu1 %v9798_v14, %s8607_s29 }
 0x5a1   :  { %7412 = vmatmul.msk.f32.gmra.mxu0 %vm677_vm3, %v1204_v28 }
 0x5a5   :  { %7444 = vmatmul.msk.f32.gmra.mxu1 %vm677_vm3, %v8955_v61 }
 0x5a6   :  { %7773 = vrot.lane.b32.xlu2 %v9862_v6, %s8601_s25 }
 0x5a7   :  { %7808 = vrot.lane.b32.xlu0 %v9824_v26, %s8603_s24  ;;  %7758 = vrot.lane.b32.xlu1 %v9824_v26, %s8601_s25 }
 0x5a9   :  { %7413 = vmatmul.msk.f32.gmra.mxu0 %vm677_vm3, %v1206_v24 }
 0x5ad   :  { %7445 = vmatmul.msk.f32.gmra.mxu1 %vm677_vm3, %v8963_v1 }
 0x5ae   :  { %7783 = vrot.lane.b32.xlu2 %v9824_v26, %s8605_s6 }
 0x5af   :  { %7813 = vrot.lane.b32.xlu0 %v9824_v26, %s8600_s23  ;;  %7763 = vrot.lane.b32.xlu1 %v9866_v23, %s8601_s25 }
 0x5b1   :  { %7414 = vmatmul.msk.f32.gmra.mxu0 %vm677_vm3, %v1208_v0 }
 0x5b5   :  { %7446 = vmatmul.msk.f32.gmra.mxu1 %vm677_vm3, %v14760_v19 }
 0x5b6   :  { %7788 = vrot.lane.b32.xlu2 %v9862_v6, %s8605_s6 }
 0x5b7   :  { %7778 = vrot.lane.b32.xlu1 %v9866_v23, %s8605_s6  ;;  %7818 = vrot.lane.b32.xlu0 %v9862_v6, %s8603_s24 }
 0x5b9   :  { %7415 = vmatmul.msk.f32.gmra.mxu0 %vm677_vm3, %v1210_v15 }
 0x5bd   :  { %7447 = vmatmul.msk.f32.gmra.mxu1 %vm677_vm3, %v14761_v39 }
 0x5be   :  { %7798 = vrot.lane.b32.xlu2 %v9866_v23, %s8603_s24 }
 0x5bf   :  { %7793 = vrot.lane.b32.xlu1 %v9798_v14, %s8603_s24  ;;  %7833 = vrot.lane.b32.xlu0 %v9824_v26, %s8609_s5 }
 0x5c1   :  { %7416 = vmatmul.msk.f32.gmra.mxu0 %vm677_vm3, %v1212_v2 }
 0x5c5   :  { %7448 = vmatmul.msk.f32.gmra.mxu1 %vm677_vm3, %v14762_v7 }
 0x5c6   :  { %7823 = vrot.lane.b32.xlu2 %v9866_v23, %s8600_s23 }
 0x5c7   :  { %7803 = vrot.lane.b32.xlu1 %v9798_v14, %s8600_s23  ;;  %7848 = vrot.lane.b32.xlu0 %v9862_v6, %s8609_s5 }
 0x5cd   :  { %7449 = vmatmul.msk.f32.gmra.mxu1 %vm677_vm3, %v14763_v3 }
 0x5ce   :  { %7838 = vrot.lane.b32.xlu2 %v9798_v14, %s8609_s5 }
 0x5cf   :  { %7828 = vrot.lane.b32.xlu1 %v9862_v6, %s8600_s23  ;;  %7863 = vrot.lane.b32.xlu0 %v9866_v23, %s14587_s1 }
 0x5d5   :  { %7450 = vmatmul.msk.f32.gmra.mxu1 %vm677_vm3, %v14764_v55 }
 0x5d6   :  { %7853 = vrot.lane.b32.xlu2 %v9824_v26, %s14587_s1 }
 0x5d7   :  { %7843 = vrot.lane.b32.xlu1 %v9866_v23, %s8609_s5  ;;  %2853 = vperm.xlu0 %7640, %v2819_v52   ;;  %v2817_v23 = vld [vmem:[%s14436_s20 + $0x20] sm:$0xff]  ;;  %v14769_v52 = vld [vmem:[#allocation15_spill] sm:$0xff] }
 0x5dd   :  { %7451 = vmatmul.msk.f32.gmra.mxu1 %vm677_vm3, %v14765_v47 }
 0x5de   :  { %7868 = vrot.lane.b32.xlu2 %v9862_v6, %s14587_s1  ;;  %v2815_v6 = vld [vmem:[%s14436_s20 + $0x10] sm:$0xff] }
 0x5df   :  { %7858 = vrot.lane.b32.xlu1 %v9798_v14, %s14587_s1  ;;  %2838 = vperm.xlu0 %7640, %v2816_v48   ;;  %v2813_v14 = vld [vmem:[%s14436_s20] sm:$0xff]  ;;  %s15043_s1 = smov 122  }
 0x5e0   :  { %v7714_v11 = vpop.permute.xlu2 %7713 }
 0x5e1   :  { %v7715_v34 = vunpack.i.l.bf16 %v7714_v11  ;;  %v7716_v26 = vunpack.i.h.bf16 %v7714_v11 }
 0x5e3   :  { %2213 = vmatpush.msrb.mxu0 %v7715_v34 }
 0x5e5   :  { %2214 = vmatpush.msrb.mxu0 %v7716_v26  ;;  %7452 = vmatmul.msk.f32.gmra.mxu1 %vm677_vm3, %v14766_v20 }
 0x5e6   :  { %2848 = vperm.xlu2 %7634, %v2818_v9   ;;  %v1214_v9 = vld [vmem:[%s14434_s12 + $0x120] sm:$0xff] }
 0x5e7   :  { %2858 = vperm.xlu1 %7646, %v2820_v59   ;;  %2823 = vperm.xlu0 %7640, %v2813_v14   ;;  %v14770_v14 = vld [vmem:[#allocation16_spill] sm:$0xff] }
 0x5e8   :  { %v7694_v31 = vpop.permute.xlu0 %7693  ;;  %v7719_v29 = vpop.permute.xlu2 %7718  ;;  %7417 = vmatmul.msk.f32.gmra.mxu0 %vm677_vm3, %v1214_v9 }
 0x5e9   :  { %v7695_v28 = vunpack.i.l.bf16 %v7694_v31  ;;  %v7696_v48 = vunpack.i.h.bf16 %v7694_v31  ;;  %v7720_v0 = vunpack.i.l.bf16 %v7719_v29  ;;  %v7721_v31 = vunpack.i.h.bf16 %v7719_v29 }
 0x5ed   :  { %7453 = vmatmul.msk.f32.gmra.mxu1 %vm677_vm3, %v14767_v22 }
 0x5ee   :  { %2833 = vperm.xlu2 %7634, %v2815_v6  }
 0x5ef   :  { %2843 = vperm.xlu1 %7646, %v2817_v23  }
 0x5f0   :  { %v7709_v37 = vpop.permute.xlu0 %7708  ;;  %v7729_v27 = vpop.permute.xlu2 %7728 }
 0x5f1   :  { %v7710_v44 = vunpack.i.l.bf16 %v7709_v37  ;;  %v7711_v35 = vunpack.i.h.bf16 %v7709_v37  ;;  %v7731_v2 = vunpack.i.h.bf16 %v7729_v27 }
 0x5f3   :  { %2215 = vmatpush.msrb.mxu0 %v7710_v44 }
 0x5f5   :  { %2216 = vmatpush.msrb.mxu0 %v7711_v35  ;;  %7454 = vmatmul.msk.f32.gmra.mxu1 %vm677_vm3, %v14768_v30 }
 0x5f7   :  { %2828 = vperm.xlu1 %7646, %v2814_v38  }
 0x5f8   :  { %v10020_v25 = vpop.permute.xlu2 %7748 }
 0x5f9   :  { %v7699_v63 = vpop.permute.xlu1 %7698  ;;  %v7739_v60 = vpop.permute.xlu0 %7738 }
 0x5fa   :  { %v7700_v58 = vunpack.i.l.bf16 %v7699_v63  ;;  %v7701_v36 = vunpack.i.h.bf16 %v7699_v63  ;;  %v7740_v37 = vunpack.i.l.bf16 %v7739_v60  ;;  %v7741_v15 = vunpack.i.h.bf16 %v7739_v60  ;;  %v14771_v63 = vld [vmem:[#allocation17_spill] sm:$0xff]  ;;  %v14772_v60 = vld [vmem:[#allocation18_spill] sm:$0xff] }
 0x5fc   :  { %2254 = vmatpush.msrb.mxu2 %v7700_v58  ;;  %v7730_v58 = vunpack.i.l.bf16 %v7729_v27 }
 0x5fd   :  { %7455 = vmatmul.msk.f32.gmra.mxu1 %vm677_vm3, %v14769_v52 }
 0x5fe   :  { %2255 = vmatpush.msrb.mxu2 %v7701_v36 }
 0x600   :  { %2256 = vmatpush.msrb.mxu2 %v7695_v28  ;;  %v10028_v26 = vpop.permute.xlu2 %7773 }
 0x601   :  { %v7744_v11 = vpop.permute.xlu0 %7743  ;;  %v7704_v34 = vpop.permute.xlu1 %7703 }
 0x602   :  { %v7705_v24 = vunpack.i.l.bf16 %v7704_v34  ;;  %2257 = vmatpush.msrb.mxu2 %v7696_v48  ;;  %v7706_v59 = vunpack.i.h.bf16 %v7704_v34  ;;  %v7746_v27 = vunpack.i.h.bf16 %v7744_v11 }
 0x604   :  { %2258 = vmatpush.msrb.mxu2 %v7705_v24  ;;  %v7745_v24 = vunpack.i.l.bf16 %v7744_v11  ;;  %v14773_v11 = vld [vmem:[#allocation19_spill] sm:$0xff] }
 0x605   :  { %7456 = vmatmul.msk.f32.gmra.mxu1 %vm677_vm3, %v14770_v14  ;;  %v1049_v14 = vld [vmem:[%s14438_s7 + $0x188] sm:$0xff] }
 0x606   :  { %2259 = vmatpush.msrb.mxu2 %v7706_v59 }
 0x608   :  { %2260 = vmatpush.msrb.mxu2 %v7720_v0  ;;  %v7784_v38 = vpop.permute.xlu2 %7783 }
 0x609   :  { %v10036_v6 = vpop.permute.xlu0 %7753  ;;  %v7724_v23 = vpop.permute.xlu1 %7723 }
 0x60a   :  { %v7725_v44 = vunpack.i.l.bf16 %v7724_v23  ;;  %2261 = vmatpush.msrb.mxu2 %v7721_v31  ;;  %v7726_v35 = vunpack.i.h.bf16 %v7724_v23  ;;  %v7750_v31 = vunpack.i.l.bf16 %v10020_v25  ;;  %v7751_v23 = vunpack.i.h.bf16 %v10020_v25 }
 0x60c   :  { %2217 = vmatpush.msrb.mxu0 %v7725_v44  ;;  %2262 = vmatpush.msrb.mxu2 %v7740_v37  ;;  %v7785_v44 = vunpack.i.l.bf16 %v7784_v38 }
 0x60d   :  { %7457 = vmatmul.msk.f32.gmra.mxu1 %vm677_vm3, %v14771_v63 }
 0x60e   :  { %2218 = vmatpush.msrb.mxu0 %v7726_v35  ;;  %2263 = vmatpush.msrb.mxu2 %v7741_v15  ;;  %v7756_v35 = vunpack.i.h.bf16 %v10036_v6 }
 0x610   :  { %2219 = vmatpush.msrb.mxu0 %v7730_v58  ;;  %v10045_v9 = vpop.permute.xlu2 %7788  ;;  %v7786_v58 = vunpack.i.h.bf16 %v7784_v38 }
 0x611   :  { %v7769_v29 = vpop.permute.xlu0 %7768  ;;  %v7734_v36 = vpop.permute.xlu1 %7733 }
 0x612   :  { %v7735_v28 = vunpack.i.l.bf16 %v7734_v36  ;;  %2220 = vmatpush.msrb.mxu0 %v7731_v2  ;;  %v10040_v48 = vpop.f32.mrf.mxu1  ;;  %v7736_v34 = vunpack.i.h.bf16 %v7734_v36  ;;  %v14774_v36 = vld [vmem:[#allocation20_spill] sm:$0xff] }
 0x614   :  { %2221 = vmatpush.msrb.mxu0 %v9816_v46  ;;  %2264 = vmatpush.msrb.mxu2 %v7735_v28  ;;  %v7771_v28 = vunpack.i.h.bf16 %v7769_v29 }
 0x615   :  { %7458 = vmatmul.msk.f32.gmra.mxu1 %vm677_vm3, %v14772_v60 }
 0x616   :  { %2222 = vmatpush.msrb.mxu0 %v9814_v56  ;;  %2265 = vmatpush.msrb.mxu2 %v7736_v34 }
 0x618   :  { %2223 = vmatpush.msrb.mxu0 %v9792_v8  ;;  %2266 = vmatpush.msrb.mxu2 %v7745_v24  ;;  %v10060_v37 = vpop.permute.xlu2 %7798 }
 0x619   :  { %v10049_v59 = vpop.permute.xlu0 %7808  ;;  %v7759_v0 = vpop.permute.xlu1 %7758 }
 0x61a   :  { %2224 = vmatpush.msrb.mxu0 %v9790_v42  ;;  %2267 = vmatpush.msrb.mxu2 %v7746_v27  ;;  %v10053_v46 = vpop.f32.mrf.mxu1  ;;  %v7760_v56 = vunpack.i.l.bf16 %v7759_v0  ;;  %v7761_v8 = vunpack.i.h.bf16 %v7759_v0  ;;  %v7755_v42 = vunpack.i.l.bf16 %v10036_v6 }
 0x61c   :  { %2225 = vmatpush.msrb.mxu0 %v9839_v12  ;;  %2268 = vmatpush.msrb.mxu2 %v7750_v31  ;;  %v2125_v12 = vld [vmem:[%s14434_s12 + $0x140] sm:$0xff]  ;;  %v2130_v31 = vld [vmem:[%s14434_s12 + $0x168] sm:$0xff] }
 0x61d   :  { %7459 = vmatmul.msk.f32.gmra.mxu1 %vm677_vm3, %v14773_v11  ;;  %v14932_v11 = vld [vmem:[#allocation92_spill] sm:$0xff] }
 0x61e   :  { %2226 = vmatpush.msrb.mxu0 %v9848_v13  ;;  %2269 = vmatpush.msrb.mxu2 %v7751_v23 }
 0x620   :  { %2336 = vmatpush.msra.mxu2 %v7760_v56  ;;  %2227 = vmatpush.msrb.mxu0 %v9837_v4  ;;  %v7770_v4 = vunpack.i.l.bf16 %v7769_v29  ;;  %v10074_v6 = vpop.permute.xlu2 %7823  ;;  %v7776_v29 = vunpack.i.h.bf16 %v10028_v26  ;;  %v7810_v56 = vunpack.i.l.bf16 %v10049_v59 }
 0x621   :  { %v7814_v25 = vpop.permute.xlu0 %7813  ;;  %v7764_v15 = vpop.permute.xlu1 %7763 }
 0x622   :  { %2337 = vmatpush.msra.mxu2 %v7761_v8  ;;  %2228 = vmatpush.msrb.mxu0 %v9846_v5  ;;  %v10068_v13 = vpop.f32.mrf.mxu1  ;;  %v7765_v2 = vunpack.i.l.bf16 %v7764_v15  ;;  %v7766_v34 = vunpack.i.h.bf16 %v7764_v15  ;;  %v7775_v5 = vunpack.i.l.bf16 %v10028_v26  ;;  %v7790_v8 = vunpack.i.l.bf16 %v10045_v9 }
 0x623   :  { %2229 = vmatmul.f32.vlgmr.msrb.gmra.mxu0 %v2125_v12  ;;  %v7791_v15 = vunpack.i.h.bf16 %v10045_v9 }
 0x624   :  { %2295 = vmatpush.msra.mxu0 %v7785_v44  ;;  %2338 = vmatpush.msra.mxu2 %v7755_v42  ;;  %v14775_v42 = vld [vmem:[#allocation21_spill] sm:$0xff]  ;;  %v7811_v44 = vunpack.i.h.bf16 %v10049_v59 }
 0x625   :  { %7460 = vmatmul.msk.f32.gmra.mxu1 %vm677_vm3, %v14774_v36 }
 0x626   :  { %2296 = vmatpush.msra.mxu0 %v7786_v58  ;;  %2339 = vmatpush.msra.mxu2 %v7756_v35  ;;  %v7815_v35 = vunpack.i.l.bf16 %v7814_v25 }
 0x628   :  { %2297 = vmatpush.msra.mxu0 %v7770_v4  ;;  %2340 = vmatpush.msra.mxu2 %v7765_v2 }
 0x629   :  { %v7779_v24 = vpop.permute.xlu1 %7778  ;;  %v7819_v27 = vpop.permute.xlu0 %7818 }
 0x62a   :  { %2298 = vmatpush.msra.mxu0 %v7771_v28  ;;  %2341 = vmatpush.msra.mxu2 %v7766_v34  ;;  %v7780_v38 = vunpack.i.l.bf16 %v7779_v24  ;;  %v10076_v0 = vpop.f32.mrf.mxu1  ;;  %v7781_v23 = vunpack.i.h.bf16 %v7779_v24  ;;  %v2135_v28 = vld [vmem:[%s14434_s12 + $0x190] sm:$0xff]  ;;  %v7816_v34 = vunpack.i.h.bf16 %v7814_v25  ;;  %v7800_v24 = vunpack.i.l.bf16 %v10060_v37 }
 0x62b   :  { %2232 = vmatmul.f32.gmra.mxu0 %v2130_v31  ;;  %v14776_v31 = vld [vmem:[#allocation22_spill] sm:$0xff] }
 0x62c   :  { %2342 = vmatpush.msra.mxu2 %v7775_v5  ;;  %2299 = vmatpush.msra.mxu0 %v7780_v38  ;;  %v7839_v5 = vpop.permute.xlu2 %7838 }
 0x62d   :  { %7461 = vmatmul.msk.f32.gmra.mxu1 %vm677_vm3, %v14775_v42  ;;  %v7840_v38 = vunpack.i.l.bf16 %v7839_v5  ;;  %v7841_v25 = vunpack.i.h.bf16 %v7839_v5 }
 0x62e   :  { %2343 = vmatpush.msra.mxu2 %v7776_v29  ;;  %2300 = vmatpush.msra.mxu0 %v7781_v23  ;;  %v7801_v29 = vunpack.i.h.bf16 %v10060_v37  ;;  %v7825_v37 = vunpack.i.l.bf16 %v10074_v6 }
 0x630   :  { %2344 = vmatpush.msra.mxu2 %v7810_v56  ;;  %2301 = vmatpush.msra.mxu0 %v7790_v8  ;;  %v7820_v56 = vunpack.i.l.bf16 %v7819_v27 }
 0x631   :  { %v7794_v26 = vpop.permute.xlu1 %7793  ;;  %v7834_v12 = vpop.permute.xlu0 %7833 }
 0x632   :  { %2345 = vmatpush.msra.mxu2 %v7811_v44  ;;  %v7795_v58 = vunpack.i.l.bf16 %v7794_v26  ;;  %v7835_v4 = vunpack.i.l.bf16 %v7834_v12  ;;  %2302 = vmatpush.msra.mxu0 %v7791_v15  ;;  %v10088_v2 = vpop.f32.mrf.mxu1  ;;  %v7796_v59 = vunpack.i.h.bf16 %v7794_v26  ;;  %v7836_v9 = vunpack.i.h.bf16 %v7834_v12  ;;  %v2140_v15 = vld [vmem:[%s14434_s12 + $0x1b8] sm:$0xff] }
 0x633   :  { %2235 = vmatmul.f32.gmra.mxu0 %v2135_v28  ;;  %v7821_v26 = vunpack.i.h.bf16 %v7819_v27  ;;  %v2145_v27 = vld [vmem:[%s14434_s12 + $0x1e0] sm:$0xff] }
 0x634   :  { %2303 = vmatpush.msra.mxu0 %v7815_v35  ;;  %2346 = vmatpush.msra.mxu2 %v7795_v58  ;;  %v14777_v35 = vld [vmem:[#allocation23_spill] sm:$0xff]  ;;  %v7826_v58 = vunpack.i.h.bf16 %v10074_v6 }
 0x635   :  { %2377 = vmatpush.msra.mxu3 %v7835_v4  ;;  %7462 = vmatmul.msk.f32.gmra.mxu1 %vm677_vm3, %v14776_v31 }
 0x636   :  { %2304 = vmatpush.msra.mxu0 %v7816_v34  ;;  %2347 = vmatpush.msra.mxu2 %v7796_v59  ;;  %v10111_v59 = vpop.f32.mrf.mxu0 }
 0x637   :  { %2378 = vmatpush.msra.mxu3 %v7836_v9  ;;  %v14778_v9 = vld [vmem:[#allocation24_spill] sm:$0xff] }
 0x638   :  { %2348 = vmatpush.msra.mxu2 %v7800_v24 }
 0x639   :  { %2379 = vmatpush.msra.mxu3 %v7840_v38  ;;  %v7804_v23 = vpop.permute.xlu1 %7803 }
 0x63a   :  { %v7805_v8 = vunpack.i.l.bf16 %v7804_v23  ;;  %2349 = vmatpush.msra.mxu2 %v7801_v29  ;;  %v10097_v44 = vpop.f32.mrf.mxu1  ;;  %v7806_v12 = vunpack.i.h.bf16 %v7804_v23  ;;  %v2150_v29 = vld [vmem:[%s14434_s12 + $0x208] sm:$0xff] }
 0x63b   :  { %2380 = vmatpush.msra.mxu3 %v7841_v25  ;;  %2238 = vmatmul.f32.gmra.mxu0 %v2140_v15  ;;  %v7849_v25 = vpop.permute.xlu0 %7848  ;;  %v14779_v15 = vld [vmem:[#allocation25_spill] sm:$0xff] }
 0x63c   :  { %2305 = vmatpush.msra.mxu0 %v7805_v8  ;;  %2350 = vmatpush.msra.mxu2 %v7820_v56  ;;  %v7850_v56 = vunpack.i.l.bf16 %v7849_v25  ;;  %v7854_v8 = vpop.permute.xlu2 %7853 }
 0x63d   :  { %7463 = vmatmul.msk.f32.gmra.mxu1 %vm677_vm3, %v14777_v35  ;;  %v2141_v35 = vld [vmem:[%s14434_s12 + $0x1c0] sm:$0xff] }
 0x63e   :  { %2306 = vmatpush.msra.mxu0 %v7806_v12  ;;  %2351 = vmatpush.msra.mxu2 %v7821_v26  ;;  %v10122_v26 = vpop.f32.mrf.mxu0  ;;  %v7851_v12 = vunpack.i.h.bf16 %v7849_v25 }
 0x640   :  { %2307 = vmatpush.msra.mxu0 %v7825_v37  ;;  %v7855_v37 = vunpack.i.l.bf16 %v7854_v8 }
 0x641   :  { %v7829_v4 = vpop.permute.xlu1 %7828 }
 0x642   :  { %v7830_v28 = vunpack.i.l.bf16 %v7829_v4  ;;  %2308 = vmatpush.msra.mxu0 %v7826_v58  ;;  %v10106_v34 = vpop.f32.mrf.mxu1  ;;  %v7831_v5 = vunpack.i.h.bf16 %v7829_v4  ;;  %v2155_v4 = vld [vmem:[%s14434_s12 + $0x230] sm:$0xff] }
 0x643   :  { %2241 = vmatmul.f32.gmra.mxu0 %v2145_v27  ;;  %v7856_v27 = vunpack.i.h.bf16 %v7854_v8  ;;  %v2160_v8 = vld [vmem:[%s14434_s12 + $0x258] sm:$0xff] }
 0x644   :  { %2309 = vmatpush.msra.mxu0 %v7830_v28 }
 0x645   :  { %7464 = vmatmul.msk.f32.gmra.mxu1 %vm677_vm3, %v14778_v9 }
 0x646   :  { %2310 = vmatpush.msra.mxu0 %v7831_v5  ;;  %v10131_v25 = vpop.f32.mrf.mxu0 }
 0x649   :  { %v7844_v6 = vpop.permute.xlu1 %7843 }
 0x64a   :  { %v7845_v24 = vunpack.i.l.bf16 %v7844_v6  ;;  %v10115_v38 = vpop.f32.mrf.mxu1  ;;  %v7846_v23 = vunpack.i.h.bf16 %v7844_v6  ;;  %v7864_v6 = vpop.permute.xlu0 %7863 }
 0x64b   :  { %2244 = vmatmul.f32.gmra.mxu0 %v2150_v29 }
 0x64c   :  { %2381 = vmatpush.msra.mxu3 %v7845_v24  ;;  %v14780_v24 = vld [vmem:[#allocation26_spill] sm:$0xff] }
 0x64d   :  { %7465 = vmatmul.msk.f32.gmra.mxu1 %vm677_vm3, %v14779_v15 }
 0x64e   :  { %2382 = vmatpush.msra.mxu3 %v7846_v23  ;;  %v7865_v23 = vunpack.i.l.bf16 %v7864_v6 }
 0x650   :  { %2383 = vmatpush.msra.mxu3 %v7850_v56 }
 0x651   :  { %v7859_v28 = vpop.permute.xlu1 %7858 }
 0x652   :  { %2384 = vmatpush.msra.mxu3 %v7851_v12  ;;  %v10124_v58 = vpop.f32.mrf.mxu1  ;;  %v7860_v5 = vunpack.i.l.bf16 %v7859_v28  ;;  %v7861_v29 = vunpack.i.h.bf16 %v7859_v28  ;;  %v7869_v12 = vpop.permute.xlu2 %7868 }
 0x653   :  { %2247 = vmatmul.f32.gmra.mxu0 %v2155_v4  ;;  %v7870_v4 = vunpack.i.l.bf16 %v7869_v12  ;;  %v7871_v28 = vunpack.i.h.bf16 %v7869_v12  ;;  %v2134_v12 = vld [vmem:[%s14434_s12 + $0x188] sm:$0xff] }
 0x654   :  { %2385 = vmatpush.msra.mxu3 %v7855_v37  ;;  %v7866_v37 = vunpack.i.h.bf16 %v7864_v6  ;;  %v2127_v6 = vld [vmem:[%s14434_s12 + $0x150] sm:$0xff] }
 0x655   :  { %7466 = vmatmul.msk.f32.gmra.mxu1 %vm677_vm3, %v14780_v24 }
 0x656   :  { %2386 = vmatpush.msra.mxu3 %v7856_v27  ;;  %v14781_v27 = vld [vmem:[#allocation27_spill] sm:$0xff] }
 0x658   :  { %2387 = vmatpush.msra.mxu3 %v7860_v5  ;;  %v2129_v5 = vld [vmem:[%s14434_s12 + $0x160] sm:$0xff] }
 0x65a   :  { %2388 = vmatpush.msra.mxu3 %v7861_v29  ;;  %v10133_v56 = vpop.f32.mrf.mxu1 }
 0x65b   :  { %2250 = vmatmul.f32.gmra.mxu0 %v2160_v8  ;;  %v14782_v8 = vld [vmem:[#allocation28_spill] sm:$0xff] }
 0x65c   :  { %2389 = vmatpush.msra.mxu3 %v7865_v23  ;;  %v10148_v23 = vpop.f32.mrf.mxu0 }
 0x65d   :  { %7467 = vmatmul.msk.f32.gmra.mxu1 %vm677_vm3, %v14781_v27 }
 0x65e   :  { %2390 = vmatpush.msra.mxu3 %v7866_v37 }
 0x660   :  { %2391 = vmatpush.msra.mxu3 %v7870_v4  ;;  %v2132_v4 = vld [vmem:[%s14434_s12 + $0x178] sm:$0xff] }
 0x662   :  { %2392 = vmatpush.msra.mxu3 %v7871_v28  ;;  %v10143_v29 = vpop.f32.mrf.mxu1 }
 0x663   :  { %2393 = vmatmul.f32.vlgmr.msra.gmra.mxu3 %v2129_v5  ;;  %2311 = vmatmul.f32.vlgmr.msra.gmra.mxu0 %v2127_v6  ;;  %v14784_v5 = vld [vmem:[#allocation29_spill] sm:$0xff]  ;;  %v2139_v6 = vld [vmem:[%s14434_s12 + $0x1b0] sm:$0xff] }
 0x664   :  { %2885 = vmatpush.msrb.mxu3 %v10115_v38  ;;  %v10164_v28 = vpop.f32.mrf.mxu0 }
 0x665   :  { %7468 = vmatmul.msk.f32.gmra.mxu1 %vm677_vm3, %v14782_v8  ;;  %14783 = vst [vmem:[#allocation111_spill] sm:$0xff] %v10164_v28  ;;  %v14786_v28 = vld [vmem:[#allocation31_spill] sm:$0xff] }
 0x666   :  { %2886 = vmatpush.msrb.mxu3 %v10106_v34 }
 0x668   :  { %2887 = vmatpush.msrb.mxu3 %v10097_v44 }
 0x66a   :  { %2888 = vmatpush.msrb.mxu3 %v10088_v2  ;;  %v10159_v37 = vpop.f32.mrf.mxu1 }
 0x66b   :  { %2396 = vmatmul.f32.gmra.mxu3 %v2134_v12  ;;  %2314 = vmatmul.f32.gmra.mxu0 %v2132_v4  ;;  %v2137_v12 = vld [vmem:[%s14434_s12 + $0x1a0] sm:$0xff] }
 0x66c   :  { %2889 = vmatpush.msrb.mxu3 %v10076_v0  ;;  %v10181_v4 = vpop.f32.mrf.mxu0 }
 0x66d   :  { %7469 = vmatmul.msk.f32.gmra.mxu1 %vm677_vm3, %v14784_v5  ;;  %14785 = vst [vmem:[#allocation112_spill] sm:$0xff] %v10181_v4  ;;  %v2144_v5 = vld [vmem:[%s14434_s12 + $0x1d8] sm:$0xff] }
 0x66e   :  { %2890 = vmatpush.msrb.mxu3 %v10068_v13 }
 0x670   :  { %2891 = vmatpush.msrb.mxu3 %v10053_v46 }
 0x672   :  { %2892 = vmatpush.msrb.mxu3 %v10040_v48  ;;  %v10175_v8 = vpop.f32.mrf.mxu1 }
 0x673   :  { %2399 = vmatmul.f32.gmra.mxu3 %v2139_v6  ;;  %2317 = vmatmul.f32.gmra.mxu0 %v2137_v12  ;;  %v2142_v6 = vld [vmem:[%s14434_s12 + $0x1c8] sm:$0xff]  ;;  %v14787_v12 = vld [vmem:[#allocation33_spill] sm:$0xff] }
 0x674   :  { %2893 = vmatpush.msrb.mxu3 %v9820_v54  ;;  %v10200_v4 = vpop.f32.mrf.mxu0 }
 0x675   :  { %7470 = vmatmul.msk.f32.gmra.mxu1 %vm677_vm3, %v14786_v28  ;;  %14788 = vst [vmem:[#allocation113_spill] sm:$0xff] %v10200_v4  ;;  %v2149_v28 = vld [vmem:[%s14434_s12 + $0x200] sm:$0xff]  ;;  %v2154_v4 = vld [vmem:[%s14434_s12 + $0x228] sm:$0xff] }
 0x676   :  { %2894 = vmatpush.msrb.mxu3 %v9831_v41 }
 0x678   :  { %2895 = vmatpush.msrb.mxu3 %v9844_v16 }
 0x67a   :  { %2896 = vmatpush.msrb.mxu3 %v9853_v10  ;;  %v10191_v27 = vpop.f32.mrf.mxu1 }
 0x67b   :  { %2402 = vmatmul.f32.gmra.mxu3 %v2144_v5  ;;  %2320 = vmatmul.f32.gmra.mxu0 %v2142_v6  ;;  %v2147_v5 = vld [vmem:[%s14434_s12 + $0x1f0] sm:$0xff]  ;;  %v14789_v6 = vld [vmem:[#allocation35_spill] sm:$0xff] }
 0x67c   :  { %2897 = vmatpush.msrb.mxu3 %v9858_v40  ;;  %v10220_v15 = vpop.f32.mrf.mxu0 }
 0x67d   :  { %7471 = vmatmul.msk.f32.gmra.mxu1 %vm677_vm3, %v14787_v12  ;;  %v2126_v12 = vld [vmem:[%s14434_s12 + $0x148] sm:$0xff]  ;;  %14790 = vst [vmem:[#allocation114_spill] sm:$0xff] %v10220_v15  ;;  %v2131_v15 = vld [vmem:[%s14434_s12 + $0x170] sm:$0xff] }
 0x67e   :  { %2898 = vmatpush.msrb.mxu3 %v9873_v62  ;;  %2270 = vmatmul.f32.vlgmr.msrb.gmra.mxu2 %v2126_v12 }
 0x680   :  { %2899 = vmatpush.msrb.mxu3 %v9882_v43 }
 0x682   :  { %2900 = vmatpush.msrb.mxu3 %v9887_v51  ;;  %v10207_v24 = vpop.f32.mrf.mxu1 }
 0x683   :  { %2405 = vmatmul.f32.gmra.mxu3 %v2149_v28  ;;  %2323 = vmatmul.f32.gmra.mxu0 %v2147_v5  ;;  %v2152_v28 = vld [vmem:[%s14434_s12 + $0x218] sm:$0xff]  ;;  %v14791_v5 = vld [vmem:[#allocation36_spill] sm:$0xff] }
 0x685   :  { %7472 = vmatmul.msk.f32.gmra.mxu1 %vm677_vm3, %v14789_v6  ;;  %v2136_v6 = vld [vmem:[%s14434_s12 + $0x198] sm:$0xff] }
 0x686   :  { %2273 = vmatmul.f32.gmra.mxu2 %v2131_v15  ;;  %v2164_v15 = vld [vmem:[%s14434_s12 + $0x278] sm:$0xff] }
 0x68a   :  { %v10222_v9 = vpop.f32.mrf.mxu1 }
 0x68b   :  { %2408 = vmatmul.f32.gmra.mxu3 %v2154_v4  ;;  %2547 = vmatpush.msrb.mxu0 %v10222_v9  ;;  %v2159_v4 = vld [vmem:[%s14434_s12 + $0x250] sm:$0xff] }
 0x68c   :  { %2326 = vmatmul.f32.gmra.mxu0 %v2152_v28  ;;  %v2157_v28 = vld [vmem:[%s14434_s12 + $0x240] sm:$0xff] }
 0x68d   :  { %2548 = vmatpush.msrb.mxu0 %v10207_v24  ;;  %7473 = vmatmul.msk.f32.gmra.mxu1 %vm677_vm3, %v14791_v5  ;;  %v10245_v5 = vpop.f32.mrf.mxu0 }
 0x68e   :  { %14792 = vst [vmem:[#allocation115_spill] sm:$0xff] %v10245_v5  ;;  %2276 = vmatmul.f32.gmra.mxu2 %v2136_v6  ;;  %v2773_v6 = vld [vmem:[%s14437_s11] sm:$0xff] }
 0x68f   :  { %2549 = vmatpush.msrb.mxu0 %v10191_v27 }
 0x691   :  { %2550 = vmatpush.msrb.mxu0 %v10175_v8 }
 0x692   :  { %v10239_v12 = vpop.f32.mrf.mxu1 }
 0x693   :  { %2411 = vmatmul.f32.gmra.mxu3 %v2159_v4  ;;  %2551 = vmatpush.msrb.mxu0 %v10159_v37 }
 0x694   :  { %2329 = vmatmul.f32.gmra.mxu0 %v2157_v28  ;;  %v2162_v28 = vld [vmem:[%s14434_s12 + $0x268] sm:$0xff] }
 0x695   :  { %2552 = vmatpush.msrb.mxu0 %v10143_v29  ;;  %v10263_v5 = vpop.f32.mrf.mxu0 }
 0x696   :  { %14793 = vst [vmem:[#allocation116_spill] sm:$0xff] %v10263_v5  ;;  %2279 = vmatmul.f32.gmra.mxu2 %v2141_v35  ;;  %v2788_v5 = vld [vmem:[%s14437_s11 + $0x78] sm:$0xff] }
 0x697   :  { %2553 = vmatpush.msrb.mxu0 %v10133_v56 }
 0x699   :  { %2554 = vmatpush.msrb.mxu0 %v10124_v58 }
 0x69a   :  { %v10256_v4 = vpop.f32.mrf.mxu1 }
 0x69b   :  { %2414 = vmatmul.f32.gmra.mxu3 %v2164_v15  ;;  %2555 = vmatpush.msrb.mxu0 %v10115_v38  ;;  %v14794_v15 = vld [vmem:[#allocation38_spill] sm:$0xff] }
 0x69c   :  { %2332 = vmatmul.f32.gmra.mxu0 %v2162_v28  ;;  %v14797_v28 = vld [vmem:[#allocation39_spill] sm:$0xff] }
 0x69d   :  { %2556 = vmatpush.msrb.mxu0 %v10106_v34  ;;  %v2146_v34 = vld [vmem:[%s14434_s12 + $0x1e8] sm:$0xff]  ;;  %v10287_v35 = vpop.f32.mrf.mxu0 }
 0x69e   :  { %14796 = vst [vmem:[#allocation117_spill] sm:$0xff] %v10287_v35  ;;  %2282 = vmatmul.f32.gmra.mxu2 %v2146_v34 }
 0x69f   :  { %2557 = vmatpush.msrb.mxu0 %v10097_v44  ;;  %v1000_v44 = vld [vmem:[%s14438_s7] sm:$0xff] }
 0x6a1   :  { %2558 = vmatpush.msrb.mxu0 %v10088_v2  ;;  %v10285_v2 = vmul.f32 %v1000_v44, %v14794_v15  ;;  %v2783_v44 = vld [vmem:[%s14437_s11 + $0x50] sm:$0xff] }
 0x6a2   :  { %v10273_v38 = vpop.f32.mrf.mxu1 }
 0x6a3   :  { %2901 = vmatmul.f32.vlgmr.msrb.gmra.mxu3 %v2773_v6  ;;  %2559 = vmatpush.msrb.mxu0 %v10076_v0  ;;  %14795 = vst [vmem:[#allocation38_spill] sm:$0xff] %v10285_v2  ;;  %v2778_v0 = vld [vmem:[%s14437_s11 + $0x28] sm:$0xff] }
 0x6a5   :  { %2560 = vmatpush.msrb.mxu0 %v10068_v13  ;;  %v10305_v15 = vpop.f32.mrf.mxu0 }
 0x6a6   :  { %14799 = vst [vmem:[#allocation118_spill] sm:$0xff] %v10305_v15 }
 0x6a7   :  { %2561 = vmatpush.msrb.mxu0 %v10053_v46  ;;  %v1002_v46 = vld [vmem:[%s14438_s7 + $0x10] sm:$0xff] }
 0x6a8   :  { %v10300_v6 = vmul.f32 %v1002_v46, %v14797_v28  ;;  %v14800_v46 = vld [vmem:[#allocation40_spill] sm:$0xff] }
 0x6a9   :  { %2562 = vmatpush.msrb.mxu0 %v10040_v48  ;;  %v2151_v48 = vld [vmem:[%s14434_s12 + $0x210] sm:$0xff] }
 0x6aa   :  { %2563 = vmatmul.f32.vlgmr.msrb.gmra.mxu0 %v10285_v2  ;;  %v10294_v13 = vpop.f32.mrf.mxu1  ;;  %14798 = vst [vmem:[#allocation39_spill] sm:$0xff] %v10300_v6  ;;  %2285 = vmatmul.f32.gmra.mxu2 %v2151_v48 }
 0x6ab   :  { %2904 = vmatmul.f32.gmra.mxu3 %v2778_v0  ;;  %v1004_v0 = vld [vmem:[%s14438_s7 + $0x20] sm:$0xff] }
 0x6ac   :  { %v10317_v28 = vmul.f32 %v1004_v0, %v14800_v46  ;;  %v1006_v0 = vld [vmem:[%s14438_s7 + $0x30] sm:$0xff]  ;;  %v14803_v46 = vld [vmem:[#allocation41_spill] sm:$0xff] }
 0x6ad   :  { %v10326_v15 = vpop.f32.mrf.mxu0  ;;  %v10334_v35 = vmul.f32 %v1006_v0, %v14803_v46  ;;  %v14806_v46 = vld [vmem:[#allocation42_spill] sm:$0xff] }
 0x6ae   :  { %14801 = vst [vmem:[#allocation40_spill] sm:$0xff] %v10317_v28 }
 0x6af   :  { %14802 = vst [vmem:[#allocation119_spill] sm:$0xff] %v10326_v15  ;;  %v2161_v15 = vld [vmem:[%s14434_s12 + $0x260] sm:$0xff] }
 0x6b0   :  { %14804 = vst [vmem:[#allocation41_spill] sm:$0xff] %v10334_v35 }
 0x6b2   :  { %2566 = vmatmul.f32.gmra.mxu0 %v10300_v6  ;;  %v10311_v34 = vpop.f32.mrf.mxu1 }
 0x6b3   :  { %2907 = vmatmul.f32.gmra.mxu3 %v2783_v44  ;;  %v2156_v44 = vld [vmem:[%s14434_s12 + $0x238] sm:$0xff] }
 0x6b4   :  { %2288 = vmatmul.f32.gmra.mxu2 %v2156_v44  ;;  %v1008_v44 = vld [vmem:[%s14438_s7 + $0x40] sm:$0xff] }
 0x6b5   :  { %v10348_v0 = vpop.f32.mrf.mxu0  ;;  %v10351_v6 = vmul.f32 %v1008_v44, %v14806_v46  ;;  %v14808_v44 = vld [vmem:[#allocation43_spill] sm:$0xff] }
 0x6b6   :  { %14805 = vst [vmem:[#allocation120_spill] sm:$0xff] %v10348_v0  ;;  %v1010_v0 = vld [vmem:[%s14438_s7 + $0x50] sm:$0xff] }
 0x6b7   :  { %14807 = vst [vmem:[#allocation42_spill] sm:$0xff] %v10351_v6  ;;  %v10368_v46 = vmul.f32 %v1010_v0, %v14808_v44  ;;  %v1012_v0 = vld [vmem:[%s14438_s7 + $0x60] sm:$0xff]  ;;  %v14811_v44 = vld [vmem:[#allocation44_spill] sm:$0xff] }
 0x6b9   :  { %14809 = vst [vmem:[#allocation43_spill] sm:$0xff] %v10368_v46 }
 0x6ba   :  { %2569 = vmatmul.f32.gmra.mxu0 %v10317_v28  ;;  %v10328_v48 = vpop.f32.mrf.mxu1 }
 0x6bb   :  { %2910 = vmatmul.f32.gmra.mxu3 %v2788_v5  ;;  %v2793_v5 = vld [vmem:[%s14437_s11 + $0xa0] sm:$0xff] }
 0x6bc   :  { %2291 = vmatmul.f32.gmra.mxu2 %v2161_v15  ;;  %v2128_v15 = vld [vmem:[%s14434_s12 + $0x158] sm:$0xff] }
 0x6c2   :  { %2572 = vmatmul.f32.gmra.mxu0 %v10334_v35  ;;  %v10343_v28 = vpop.f32.mrf.mxu1 }
 0x6c3   :  { %2913 = vmatmul.f32.gmra.mxu3 %v2793_v5  ;;  %v2798_v5 = vld [vmem:[%s14437_s11 + $0xc8] sm:$0xff] }
 0x6c4   :  { %2352 = vmatmul.f32.vlgmr.msra.gmra.mxu2 %v2128_v15  ;;  %v2133_v15 = vld [vmem:[%s14434_s12 + $0x180] sm:$0xff] }
 0x6ca   :  { %2575 = vmatmul.f32.gmra.mxu0 %v10351_v6  ;;  %v10360_v35 = vpop.f32.mrf.mxu1  ;;  %v10370_v6 = vpop.f32.mrf.mxu0 }
 0x6cb   :  { %2916 = vmatmul.f32.gmra.mxu3 %v2798_v5  ;;  %14810 = vst [vmem:[#allocation121_spill] sm:$0xff] %v10370_v6  ;;  %v2803_v5 = vld [vmem:[%s14437_s11 + $0xf0] sm:$0xff]  ;;  %v10389_v6 = vmul.f32 %v1012_v0, %v14811_v44  ;;  %v14814_v44 = vld [vmem:[#allocation45_spill] sm:$0xff] }
 0x6cc   :  { %2926 = vmatpush.msra.mxu3 %v10360_v35  ;;  %2355 = vmatmul.f32.gmra.mxu2 %v2133_v15  ;;  %v1014_v0 = vld [vmem:[%s14438_s7 + $0x70] sm:$0xff] }
 0x6cd   :  { %14812 = vst [vmem:[#allocation44_spill] sm:$0xff] %v10389_v6  ;;  %v10410_v42 = vmul.f32 %v1014_v0, %v14814_v44  ;;  %v14820_v0 = vld [vmem:[#allocation47_spill] sm:$0xff] }
 0x6ce   :  { %2927 = vmatpush.msra.mxu3 %v10343_v28 }
 0x6cf   :  { %14815 = vst [vmem:[#allocation45_spill] sm:$0xff] %v10410_v42 }
 0x6d0   :  { %2928 = vmatpush.msra.mxu3 %v10328_v48 }
 0x6d2   :  { %2578 = vmatmul.f32.gmra.mxu0 %v10368_v46  ;;  %2929 = vmatpush.msra.mxu3 %v10311_v34  ;;  %v10381_v2 = vpop.f32.mrf.mxu1  ;;  %v2808_v46 = vld [vmem:[%s14437_s11 + $0x118] sm:$0xff]  ;;  %v10398_v15 = vpop.f32.mrf.mxu0 }
 0x6d3   :  { %2919 = vmatmul.f32.gmra.mxu3 %v2803_v5  ;;  %v2138_v5 = vld [vmem:[%s14434_s12 + $0x1a8] sm:$0xff]  ;;  %14813 = vst [vmem:[#allocation122_spill] sm:$0xff] %v10398_v15  ;;  %v2143_v15 = vld [vmem:[%s14434_s12 + $0x1d0] sm:$0xff] }
 0x6d4   :  { %2930 = vmatpush.msra.mxu3 %v10294_v13  ;;  %2358 = vmatmul.f32.gmra.mxu2 %v2138_v5 }
 0x6d6   :  { %2931 = vmatpush.msra.mxu3 %v10273_v38 }
 0x6d8   :  { %2932 = vmatpush.msra.mxu3 %v10256_v4 }
 0x6da   :  { %2581 = vmatmul.f32.gmra.mxu0 %v10389_v6  ;;  %2933 = vmatpush.msra.mxu3 %v10239_v12  ;;  %v10402_v31 = vpop.f32.mrf.mxu1  ;;  %v1043_v6 = vld [vmem:[%s14438_s7 + $0x158] sm:$0xff] }
 0x6db   :  { %2922 = vmatmul.f32.gmra.mxu3 %v2808_v46  ;;  %v10418_v46 = vpop.f32.mrf.mxu0 }
 0x6dc   :  { %2934 = vmatpush.msra.mxu3 %v10222_v9  ;;  %14816 = vst [vmem:[#allocation123_spill] sm:$0xff] %v10418_v46  ;;  %2361 = vmatmul.f32.gmra.mxu2 %v2143_v15  ;;  %v1016_v9 = vld [vmem:[%s14438_s7 + $0x80] sm:$0xff]  ;;  %v2148_v15 = vld [vmem:[%s14434_s12 + $0x1f8] sm:$0xff] }
 0x6de   :  { %2935 = vmatpush.msra.mxu3 %v10207_v24  ;;  %v14817_v24 = vld [vmem:[#allocation46_spill] sm:$0xff] }
 0x6e0   :  { %2936 = vmatpush.msra.mxu3 %v10191_v27  ;;  %v10428_v27 = vmul.f32 %v1016_v9, %v14817_v24  ;;  %v2779_v9 = vld [vmem:[%s14437_s11 + $0x30] sm:$0xff] }
 0x6e2   :  { %2584 = vmatmul.f32.gmra.mxu0 %v10410_v42  ;;  %2937 = vmatpush.msra.mxu3 %v10175_v8  ;;  %v10420_v5 = vpop.f32.mrf.mxu1  ;;  %14818 = vst [vmem:[#allocation46_spill] sm:$0xff] %v10428_v27  ;;  %v2774_v8 = vld [vmem:[%s14437_s11 + $0x8] sm:$0xff] }
 0x6e4   :  { %2938 = vmatpush.msra.mxu3 %v10159_v37  ;;  %2364 = vmatmul.f32.gmra.mxu2 %v2148_v15  ;;  %v14822_v15 = vld [vmem:[#allocation48_spill] sm:$0xff] }
 0x6e6   :  { %2939 = vmatpush.msra.mxu3 %v10143_v29  ;;  %v10444_v29 = vpop.f32.mrf.mxu0  ;;  %v10906_v22 = vpop.f32.mrf.mxu3 }
 0x6e7   :  { %14819 = vst [vmem:[#allocation124_spill] sm:$0xff] %v10444_v29  ;;  %v2784_v29 = vld [vmem:[%s14437_s11 + $0x58] sm:$0xff] }
 0x6e8   :  { %2940 = vmatpush.msra.mxu3 %v10133_v56  ;;  %v1018_v56 = vld [vmem:[%s14438_s7 + $0x90] sm:$0xff]  ;;  %14938 = vst [vmem:[#allocation155_spill] sm:$0xff] %v10906_v22 }
 0x6e9   :  { %v10447_v44 = vmul.f32 %v1018_v56, %v14820_v0 }
 0x6ea   :  { %2587 = vmatmul.f32.gmra.mxu0 %v10428_v27  ;;  %2941 = vmatpush.msra.mxu3 %v10124_v58  ;;  %v10439_v37 = vpop.f32.mrf.mxu1  ;;  %v2153_v58 = vld [vmem:[%s14434_s12 + $0x220] sm:$0xff] }
 0x6eb   :  { %2942 = vmatmul.f32.vlgmr.msra.gmra.mxu3 %v2774_v8  ;;  %14821 = vst [vmem:[#allocation47_spill] sm:$0xff] %v10447_v44  ;;  %v1020_v8 = vld [vmem:[%s14438_s7 + $0xa0] sm:$0xff] }
 0x6ec   :  { %2367 = vmatmul.f32.gmra.mxu2 %v2153_v58  ;;  %v10462_v56 = vmul.f32 %v1020_v8, %v14822_v15  ;;  %v1022_v8 = vld [vmem:[%s14438_s7 + $0xb0] sm:$0xff]  ;;  %v14825_v15 = vld [vmem:[#allocation49_spill] sm:$0xff] }
 0x6ed   :  { %v10479_v46 = vmul.f32 %v1022_v8, %v14825_v15  ;;  %v1024_v8 = vld [vmem:[%s14438_s7 + $0xc0] sm:$0xff] }
 0x6ee   :  { %14823 = vst [vmem:[#allocation48_spill] sm:$0xff] %v10462_v56  ;;  %v10464_v0 = vpop.f32.mrf.mxu0  ;;  %v14828_v15 = vld [vmem:[#allocation50_spill] sm:$0xff] }
 0x6ef   :  { %14824 = vst [vmem:[#allocation125_spill] sm:$0xff] %v10464_v0  ;;  %v2789_v0 = vld [vmem:[%s14437_s11 + $0x80] sm:$0xff] }
 0x6f0   :  { %14826 = vst [vmem:[#allocation49_spill] sm:$0xff] %v10479_v46 }
 0x6f2   :  { %2590 = vmatmul.f32.gmra.mxu0 %v10447_v44  ;;  %v10456_v24 = vpop.f32.mrf.mxu1  ;;  %v10496_v44 = vmul.f32 %v1024_v8, %v14828_v15  ;;  %v14832_v8 = vld [vmem:[#allocation51_spill] sm:$0xff] }
 0x6f3   :  { %2945 = vmatmul.f32.gmra.mxu3 %v2779_v9  ;;  %v2158_v9 = vld [vmem:[%s14434_s12 + $0x248] sm:$0xff] }
 0x6f4   :  { %2370 = vmatmul.f32.gmra.mxu2 %v2158_v9  ;;  %14829 = vst [vmem:[#allocation50_spill] sm:$0xff] %v10496_v44 }
 0x6fa   :  { %2593 = vmatmul.f32.gmra.mxu0 %v10462_v56  ;;  %v10473_v58 = vpop.f32.mrf.mxu1  ;;  %v10484_v56 = vpop.f32.mrf.mxu0 }
 0x6fb   :  { %2948 = vmatmul.f32.gmra.mxu3 %v2784_v29  ;;  %14827 = vst [vmem:[#allocation126_spill] sm:$0xff] %v10484_v56  ;;  %v2163_v29 = vld [vmem:[%s14434_s12 + $0x270] sm:$0xff]  ;;  %v2794_v56 = vld [vmem:[%s14437_s11 + $0xa8] sm:$0xff] }
 0x6fc   :  { %2373 = vmatmul.f32.gmra.mxu2 %v2163_v29 }
 0x701   :  { %v10511_v29 = vpop.f32.mrf.mxu2 }
 0x702   :  { %2596 = vmatmul.f32.gmra.mxu0 %v10479_v46  ;;  %v10490_v9 = vpop.f32.mrf.mxu1  ;;  %v10502_v46 = vpop.f32.mrf.mxu0  ;;  %14831 = vst [vmem:[#allocation128_spill] sm:$0xff] %v10511_v29 }
 0x703   :  { %2951 = vmatmul.f32.gmra.mxu3 %v2789_v0  ;;  %14830 = vst [vmem:[#allocation127_spill] sm:$0xff] %v10502_v46  ;;  %v1026_v0 = vld [vmem:[%s14438_s7 + $0xd0] sm:$0xff] }
 0x704   :  { %v10514_v15 = vmul.f32 %v1026_v0, %v14832_v8  ;;  %v2799_v46 = vld [vmem:[%s14437_s11 + $0xd0] sm:$0xff] }
 0x705   :  { %v14835_v0 = vld [vmem:[#allocation52_spill] sm:$0xff] }
 0x706   :  { %14833 = vst [vmem:[#allocation51_spill] sm:$0xff] %v10514_v15 }
 0x70a   :  { %2599 = vmatmul.f32.gmra.mxu0 %v10496_v44  ;;  %v10504_v27 = vpop.f32.mrf.mxu1  ;;  %v10526_v29 = vpop.f32.mrf.mxu0 }
 0x70b   :  { %2954 = vmatmul.f32.gmra.mxu3 %v2794_v56  ;;  %2660 = vmatpush.msrb.mxu2 %v10504_v27  ;;  %v1028_v56 = vld [vmem:[%s14438_s7 + $0xe0] sm:$0xff]  ;;  %14834 = vst [vmem:[#allocation129_spill] sm:$0xff] %v10526_v29  ;;  %v1030_v29 = vld [vmem:[%s14438_s7 + $0xf0] sm:$0xff] }
 0x70c   :  { %v10530_v8 = vmul.f32 %v1028_v56, %v14835_v0  ;;  %v14838_v56 = vld [vmem:[#allocation53_spill] sm:$0xff] }
 0x70d   :  { %2661 = vmatpush.msrb.mxu2 %v10490_v9  ;;  %v10546_v0 = vmul.f32 %v1030_v29, %v14838_v56 }
 0x70e   :  { %14836 = vst [vmem:[#allocation52_spill] sm:$0xff] %v10530_v8 }
 0x70f   :  { %2662 = vmatpush.msrb.mxu2 %v10473_v58  ;;  %14839 = vst [vmem:[#allocation53_spill] sm:$0xff] %v10546_v0 }
 0x711   :  { %2663 = vmatpush.msrb.mxu2 %v10456_v24 }
 0x712   :  { %2602 = vmatmul.f32.gmra.mxu0 %v10514_v15  ;;  %v2804_v15 = vld [vmem:[%s14437_s11 + $0xf8] sm:$0xff]  ;;  %v10548_v44 = vpop.f32.mrf.mxu0 }
 0x713   :  { %2957 = vmatmul.f32.gmra.mxu3 %v2799_v46  ;;  %2664 = vmatpush.msrb.mxu2 %v10439_v37  ;;  %v10536_v46 = vpop.f32.mrf.mxu2  ;;  %14840 = vst [vmem:[#allocation131_spill] sm:$0xff] %v10548_v44 }
 0x714   :  { %14837 = vst [vmem:[#allocation130_spill] sm:$0xff] %v10536_v46  ;;  %v2809_v46 = vld [vmem:[%s14437_s11 + $0x120] sm:$0xff] }
 0x715   :  { %2665 = vmatpush.msrb.mxu2 %v10420_v5 }
 0x717   :  { %2666 = vmatpush.msrb.mxu2 %v10402_v31 }
 0x719   :  { %2667 = vmatpush.msrb.mxu2 %v10381_v2 }
 0x71a   :  { %2605 = vmatmul.f32.gmra.mxu0 %v10530_v8 }
 0x71b   :  { %2960 = vmatmul.f32.gmra.mxu3 %v2804_v15  ;;  %2668 = vmatpush.msrb.mxu2 %v10360_v35  ;;  %v10556_v15 = vpop.f32.mrf.mxu2  ;;  %v1032_v35 = vld [vmem:[%s14438_s7 + $0x100] sm:$0xff] }
 0x71c   :  { %14841 = vst [vmem:[#allocation132_spill] sm:$0xff] %v10556_v15 }
 0x71d   :  { %2669 = vmatpush.msrb.mxu2 %v10343_v28  ;;  %v1001_v28 = vld [vmem:[%s14438_s7 + $0x8] sm:$0xff] }
 0x71f   :  { %2670 = vmatpush.msrb.mxu2 %v10328_v48  ;;  %v14842_v48 = vld [vmem:[#allocation54_spill] sm:$0xff] }
 0x720   :  { %v10567_v29 = vmul.f32 %v1032_v35, %v14842_v48  ;;  %v1005_v48 = vld [vmem:[%s14438_s7 + $0x28] sm:$0xff] }
 0x721   :  { %2671 = vmatpush.msrb.mxu2 %v10311_v34  ;;  %v10571_v34 = vmul.f32 %v1001_v28, %v10111_v59  ;;  %v14847_v59 = vld [vmem:[#allocation55_spill] sm:$0xff]  ;;  %v1036_v28 = vld [vmem:[%s14438_s7 + $0x120] sm:$0xff] }
 0x722   :  { %2608 = vmatmul.f32.gmra.mxu0 %v10546_v0  ;;  %14843 = vst [vmem:[#allocation54_spill] sm:$0xff] %v10567_v29 }
 0x723   :  { %2963 = vmatmul.f32.gmra.mxu3 %v2809_v46  ;;  %2672 = vmatpush.msrb.mxu2 %v10294_v13  ;;  %14844 = vst [vmem:[#allocation133_spill] sm:$0xff] %v10571_v34  ;;  %v10573_v46 = vpop.f32.mrf.mxu0  ;;  %v10581_v13 = vpop.f32.mrf.mxu2 }
 0x724   :  { %14845 = vst [vmem:[#allocation134_spill] sm:$0xff] %v10573_v46  ;;  %v14860_v46 = vld [vmem:[#allocation58_spill] sm:$0xff] }
 0x725   :  { %2673 = vmatpush.msrb.mxu2 %v10273_v38  ;;  %v1034_v38 = vld [vmem:[%s14438_s7 + $0x110] sm:$0xff]  ;;  %14846 = vst [vmem:[#allocation135_spill] sm:$0xff] %v10581_v13 }
 0x726   :  { %v10587_v56 = vmul.f32 %v1034_v38, %v14847_v59  ;;  %v14852_v38 = vld [vmem:[#allocation56_spill] sm:$0xff] }
 0x727   :  { %2674 = vmatpush.msrb.mxu2 %v10256_v4  ;;  %v1003_v4 = vld [vmem:[%s14438_s7 + $0x18] sm:$0xff]  ;;  %v10605_v59 = vmul.f32 %v1036_v28, %v14852_v38  ;;  %v1042_v13 = vld [vmem:[%s14438_s7 + $0x150] sm:$0xff] }
 0x728   :  { %14848 = vst [vmem:[#allocation55_spill] sm:$0xff] %v10587_v56  ;;  %v10590_v35 = vmul.f32 %v1003_v4, %v10122_v26  ;;  %v10608_v26 = vmul.f32 %v1005_v48, %v10131_v25  ;;  %v1038_v4 = vld [vmem:[%s14438_s7 + $0x130] sm:$0xff]  ;;  %v1040_v48 = vld [vmem:[%s14438_s7 + $0x140] sm:$0xff] }
 0x729   :  { %2675 = vmatpush.msrb.mxu2 %v10239_v12  ;;  %14853 = vst [vmem:[#allocation56_spill] sm:$0xff] %v10605_v59 }
 0x72a   :  { %2611 = vmatmul.f32.gmra.mxu0 %v10567_v29  ;;  %2676 = vmatmul.f32.vlgmr.msrb.gmra.mxu2 %v10571_v34  ;;  %14849 = vst [vmem:[#allocation136_spill] sm:$0xff] %v10590_v35  ;;  %v14910_v34 = vld [vmem:[#allocation68_spill] sm:$0xff] }
 0x72b   :  { %v10593_v12 = vpop.f32.mrf.mxu0  ;;  %v10602_v44 = vpop.f32.mrf.mxu2  ;;  %14854 = vst [vmem:[#allocation139_spill] sm:$0xff] %v10608_v26 }
 0x72c   :  { %14850 = vst [vmem:[#allocation137_spill] sm:$0xff] %v10593_v12  ;;  %v1007_v12 = vld [vmem:[%s14438_s7 + $0x38] sm:$0xff] }
 0x72d   :  { %14851 = vst [vmem:[#allocation138_spill] sm:$0xff] %v10602_v44  ;;  %v14856_v44 = vld [vmem:[#allocation57_spill] sm:$0xff]  ;;  %v10626_v25 = vmul.f32 %v1007_v12, %v10148_v23 }
 0x72e   :  { %v10621_v28 = vmul.f32 %v1038_v4, %v14856_v44  ;;  %v10637_v44 = vmul.f32 %v1040_v48, %v14860_v46  ;;  %v1011_v46 = vld [vmem:[%s14438_s7 + $0x58] sm:$0xff]  ;;  %v14866_v48 = vld [vmem:[#allocation59_spill] sm:$0xff] }
 0x72f   :  { %14859 = vst [vmem:[#allocation142_spill] sm:$0xff] %v10626_v25 }
 0x730   :  { %14857 = vst [vmem:[#allocation57_spill] sm:$0xff] %v10621_v28 }
 0x731   :  { %14861 = vst [vmem:[#allocation58_spill] sm:$0xff] %v10637_v44 }
 0x732   :  { %2614 = vmatmul.f32.gmra.mxu0 %v10587_v56  ;;  %2679 = vmatmul.f32.gmra.mxu2 %v10590_v35  ;;  %v14905_v56 = vld [vmem:[#allocation67_spill] sm:$0xff] }
 0x733   :  { %v10615_v15 = vpop.f32.mrf.mxu0  ;;  %v10623_v38 = vpop.f32.mrf.mxu2 }
 0x734   :  { %14855 = vst [vmem:[#allocation140_spill] sm:$0xff] %v10615_v15  ;;  %v1009_v15 = vld [vmem:[%s14438_s7 + $0x48] sm:$0xff] }
 0x735   :  { %14858 = vst [vmem:[#allocation141_spill] sm:$0xff] %v10623_v38  ;;  %v14863_v38 = vld [vmem:[#allocation30_spill] sm:$0xff] }
 0x736   :  { %v10642_v23 = vmul.f32 %v1009_v15, %v14863_v38 }
 0x738   :  { %14864 = vst [vmem:[#allocation30_spill] sm:$0xff] %v10642_v23 }
 0x73a   :  { %2617 = vmatmul.f32.gmra.mxu0 %v10605_v59  ;;  %2682 = vmatmul.f32.gmra.mxu2 %v10608_v26  ;;  %v14886_v26 = vld [vmem:[#allocation63_spill] sm:$0xff]  ;;  %v14893_v59 = vld [vmem:[#allocation80_spill] sm:$0xff] }
 0x73b   :  { %v10639_v4 = vpop.f32.mrf.mxu0  ;;  %v10645_v12 = vpop.f32.mrf.mxu2 }
 0x73c   :  { %14862 = vst [vmem:[#allocation143_spill] sm:$0xff] %v10639_v4  ;;  %v14868_v4 = vld [vmem:[#allocation32_spill] sm:$0xff] }
 0x73d   :  { %14865 = vst [vmem:[#allocation144_spill] sm:$0xff] %v10645_v12  ;;  %v10658_v15 = vmul.f32 %v1011_v46, %v14868_v4  ;;  %v1044_v12 = vld [vmem:[%s14438_s7 + $0x160] sm:$0xff] }
 0x73e   :  { %v14874_v4 = vld [vmem:[#allocation34_spill] sm:$0xff] }
 0x73f   :  { %14869 = vst [vmem:[#allocation32_spill] sm:$0xff] %v10658_v15 }
 0x742   :  { %2620 = vmatmul.f32.gmra.mxu0 %v10621_v28  ;;  %2685 = vmatmul.f32.gmra.mxu2 %v10626_v25  ;;  %v10655_v25 = vmul.f32 %v1042_v13, %v14866_v48  ;;  %v1013_v13 = vld [vmem:[%s14438_s7 + $0x68] sm:$0xff]  ;;  %v14872_v48 = vld [vmem:[#allocation60_spill] sm:$0xff]  ;;  %v14881_v28 = vld [vmem:[#allocation62_spill] sm:$0xff] }
 0x743   :  { %v10660_v38 = vpop.f32.mrf.mxu0  ;;  %v10676_v46 = vmul.f32 %v1013_v13, %v14874_v4  ;;  %v14879_v13 = vld [vmem:[#allocation37_spill] sm:$0xff] }
 0x744   :  { %14867 = vst [vmem:[#allocation59_spill] sm:$0xff] %v10655_v25 }
 0x745   :  { %14870 = vst [vmem:[#allocation145_spill] sm:$0xff] %v10660_v38 }
 0x746   :  { %14875 = vst [vmem:[#allocation34_spill] sm:$0xff] %v10676_v46 }
 0x74a   :  { %2623 = vmatmul.f32.gmra.mxu0 %v10637_v44  ;;  %2688 = vmatmul.f32.gmra.mxu2 %v10642_v23  ;;  %v10667_v23 = vpop.f32.mrf.mxu2  ;;  %v10673_v44 = vmul.f32 %v1044_v12, %v14872_v48  ;;  %v14877_v12 = vld [vmem:[#allocation61_spill] sm:$0xff] }
 0x74b   :  { %14871 = vst [vmem:[#allocation146_spill] sm:$0xff] %v10667_v23  ;;  %v10679_v38 = vpop.f32.mrf.mxu0  ;;  %v1046_v23 = vld [vmem:[%s14438_s7 + $0x170] sm:$0xff] }
 0x74c   :  { %14873 = vst [vmem:[#allocation60_spill] sm:$0xff] %v10673_v44  ;;  %v10691_v48 = vmul.f32 %v1046_v23, %v14877_v12 }
 0x74e   :  { %14878 = vst [vmem:[#allocation61_spill] sm:$0xff] %v10691_v48 }
 0x752   :  { %2626 = vmatmul.f32.gmra.mxu0 %v10655_v25  ;;  %2691 = vmatmul.f32.gmra.mxu2 %v10658_v15  ;;  %v1015_v15 = vld [vmem:[%s14438_s7 + $0x78] sm:$0xff]  ;;  %v10688_v25 = vpop.f32.mrf.mxu2 }
 0x753   :  { %14876 = vst [vmem:[#allocation147_spill] sm:$0xff] %v10688_v25  ;;  %v10694_v4 = vmul.f32 %v1015_v15, %v14879_v13  ;;  %v1017_v25 = vld [vmem:[%s14438_s7 + $0x88] sm:$0xff]  ;;  %v14884_v15 = vld [vmem:[#allocation78_spill] sm:$0xff] }
 0x754   :  { %v10712_v13 = vmul.f32 %v1017_v25, %v14884_v15 }
 0x755   :  { %14880 = vst [vmem:[#allocation37_spill] sm:$0xff] %v10694_v4 }
 0x756   :  { %14885 = vst [vmem:[#allocation78_spill] sm:$0xff] %v10712_v13 }
 0x75a   :  { %2629 = vmatmul.f32.gmra.mxu0 %v10673_v44  ;;  %2694 = vmatmul.f32.gmra.mxu2 %v10676_v46  ;;  %v1048_v46 = vld [vmem:[%s14438_s7 + $0x180] sm:$0xff]  ;;  %v10701_v44 = vpop.f32.mrf.mxu0  ;;  %v10709_v12 = vpop.f32.mrf.mxu2 }
 0x75b   :  { %v10707_v23 = vmul.f32 %v1048_v46, %v14881_v28  ;;  %14883 = vst [vmem:[#allocation148_spill] sm:$0xff] %v10709_v12  ;;  %v14888_v12 = vld [vmem:[#allocation79_spill] sm:$0xff] }
 0x75d   :  { %14882 = vst [vmem:[#allocation62_spill] sm:$0xff] %v10707_v23 }
 0x762   :  { %2632 = vmatmul.f32.gmra.mxu0 %v10691_v48  ;;  %2697 = vmatmul.f32.gmra.mxu2 %v10694_v4  ;;  %v1050_v4 = vld [vmem:[%s14438_s7 + $0x190] sm:$0xff]  ;;  %v1019_v48 = vld [vmem:[%s14438_s7 + $0x98] sm:$0xff]  ;;  %v10725_v46 = vpop.f32.mrf.mxu0  ;;  %v10731_v15 = vpop.f32.mrf.mxu2 }
 0x763   :  { %v10723_v28 = vmul.f32 %v1050_v4, %v14886_v26  ;;  %v10728_v25 = vmul.f32 %v1019_v48, %v14888_v12  ;;  %14890 = vst [vmem:[#allocation149_spill] sm:$0xff] %v10731_v15  ;;  %v1021_v26 = vld [vmem:[%s14438_s7 + $0xa8] sm:$0xff]  ;;  %v14891_v4 = vld [vmem:[#allocation64_spill] sm:$0xff] }
 0x764   :  { %v10744_v48 = vmul.f32 %v1021_v26, %v14893_v59  ;;  %v1054_v15 = vld [vmem:[%s14438_s7 + $0x1b0] sm:$0xff]  ;;  %v14898_v59 = vld [vmem:[#allocation81_spill] sm:$0xff] }
 0x765   :  { %14887 = vst [vmem:[#allocation63_spill] sm:$0xff] %v10723_v28 }
 0x766   :  { %14889 = vst [vmem:[#allocation79_spill] sm:$0xff] %v10728_v25 }
 0x767   :  { %14894 = vst [vmem:[#allocation80_spill] sm:$0xff] %v10744_v48 }
 0x76a   :  { %2635 = vmatmul.f32.gmra.mxu0 %v10707_v23  ;;  %2700 = vmatmul.f32.gmra.mxu2 %v10712_v13  ;;  %v1052_v13 = vld [vmem:[%s14438_s7 + $0x1a0] sm:$0xff]  ;;  %v10746_v12 = vpop.f32.mrf.mxu0 }
 0x76b   :  { %v10741_v23 = vmul.f32 %v1052_v13, %v14891_v4  ;;  %v1023_v13 = vld [vmem:[%s14438_s7 + $0xb8] sm:$0xff] }
 0x76c   :  { %v14896_v4 = vld [vmem:[#allocation65_spill] sm:$0xff]  ;;  %v10762_v26 = vmul.f32 %v1023_v13, %v14898_v59  ;;  %v14903_v13 = vld [vmem:[#allocation82_spill] sm:$0xff] }
 0x76d   :  { %14892 = vst [vmem:[#allocation64_spill] sm:$0xff] %v10741_v23 }
 0x76e   :  { %14899 = vst [vmem:[#allocation81_spill] sm:$0xff] %v10762_v26 }
 0x772   :  { %2638 = vmatmul.f32.gmra.mxu0 %v10723_v28  ;;  %2703 = vmatmul.f32.gmra.mxu2 %v10728_v25  ;;  %v10753_v25 = vpop.f32.mrf.mxu2  ;;  %v10759_v28 = vmul.f32 %v1054_v15, %v14896_v4  ;;  %v14901_v15 = vld [vmem:[#allocation66_spill] sm:$0xff] }
 0x773   :  { %14895 = vst [vmem:[#allocation150_spill] sm:$0xff] %v10753_v25  ;;  %v1056_v25 = vld [vmem:[%s14438_s7 + $0x1c0] sm:$0xff] }
 0x774   :  { %14897 = vst [vmem:[#allocation65_spill] sm:$0xff] %v10759_v28  ;;  %v10777_v4 = vmul.f32 %v1056_v25, %v14901_v15 }
 0x776   :  { %14902 = vst [vmem:[#allocation66_spill] sm:$0xff] %v10777_v4 }
 0x77a   :  { %2641 = vmatmul.f32.gmra.mxu0 %v10741_v23  ;;  %2706 = vmatmul.f32.gmra.mxu2 %v10744_v48  ;;  %v10765_v23 = vpop.f32.mrf.mxu0  ;;  %v1025_v48 = vld [vmem:[%s14438_s7 + $0xc8] sm:$0xff]  ;;  %v10774_v35 = vpop.f32.mrf.mxu2 }
 0x77b   :  { %14900 = vst [vmem:[#allocation151_spill] sm:$0xff] %v10774_v35  ;;  %v10780_v59 = vmul.f32 %v1025_v48, %v14903_v13  ;;  %v1027_v35 = vld [vmem:[%s14438_s7 + $0xd8] sm:$0xff]  ;;  %v14908_v48 = vld [vmem:[#allocation83_spill] sm:$0xff] }
 0x77c   :  { %v10798_v13 = vmul.f32 %v1027_v35, %v14908_v48  ;;  %v1062_v48 = vld [vmem:[%s14438_s7 + $0x1f0] sm:$0xff] }
 0x77d   :  { %14904 = vst [vmem:[#allocation82_spill] sm:$0xff] %v10780_v59 }
 0x77e   :  { %14909 = vst [vmem:[#allocation83_spill] sm:$0xff] %v10798_v13 }
 0x782   :  { %2644 = vmatmul.f32.gmra.mxu0 %v10759_v28  ;;  %2709 = vmatmul.f32.gmra.mxu2 %v10762_v26  ;;  %v1058_v26 = vld [vmem:[%s14438_s7 + $0x1d0] sm:$0xff]  ;;  %v10787_v28 = vpop.f32.mrf.mxu0  ;;  %v10795_v15 = vpop.f32.mrf.mxu2 }
 0x783   :  { %v10793_v25 = vmul.f32 %v1058_v26, %v14905_v56  ;;  %14907 = vst [vmem:[#allocation152_spill] sm:$0xff] %v10795_v15  ;;  %v14912_v15 = vld [vmem:[#allocation84_spill] sm:$0xff] }
 0x785   :  { %14906 = vst [vmem:[#allocation67_spill] sm:$0xff] %v10793_v25 }
 0x78a   :  { %2647 = vmatmul.f32.gmra.mxu0 %v10777_v4  ;;  %2712 = vmatmul.f32.gmra.mxu2 %v10780_v59  ;;  %v1060_v59 = vld [vmem:[%s14438_s7 + $0x1e0] sm:$0xff]  ;;  %v1029_v4 = vld [vmem:[%s14438_s7 + $0xe8] sm:$0xff]  ;;  %v2582_v26 = vpop.f32.mrf.mxu0  ;;  %v10815_v35 = vpop.f32.mrf.mxu2 }
 0x78b   :  { %v10809_v56 = vmul.f32 %v1060_v59, %v14910_v34  ;;  %v10812_v29 = vmul.f32 %v1029_v4, %v14912_v15  ;;  %14914 = vst [vmem:[#allocation153_spill] sm:$0xff] %v10815_v35  ;;  %v14915_v34 = vld [vmem:[#allocation69_spill] sm:$0xff] }
 0x78c   :  { %v10825_v59 = vmul.f32 %v1062_v48, %v14915_v34  ;;  %v14922_v48 = vld [vmem:[#allocation87_spill] sm:$0xff] }
 0x78d   :  { %14911 = vst [vmem:[#allocation68_spill] sm:$0xff] %v10809_v56 }
 0x78e   :  { %14913 = vst [vmem:[#allocation84_spill] sm:$0xff] %v10812_v29 }
 0x78f   :  { %14916 = vst [vmem:[#allocation69_spill] sm:$0xff] %v10825_v59 }
 0x792   :  { %2650 = vmatmul.f32.gmra.mxu0 %v10793_v25  ;;  %2715 = vmatmul.f32.gmra.mxu2 %v10798_v13  ;;  %v1031_v13 = vld [vmem:[%s14438_s7 + $0xf8] sm:$0xff]  ;;  %v2585_v15 = vpop.f32.mrf.mxu0  ;;  %v10832_v35 = vpop.f32.mrf.mxu2 }
 0x793   :  { %v14917_v25 = vld [vmem:[#allocation85_spill] sm:$0xff]  ;;  %14919 = vst [vmem:[#allocation154_spill] sm:$0xff] %v10832_v35  ;;  %v1037_v35 = vld [vmem:[%s14438_s7 + $0x128] sm:$0xff] }
 0x794   :  { %v10828_v4 = vmul.f32 %v1031_v13, %v14917_v25  ;;  %v1035_v25 = vld [vmem:[%s14438_s7 + $0x118] sm:$0xff] }
 0x795   :  { %v10845_v34 = vmul.f32 %v1035_v25, %v14922_v48  ;;  %v14926_v25 = vld [vmem:[#allocation89_spill] sm:$0xff] }
 0x796   :  { %14918 = vst [vmem:[#allocation85_spill] sm:$0xff] %v10828_v4 }
 0x797   :  { %14923 = vst [vmem:[#allocation87_spill] sm:$0xff] %v10845_v34 }
 0x79a   :  { %2653 = vmatmul.f32.gmra.mxu0 %v10809_v56  ;;  %2718 = vmatmul.f32.gmra.mxu2 %v10812_v29  ;;  %v1033_v29 = vld [vmem:[%s14438_s7 + $0x108] sm:$0xff]  ;;  %v14920_v56 = vld [vmem:[#allocation86_spill] sm:$0xff]  ;;  %v10858_v8 = vpop.f32.mrf.mxu0 }
 0x79b   :  { %v10838_v0 = vmul.f32 %v1033_v29, %v14920_v56  ;;  %v1039_v56 = vld [vmem:[%s14438_s7 + $0x138] sm:$0xff] }
 0x79c   :  { %v10861_v48 = vmul.f32 %v1039_v56, %v14926_v25  ;;  %v14930_v25 = vld [vmem:[#allocation91_spill] sm:$0xff] }
 0x79d   :  { %14921 = vst [vmem:[#allocation86_spill] sm:$0xff] %v10838_v0  ;;  %v10877_v36 = vmul.f32 %v1043_v6, %v14930_v25 }
 0x79e   :  { %14927 = vst [vmem:[#allocation89_spill] sm:$0xff] %v10861_v48 }
 0x79f   :  { %14931 = vst [vmem:[#allocation91_spill] sm:$0xff] %v10877_v36 }
 0x7a2   :  { %2656 = vmatmul.f32.gmra.mxu0 %v10825_v59  ;;  %2721 = vmatmul.f32.gmra.mxu2 %v10828_v4  ;;  %v14924_v59 = vld [vmem:[#allocation88_spill] sm:$0xff] }
 0x7a3   :  { %v10852_v29 = vmul.f32 %v1037_v35, %v14924_v59  ;;  %v14928_v59 = vld [vmem:[#allocation90_spill] sm:$0xff] }
 0x7a5   :  { %14925 = vst [vmem:[#allocation88_spill] sm:$0xff] %v10852_v29 }
 0x7aa   :  { %2724 = vmatmul.f32.gmra.mxu2 %v10838_v0 }
 0x7ad   :  { %v2677_v13 = vpop.f32.mrf.mxu2 }
 0x7b2   :  { %2727 = vmatmul.f32.gmra.mxu2 %v10845_v34  ;;  %v1041_v34 = vld [vmem:[%s14438_s7 + $0x148] sm:$0xff] }
 0x7b3   :  { %v10868_v42 = vmul.f32 %v1041_v34, %v14928_v59  ;;  %v1045_v34 = vld [vmem:[%s14438_s7 + $0x168] sm:$0xff] }
 0x7b4   :  { %v10886_v60 = vmul.f32 %v1045_v34, %v14932_v11 }
 0x7b5   :  { %v2680_v4 = vpop.f32.mrf.mxu2  ;;  %14929 = vst [vmem:[#allocation90_spill] sm:$0xff] %v10868_v42 }
 0x7b6   :  { %14933 = vst [vmem:[#allocation92_spill] sm:$0xff] %v10886_v60 }
 0x7ba   :  { %2730 = vmatmul.f32.gmra.mxu2 %v10852_v29  ;;  %v10870_v29 = vpop.f32.mrf.mxu0 }
 0x7bd   :  { %v2683_v0 = vpop.f32.mrf.mxu2 }
 0x7c2   :  { %2733 = vmatmul.f32.gmra.mxu2 %v10861_v48  ;;  %v10880_v48 = vpop.f32.mrf.mxu0 }
 0x7c5   :  { %v2686_v35 = vpop.f32.mrf.mxu2 }
 0x7ca   :  { %2736 = vmatmul.f32.gmra.mxu2 %v10868_v42  ;;  %v1047_v42 = vld [vmem:[%s14438_s7 + $0x178] sm:$0xff]  ;;  %v10892_v6 = vpop.f32.mrf.mxu0 }
 0x7cd   :  { %v2689_v56 = vpop.f32.mrf.mxu2 }
 0x7d2   :  { %2739 = vmatmul.f32.gmra.mxu2 %v10877_v36  ;;  %v14934_v36 = vld [vmem:[#allocation94_spill] sm:$0xff]  ;;  %v10901_v52 = vpop.f32.mrf.mxu0 }
 0x7d3   :  { %v10895_v63 = vmul.f32 %v1047_v42, %v14934_v36  ;;  %v2690_v42 = vadd.f32 %v2689_v56, %v10765_v23  ;;  %v2681_v23 = vadd.f32 %v2680_v4, %v10701_v44  ;;  %v2678_v56 = vadd.f32 %v2677_v13, %v10679_v38  ;;  %v1055_v4 = vld [vmem:[%s14438_s7 + $0x1b8] sm:$0xff] }
 0x7d5   :  { %v2692_v59 = vpop.f32.mrf.mxu2  ;;  %14935 = vst [vmem:[#allocation94_spill] sm:$0xff] %v10895_v63 }
 0x7d6   :  { %v2693_v36 = vadd.f32 %v2692_v59, %v10787_v28  ;;  %v2684_v28 = vadd.f32 %v2683_v0, %v10725_v46  ;;  %v14942_v0 = vld [vmem:[#allocation100_spill] sm:$0xff] }
 0x7da   :  { %2742 = vmatmul.f32.gmra.mxu2 %v10886_v60  ;;  %v14936_v60 = vld [vmem:[#allocation96_spill] sm:$0xff]  ;;  %v10921_v59 = vpop.f32.mrf.mxu0 }
 0x7db   :  { %v10904_v30 = vmul.f32 %v1049_v14, %v14936_v60  ;;  %v2687_v14 = vadd.f32 %v2686_v35, %v10746_v12  ;;  %v14939_v60 = vld [vmem:[#allocation98_spill] sm:$0xff]  ;;  %v1053_v12 = vld [vmem:[%s14438_s7 + $0x1a8] sm:$0xff] }
 0x7dc   :  { %v10934_v46 = vmul.f32 %v1053_v12, %v14942_v0  ;;  %v14953_v0 = vld [vmem:[#allocation108_spill] sm:$0xff] }
 0x7dd   :  { %v2695_v25 = vpop.f32.mrf.mxu2  ;;  %14937 = vst [vmem:[#allocation96_spill] sm:$0xff] %v10904_v30 }
 0x7de   :  { %v2696_v20 = vadd.f32 %v2695_v25, %v2582_v26  ;;  %14943 = vst [vmem:[#allocation100_spill] sm:$0xff] %v10934_v46  ;;  %v14945_v25 = vld [vmem:[#allocation102_spill] sm:$0xff] }
 0x7e2   :  { %2745 = vmatmul.f32.gmra.mxu2 %v10895_v63  ;;  %v10939_v44 = vpop.f32.mrf.mxu0 }
 0x7e5   :  { %v2698_v11 = vpop.f32.mrf.mxu2 }
 0x7e6   :  { %v2699_v34 = vadd.f32 %v2698_v11, %v2585_v15  ;;  %v1051_v15 = vld [vmem:[%s14438_s7 + $0x198] sm:$0xff] }
 0x7e7   :  { %v10918_v26 = vmul.f32 %v1051_v15, %v14939_v60 }
 0x7e8   :  { %2967 = vmatpush.msrb.mxu3 %v2699_v34 }
 0x7e9   :  { %14940 = vst [vmem:[#allocation98_spill] sm:$0xff] %v10918_v26 }
 0x7ea   :  { %2748 = vmatmul.f32.gmra.mxu2 %v10904_v30  ;;  %2968 = vmatpush.msrb.mxu3 %v2696_v20  ;;  %v10923_v20 = vpop.f32.mrf.mxu3 }
 0x7eb   :  { %14941 = vst [vmem:[#allocation156_spill] sm:$0xff] %v10923_v20  ;;  %v2800_v20 = vld [vmem:[%s14437_s11 + $0xd8] sm:$0xff] }
 0x7ec   :  { %2969 = vmatpush.msrb.mxu3 %v2693_v36 }
 0x7ed   :  { %v10914_v11 = vpop.f32.mrf.mxu2 }
 0x7ee   :  { %2970 = vmatpush.msrb.mxu3 %v2690_v42  ;;  %v1059_v42 = vld [vmem:[%s14438_s7 + $0x1d8] sm:$0xff] }
 0x7f0   :  { %2971 = vmatpush.msrb.mxu3 %v2687_v14 }
 0x7f2   :  { %2751 = vmatmul.f32.gmra.mxu2 %v10918_v26  ;;  %2972 = vmatpush.msrb.mxu3 %v2684_v28  ;;  %v10941_v38 = vpop.f32.mrf.mxu3 }
 0x7f3   :  { %14944 = vst [vmem:[#allocation157_spill] sm:$0xff] %v10941_v38 }
 0x7f4   :  { %2973 = vmatpush.msrb.mxu3 %v2681_v23  ;;  %v2785_v23 = vld [vmem:[%s14437_s11 + $0x60] sm:$0xff] }
 0x7f5   :  { %v10931_v35 = vpop.f32.mrf.mxu2 }
 0x7f6   :  { %2974 = vmatpush.msrb.mxu3 %v2678_v56  ;;  %v1061_v56 = vld [vmem:[%s14438_s7 + $0x1e8] sm:$0xff] }
 0x7f8   :  { %2975 = vmatpush.msrb.mxu3 %v10504_v27  ;;  %v10951_v27 = vmul.f32 %v1055_v4, %v14945_v25  ;;  %v10999_v4 = vmul.f32 %v1061_v56, %v14953_v0  ;;  %v2795_v0 = vld [vmem:[%s14437_s11 + $0xb0] sm:$0xff] }
 0x7fa   :  { %2754 = vmatmul.f32.gmra.mxu2 %v10934_v46  ;;  %2976 = vmatpush.msrb.mxu3 %v10490_v9  ;;  %14946 = vst [vmem:[#allocation102_spill] sm:$0xff] %v10951_v27  ;;  %v1057_v9 = vld [vmem:[%s14438_s7 + $0x1c8] sm:$0xff]  ;;  %v10967_v36 = vpop.f32.mrf.mxu3 }
 0x7fb   :  { %14947 = vst [vmem:[#allocation158_spill] sm:$0xff] %v10967_v36 }
 0x7fc   :  { %2977 = vmatpush.msrb.mxu3 %v10473_v58  ;;  %v2775_v58 = vld [vmem:[%s14437_s11 + $0x10] sm:$0xff]  ;;  %14954 = vst [vmem:[#allocation108_spill] sm:$0xff] %v10999_v4 }
 0x7fd   :  { %v10947_v13 = vpop.f32.mrf.mxu2 }
 0x7fe   :  { %2978 = vmatpush.msrb.mxu3 %v10456_v24  ;;  %v10963_v24 = vpop.f32.mrf.mxu0 }
 0x800   :  { %2979 = vmatpush.msrb.mxu3 %v10439_v37 }
 0x802   :  { %2757 = vmatmul.f32.gmra.mxu2 %v10951_v27  ;;  %2980 = vmatpush.msrb.mxu3 %v10420_v5  ;;  %v14948_v5 = vld [vmem:[#allocation104_spill] sm:$0xff]  ;;  %v10987_v28 = vpop.f32.mrf.mxu3 }
 0x803   :  { %v10971_v37 = vmul.f32 %v1057_v9, %v14948_v5  ;;  %14952 = vst [vmem:[#allocation159_spill] sm:$0xff] %v10987_v28  ;;  %v2790_v9 = vld [vmem:[%s14437_s11 + $0x88] sm:$0xff]  ;;  %v1063_v5 = vld [vmem:[%s14438_s7 + $0x1f8] sm:$0xff]  ;;  %s8613_s7 = smov 4  }
 0x804   :  { %2981 = vmatpush.msrb.mxu3 %v10402_v31  ;;  %v2780_v31 = vld [vmem:[%s14437_s11 + $0x38] sm:$0xff] }
 0x805   :  { %v10965_v34 = vpop.f32.mrf.mxu2  ;;  %14949 = vst [vmem:[#allocation104_spill] sm:$0xff] %v10971_v37 }
 0x806   :  { %2982 = vmatpush.msrb.mxu3 %v10381_v2  ;;  %v10982_v14 = vpop.f32.mrf.mxu0  ;;  %v14950_v2 = vld [vmem:[#allocation106_spill] sm:$0xff] }
 0x807   :  { %2983 = vmatmul.f32.vlgmr.msrb.gmra.mxu3 %v2775_v58  ;;  %v10985_v60 = vmul.f32 %v1059_v42, %v14950_v2  ;;  %v14956_v42 = vld [vmem:[#allocation109_spill] sm:$0xff] }
 0x808   :  { %v11011_v2 = vmul.f32 %v1063_v5, %v14956_v42  ;;  %v2805_v5 = vld [vmem:[%s14437_s11 + $0x100] sm:$0xff] }
 0x809   :  { %14951 = vst [vmem:[#allocation106_spill] sm:$0xff] %v10985_v60 }
 0x80a   :  { %2760 = vmatmul.f32.gmra.mxu2 %v10971_v37  ;;  %v11001_v58 = vpop.f32.mrf.mxu3  ;;  %14957 = vst [vmem:[#allocation109_spill] sm:$0xff] %v11011_v2 }
 0x80b   :  { %14955 = vst [vmem:[#allocation160_spill] sm:$0xff] %v11001_v58 }
 0x80d   :  { %v10980_v15 = vpop.f32.mrf.mxu2 }
 0x80e   :  { %v2615_v25 = vpop.f32.mrf.mxu0 }
 0x80f   :  { %2986 = vmatmul.f32.gmra.mxu3 %v2780_v31 }
 0x812   :  { %2763 = vmatmul.f32.gmra.mxu2 %v10985_v60  ;;  %v11014_v56 = vpop.f32.mrf.mxu3 }
 0x813   :  { %14958 = vst [vmem:[#allocation161_spill] sm:$0xff] %v11014_v56 }
 0x815   :  { %v10996_v12 = vpop.f32.mrf.mxu2 }
 0x817   :  { %2989 = vmatmul.f32.gmra.mxu3 %v2785_v23  ;;  %v2618_v23 = vpop.f32.mrf.mxu0 }
 0x81a   :  { %2766 = vmatmul.f32.gmra.mxu2 %v10999_v4  ;;  %v11022_v58 = vpop.f32.mrf.mxu3 }
 0x81b   :  { %14959 = vst [vmem:[#allocation162_spill] sm:$0xff] %v11022_v58 }
 0x81d   :  { %v2719_v31 = vpop.f32.mrf.mxu2 }
 0x81f   :  { %2992 = vmatmul.f32.gmra.mxu3 %v2790_v9  ;;  %v2621_v38 = vpop.f32.mrf.mxu0 }
 0x822   :  { %2769 = vmatmul.f32.gmra.mxu2 %v11011_v2  ;;  %v11027_v36 = vpop.f32.mrf.mxu3 }
 0x825   :  { %v2722_v22 = vpop.f32.mrf.mxu2 }
 0x827   :  { %2995 = vmatmul.f32.gmra.mxu3 %v2795_v0  ;;  %v2624_v28 = vpop.f32.mrf.mxu0  ;;  %v2810_v0 = vld [vmem:[%s14437_s11 + $0x128] sm:$0xff] }
 0x82a   :  { %v11032_v4 = vpop.f32.mrf.mxu3 }
 0x82d   :  { %v2725_v9 = vpop.f32.mrf.mxu2 }
 0x82f   :  { %2998 = vmatmul.f32.gmra.mxu3 %v2800_v20  ;;  %v2627_v2 = vpop.f32.mrf.mxu0 }
 0x832   :  { %v11034_v60 = vpop.f32.mrf.mxu3 }
 0x835   :  { %v2728_v42 = vpop.f32.mrf.mxu2 }
 0x836   :  { %v2729_v53 = vadd.f32 %v2728_v42, %v2615_v25 }
 0x837   :  { %3001 = vmatmul.f32.gmra.mxu3 %v2805_v5  ;;  %v2630_v20 = vpop.f32.mrf.mxu0 }
 0x83a   :  { %v11036_v26 = vpop.f32.mrf.mxu3 }
 0x83d   :  { %v2731_v56 = vpop.f32.mrf.mxu2 }
 0x83e   :  { %v2732_v57 = vadd.f32 %v2731_v56, %v2618_v23 }
 0x83f   :  { %3004 = vmatmul.f32.gmra.mxu3 %v2810_v0  ;;  %v2633_v27 = vpop.f32.mrf.mxu0 }
 0x842   :  { %v11040_v63 = vpop.f32.mrf.mxu3 }
 0x845   :  { %v2734_v58 = vpop.f32.mrf.mxu2 }
 0x846   :  { %v2735_v61 = vadd.f32 %v2734_v58, %v2621_v38  ;;  %v2796_v58 = vld [vmem:[%s14437_s11 + $0xb8] sm:$0xff] }
 0x847   :  { %v11038_v30 = vpop.f32.mrf.mxu0 }
 0x84a   :  { %v11044_v7 = vpop.f32.mrf.mxu3 }
 0x84d   :  { %v2737_v37 = vpop.f32.mrf.mxu2 }
 0x84e   :  { %v2738_v19 = vadd.f32 %v2737_v37, %v2624_v28  ;;  %v2791_v28 = vld [vmem:[%s14437_s11 + $0x90] sm:$0xff] }
 0x84f   :  { %v11042_v3 = vpop.f32.mrf.mxu0 }
 0x855   :  { %v2740_v46 = vpop.f32.mrf.mxu2 }
 0x856   :  { %v2741_v39 = vadd.f32 %v2740_v46, %v2627_v2  ;;  %v2723_v46 = vadd.f32 %v2722_v22, %v10963_v24  ;;  %v2708_v22 = vadd.f32 %v10947_v13, %v10880_v48  ;;  %v2781_v48 = vld [vmem:[%s14437_s11 + $0x40] sm:$0xff] }
 0x857   :  { %v2642_v43 = vpop.f32.mrf.mxu0 }
 0x85d   :  { %v2743_v5 = vpop.f32.mrf.mxu2 }
 0x85e   :  { %v2744_v0 = vadd.f32 %v2743_v5, %v2630_v20  ;;  %v2801_v20 = vld [vmem:[%s14437_s11 + $0xe0] sm:$0xff] }
 0x865   :  { %v2746_v47 = vpop.f32.mrf.mxu2 }
 0x866   :  { %v2747_v55 = vadd.f32 %v2746_v47, %v2633_v27  ;;  %v11048_v47 = vpop.f32.mrf.mxu3 }
 0x868   :  { %3008 = vmatpush.msra.mxu3 %v2747_v55  ;;  %v2726_v55 = vadd.f32 %v2725_v9, %v10982_v14 }
 0x86a   :  { %3009 = vmatpush.msra.mxu3 %v2744_v0 }
 0x86c   :  { %3010 = vmatpush.msra.mxu3 %v2741_v39  ;;  %v2720_v39 = vadd.f32 %v2719_v31, %v10939_v44  ;;  %v2776_v44 = vld [vmem:[%s14437_s11 + $0x18] sm:$0xff] }
 0x86d   :  { %v11046_v1 = vpop.f32.mrf.mxu2 }
 0x86e   :  { %3011 = vmatpush.msra.mxu3 %v2738_v19  ;;  %v2717_v19 = vadd.f32 %v10996_v12, %v10921_v59  ;;  %v11057_v37 = vpop.f32.mrf.mxu3  ;;  %v2705_v59 = vadd.f32 %v10931_v35, %v10870_v29 }
 0x870   :  { %3012 = vmatpush.msra.mxu3 %v2735_v61  ;;  %v2645_v61 = vpop.f32.mrf.mxu0 }
 0x872   :  { %3013 = vmatpush.msra.mxu3 %v2732_v57  ;;  %v2714_v57 = vadd.f32 %v10980_v15, %v10901_v52  ;;  %v2702_v52 = vadd.f32 %v10914_v11, %v10858_v8  ;;  %v2786_v11 = vld [vmem:[%s14437_s11 + $0x68] sm:$0xff] }
 0x874   :  { %3014 = vmatpush.msra.mxu3 %v2729_v53  ;;  %v2711_v53 = vadd.f32 %v10965_v34, %v10892_v6 }
 0x875   :  { %v2752_v27 = vpop.f32.mrf.mxu2 }
 0x876   :  { %3015 = vmatpush.msra.mxu3 %v2726_v55  ;;  %v11070_v15 = vpop.f32.mrf.mxu3 }
 0x878   :  { %3016 = vmatpush.msra.mxu3 %v2723_v46  ;;  %v2648_v6 = vpop.f32.mrf.mxu0  ;;  %v2753_v46 = vadd.f32 %v2752_v27, %v11042_v3  ;;  %v2811_v3 = vld [vmem:[%s14437_s11 + $0x130] sm:$0xff] }
 0x879   :  { %v2787_v27 = vld [vmem:[%s14437_s11 + $0x70] sm:$0xff] }
 0x87a   :  { %3017 = vmatpush.msra.mxu3 %v2720_v39  ;;  %v2750_v39 = vadd.f32 %v11046_v1, %v11038_v30  ;;  %v2782_v1 = vld [vmem:[%s14437_s11 + $0x48] sm:$0xff] }
 0x87c   :  { %3018 = vmatpush.msra.mxu3 %v2717_v19  ;;  %v2806_v19 = vld [vmem:[%s14437_s11 + $0x108] sm:$0xff] }
 0x87d   :  { %v2755_v38 = vpop.f32.mrf.mxu2 }
 0x87e   :  { %3019 = vmatpush.msra.mxu3 %v2714_v57  ;;  %v11075_v35 = vpop.f32.mrf.mxu3  ;;  %v2756_v55 = vadd.f32 %v2755_v38, %v2642_v43  ;;  %v2777_v57 = vld [vmem:[%s14437_s11 + $0x20] sm:$0xff]  ;;  %v2792_v38 = vld [vmem:[%s14437_s11 + $0x98] sm:$0xff] }
 0x880   :  { %3020 = vmatpush.msra.mxu3 %v2711_v53  ;;  %v2651_v8 = vpop.f32.mrf.mxu0 }
 0x882   :  { %3021 = vmatpush.msra.mxu3 %v2708_v22  ;;  %v2797_v22 = vld [vmem:[%s14437_s11 + $0xc0] sm:$0xff] }
 0x884   :  { %3022 = vmatpush.msra.mxu3 %v2705_v59  ;;  %v2802_v59 = vld [vmem:[%s14437_s11 + $0xe8] sm:$0xff] }
 0x885   :  { %v2758_v24 = vpop.f32.mrf.mxu2 }
 0x886   :  { %3023 = vmatpush.msra.mxu3 %v2702_v52  ;;  %v11080_v34 = vpop.f32.mrf.mxu3  ;;  %v2759_v0 = vadd.f32 %v2758_v24, %v2645_v61 }
 0x887   :  { %3024 = vmatmul.f32.vlgmr.msra.gmra.mxu3 %v2776_v44  ;;  %v2807_v44 = vld [vmem:[%s14437_s11 + $0x110] sm:$0xff] }
 0x888   :  { %v2654_v14 = vpop.f32.mrf.mxu0 }
 0x88d   :  { %v2761_v29 = vpop.f32.mrf.mxu2 }
 0x88e   :  { %v11085_v25 = vpop.f32.mrf.mxu3  ;;  %v2762_v42 = vadd.f32 %v2761_v29, %v2648_v6  ;;  %v2812_v6 = vld [vmem:[%s14437_s11 + $0x138] sm:$0xff] }
 0x88f   :  { %3027 = vmatmul.f32.gmra.mxu3 %v2781_v48 }
 0x890   :  { %v2657_v31 = vpop.f32.mrf.mxu0 }
 0x895   :  { %v2764_v13 = vpop.f32.mrf.mxu2 }
 0x896   :  { %v2765_v9 = vadd.f32 %v2764_v13, %v2651_v8  ;;  %v11093_v5 = vpop.f32.mrf.mxu3 }
 0x897   :  { %3030 = vmatmul.f32.gmra.mxu3 %v2786_v11 }
 0x89d   :  { %v2767_v12 = vpop.f32.mrf.mxu2 }
 0x89e   :  { %v2768_v56 = vadd.f32 %v2767_v12, %v2654_v14  ;;  %v2958_v43 = vpop.f32.mrf.mxu3 }
 0x89f   :  { %3033 = vmatmul.f32.gmra.mxu3 %v2791_v28 }
 0x8a5   :  { %v2770_v2 = vpop.f32.mrf.mxu2 }
 0x8a6   :  { %v2771_v23 = vadd.f32 %v2770_v2, %v2657_v31  ;;  %v11112_v30 = vpop.f32.mrf.mxu3  ;;  %v2849_v31 = vpop.permute.xlu2 %2848 }
 0x8a7   :  { %3036 = vmatmul.f32.gmra.mxu3 %v2796_v58  ;;  %v2854_v2 = vpop.permute.xlu0 %2853 }
 0x8a8   :  { %3057 = vmatpush.msra.mxu1 %v2771_v23 }
 0x8aa   :  { %3058 = vmatpush.msra.mxu1 %v2768_v56 }
 0x8ac   :  { %3059 = vmatpush.msra.mxu1 %v2765_v9 }
 0x8ae   :  { %3060 = vmatpush.msra.mxu1 %v2762_v42  ;;  %v11118_v61 = vpop.f32.mrf.mxu3  ;;  %v2834_v9 = vpop.permute.xlu2 %2833 }
 0x8af   :  { %3039 = vmatmul.f32.gmra.mxu3 %v2801_v20  ;;  %v2839_v42 = vpop.permute.xlu0 %2838 }
 0x8b0   :  { %3061 = vmatpush.msra.mxu1 %v2759_v0  ;;  %v2909_v0 = vadd.f32 %v11034_v60, %v2834_v9 }
 0x8b2   :  { %3062 = vmatpush.msra.mxu1 %v2756_v55  ;;  %v2912_v55 = vadd.f32 %v11036_v26, %v2839_v42 }
 0x8b4   :  { %3063 = vmatpush.msra.mxu1 %v2753_v46  ;;  %v2950_v46 = vadd.f32 %v11080_v34, %v2909_v0 }
 0x8b6   :  { %3064 = vmatpush.msra.mxu1 %v2750_v39  ;;  %v11124_v53 = vpop.f32.mrf.mxu3  ;;  %v2953_v39 = vadd.f32 %v11085_v25, %v2912_v55 }
 0x8b7   :  { %3042 = vmatmul.f32.gmra.mxu3 %v2806_v19  ;;  %7474 = vmatmul.msk.f32.vlgmr.msra.gmra.mxu1 %vm677_vm3, %v2777_v57  ;;  %v2859_v19 = vpop.permute.xlu1 %2858 }
 0x8be   :  { %v11133_v52 = vpop.f32.mrf.mxu3 }
 0x8bf   :  { %3045 = vmatmul.f32.gmra.mxu3 %v2811_v3  ;;  %7475 = vmatmul.msk.f32.gmra.mxu1 %vm677_vm3, %v2782_v1  ;;  %v2844_v26 = vpop.permute.xlu1 %2843 }
 0x8c6   :  { %v2990_v24 = vpop.f32.mrf.mxu3 }
 0x8c7   :  { %7476 = vmatmul.msk.f32.gmra.mxu1 %vm677_vm3, %v2787_v27  ;;  %v2991_v57 = vadd.f32 %v2990_v24, %v2950_v46  ;;  %v2915_v24 = vadd.f32 %v11040_v63, %v2844_v26  ;;  %v2921_v63 = vadd.f32 %v11048_v47, %v2854_v2 }
 0x8ce   :  { %v2993_v48 = vpop.f32.mrf.mxu3 }
 0x8cf   :  { %7477 = vmatmul.msk.f32.gmra.mxu1 %vm677_vm3, %v2792_v38  ;;  %v2994_v3 = vadd.f32 %v2993_v48, %v2953_v39  ;;  %v2956_v48 = vadd.f32 %v11093_v5, %v2915_v24  ;;  %v2924_v5 = vadd.f32 %v11057_v37, %v2859_v19 }
 0x8d6   :  { %v2996_v29 = vpop.f32.mrf.mxu3 }
 0x8d7   :  { %7478 = vmatmul.msk.f32.gmra.mxu1 %vm677_vm3, %v2797_v22 }
 0x8de   :  { %v2999_v8 = vpop.f32.mrf.mxu3 }
 0x8df   :  { %7479 = vmatmul.msk.f32.gmra.mxu1 %vm677_vm3, %v2802_v59 }
 0x8e6   :  { %v3002_v11 = vpop.f32.mrf.mxu3 }
 0x8e7   :  { %7480 = vmatmul.msk.f32.gmra.mxu1 %vm677_vm3, %v2807_v44 }
 0x8ee   :  { %v3005_v13 = vpop.f32.mrf.mxu3 }
 0x8ef   :  { %7481 = vmatmul.msk.f32.gmra.mxu1 %vm677_vm3, %v2812_v6  ;;  %v2918_v6 = vadd.f32 %v11044_v7, %v2849_v31 }
 0x90a   :  { %v11144_v14 = vpop.f32.mrf.mxu3 }
 0x912   :  { %v11146_v28 = vpop.f32.mrf.mxu3 }
 0x91a   :  { %v3031_v58 = vpop.f32.mrf.mxu3 }
 0x91b   :  { %v3032_v27 = vadd.f32 %v3031_v58, %v2991_v57  ;;  %v2959_v58 = vadd.f32 %v2958_v43, %v2918_v6  ;;  %v2962_v43 = vadd.f32 %v11112_v30, %v2921_v63 }
 0x91d   :  { %v3000_v9 = vadd.f32 %v2999_v8, %v2959_v58  ;;  %v3003_v31 = vadd.f32 %v3002_v11, %v2962_v43 }
 0x922   :  { %v3034_v56 = vpop.f32.mrf.mxu3 }
 0x923   :  { %v3035_v38 = vadd.f32 %v3034_v56, %v2994_v3  ;;  %v2997_v56 = vadd.f32 %v2996_v29, %v2956_v48  ;;  %v2965_v29 = vadd.f32 %v11118_v61, %v2924_v5 }
 0x925   :  { %v3006_v3 = vadd.f32 %v3005_v13, %v2965_v29 }
 0x92a   :  { %v3037_v1 = vpop.f32.mrf.mxu3 }
 0x92b   :  { %v3038_v42 = vadd.f32 %v3037_v1, %v2997_v56  ;;  %v2829_v1 = vpop.permute.xlu1 %2828 }
 0x932   :  { %v3040_v34 = vpop.f32.mrf.mxu3 }
 0x934   :  { %v11148_v12 = vpop.f32.mrf.mxu1 }
 0x93a   :  { %v3043_v39 = vpop.f32.mrf.mxu3 }
 0x93c   :  { %v11150_v23 = vpop.f32.mrf.mxu1 }
 0x942   :  { %v3046_v8 = vpop.f32.mrf.mxu3 }
 0x943   :  { %v3047_v26 = vadd.f32 %v3046_v8, %v3006_v3 }
 0x944   :  { %v3072_v20 = vpop.f32.mrf.mxu1 }
 0x945   :  { %v11156_v59 = vadd.f32 %v3072_v20, %v3032_v27  ;;  %v3041_v20 = vadd.f32 %v3040_v34, %v3000_v9  ;;  %v2824_v27 = vpop.permute.xlu0 %2823 }
 0x946   :  { %v2903_v34 = vadd.f32 %v11027_v36, %v2824_v27 }
 0x947   :  { %14960 = vst [vmem:[#allocation163_spill] sm:$0xff] %v11156_v59 }
 0x948   :  { %v2944_v30 = vadd.f32 %v11070_v15, %v2903_v34 }
 0x94c   :  { %v3075_v22 = vpop.f32.mrf.mxu1 }
 0x94d   :  { %v11158_v44 = vadd.f32 %v3075_v22, %v3035_v38  ;;  %v2906_v38 = vadd.f32 %v11032_v4, %v2829_v1  ;;  %v3044_v22 = vadd.f32 %v3043_v39, %v3003_v31  ;;  %v2985_v4 = vadd.f32 %v11124_v53, %v2944_v30 }
 0x94f   :  { %14961 = vst [vmem:[#allocation164_spill] sm:$0xff] %v11158_v44  ;;  %v11162_v60 = vpack.i.bf16 %v11156_v59, %v11158_v44  ;;  %v2947_v47 = vadd.f32 %v11075_v35, %v2906_v38  ;;  %v3026_v36 = vadd.f32 %v11144_v14, %v2985_v4 }
 0x951   :  { %7883 = vrot.lane.b32.xlu0 %v11162_v60, %s14585_s30  ;;  %v2988_v61 = vadd.f32 %v11133_v52, %v2947_v47  ;;  %v11211_v35 = vadd.f32 %v11148_v12, %v3026_v36 }
 0x953   :  { %v3029_v13 = vadd.f32 %v11146_v28, %v2988_v61  ;;  %14969 = vst [vmem:[#allocation172_spill] sm:$0xff] %v11211_v35 }
 0x954   :  { %v3078_v25 = vpop.f32.mrf.mxu1 }
 0x955   :  { %v11169_v55 = vadd.f32 %v3078_v25, %v3038_v42  ;;  %v11208_v15 = vadd.f32 %v11150_v23, %v3029_v13 }
 0x957   :  { %14962 = vst [vmem:[#allocation165_spill] sm:$0xff] %v11169_v55  ;;  %v11215_v53 = vpack.i.bf16 %v11211_v35, %v11208_v15 }
 0x958   :  { %14968 = vst [vmem:[#allocation171_spill] sm:$0xff] %v11208_v15 }
 0x959   :  { %14970 = vst [vmem:[#allocation173_spill] sm:$0xff] %v11215_v53 }
 0x95c   :  { %v3081_v0 = vpop.f32.mrf.mxu1 }
 0x95d   :  { %v11171_v46 = vadd.f32 %v3081_v0, %v3041_v20 }
 0x95f   :  { %14963 = vst [vmem:[#allocation166_spill] sm:$0xff] %v11171_v46  ;;  %v11175_v57 = vpack.i.bf16 %v11169_v55, %v11171_v46 }
 0x961   :  { %14964 = vst [vmem:[#allocation167_spill] sm:$0xff] %v11175_v57  ;;  %7878 = vrot.lane.b32.xlu1 %v11175_v57, %s14585_s30  ;;  %7898 = vrot.lane.b32.xlu0 %v11175_v57, %s8607_s29 }
 0x964   :  { %v3084_v7 = vpop.f32.mrf.mxu1 }
 0x965   :  { %v11188_v2 = vadd.f32 %v3084_v7, %v3044_v22 }
 0x967   :  { %14965 = vst [vmem:[#allocation168_spill] sm:$0xff] %v11188_v2 }
 0x96c   :  { %v3087_v25 = vpop.f32.mrf.mxu1 }
 0x96d   :  { %v11190_v37 = vadd.f32 %v3087_v25, %v3047_v26  ;;  %v3315_v25 = vld [vmem:[%s14434_s12 + $0x288] sm:$0xff] }
 0x96f   :  { %14966 = vst [vmem:[#allocation169_spill] sm:$0xff] %v11190_v37  ;;  %v11196_v11 = vpack.i.bf16 %v11188_v2, %v11190_v37 }
 0x971   :  { %14967 = vst [vmem:[#allocation170_spill] sm:$0xff] %v11196_v11  ;;  %7873 = vrot.lane.b32.xlu2 %v11196_v11, %s14585_s30  ;;  %7893 = vrot.lane.b32.xlu1 %v11196_v11, %s8607_s29 }
 0x972   :  { %7913 = vrot.lane.b32.xlu0 %v11196_v11, %s8605_s6 }
 0x979   :  { %7908 = vrot.lane.b32.xlu1 %v11215_v53, %s8607_s29  ;;  %7888 = vrot.lane.b32.xlu2 %v11215_v53, %s14585_s30  ;;  %s15040_s30 = smov 112  }
 0x97a   :  { %7928 = vrot.lane.b32.xlu0 %v11215_v53, %s8605_s6 }
 0x981   :  { %7923 = vrot.lane.b32.xlu1 %v11162_v60, %s8605_s6  ;;  %7903 = vrot.lane.b32.xlu2 %v11162_v60, %s8607_s29 }
 0x982   :  { %7943 = vrot.lane.b32.xlu0 %v11162_v60, %s8600_s23 }
 0x989   :  { %7938 = vrot.lane.b32.xlu1 %v11175_v57, %s8600_s23  ;;  %7918 = vrot.lane.b32.xlu2 %v11175_v57, %s8605_s6 }
 0x991   :  { %7933 = vrot.lane.b32.xlu2 %v11196_v11, %s8600_s23 }
 0x999   :  { %7948 = vrot.lane.b32.xlu2 %v11215_v53, %s8600_s23 }
 0x9c3   :  { %v7884_v23 = vpop.permute.xlu0 %7883 }
 0x9c4   :  { %v7885_v48 = vunpack.i.l.bf16 %v7884_v23  ;;  %v7886_v58 = vunpack.i.h.bf16 %v7884_v23 }
 0x9cb   :  { %v7874_v52 = vpop.permute.xlu2 %7873 }
 0x9cc   :  { %v7875_v14 = vunpack.i.l.bf16 %v7874_v52  ;;  %v7876_v28 = vunpack.i.h.bf16 %v7874_v52 }
 0x9ce   :  { %3443 = vmatpush.msra.mxu2 %v7875_v14  ;;  %v3320_v14 = vld [vmem:[%s14434_s12 + $0x2b0] sm:$0xff] }
 0x9d0   :  { %3444 = vmatpush.msra.mxu2 %v7876_v28 }
 0x9d3   :  { %v7879_v12 = vpop.permute.xlu1 %7878  ;;  %v7889_v24 = vpop.permute.xlu2 %7888 }
 0x9d4   :  { %v7880_v19 = vunpack.i.l.bf16 %v7879_v12  ;;  %v7881_v6 = vunpack.i.h.bf16 %v7879_v12  ;;  %v7899_v56 = vpop.permute.xlu0 %7898  ;;  %v7890_v9 = vunpack.i.l.bf16 %v7889_v24  ;;  %v7891_v20 = vunpack.i.h.bf16 %v7889_v24 }
 0x9d5   :  { %v7900_v8 = vunpack.i.l.bf16 %v7899_v56  ;;  %v7901_v3 = vunpack.i.h.bf16 %v7899_v56 }
 0x9d6   :  { %3445 = vmatpush.msra.mxu2 %v7880_v19 }
 0x9d8   :  { %3446 = vmatpush.msra.mxu2 %v7881_v6 }
 0x9da   :  { %3447 = vmatpush.msra.mxu2 %v7885_v48  ;;  %v3325_v48 = vld [vmem:[%s14434_s12 + $0x2d8] sm:$0xff] }
 0x9db   :  { %v7904_v42 = vpop.permute.xlu2 %7903 }
 0x9dc   :  { %3448 = vmatpush.msra.mxu2 %v7886_v58  ;;  %v7905_v38 = vunpack.i.l.bf16 %v7904_v42  ;;  %v7906_v22 = vunpack.i.h.bf16 %v7904_v42 }
 0x9de   :  { %3449 = vmatpush.msra.mxu2 %v7890_v9  ;;  %v11249_v9 = vld [vmem:[%s14439_s8] sm:$0x3]  ;;  %s8615_s8 = smov 8  }
 0x9df   :  { %3628 = vrot.lane.b32.xlu1 %v11249_v9, %s8612_s4  ;;  %3631 = vrot.lane.b32.xlu0 %v11249_v9, %s8613_s7  ;;  %s8618_s4 = smov 14   ;;  %s8619_s7 = smov 16  }
 0x9e0   :  { %3450 = vmatpush.msra.mxu2 %v7891_v20  ;;  %3634 = vrot.lane.b32.xlu2 %v11249_v9, %s8614_s9  ;;  %s8620_s9 = smov 18  }
 0x9e3   :  { %v7894_v0 = vpop.permute.xlu1 %7893  ;;  %v7919_v43 = vpop.permute.xlu2 %7918 }
 0x9e4   :  { %v7895_v39 = vunpack.i.l.bf16 %v7894_v0  ;;  %v7914_v7 = vpop.permute.xlu0 %7913  ;;  %v7896_v5 = vunpack.i.h.bf16 %v7894_v0  ;;  %v7920_v31 = vunpack.i.l.bf16 %v7919_v43  ;;  %v7921_v1 = vunpack.i.h.bf16 %v7919_v43 }
 0x9e5   :  { %v7915_v63 = vunpack.i.l.bf16 %v7914_v7  ;;  %v7916_v29 = vunpack.i.h.bf16 %v7914_v7  ;;  %v3673_v7 = vsel %vm3671_vm5, %v11208_v15, 0.0  ;;  %v3620_v43 = vrot.slane %v11249_v9, 2 }
 0x9e6   :  { %3451 = vmatpush.msra.mxu2 %v7895_v39  ;;  %v3330_v39 = vld [vmem:[%s14434_s12 + $0x300] sm:$0xff] }
 0x9e7   :  { %3484 = vmatpush.msrb.mxu3 %v7915_v63  ;;  %v3616_v63 = vrot.slane %v11249_v9, 6  ;;  %3637 = vrot.lane.b32.xlu1 %v11249_v9, %s8615_s8 }
 0x9e8   :  { %3452 = vmatpush.msra.mxu2 %v7896_v5  ;;  %v3618_v5 = vrot.slane %v11249_v9, 4  ;;  %3640 = vrot.lane.b32.xlu0 %v11249_v9, %s8616_s22 }
 0x9e9   :  { %3485 = vmatpush.msrb.mxu3 %v7916_v29  ;;  %v3672_v29 = vsel %vm3671_vm5, %v11211_v35, 0.0  ;;  %3643 = vrot.lane.b32.xlu2 %v11249_v9, %s8617_s0 }
 0x9ea   :  { %3453 = vmatpush.msra.mxu2 %v7900_v8  ;;  %v3675_v8 = vsel %vm3671_vm5, %v11156_v59, 0.0 }
 0x9eb   :  { %3486 = vmatpush.msrb.mxu3 %v7920_v31  ;;  %v7909_v27 = vpop.permute.xlu1 %7908  ;;  %v7934_v36 = vpop.permute.xlu2 %7933  ;;  %v3623_v31 = vsel %vm3622_vm6, %v11249_v9, %v3616_v63  ;;  %v3336_v63 = vld [vmem:[%s14434_s12 + $0x330] sm:$0xff] }
 0x9ec   :  { %3454 = vmatpush.msra.mxu2 %v7901_v3  ;;  %v7910_v26 = vunpack.i.l.bf16 %v7909_v27  ;;  %v7911_v34 = vunpack.i.h.bf16 %v7909_v27  ;;  %v7929_v61 = vpop.permute.xlu0 %7928  ;;  %v7935_v28 = vunpack.i.l.bf16 %v7934_v36  ;;  %v7936_v23 = vunpack.i.h.bf16 %v7934_v36 }
 0x9ed   :  { %3487 = vmatpush.msrb.mxu3 %v7921_v1  ;;  %v7930_v13 = vunpack.i.l.bf16 %v7929_v61  ;;  %v7931_v52 = vunpack.i.h.bf16 %v7929_v61  ;;  %v3674_v3 = vadd.f32 %v3673_v7, %v3672_v29  ;;  %v3625_v1 = vsel %vm3624_vm7, %v3623_v31, %v3618_v5 }
 0x9ee   :  { %3455 = vmatpush.msra.mxu2 %v7905_v38  ;;  %v3677_v27 = vsel %vm3671_vm5, %v11158_v44, 0.0  ;;  %v11275_v38 = vsel %vm3626_vm8, %v3625_v1, %v3620_v43  ;;  %v3683_v61 = vsel %vm3671_vm5, %v11188_v2, 0.0 }
 0x9ef   :  { %14971 = vst [vmem:[#allocation174_spill] sm:$0xff] %v11275_v38  ;;  %3646 = vrot.lane.b32.xlu1 %v11249_v9, %s8618_s4 }
 0x9f0   :  { %3456 = vmatpush.msra.mxu2 %v7906_v22  ;;  %v3676_v22 = vadd.f32 %v3675_v8, %v3674_v3  ;;  %3649 = vrot.lane.b32.xlu0 %v11249_v9, %s8619_s7 }
 0x9f1   :  { %3652 = vrot.lane.b32.xlu2 %v11249_v9, %s8620_s9 }
 0x9f2   :  { %3457 = vmatpush.msra.mxu2 %v7910_v26  ;;  %v3335_v26 = vld [vmem:[%s14434_s12 + $0x328] sm:$0xff] }
 0x9f3   :  { %v7924_v47 = vpop.permute.xlu1 %7923  ;;  %v7949_v56 = vpop.permute.xlu2 %7948 }
 0x9f4   :  { %v7925_v30 = vunpack.i.l.bf16 %v7924_v47  ;;  %3458 = vmatpush.msra.mxu2 %v7911_v34  ;;  %v7926_v4 = vunpack.i.h.bf16 %v7924_v47  ;;  %v7944_v24 = vpop.permute.xlu0 %7943  ;;  %v7950_v20 = vunpack.i.l.bf16 %v7949_v56  ;;  %v7951_v0 = vunpack.i.h.bf16 %v7949_v56  ;;  %v3316_v56 = vld [vmem:[%s14434_s12 + $0x290] sm:$0xff] }
 0x9f5   :  { %3459 = vmatmul.f32.vlgmr.msra.gmra.mxu2 %v3315_v25  ;;  %v7945_v58 = vunpack.i.l.bf16 %v7944_v24  ;;  %v7946_v42 = vunpack.i.h.bf16 %v7944_v24  ;;  %v3679_v34 = vsel %vm3671_vm5, %v11169_v55, 0.0  ;;  %v3678_v25 = vadd.f32 %v3677_v27, %v3676_v22  ;;  %v3350_v24 = vld [vmem:[%s14434_s12 + $0x3a0] sm:$0xff]  ;;  %v3341_v27 = vld [vmem:[%s14434_s12 + $0x358] sm:$0xff] }
 0x9f6   :  { %3488 = vmatpush.msrb.mxu3 %v7925_v30  ;;  %7482 = vmatpush.msk.msrb.mxu2 %vm3624_vm7, %v3623_v31  ;;  %v3681_v47 = vsel %vm3671_vm5, %v11171_v46, 0.0 }
 0x9f7   :  { %v3680_v30 = vadd.f32 %v3679_v34, %v3678_v25 }
 0x9f8   :  { %3489 = vmatpush.msrb.mxu3 %v7926_v4  ;;  %3713 = vmatpush.msrb.mxu2 %v11275_v38 }
 0x9f9   :  { %v3682_v4 = vadd.f32 %v3681_v47, %v3680_v30 }
 0x9fa   :  { %3490 = vmatpush.msrb.mxu3 %v7930_v13  ;;  %3714 = vmatpush.msrb.mxu2 %v11275_v38  ;;  %v3685_v13 = vsel %vm3671_vm5, %v11190_v37, 0.0 }
 0x9fb   :  { %v7939_v12 = vpop.permute.xlu1 %7938  ;;  %v3684_v36 = vadd.f32 %v3683_v61, %v3682_v4  ;;  %v3346_v61 = vld [vmem:[%s14434_s12 + $0x380] sm:$0xff] }
 0x9fc   :  { %3491 = vmatpush.msrb.mxu3 %v7931_v52  ;;  %v7940_v19 = vunpack.i.l.bf16 %v7939_v12  ;;  %v7941_v6 = vunpack.i.h.bf16 %v7939_v12  ;;  %7486 = vmatpush.msk.msra.mxu2 %vm3624_vm7, %v3623_v31  ;;  %v3340_v52 = vld [vmem:[%s14434_s12 + $0x350] sm:$0xff]  ;;  %v3345_v12 = vld [vmem:[%s14434_s12 + $0x378] sm:$0xff] }
 0x9fd   :  { %3462 = vmatmul.f32.gmra.mxu2 %v3320_v14  ;;  %v3686_v14 = vadd.f32 %v3685_v13, %v3684_v36 }
 0x9fe   :  { %3492 = vmatpush.msrb.mxu3 %v7935_v28  ;;  %3801 = vmatpush.msra.mxu2 %v11275_v38 }
 0x9ff   :  { %v3687_v28 = vrot.slane %v3686_v14, 4 }
 0xa00   :  { %3493 = vmatpush.msrb.mxu3 %v7936_v23  ;;  %3802 = vmatpush.msra.mxu2 %v11275_v38 }
 0xa01   :  { %v3688_v23 = vadd.f32 %v3687_v28, %v3686_v14 }
 0xa02   :  { %3494 = vmatpush.msrb.mxu3 %v7940_v19 }
 0xa03   :  { %v3689_v19 = vrot.slane %v3688_v23, 2 }
 0xa04   :  { %3495 = vmatpush.msrb.mxu3 %v7941_v6 }
 0xa05   :  { %3465 = vmatmul.f32.gmra.mxu2 %v3325_v48  ;;  %v3690_v6 = vadd.f32 %v3689_v19, %v3688_v23 }
 0xa06   :  { %3496 = vmatpush.msrb.mxu3 %v7945_v58 }
 0xa07   :  { %v3691_v48 = vrot.slane %v3690_v6, 1 }
 0xa08   :  { %3497 = vmatpush.msrb.mxu3 %v7946_v42  ;;  %v3321_v42 = vld [vmem:[%s14434_s12 + $0x2b8] sm:$0xff] }
 0xa09   :  { %v3692_v58 = vadd.f32 %v3691_v48, %v3690_v6 }
 0xa0a   :  { %3498 = vmatpush.msrb.mxu3 %v7950_v20  ;;  %v3326_v20 = vld [vmem:[%s14434_s12 + $0x2e0] sm:$0xff] }
 0xa0c   :  { %3499 = vmatpush.msrb.mxu3 %v7951_v0  ;;  %v3331_v0 = vld [vmem:[%s14434_s12 + $0x308] sm:$0xff] }
 0xa0d   :  { %3468 = vmatmul.f32.gmra.mxu2 %v3330_v39  ;;  %3500 = vmatmul.f32.vlgmr.msrb.gmra.mxu3 %v3316_v56 }
 0xa15   :  { %3471 = vmatmul.f32.gmra.mxu2 %v3335_v26  ;;  %3503 = vmatmul.f32.gmra.mxu3 %v3321_v42 }
 0xa1d   :  { %3474 = vmatmul.f32.gmra.mxu2 %v3340_v52  ;;  %3506 = vmatmul.f32.gmra.mxu3 %v3326_v20 }
 0xa25   :  { %3477 = vmatmul.f32.gmra.mxu2 %v3345_v12  ;;  %3509 = vmatmul.f32.gmra.mxu3 %v3331_v0  ;;  %v3351_v12 = vld [vmem:[%s14434_s12 + $0x3a8] sm:$0xff] }
 0xa2d   :  { %3480 = vmatmul.f32.gmra.mxu2 %v3350_v24  ;;  %3512 = vmatmul.f32.gmra.mxu3 %v3336_v63 }
 0xa35   :  { %7483 = vmatmul.msk.f32.vlgmr.msrb.gmra.mxu2 %vm3671_vm5, %v3692_v58  ;;  %3515 = vmatmul.f32.gmra.mxu3 %v3341_v27 }
 0xa3a   :  { %v3635_v29 = vpop.permute.xlu2 %3634 }
 0xa3d   :  { %3518 = vmatmul.f32.gmra.mxu3 %v3346_v61 }
 0xa43   :  { %v3644_v34 = vpop.permute.xlu2 %3643 }
 0xa45   :  { %3521 = vmatmul.f32.gmra.mxu3 %v3351_v12 }
 0xa4b   :  { %v3653_v36 = vpop.permute.xlu2 %3652 }
 0xa51   :  { %v3629_v7 = vpop.permute.xlu1 %3628  ;;  %v3632_v43 = vpop.permute.xlu0 %3631 }
 0xa52   :  { %v3656_v5 = vsel %vm3655_vm9, %v11249_v9, %v3629_v7 }
 0xa53   :  { %v3658_v8 = vsel %vm3657_vm10, %v3656_v5, %v3632_v43 }
 0xa54   :  { %v3660_v31 = vsel %vm3659_vm11, %v3658_v8, %v3635_v29 }
 0xa59   :  { %v3638_v1 = vpop.permute.xlu1 %3637 }
 0xa5a   :  { %v3661_v22 = vsel %vm72_vm0, %v3660_v31, %v3638_v1  ;;  %v3641_v26 = vpop.permute.xlu0 %3640 }
 0xa5b   :  { %v3663_v9 = vsel %vm3662_vm12, %v3661_v22, %v3641_v26 }
 0xa5c   :  { %v3665_v25 = vsel %vm3664_vm13, %v3663_v9, %v3644_v34 }
 0xa61   :  { %v3647_v30 = vpop.permute.xlu1 %3646 }
 0xa62   :  { %v11336_v4 = vsel %vm3666_vm14, %v3665_v25, %v3647_v30  ;;  %v3650_v13 = vpop.permute.xlu0 %3649 }
 0xa63   :  { %14975 = vst [vmem:[#allocation178_spill] sm:$0xff] %v11336_v4  ;;  %v3668_v52 = vsel %vm1425_vm4, %v11336_v4, %v3650_v13 }
 0xa64   :  { %v3670_v14 = vsel %vm3669_vm15, %v3668_v52, %v3653_v36 }
 0xa65   :  { %7484 = vmatpush.msk.msra.mxu3 %vm3622_vm6, %v3670_v14 }
 0xa67   :  { %7488 = vmatpush.msk.msrb.mxu3 %vm3622_vm6, %v3670_v14 }
 0xa78   :  { %v11318_v39 = vpop.f32.mrf.mxu2 }
 0xa79   :  { %14972 = vst [vmem:[#allocation175_spill] sm:$0xff] %v11318_v39 }
 0xa80   :  { %v11325_v3 = vpop.f32.mrf.mxu2 }
 0xa81   :  { %14973 = vst [vmem:[#allocation176_spill] sm:$0xff] %v11325_v3 }
 0xa88   :  { %v11331_v47 = vpop.f32.mrf.mxu2 }
 0xa89   :  { %14974 = vst [vmem:[#allocation177_spill] sm:$0xff] %v11331_v47 }
 0xa90   :  { %v11342_v28 = vpop.f32.mrf.mxu2  ;;  %v11356_v56 = vpop.f32.mrf.mxu3 }
 0xa91   :  { %14976 = vst [vmem:[#allocation179_spill] sm:$0xff] %v11342_v28  ;;  %v3819_v28 = vld [vmem:[%s14441_s16 + $0x18] sm:$0xff] }
 0xa92   :  { %14981 = vst [vmem:[#allocation184_spill] sm:$0xff] %v11356_v56 }
 0xa98   :  { %v11347_v23 = vpop.f32.mrf.mxu2  ;;  %v11358_v42 = vpop.f32.mrf.mxu3 }
 0xa99   :  { %14977 = vst [vmem:[#allocation180_spill] sm:$0xff] %v11347_v23 }
 0xa9a   :  { %14982 = vst [vmem:[#allocation185_spill] sm:$0xff] %v11358_v42 }
 0xaa0   :  { %v11349_v19 = vpop.f32.mrf.mxu2  ;;  %v11360_v20 = vpop.f32.mrf.mxu3 }
 0xaa1   :  { %14978 = vst [vmem:[#allocation181_spill] sm:$0xff] %v11349_v19 }
 0xaa2   :  { %14983 = vst [vmem:[#allocation186_spill] sm:$0xff] %v11360_v20 }
 0xaa8   :  { %v11351_v24 = vpop.f32.mrf.mxu2  ;;  %v11362_v0 = vpop.f32.mrf.mxu3 }
 0xaa9   :  { %14979 = vst [vmem:[#allocation182_spill] sm:$0xff] %v11351_v24 }
 0xaaa   :  { %14984 = vst [vmem:[#allocation187_spill] sm:$0xff] %v11362_v0 }
 0xab0   :  { %v11353_v6 = vpop.f32.mrf.mxu2  ;;  %v11364_v7 = vpop.f32.mrf.mxu3 }
 0xab1   :  { %14980 = vst [vmem:[#allocation183_spill] sm:$0xff] %v11353_v6 }
 0xab2   :  { %14985 = vst [vmem:[#allocation188_spill] sm:$0xff] %v11364_v7 }
 0xab8   :  { %v3716_v48 = vpop.f32.mrf.mxu2  ;;  %v11366_v63 = vpop.f32.mrf.mxu3 }
 0xab9   :  { %v3719_v58 = vmul.f32 0.0015625, %v3716_v48  ;;  %14986 = vst [vmem:[#allocation189_spill] sm:$0xff] %v11366_v63 }
 0xabb   :  { %7485 = vmatmul.msk.f32.vlgmr.msra.gmra.mxu3 %vm3655_vm9, %v3719_v58 }
 0xac0   :  { %v11368_v5 = vpop.f32.mrf.mxu3 }
 0xac1   :  { %14987 = vst [vmem:[#allocation190_spill] sm:$0xff] %v11368_v5 }
 0xac8   :  { %v11370_v43 = vpop.f32.mrf.mxu3 }
 0xac9   :  { %14988 = vst [vmem:[#allocation191_spill] sm:$0xff] %v11370_v43  ;;  %v3816_v43 = vld [vmem:[%s14441_s16] sm:$0xff] }
 0xb3e   :  { %v3743_v29 = vpop.f32.mrf.mxu3 }
 0xb3f   :  { %v3746_v8 = vperm.slane %v3743_v29, 0 }
 0xb41   :  { %v11373_v31 = vsub.f32 %v11211_v35, %v3746_v8  ;;  %v11376_v1 = vsub.f32 %v11208_v15, %v3746_v8  ;;  %v11379_v27 = vsub.f32 %v11156_v59, %v3746_v8  ;;  %v11382_v22 = vsub.f32 %v11158_v44, %v3746_v8 }
 0xb42   :  { %v3751_v26 = vsub.f32 %v11169_v55, %v3746_v8  ;;  %v3752_v30 = vsub.f32 %v11171_v46, %v3746_v8  ;;  %v3753_v14 = vsub.f32 %v11188_v2, %v3746_v8  ;;  %v3754_v29 = vsub.f32 %v11190_v37, %v3746_v8 }
 0xb43   :  { %v3755_v34 = vmul.f32 %v11373_v31, %v11373_v31  ;;  %v3756_v9 = vmul.f32 %v11376_v1, %v11376_v1  ;;  %v3757_v25 = vmul.f32 %v11379_v27, %v11379_v27  ;;  %v3758_v61 = vmul.f32 %v11382_v22, %v11382_v22 }
 0xb44   :  { %v3759_v12 = vmul.f32 %v3751_v26, %v3751_v26  ;;  %v3760_v56 = vmul.f32 %v3752_v30, %v3752_v30  ;;  %v3761_v3 = vmul.f32 %v3753_v14, %v3753_v14 }
 0xb45   :  { %v3763_v13 = vsel %vm3671_vm5, %v3755_v34, 0.0  ;;  %v3764_v36 = vsel %vm3671_vm5, %v3756_v9, 0.0  ;;  %v3766_v48 = vsel %vm3671_vm5, %v3757_v25, 0.0  ;;  %v3768_v42 = vsel %vm3671_vm5, %v3758_v61, 0.0 }
 0xb46   :  { %v3765_v52 = vadd.f32 %v3764_v36, %v3763_v13  ;;  %v3770_v20 = vsel %vm3671_vm5, %v3759_v12, 0.0  ;;  %v3762_v34 = vmul.f32 %v3754_v29, %v3754_v29  ;;  %v3772_v9 = vsel %vm3671_vm5, %v3760_v56, 0.0 }
 0xb47   :  { %v3774_v36 = vsel %vm3671_vm5, %v3761_v3, 0.0 }
 0xb48   :  { %v3767_v58 = vadd.f32 %v3766_v48, %v3765_v52  ;;  %v3776_v25 = vsel %vm3671_vm5, %v3762_v34, 0.0 }
 0xb4a   :  { %v3769_v39 = vadd.f32 %v3768_v42, %v3767_v58 }
 0xb4c   :  { %v3771_v47 = vadd.f32 %v3770_v20, %v3769_v39 }
 0xb4e   :  { %v3773_v13 = vadd.f32 %v3772_v9, %v3771_v47 }
 0xb50   :  { %v3775_v7 = vadd.f32 %v3774_v36, %v3773_v13  ;;  %v3814_v13 = vld [vmem:[%s14440_s15 + $0x30] sm:$0xff]  ;;  %v3815_v36 = vld [vmem:[%s14440_s15 + $0x38] sm:$0xff] }
 0xb52   :  { %v3777_v52 = vadd.f32 %v3776_v25, %v3775_v7  ;;  %v3822_v25 = vld [vmem:[%s14441_s16 + $0x30] sm:$0xff] }
 0xb54   :  { %v3778_v48 = vrot.slane %v3777_v52, 4 }
 0xb56   :  { %v3779_v8 = vadd.f32 %v3778_v48, %v3777_v52  ;;  %v3823_v52 = vld [vmem:[%s14441_s16 + $0x38] sm:$0xff]  ;;  %v3812_v48 = vld [vmem:[%s14440_s15 + $0x20] sm:$0xff] }
 0xb58   :  { %v3780_v63 = vrot.slane %v3779_v8, 2 }
 0xb5a   :  { %v3781_v23 = vadd.f32 %v3780_v63, %v3779_v8  ;;  %v3813_v8 = vld [vmem:[%s14440_s15 + $0x28] sm:$0xff] }
 0xb5c   :  { %v3782_v61 = vrot.slane %v3781_v23, 1 }
 0xb5e   :  { %v3783_v42 = vadd.f32 %v3782_v61, %v3781_v23  ;;  %v3810_v61 = vld [vmem:[%s14440_s15 + $0x10] sm:$0xff] }
 0xb60   :  { %7487 = vmatmul.msk.f32.vlgmr.msra.gmra.mxu2 %vm3671_vm5, %v3783_v42 }
 0xbe3   :  { %v3804_v12 = vpop.f32.mrf.mxu2 }
 0xbe4   :  { %v3807_v39 = vmul.f32 0.0015625, %v3804_v12 }
 0xbe6   :  { %7489 = vmatmul.msk.f32.vlgmr.msrb.gmra.mxu3 %vm3655_vm9, %v3807_v39 }
 0xc69   :  { %v3844_v56 = vpop.f32.mrf.mxu3 }
 0xc6a   :  { %v3845_v47 = vadd.f32 1e-05, %v3844_v56 }
 0xc6c   :  { %8532 = vrsqrt.f32 %v3845_v47  ;;  %vm3853_vm1 = vweird.f32 %v3845_v47 }
 0xc72   :  { %v8533_v3 = vpop.eup %8532 }
 0xc73   :  { %v3848_v20 = vmul.f32 %v8533_v3, %v3845_v47  ;;  %vm3854_vm0 = vweird.f32 %v8533_v3  ;;  %v3811_v47 = vld [vmem:[%s14440_s15 + $0x18] sm:$0xff] }
 0xc74   :  { %vm3855_vm2 = vmor %vm3853_vm1, %vm3854_vm0 }
 0xc75   :  { %v3849_v58 = vmul.f32 %v8533_v3, %v3848_v20  ;;  %v3809_v20 = vld [vmem:[%s14440_s15 + $0x8] sm:$0xff] }
 0xc77   :  { %v3850_v34 = vmul.f32 0.5, %v3849_v58  ;;  %v3820_v58 = vld [vmem:[%s14441_s16 + $0x20] sm:$0xff] }
 0xc79   :  { %v3851_v7 = vsub.f32 1.5, %v3850_v34 }
 0xc7b   :  { %v3852_v9 = vmul.f32 %v8533_v3, %v3851_v7 }
 0xc7d   :  { %v3856_v63 = vsel %vm3855_vm2, %v8533_v3, %v3852_v9  ;;  %v3808_v3 = vld [vmem:[%s14440_s15] sm:$0xff] }
 0xc7e   :  { %v3857_v23 = vperm.slane %v3856_v63, 0 }
 0xc80   :  { %v3864_v42 = vmul.f32 %v3857_v23, %v3753_v14  ;;  %v3865_v12 = vmul.f32 %v3857_v23, %v3754_v29  ;;  %v3862_v39 = vmul.f32 %v3857_v23, %v3751_v26  ;;  %v3863_v56 = vmul.f32 %v3857_v23, %v3752_v30  ;;  %v3821_v26 = vld [vmem:[%s14441_s16 + $0x28] sm:$0xff]  ;;  %v3818_v30 = vld [vmem:[%s14441_s16 + $0x10] sm:$0xff] }
 0xc81   :  { %v3860_v14 = vmul.f32 %v3857_v23, %v11379_v27  ;;  %v3861_v29 = vmul.f32 %v3857_v23, %v11382_v22  ;;  %v3858_v34 = vmul.f32 %v3857_v23, %v11373_v31  ;;  %v3859_v7 = vmul.f32 %v3857_v23, %v11376_v1  ;;  %v3817_v27 = vld [vmem:[%s14441_s16 + $0x8] sm:$0xff] }
 0xc82   :  { %v3872_v9 = vmul.f32 %v3864_v42, %v3814_v13  ;;  %v3873_v63 = vmul.f32 %v3865_v12, %v3815_v36  ;;  %v3870_v19 = vmul.f32 %v3862_v39, %v3812_v48  ;;  %v3871_v0 = vmul.f32 %v3863_v56, %v3813_v8 }
 0xc83   :  { %v3868_v22 = vmul.f32 %v3860_v14, %v3810_v61  ;;  %v3869_v31 = vmul.f32 %v3861_v29, %v3811_v47  ;;  %v3866_v6 = vmul.f32 %v3858_v34, %v3808_v3  ;;  %v3867_v1 = vmul.f32 %v3859_v7, %v3809_v20  ;;  %v3998_v3 = vld [vmem:[%s14433_s18 + $0xe0] sm:$0xff]  ;;  %v3993_v20 = vld [vmem:[%s14433_s18 + $0xb8] sm:$0xff]  ;;  %v3996_v14 = vld [vmem:[%s14433_s18 + $0xd0] sm:$0xff] }
 0xc84   :  { %v3880_v23 = vadd.f32 %v3872_v9, %v3822_v25  ;;  %v3881_v13 = vadd.f32 %v3873_v63, %v3823_v52  ;;  %v3878_v36 = vadd.f32 %v3870_v19, %v3820_v58  ;;  %v3879_v48 = vadd.f32 %v3871_v0, %v3821_v26  ;;  %v14989_v0 = vld [vmem:[#allocation110_spill] sm:$0xff]  ;;  %v3999_v52 = vld [vmem:[%s14433_s18 + $0xe8] sm:$0xff]  ;;  %v3992_v58 = vld [vmem:[%s14433_s18 + $0xb0] sm:$0xff] }
 0xc85   :  { %v3876_v8 = vadd.f32 %v3868_v22, %v3818_v30  ;;  %v3877_v42 = vadd.f32 %v3869_v31, %v3819_v28  ;;  %v3874_v12 = vadd.f32 %v3866_v6, %v3816_v43  ;;  %v3875_v39 = vadd.f32 %v3867_v1, %v3817_v27  ;;  %v4001_v43 = vld [vmem:[%s14433_s18 + $0xf8] sm:$0xff]  ;;  %v3991_v26 = vld [vmem:[%s14433_s18 + $0xa8] sm:$0xff]  ;;  %v3990_v34 = vld [vmem:[%s14433_s18 + $0xa0] sm:$0xff] }
 0xc86   :  { %v3888_v56 = vadd.f32 %v3880_v23, %v9551_v33  ;;  %v3889_v5 = vadd.f32 %v3881_v13, %v9538_v49  ;;  %v3886_v24 = vadd.f32 %v3878_v36, %v9564_v17  ;;  %v3887_v4 = vadd.f32 %v3879_v48, %v9566_v32  ;;  %v3997_v30 = vld [vmem:[%s14433_s18 + $0xd8] sm:$0xff]  ;;  %v3995_v29 = vld [vmem:[%s14433_s18 + $0xc8] sm:$0xff]  ;;  %v3988_v9 = vld [vmem:[%s14433_s18 + $0x90] sm:$0xff] }
 0xc87   :  { %v3884_v61 = vadd.f32 %v3876_v8, %v9578_v21  ;;  %v3885_v47 = vadd.f32 %v3877_v42, %v9569_v50  ;;  %v3882_v21 = vadd.f32 %v3874_v12, %v9589_v45  ;;  %v3989_v7 = vld [vmem:[%s14433_s18 + $0x98] sm:$0xff]  ;;  %v3994_v63 = vld [vmem:[%s14433_s18 + $0xc0] sm:$0xff]  ;;  %v3987_v27 = vld [vmem:[%s14433_s18 + $0x88] sm:$0xff] }
 0xc88   :  { %v11465_v25 = vadd.f32 %v3888_v56, %v9831_v41  ;;  %v11468_v19 = vadd.f32 %v3889_v5, %v9820_v54  ;;  %v11471_v28 = vadd.f32 %v3886_v24, %v9853_v10  ;;  %v11474_v33 = vadd.f32 %v3887_v4, %v9844_v16  ;;  %v3986_v22 = vld [vmem:[%s14433_s18 + $0x80] sm:$0xff]  ;;  %v14990_v31 = vld [vmem:[#allocation75_spill] sm:$0xff]  ;;  %v14992_v23 = vld [vmem:[#allocation73_spill] sm:$0xff] }
 0xc89   :  { %v11477_v17 = vadd.f32 %v3884_v61, %v9873_v62  ;;  %v11480_v49 = vadd.f32 %v3885_v47, %v9858_v40  ;;  %v3883_v24 = vadd.f32 %v3875_v39, %v9582_v18  ;;  %v11494_v6 = vadd.f32 %v3882_v21, %v9887_v51  ;;  %v4000_v18 = vld [vmem:[%s14433_s18 + $0xf0] sm:$0xff]  ;;  %v14991_v1 = vld [vmem:[#allocation74_spill] sm:$0xff]  ;;  %v14994_v36 = vld [vmem:[#allocation71_spill] sm:$0xff] }
 0xc8a   :  { %v7952_v32 = vpack.i.bf16 %v11465_v25, %v11468_v19  ;;  %v7957_v50 = vpack.i.bf16 %v11471_v28, %v11474_v33  ;;  %v14993_v13 = vld [vmem:[#allocation72_spill] sm:$0xff]  ;;  %v14995_v8 = vld [vmem:[#allocation70_spill] sm:$0xff] }
 0xc8b   :  { %v7962_v4 = vpack.i.bf16 %v11477_v17, %v11480_v49  ;;  %v11497_v5 = vadd.f32 %v3883_v24, %v14989_v0 }
 0xc8c   :  { %7953 = vrot.lane.b32.xlu1 %v7952_v32, %s8604_s28  ;;  %7958 = vrot.lane.b32.xlu0 %v7957_v50, %s8604_s28 }
 0xc8d   :  { %7963 = vrot.lane.b32.xlu2 %v7962_v4, %s8604_s28  ;;  %v7967_v45 = vpack.i.bf16 %v11494_v6, %v11497_v5 }
 0xc94   :  { %3944 = vrot.lane.b32.xlu0 %v11468_v19, %s8607_s29  ;;  %7968 = vrot.lane.b32.xlu1 %v7967_v45, %s8604_s28 }
 0xc95   :  { %3942 = vrot.lane.b32.xlu2 %v11465_v25, %s8607_s29 }
 0xc9c   :  { %3938 = vrot.lane.b32.xlu0 %v11471_v28, %s8607_s29  ;;  %3940 = vrot.lane.b32.xlu1 %v11474_v33, %s8607_s29 }
 0xc9d   :  { %3936 = vrot.lane.b32.xlu2 %v11480_v49, %s8607_s29 }
 0xca4   :  { %3932 = vrot.lane.b32.xlu0 %v11497_v5, %s8607_s29  ;;  %3934 = vrot.lane.b32.xlu1 %v11477_v17, %s8607_s29 }
 0xca5   :  { %3930 = vrot.lane.b32.xlu2 %v11494_v6, %s8607_s29 }
 0xcac   :  { %4074 = vperm.xlu0 %7640, %v4000_v18   ;;  %4079 = vperm.xlu1 %7646, %v4001_v43  }
 0xcad   :  { %4069 = vperm.xlu2 %7634, %v3999_v52  }
 0xcb4   :  { %4064 = vperm.xlu0 %7640, %v3998_v3   ;;  %4039 = vperm.xlu1 %7646, %v3993_v20  }
 0xcb5   :  { %4034 = vperm.xlu2 %7634, %v3992_v58  }
 0xcbc   :  { %4029 = vperm.xlu0 %7640, %v3991_v26   ;;  %4059 = vperm.xlu1 %7646, %v3997_v30   ;;  %v3958_v30 = vld [vmem:[%s14435_s10 + $0x120] sm:$0xff] }
 0xcbd   :  { %4054 = vperm.xlu2 %7634, %v3996_v14  }
 0xcc4   :  { %4049 = vperm.xlu0 %7640, %v3995_v29   ;;  %4024 = vperm.xlu1 %7646, %v3990_v34  }
 0xcc5   :  { %4019 = vperm.xlu2 %7634, %v3989_v7   ;;  %v3961_v7 = vld [vmem:[%s14435_s10 + $0x138] sm:$0xff] }
 0xccc   :  { %4014 = vperm.xlu0 %7640, %v3988_v9   ;;  %4044 = vperm.xlu1 %7646, %v3994_v63   ;;  %v3960_v9 = vld [vmem:[%s14435_s10 + $0x130] sm:$0xff] }
 0xccd   :  { %4009 = vperm.xlu2 %7634, %v3987_v27  }
 0xcd4   :  { %4004 = vperm.xlu0 %7640, %v3986_v22   ;;  %4750 = vrot.lane.b32.xlu1 %v14990_v31, %s8600_s23  ;;  %v3963_v31 = vld [vmem:[%s14435_s10 + $0x148] sm:$0xff] }
 0xcd5   :  { %4748 = vrot.lane.b32.xlu2 %v14991_v1, %s8600_s23  ;;  %v3962_v1 = vld [vmem:[%s14435_s10 + $0x140] sm:$0xff] }
 0xcdc   :  { %4746 = vrot.lane.b32.xlu0 %v14992_v23, %s8600_s23  ;;  %4790 = vrot.lane.b32.xlu1 %v9820_v54, %s8607_s29 }
 0xcdd   :  { %4788 = vrot.lane.b32.xlu2 %v9831_v41, %s8607_s29  ;;  %v14997_v41 = vld [vmem:[#allocation76_spill] sm:$0xff] }
 0xce4   :  { %4786 = vrot.lane.b32.xlu0 %v9844_v16, %s8607_s29  ;;  %4744 = vrot.lane.b32.xlu1 %v14993_v13, %s8600_s23  ;;  %v14998_v16 = vld [vmem:[#allocation77_spill] sm:$0xff] }
 0xce5   :  { %4742 = vrot.lane.b32.xlu2 %v14994_v36, %s8600_s23 }
 0xce7   :  { %v7964_v48 = vpop.permute.xlu2 %7963 }
 0xce8   :  { %v7965_v32 = vunpack.i.l.bf16 %v7964_v48  ;;  %v7966_v21 = vunpack.i.h.bf16 %v7964_v48  ;;  %v3965_v48 = vld [vmem:[%s14435_s10 + $0x158] sm:$0xff] }
 0xcec   :  { %4740 = vrot.lane.b32.xlu0 %v14995_v8, %s8600_s23  ;;  %4784 = vrot.lane.b32.xlu1 %v9853_v10, %s8607_s29  ;;  %v3964_v8 = vld [vmem:[%s14435_s10 + $0x150] sm:$0xff] }
 0xced   :  { %4782 = vrot.lane.b32.xlu2 %v9858_v40, %s8607_s29 }
 0xcef   :  { %v11588_v54 = vpop.permute.xlu2 %3942 }
 0xcf0   :  { %14996 = vst [vmem:[#allocation110_spill] sm:$0xff] %v11588_v54 }
 0xcf4   :  { %4780 = vrot.lane.b32.xlu0 %v9873_v62, %s8607_s29  ;;  %4738 = vrot.lane.b32.xlu1 %v14997_v41, %s8600_s23 }
 0xcf5   :  { %4736 = vrot.lane.b32.xlu2 %v14998_v16, %s8600_s23 }
 0xcf7   :  { %v11596_v42 = vpop.permute.xlu2 %3936 }
 0xcf8   :  { %14999 = vst [vmem:[#allocation75_spill] sm:$0xff] %v11596_v42 }
 0xcfc   :  { %4776 = vrot.lane.b32.xlu0 %v9887_v51, %s8607_s29  ;;  %4778 = vrot.lane.b32.xlu1 %v14989_v0, %s8607_s29 }
 0xcfd   :  { %7973 = vrot.lane.b32.xlu2 %v11196_v11, %s8601_s25 }
 0xcfe   :  { %v7954_v10 = vpop.permute.xlu1 %7953  ;;  %v7959_v40 = vpop.permute.xlu0 %7958 }
 0xcff   :  { %v7955_v62 = vunpack.i.l.bf16 %v7954_v10  ;;  %v11604_v12 = vpop.permute.xlu2 %3930  ;;  %v7956_v39 = vunpack.i.h.bf16 %v7954_v10  ;;  %v7960_v56 = vunpack.i.l.bf16 %v7959_v40  ;;  %v7961_v51 = vunpack.i.h.bf16 %v7959_v40  ;;  %v3967_v40 = vld [vmem:[%s14435_s10 + $0x168] sm:$0xff] }
 0xd00   :  { %15000 = vst [vmem:[#allocation74_spill] sm:$0xff] %v11604_v12 }
 0xd01   :  { %4130 = vmatpush.msrb.mxu2 %v7955_v62  ;;  %v3966_v62 = vld [vmem:[%s14435_s10 + $0x160] sm:$0xff] }
 0xd03   :  { %4131 = vmatpush.msrb.mxu2 %v7956_v39 }
 0xd04   :  { %7983 = vrot.lane.b32.xlu0 %v11162_v60, %s8601_s25  ;;  %7978 = vrot.lane.b32.xlu1 %v11175_v57, %s8601_s25 }
 0xd05   :  { %7988 = vrot.lane.b32.xlu2 %v11215_v53, %s8601_s25  ;;  %4132 = vmatpush.msrb.mxu2 %v7960_v56 }
 0xd06   :  { %v11612_v61 = vpop.permute.xlu0 %3944  ;;  %v7969_v47 = vpop.permute.xlu1 %7968 }
 0xd07   :  { %15001 = vst [vmem:[#allocation73_spill] sm:$0xff] %v11612_v61  ;;  %v11614_v50 = vpop.permute.xlu2 %4069  ;;  %4133 = vmatpush.msrb.mxu2 %v7961_v51  ;;  %4203 = vmatpush.msra.mxu3 %v11612_v61  ;;  %v7970_v24 = vunpack.i.l.bf16 %v7969_v47  ;;  %v7971_v4 = vunpack.i.h.bf16 %v7969_v47  ;;  %v3969_v47 = vld [vmem:[%s14435_s10 + $0x178] sm:$0xff] }
 0xd09   :  { %4134 = vmatpush.msrb.mxu2 %v7965_v32  ;;  %4204 = vmatpush.msra.mxu3 %v11588_v54  ;;  %v3968_v32 = vld [vmem:[%s14435_s10 + $0x170] sm:$0xff] }
 0xd0b   :  { %4135 = vmatpush.msrb.mxu2 %v7966_v21 }
 0xd0c   :  { %7998 = vrot.lane.b32.xlu0 %v11175_v57, %s8603_s24  ;;  %7993 = vrot.lane.b32.xlu1 %v11196_v11, %s8603_s24 }
 0xd0d   :  { %8003 = vrot.lane.b32.xlu2 %v11162_v60, %s8603_s24  ;;  %4136 = vmatpush.msrb.mxu2 %v7970_v24 }
 0xd0e   :  { %v11624_v0 = vpop.permute.xlu0 %3938  ;;  %v11626_v45 = vpop.permute.xlu1 %3940 }
 0xd0f   :  { %15002 = vst [vmem:[#allocation72_spill] sm:$0xff] %v11624_v0  ;;  %v11628_v18 = vpop.permute.xlu2 %4034  ;;  %4137 = vmatpush.msrb.mxu2 %v7971_v4  ;;  %4205 = vmatpush.msra.mxu3 %v11626_v45 }
 0xd10   :  { %15003 = vst [vmem:[#allocation71_spill] sm:$0xff] %v11626_v45 }
 0xd11   :  { %4138 = vmatpush.msrb.mxu2 %v11468_v19  ;;  %4206 = vmatpush.msra.mxu3 %v11624_v0  ;;  %v3954_v19 = vld [vmem:[%s14435_s10 + $0x100] sm:$0xff] }
 0xd13   :  { %4139 = vmatpush.msrb.mxu2 %v11465_v25  ;;  %4207 = vmatpush.msra.mxu3 %v11596_v42  ;;  %v3955_v25 = vld [vmem:[%s14435_s10 + $0x108] sm:$0xff] }
 0xd14   :  { %8008 = vrot.lane.b32.xlu1 %v11215_v53, %s8603_s24 }
 0xd15   :  { %4140 = vmatpush.msrb.mxu2 %v11474_v33 }
 0xd16   :  { %v11638_v43 = vpop.permute.xlu0 %3932  ;;  %v11640_v52 = vpop.permute.xlu1 %3934 }
 0xd17   :  { %15004 = vst [vmem:[#allocation70_spill] sm:$0xff] %v11638_v43  ;;  %v11642_v3 = vpop.permute.xlu2 %4054  ;;  %4141 = vmatpush.msrb.mxu2 %v11471_v28  ;;  %4208 = vmatpush.msra.mxu3 %v11640_v52 }
 0xd18   :  { %15005 = vst [vmem:[#allocation76_spill] sm:$0xff] %v11640_v52 }
 0xd19   :  { %4142 = vmatpush.msrb.mxu2 %v11480_v49  ;;  %4209 = vmatpush.msra.mxu3 %v11638_v43 }
 0xd1b   :  { %4143 = vmatpush.msrb.mxu2 %v11477_v17  ;;  %4210 = vmatpush.msra.mxu3 %v11604_v12  ;;  %v3957_v17 = vld [vmem:[%s14435_s10 + $0x118] sm:$0xff] }
 0xd1c   :  { %7490 = vmatmul.msk.f32.vlgmr.msra.gmra.mxu3 %vm677_vm3, %v3955_v25 }
 0xd1d   :  { %4144 = vmatpush.msrb.mxu2 %v11497_v5  ;;  %v3956_v5 = vld [vmem:[%s14435_s10 + $0x110] sm:$0xff] }
 0xd1e   :  { %v11658_v28 = vpop.permute.xlu0 %4074  ;;  %v11660_v33 = vpop.permute.xlu1 %4079 }
 0xd1f   :  { %v11662_v49 = vpop.permute.xlu2 %4019  ;;  %4145 = vmatpush.msrb.mxu2 %v11494_v6  ;;  %v3959_v6 = vld [vmem:[%s14435_s10 + $0x128] sm:$0xff] }
 0xd20   :  { %4146 = vmatmul.f32.vlgmr.msrb.gmra.mxu2 %v3954_v19  ;;  %v3971_v19 = vld [vmem:[%s14435_s10 + $0x188] sm:$0xff] }
 0xd24   :  { %7491 = vmatmul.msk.f32.gmra.mxu3 %vm677_vm3, %v3957_v17 }
 0xd26   :  { %v11672_v20 = vpop.permute.xlu0 %4064  ;;  %v11674_v58 = vpop.permute.xlu1 %4039 }
 0xd27   :  { %v11676_v26 = vpop.permute.xlu2 %4009 }
 0xd28   :  { %4149 = vmatmul.f32.gmra.mxu2 %v3956_v5  ;;  %v3970_v5 = vld [vmem:[%s14435_s10 + $0x180] sm:$0xff] }
 0xd2c   :  { %7492 = vmatmul.msk.f32.gmra.mxu3 %vm677_vm3, %v3959_v6 }
 0xd2e   :  { %v11685_v14 = vpop.permute.xlu0 %4029  ;;  %v11687_v29 = vpop.permute.xlu1 %4059 }
 0xd2f   :  { %v11689_v34 = vpop.permute.xlu2 %4748 }
 0xd30   :  { %4152 = vmatmul.f32.gmra.mxu2 %v3958_v30 }
 0xd34   :  { %7493 = vmatmul.msk.f32.gmra.mxu3 %vm677_vm3, %v3961_v7  ;;  %v3973_v7 = vld [vmem:[%s14435_s10 + $0x198] sm:$0xff] }
 0xd36   :  { %v11698_v63 = vpop.permute.xlu0 %4049  ;;  %v11700_v27 = vpop.permute.xlu1 %4024 }
 0xd37   :  { %v11702_v22 = vpop.permute.xlu2 %4788 }
 0xd38   :  { %4155 = vmatmul.f32.gmra.mxu2 %v3960_v9  ;;  %v3972_v9 = vld [vmem:[%s14435_s10 + $0x190] sm:$0xff] }
 0xd3c   :  { %7494 = vmatmul.msk.f32.gmra.mxu3 %vm677_vm3, %v3963_v31 }
 0xd3e   :  { %v11711_v23 = vpop.permute.xlu0 %4014  ;;  %v11713_v13 = vpop.permute.xlu1 %4044 }
 0xd3f   :  { %v11715_v36 = vpop.permute.xlu2 %4742 }
 0xd40   :  { %4158 = vmatmul.f32.gmra.mxu2 %v3962_v1 }
 0xd44   :  { %7495 = vmatmul.msk.f32.gmra.mxu3 %vm677_vm3, %v3965_v48  ;;  %v3975_v48 = vld [vmem:[%s14435_s10 + $0x1a8] sm:$0xff] }
 0xd46   :  { %v11724_v41 = vpop.permute.xlu0 %4004  ;;  %v11726_v16 = vpop.permute.xlu1 %4750 }
 0xd47   :  { %v11728_v10 = vpop.permute.xlu2 %4782 }
 0xd48   :  { %15006 = vst [vmem:[#allocation77_spill] sm:$0xff] %v11728_v10  ;;  %4161 = vmatmul.f32.gmra.mxu2 %v3964_v8  ;;  %v3974_v8 = vld [vmem:[%s14435_s10 + $0x1a0] sm:$0xff] }
 0xd4c   :  { %7496 = vmatmul.msk.f32.gmra.mxu3 %vm677_vm3, %v3967_v40 }
 0xd4e   :  { %v11737_v39 = vpop.permute.xlu0 %4746  ;;  %v11739_v56 = vpop.permute.xlu1 %4790 }
 0xd4f   :  { %v11741_v51 = vpop.permute.xlu2 %4736 }
 0xd50   :  { %15007 = vst [vmem:[#allocation192_spill] sm:$0xff] %v11741_v51  ;;  %4164 = vmatmul.f32.gmra.mxu2 %v3966_v62 }
 0xd54   :  { %7497 = vmatmul.msk.f32.gmra.mxu3 %vm677_vm3, %v3969_v47  ;;  %v3977_v47 = vld [vmem:[%s14435_s10 + $0x1b8] sm:$0xff] }
 0xd56   :  { %v11750_v21 = vpop.permute.xlu0 %4786  ;;  %v11752_v24 = vpop.permute.xlu1 %4744 }
 0xd57   :  { %v7974_v4 = vpop.permute.xlu2 %7973 }
 0xd58   :  { %v7975_v25 = vunpack.i.l.bf16 %v7974_v4  ;;  %4167 = vmatmul.f32.gmra.mxu2 %v3968_v32  ;;  %v7976_v17 = vunpack.i.h.bf16 %v7974_v4  ;;  %v3976_v32 = vld [vmem:[%s14435_s10 + $0x1b0] sm:$0xff] }
 0xd5a   :  { %3525 = vmatpush.msrb.mxu1 %v7975_v25 }
 0xd5c   :  { %3526 = vmatpush.msrb.mxu1 %v7976_v17  ;;  %7498 = vmatmul.msk.f32.gmra.mxu3 %vm677_vm3, %v3971_v19 }
 0xd5e   :  { %v11761_v6 = vpop.permute.xlu0 %4740  ;;  %v11763_v30 = vpop.permute.xlu1 %4784 }
 0xd5f   :  { %15008 = vst [vmem:[#allocation193_spill] sm:$0xff] %v11761_v6 }
 0xd60   :  { %15009 = vst [vmem:[#allocation194_spill] sm:$0xff] %v11763_v30  ;;  %4170 = vmatmul.f32.gmra.mxu2 %v3970_v5  ;;  %v3979_v5 = vld [vmem:[%s14435_s10 + $0x1c8] sm:$0xff] }
 0xd64   :  { %7499 = vmatmul.msk.f32.gmra.mxu3 %vm677_vm3, %v3973_v7 }
 0xd66   :  { %v11772_v31 = vpop.permute.xlu0 %4780  ;;  %v11774_v1 = vpop.permute.xlu1 %4738 }
 0xd67   :  { %15010 = vst [vmem:[#allocation195_spill] sm:$0xff] %v11772_v31 }
 0xd68   :  { %15011 = vst [vmem:[#allocation196_spill] sm:$0xff] %v11774_v1  ;;  %4173 = vmatmul.f32.gmra.mxu2 %v3972_v9  ;;  %v7989_v9 = vpop.permute.xlu2 %7988 }
 0xd6c   :  { %7500 = vmatmul.msk.f32.gmra.mxu3 %vm677_vm3, %v3975_v48 }
 0xd6e   :  { %v11783_v40 = vpop.permute.xlu0 %4776  ;;  %v11785_v62 = vpop.permute.xlu1 %4778 }
 0xd6f   :  { %15012 = vst [vmem:[#allocation197_spill] sm:$0xff] %v11783_v40 }
 0xd70   :  { %15013 = vst [vmem:[#allocation198_spill] sm:$0xff] %v11785_v62  ;;  %4176 = vmatmul.f32.gmra.mxu2 %v3974_v8  ;;  %v3978_v8 = vld [vmem:[%s14435_s10 + $0x1c0] sm:$0xff] }
 0xd74   :  { %7501 = vmatmul.msk.f32.gmra.mxu3 %vm677_vm3, %v3977_v47  ;;  %v7990_v47 = vunpack.i.l.bf16 %v7989_v9 }
 0xd76   :  { %v7979_v4 = vpop.permute.xlu1 %7978  ;;  %v7984_v19 = vpop.permute.xlu0 %7983 }
 0xd77   :  { %v7980_v25 = vunpack.i.l.bf16 %v7979_v4  ;;  %v7981_v17 = vunpack.i.h.bf16 %v7979_v4  ;;  %v7985_v7 = vunpack.i.l.bf16 %v7984_v19  ;;  %v7986_v48 = vunpack.i.h.bf16 %v7984_v19 }
 0xd78   :  { %4179 = vmatmul.f32.gmra.mxu2 %v3976_v32  ;;  %v7991_v4 = vunpack.i.h.bf16 %v7989_v9 }
 0xd79   :  { %3527 = vmatpush.msrb.mxu1 %v7980_v25  ;;  %v3981_v25 = vld [vmem:[%s14435_s10 + $0x1d8] sm:$0xff] }
 0xd7b   :  { %3528 = vmatpush.msrb.mxu1 %v7981_v17 }
 0xd7c   :  { %7502 = vmatmul.msk.f32.gmra.mxu3 %vm677_vm3, %v3979_v5  ;;  %v3980_v5 = vld [vmem:[%s14435_s10 + $0x1d0] sm:$0xff] }
 0xd7d   :  { %3529 = vmatpush.msrb.mxu1 %v7985_v7 }
 0xd7e   :  { %v7994_v32 = vpop.permute.xlu1 %7993  ;;  %v7999_v38 = vpop.permute.xlu0 %7998 }
 0xd7f   :  { %3530 = vmatpush.msrb.mxu1 %v7986_v48  ;;  %v7995_v17 = vunpack.i.l.bf16 %v7994_v32  ;;  %v7996_v19 = vunpack.i.h.bf16 %v7994_v32  ;;  %v8000_v7 = vunpack.i.l.bf16 %v7999_v38  ;;  %v8004_v48 = vpop.permute.xlu2 %8003  ;;  %v8001_v9 = vunpack.i.h.bf16 %v7999_v38 }
 0xd80   :  { %4182 = vmatmul.f32.gmra.mxu2 %v3978_v8  ;;  %v3983_v8 = vld [vmem:[%s14435_s10 + $0x1e8] sm:$0xff]  ;;  %v8006_v32 = vunpack.i.h.bf16 %v8004_v48 }
 0xd81   :  { %3531 = vmatpush.msrb.mxu1 %v7990_v47  ;;  %v8005_v47 = vunpack.i.l.bf16 %v8004_v48 }
 0xd83   :  { %3532 = vmatpush.msrb.mxu1 %v7991_v4 }
 0xd84   :  { %7503 = vmatmul.msk.f32.gmra.mxu3 %vm677_vm3, %v3981_v25  ;;  %v3982_v25 = vld [vmem:[%s14435_s10 + $0x1e0] sm:$0xff] }
 0xd85   :  { %3533 = vmatpush.msrb.mxu1 %v7995_v17 }
 0xd86   :  { %v8009_v4 = vpop.permute.xlu1 %8008 }
 0xd87   :  { %3534 = vmatpush.msrb.mxu1 %v7996_v19  ;;  %v8010_v17 = vunpack.i.l.bf16 %v8009_v4  ;;  %v8011_v38 = vunpack.i.h.bf16 %v8009_v4  ;;  %v3985_v19 = vld [vmem:[%s14435_s10 + $0x1f8] sm:$0xff] }
 0xd88   :  { %4185 = vmatmul.f32.gmra.mxu2 %v3980_v5  ;;  %v3984_v5 = vld [vmem:[%s14435_s10 + $0x1f0] sm:$0xff] }
 0xd89   :  { %3535 = vmatpush.msrb.mxu1 %v8000_v7 }
 0xd8b   :  { %3536 = vmatpush.msrb.mxu1 %v8001_v9 }
 0xd8c   :  { %7504 = vmatmul.msk.f32.gmra.mxu3 %vm677_vm3, %v3983_v8 }
 0xd8d   :  { %3537 = vmatpush.msrb.mxu1 %v8005_v47 }
 0xd8f   :  { %3538 = vmatpush.msrb.mxu1 %v8006_v32 }
 0xd90   :  { %4188 = vmatmul.f32.gmra.mxu2 %v3982_v25 }
 0xd91   :  { %3539 = vmatpush.msrb.mxu1 %v8010_v17 }
 0xd93   :  { %3540 = vmatpush.msrb.mxu1 %v8011_v38 }
 0xd94   :  { %7505 = vmatmul.msk.f32.gmra.mxu3 %vm677_vm3, %v3985_v19 }
 0xd98   :  { %4191 = vmatmul.f32.gmra.mxu2 %v3984_v5 }
 0xd9f   :  { %v11822_v7 = vpop.f32.mrf.mxu3 }
 0xda3   :  { %v11824_v48 = vpop.f32.mrf.mxu2 }
 0xda7   :  { %v11826_v9 = vpop.f32.mrf.mxu3 }
 0xdab   :  { %v11828_v8 = vpop.f32.mrf.mxu2 }
 0xdaf   :  { %v4218_v47 = vpop.f32.mrf.mxu3 }
 0xdb3   :  { %v4153_v4 = vpop.f32.mrf.mxu2 }
 0xdb4   :  { %v4154_v51 = vadd.f32 %v4153_v4, %v11711_v23 }
 0xdb6   :  { %v4219_v10 = vadd.f32 %v4218_v47, %v4154_v51 }
 0xdb7   :  { %v4221_v32 = vpop.f32.mrf.mxu3 }
 0xdbb   :  { %v4156_v25 = vpop.f32.mrf.mxu2 }
 0xdbc   :  { %v4157_v31 = vadd.f32 %v4156_v25, %v11662_v49 }
 0xdbe   :  { %v4222_v6 = vadd.f32 %v4221_v32, %v4157_v31  ;;  %v4148_v32 = vadd.f32 %v11824_v48, %v11724_v41 }
 0xdbf   :  { %v4224_v17 = vpop.f32.mrf.mxu3 }
 0xdc3   :  { %v4159_v38 = vpop.f32.mrf.mxu2 }
 0xdc7   :  { %v11830_v19 = vpop.f32.mrf.mxu3 }
 0xdcb   :  { %v4162_v35 = vpop.f32.mrf.mxu2 }
 0xdcf   :  { %v11832_v15 = vpop.f32.mrf.mxu3 }
 0xdd3   :  { %v11834_v5 = vpop.f32.mrf.mxu2 }
 0xdd7   :  { %v11836_v59 = vpop.f32.mrf.mxu3 }
 0xddb   :  { %v11838_v44 = vpop.f32.mrf.mxu2 }
 0xddf   :  { %v4236_v55 = vpop.f32.mrf.mxu3 }
 0xde3   :  { %v4171_v46 = vpop.f32.mrf.mxu2 }
 0xde4   :  { %v4172_v49 = vadd.f32 %v4171_v46, %v11713_v13  ;;  %v4163_v46 = vadd.f32 %v4162_v35, %v11685_v14  ;;  %v4151_v35 = vadd.f32 %v11828_v8, %v11676_v26 }
 0xde7   :  { %v4239_v2 = vpop.f32.mrf.mxu3 }
 0xdeb   :  { %v4174_v37 = vpop.f32.mrf.mxu2 }
 0xdef   :  { %v4242_v53 = vpop.f32.mrf.mxu3 }
 0xdf3   :  { %v4177_v57 = vpop.f32.mrf.mxu2 }
 0xdf4   :  { %v4178_v12 = vadd.f32 %v4177_v57, %v11642_v3 }
 0xdf6   :  { %v4243_v43 = vadd.f32 %v4242_v53, %v4178_v12  ;;  %v4175_v53 = vadd.f32 %v4174_v37, %v11698_v63  ;;  %v4160_v37 = vadd.f32 %v4159_v38, %v11700_v27 }
 0xdf7   :  { %v4245_v40 = vpop.f32.mrf.mxu3 }
 0xdf8   :  { %v4270_v52 = vmul.f32 0.5, %v4243_v43 }
 0xdfa   :  { %8534 = vtanh.f32 %v4270_v52 }
 0xdfb   :  { %v4180_v62 = vpop.f32.mrf.mxu2 }
 0xdfc   :  { %v4181_v42 = vadd.f32 %v4180_v62, %v11687_v29  ;;  %v4240_v29 = vadd.f32 %v4239_v2, %v4175_v53  ;;  %v4237_v62 = vadd.f32 %v4236_v55, %v4172_v49  ;;  %v4225_v55 = vadd.f32 %v4224_v17, %v4160_v37 }
 0xdfd   :  { %v4166_v53 = vadd.f32 %v11834_v5, %v11628_v18 }
 0xdfe   :  { %v4246_v0 = vadd.f32 %v4245_v40, %v4181_v42 }
 0xdff   :  { %v4248_v11 = vpop.f32.mrf.mxu3 }
 0xe00   :  { %v4271_v1 = vmul.f32 0.5, %v4246_v0  ;;  %v8535_v45 = vpop.eup %8534 }
 0xe01   :  { %v4286_v12 = vadd.f32 1.0, %v8535_v45  ;;  %v4269_v45 = vmul.f32 0.5, %v4240_v29 }
 0xe02   :  { %8536 = vtanh.f32 %v4271_v1 }
 0xe03   :  { %v4183_v30 = vpop.f32.mrf.mxu2  ;;  %8538 = vtanh.f32 %v4219_v10  ;;  %v4294_v0 = vmul.f32 0.5, %v4286_v12  ;;  %v4268_v10 = vmul.f32 0.5, %v4237_v62 }
 0xe04   :  { %v4184_v57 = vadd.f32 %v4183_v30, %v11672_v20  ;;  %8540 = vtanh.f32 %v4222_v6  ;;  %v4228_v30 = vadd.f32 %v11830_v19, %v4163_v46 }
 0xe06   :  { %v4249_v43 = vadd.f32 %v4248_v11, %v4184_v57  ;;  %v4216_v57 = vadd.f32 %v11826_v9, %v4151_v35  ;;  %v4231_v9 = vadd.f32 %v11832_v15, %v4166_v53 }
 0xe07   :  { %v4251_v52 = vpop.f32.mrf.mxu3 }
 0xe08   :  { %v8537_v3 = vpop.eup %8536  ;;  %v4272_v42 = vmul.f32 0.5, %v4249_v43 }
 0xe09   :  { %v4287_v23 = vadd.f32 1.0, %v8537_v3  ;;  %v8539_v51 = vpop.eup %8538 }
 0xe0a   :  { %v8541_v40 = vpop.eup %8540  ;;  %8542 = vtanh.f32 %v4272_v42  ;;  %v11849_v11 = vmul.f32 %v8539_v51, %v4294_v0 }
 0xe0b   :  { %v4295_v31 = vmul.f32 0.5, %v4287_v23  ;;  %v4186_v1 = vpop.f32.mrf.mxu2  ;;  %8544 = vtanh.f32 %v4269_v45 }
 0xe0c   :  { %v4187_v20 = vadd.f32 %v4186_v1, %v11614_v50 }
 0xe0d   :  { %v11851_v63 = vmul.f32 %v8541_v40, %v4295_v31 }
 0xe0e   :  { %v4252_v2 = vadd.f32 %v4251_v52, %v4187_v20 }
 0xe0f   :  { %v11856_v13 = vpack.i.bf16 %v11849_v11, %v11851_v63  ;;  %v4254_v50 = vpop.f32.mrf.mxu3 }
 0xe10   :  { %v4273_v6 = vmul.f32 0.5, %v4252_v2  ;;  %v8543_v27 = vpop.eup %8542 }
 0xe11   :  { %8023 = vrot.lane.b32.xlu1 %v11856_v13, %s8604_s28  ;;  %v4288_v4 = vadd.f32 1.0, %v8543_v27  ;;  %v8545_v17 = vpop.eup %8544 }
 0xe12   :  { %8546 = vtanh.f32 %v4273_v6  ;;  %v4285_v52 = vadd.f32 1.0, %v8545_v17 }
 0xe13   :  { %v4189_v47 = vpop.f32.mrf.mxu2  ;;  %8548 = vtanh.f32 %v4268_v10  ;;  %v4296_v12 = vmul.f32 0.5, %v4288_v4 }
 0xe14   :  { %v4190_v14 = vadd.f32 %v4189_v47, %v11658_v28  ;;  %8550 = vtanh.f32 %v4225_v55  ;;  %v4213_v28 = vadd.f32 %v11822_v7, %v4148_v32  ;;  %v4169_v7 = vadd.f32 %v11838_v44, %v11674_v58 }
 0xe15   :  { %8552 = vtanh.f32 %v4228_v30  ;;  %v4293_v23 = vmul.f32 0.5, %v4285_v52 }
 0xe16   :  { %v4255_v25 = vadd.f32 %v4254_v50, %v4190_v14  ;;  %v4234_v44 = vadd.f32 %v11836_v59, %v4169_v7  ;;  %v15026_v7 = vld [vmem:[#allocation192_spill] sm:$0xff] }
 0xe17   :  { %v4257_v48 = vpop.f32.mrf.mxu3 }
 0xe18   :  { %v8547_v38 = vpop.eup %8546  ;;  %v4274_v19 = vmul.f32 0.5, %v4255_v25 }
 0xe19   :  { %v4289_v26 = vadd.f32 1.0, %v8547_v38  ;;  %v8549_v8 = vpop.eup %8548  ;;  %v4763_v38 = vadd.f32 %v11715_v36, %v11851_v63 }
 0xe1a   :  { %8554 = vtanh.f32 %v4274_v19  ;;  %v8551_v43 = vpop.eup %8550  ;;  %v4284_v29 = vadd.f32 1.0, %v8549_v8  ;;  %v15016_v19 = vld [vmem:[#allocation194_spill] sm:$0xff]  ;;  %v15018_v8 = vld [vmem:[#allocation71_spill] sm:$0xff] }
 0xe1b   :  { %v4297_v3 = vmul.f32 0.5, %v4289_v26  ;;  %v4192_v41 = vpop.f32.mrf.mxu2  ;;  %v8553_v49 = vpop.eup %8552  ;;  %8556 = vtanh.f32 %v4216_v57  ;;  %v11872_v0 = vmul.f32 %v8551_v43, %v4296_v12  ;;  %v15017_v12 = vld [vmem:[#allocation193_spill] sm:$0xff] }
 0xe1c   :  { %v4193_v42 = vadd.f32 %v4192_v41, %v11660_v33  ;;  %8558 = vtanh.f32 %v4213_v28  ;;  %v4292_v33 = vmul.f32 0.5, %v4284_v29  ;;  %v4762_v26 = vadd.f32 %v15017_v12, %v11849_v11  ;;  %v15020_v43 = vld [vmem:[#allocation77_spill] sm:$0xff] }
 0xe1d   :  { %v11874_v18 = vmul.f32 %v8553_v49, %v4297_v3  ;;  %8560 = vtanh.f32 %v4231_v9  ;;  %v4764_v32 = vadd.f32 %v11752_v24, %v11872_v0  ;;  %v4803_v52 = vadd.f32 %v15020_v43, %v4763_v38  ;;  %v15021_v3 = vld [vmem:[#allocation196_spill] sm:$0xff]  ;;  %v15025_v9 = vld [vmem:[#allocation195_spill] sm:$0xff] }
 0xe1e   :  { %v4258_v5 = vadd.f32 %v4257_v48, %v4193_v42  ;;  %v15022_v48 = vld [vmem:[#allocation170_spill] sm:$0xff]  ;;  %v15023_v49 = vld [vmem:[#allocation72_spill] sm:$0xff]  ;;  %v4802_v29 = vadd.f32 %v15025_v9, %v4762_v26 }
 0xe1f   :  { %v11880_v51 = vpack.i.bf16 %v11872_v0, %v11874_v18  ;;  %v4765_v35 = vadd.f32 %v11737_v39, %v11874_v18  ;;  %v4804_v53 = vadd.f32 %v15016_v19, %v4764_v32  ;;  %v15046_v32 = vld [vmem:[#allocation7_spill] sm:$0xff]  ;;  %v5201_v38 = vld [vmem:[%s14436_s20 + $0x70] sm:$0xff]  ;;  %v15049_v26 = vld [vmem:[#allocation10_spill] sm:$0xff] }
 0xe20   :  { %v8555_v31 = vpop.eup %8554  ;;  %v4275_v1 = vmul.f32 0.5, %v4258_v5 }
 0xe21   :  { %v4290_v15 = vadd.f32 1.0, %v8555_v31  ;;  %8018 = vrot.lane.b32.xlu2 %v11880_v51, %s8604_s28  ;;  %8033 = vrot.lane.b32.xlu1 %v11880_v51, %s8605_s6  ;;  %v8557_v40 = vpop.eup %8556  ;;  %v4805_v17 = vadd.f32 %v11750_v21, %v4765_v35  ;;  %v11945_v42 = vadd.f32 %v4804_v53, %v15023_v49  ;;  %v15042_v35 = vld [vmem:[#allocation4_spill] sm:$0xff] }
 0xe22   :  { %8562 = vtanh.f32 %v4275_v1  ;;  %v11887_v58 = vmul.f32 %v8557_v40, %v4293_v23  ;;  %v8559_v62 = vpop.eup %8558  ;;  %v15027_v23 = vld [vmem:[#allocation75_spill] sm:$0xff]  ;;  %v15029_v1 = vld [vmem:[#allocation198_spill] sm:$0xff] }
 0xe23   :  { %v11889_v20 = vmul.f32 %v8559_v62, %v4292_v33  ;;  %v4298_v37 = vmul.f32 0.5, %v4290_v15  ;;  %8564 = vtanh.f32 %v4234_v44  ;;  %v8561_v45 = vpop.eup %8560  ;;  %v11936_v28 = vadd.f32 %v4805_v17, %v15018_v8  ;;  %15024 = vst [vmem:[#allocation193_spill] sm:$0xff] %v11945_v42  ;;  %v15030_v15 = vld [vmem:[#allocation76_spill] sm:$0xff]  ;;  %v15032_v44 = vld [vmem:[#allocation197_spill] sm:$0xff] }
 0xe24   :  { %v4761_v41 = vadd.f32 %v15021_v3, %v11887_v58  ;;  %v11956_v31 = vadd.f32 %v4803_v52, %v15027_v23  ;;  %v11961_v40 = vadd.f32 %v4802_v29, %v15030_v15  ;;  %v15048_v17 = vld [vmem:[#allocation9_spill] sm:$0xff]  ;;  %v5195_v29 = vld [vmem:[%s14436_s20 + $0x40] sm:$0xff] }
 0xe25   :  { %v11893_v46 = vpack.i.bf16 %v11889_v20, %v11887_v58  ;;  %v11895_v10 = vmul.f32 %v8561_v45, %v4298_v37  ;;  %15019 = vst [vmem:[#allocation194_spill] sm:$0xff] %v11936_v28  ;;  %v4760_v5 = vadd.f32 %v15026_v7, %v11889_v20  ;;  %v15033_v37 = vld [vmem:[#allocation70_spill] sm:$0xff]  ;;  %v5198_v52 = vld [vmem:[%s14436_s20 + $0x58] sm:$0xff] }
 0xe26   :  { %15028 = vst [vmem:[#allocation77_spill] sm:$0xff] %v11956_v31  ;;  %v4801_v33 = vadd.f32 %v15029_v1, %v4761_v41 }
 0xe27   :  { %v4766_v27 = vadd.f32 %v11689_v34, %v11895_v10  ;;  %15031 = vst [vmem:[#allocation196_spill] sm:$0xff] %v11961_v40  ;;  %v4800_v62 = vadd.f32 %v15032_v44, %v4760_v5 }
 0xe28   :  { %v8563_v2 = vpop.eup %8562  ;;  %v11966_v45 = vadd.f32 %v4801_v33, %v15033_v37  ;;  %v15051_v33 = vld [vmem:[#allocation12_spill] sm:$0xff]  ;;  %v15184_v37 = vld [vmem:[#allocation94_spill] sm:$0xff] }
 0xe29   :  { %v4291_v6 = vadd.f32 1.0, %v8563_v2  ;;  %8053 = vrot.lane.b32.xlu1 %v11893_v46, %s8605_s6  ;;  %v8565_v55 = vpop.eup %8564  ;;  %v4806_v4 = vadd.f32 %v11702_v22, %v4766_v27  ;;  %v15035_v2 = vld [vmem:[#allocation74_spill] sm:$0xff]  ;;  %v15039_v27 = vld [vmem:[#allocation173_spill] sm:$0xff] }
 0xe2a   :  { %15034 = vst [vmem:[#allocation170_spill] sm:$0xff] %v11966_v45 }
 0xe2b   :  { %v4299_v59 = vmul.f32 0.5, %v4291_v6  ;;  %v11929_v57 = vadd.f32 %v4806_v4, %v11588_v54  ;;  %v11972_v6 = vadd.f32 %v4800_v62, %v15035_v2  ;;  %v15045_v4 = vld [vmem:[#allocation6_spill] sm:$0xff] }
 0xe2d   :  { %v11899_v50 = vmul.f32 %v8565_v55, %v4299_v59  ;;  %15015 = vst [vmem:[#allocation200_spill] sm:$0xff] %v11929_v57  ;;  %v15037_v59 = vld [vmem:[#allocation167_spill] sm:$0xff]  ;;  %v15038_v55 = vld [vmem:[#allocation2_spill] sm:$0xff] }
 0xe2e   :  { %15036 = vst [vmem:[#allocation195_spill] sm:$0xff] %v11972_v6 }
 0xe2f   :  { %v11905_v30 = vpack.i.bf16 %v11895_v10, %v11899_v50  ;;  %v4767_v47 = vadd.f32 %v11726_v16, %v11899_v50 }
 0xe31   :  { %8013 = vrot.lane.b32.xlu0 %v11905_v30, %s8604_s28  ;;  %8043 = vrot.lane.b32.xlu2 %v11905_v30, %s8605_s6  ;;  %v4807_v14 = vadd.f32 %v11739_v56, %v4767_v47  ;;  %v15041_v47 = vld [vmem:[#allocation3_spill] sm:$0xff] }
 0xe32   :  { %8063 = vrot.lane.b32.xlu1 %v11162_v60, %s8604_s28 }
 0xe33   :  { %v11922_v25 = vadd.f32 %v4807_v14, %v11612_v61  ;;  %v15044_v14 = vld [vmem:[#allocation5_spill] sm:$0xff] }
 0xe35   :  { %15014 = vst [vmem:[#allocation199_spill] sm:$0xff] %v11922_v25  ;;  %4824 = vmatpush.msrb.mxu3 %v11922_v25 }
 0xe37   :  { %4825 = vmatpush.msrb.mxu3 %v11929_v57 }
 0xe39   :  { %4826 = vmatpush.msrb.mxu3 %v11936_v28  ;;  %8048 = vrot.lane.b32.xlu2 %v15022_v48, %s8604_s28 }
 0xe3a   :  { %8083 = vrot.lane.b32.xlu1 %v11856_v13, %s8600_s23  ;;  %8028 = vrot.lane.b32.xlu0 %v11893_v46, %s8604_s28 }
 0xe3b   :  { %4827 = vmatpush.msrb.mxu3 %v11945_v42 }
 0xe3d   :  { %4828 = vmatpush.msrb.mxu3 %v11956_v31 }
 0xe3f   :  { %4829 = vmatpush.msrb.mxu3 %v11961_v40 }
 0xe41   :  { %8073 = vrot.lane.b32.xlu2 %v11905_v30, %s8600_s23  ;;  %4830 = vmatpush.msrb.mxu3 %v11966_v45 }
 0xe42   :  { %8098 = vrot.lane.b32.xlu1 %v15037_v59, %s8609_s5  ;;  %8038 = vrot.lane.b32.xlu0 %v11856_v13, %s8605_s6 }
 0xe43   :  { %4831 = vmatpush.msrb.mxu3 %v11972_v6 }
 0xe44   :  { %7506 = vmatmul.msk.f32.vlgmr.msrb.gmra.mxu3 %vm677_vm3, %v15038_v55  ;;  %v15052_v55 = vld [vmem:[#allocation13_spill] sm:$0xff] }
 0xe49   :  { %8078 = vrot.lane.b32.xlu2 %v15039_v27, %s8604_s28 }
 0xe4a   :  { %8113 = vrot.lane.b32.xlu1 %v15022_v48, %s15040_s30  ;;  %8058 = vrot.lane.b32.xlu0 %v15037_v59, %s8604_s28 }
 0xe4c   :  { %7507 = vmatmul.msk.f32.gmra.mxu3 %vm677_vm3, %v15041_v47 }
 0xe51   :  { %8093 = vrot.lane.b32.xlu2 %v15022_v48, %s8609_s5  ;;  %v15050_v48 = vld [vmem:[#allocation11_spill] sm:$0xff] }
 0xe52   :  { %8128 = vrot.lane.b32.xlu1 %v15039_v27, %s15040_s30  ;;  %8068 = vrot.lane.b32.xlu0 %v11880_v51, %s8600_s23 }
 0xe54   :  { %7508 = vmatmul.msk.f32.gmra.mxu3 %vm677_vm3, %v15042_v35 }
 0xe59   :  { %8108 = vrot.lane.b32.xlu2 %v15039_v27, %s8609_s5  ;;  %v5200_v27 = vld [vmem:[%s14436_s20 + $0x68] sm:$0xff] }
 0xe5a   :  { %8143 = vrot.lane.b32.xlu1 %v11856_v13, %s15043_s1  ;;  %8088 = vrot.lane.b32.xlu0 %v11893_v46, %s8600_s23 }
 0xe5c   :  { %7509 = vmatmul.msk.f32.gmra.mxu3 %vm677_vm3, %v15044_v14 }
 0xe61   :  { %8123 = vrot.lane.b32.xlu2 %v11162_v60, %s15040_s30 }
 0xe62   :  { %8158 = vrot.lane.b32.xlu1 %v11880_v51, %s8607_s29  ;;  %8103 = vrot.lane.b32.xlu0 %v11162_v60, %s8609_s5  ;;  %v15047_v60 = vld [vmem:[#allocation8_spill] sm:$0xff] }
 0xe64   :  { %7510 = vmatmul.msk.f32.gmra.mxu3 %vm677_vm3, %v15045_v4  ;;  %v15053_v4 = vld [vmem:[#allocation14_spill] sm:$0xff] }
 0xe69   :  { %8138 = vrot.lane.b32.xlu2 %v11880_v51, %s15043_s1 }
 0xe6a   :  { %8173 = vrot.lane.b32.xlu1 %v11905_v30, %s8601_s25  ;;  %8118 = vrot.lane.b32.xlu0 %v15037_v59, %s15040_s30  ;;  %v5199_v59 = vld [vmem:[%s14436_s20 + $0x60] sm:$0xff] }
 0xe6c   :  { %7511 = vmatmul.msk.f32.gmra.mxu3 %vm677_vm3, %v15046_v32 }
 0xe71   :  { %8153 = vrot.lane.b32.xlu2 %v11905_v30, %s8607_s29 }
 0xe72   :  { %8188 = vrot.lane.b32.xlu1 %v11893_v46, %s8601_s25  ;;  %8133 = vrot.lane.b32.xlu0 %v11905_v30, %s15043_s1 }
 0xe74   :  { %7512 = vmatmul.msk.f32.gmra.mxu3 %vm677_vm3, %v15047_v60  ;;  %v5197_v60 = vld [vmem:[%s14436_s20 + $0x50] sm:$0xff] }
 0xe79   :  { %8168 = vrot.lane.b32.xlu2 %v11893_v46, %s8607_s29 }
 0xe7a   :  { %8203 = vrot.lane.b32.xlu1 %v11856_v13, %s8603_s24  ;;  %8148 = vrot.lane.b32.xlu0 %v11893_v46, %s15043_s1 }
 0xe7b   :  { %v8019_v53 = vpop.permute.xlu2 %8018 }
 0xe7c   :  { %7513 = vmatmul.msk.f32.gmra.mxu3 %vm677_vm3, %v15048_v17  ;;  %v8020_v17 = vunpack.i.l.bf16 %v8019_v53 }
 0xe81   :  { %8183 = vrot.lane.b32.xlu2 %v11856_v13, %s8601_s25 }
 0xe82   :  { %5235 = vperm.xlu1 %7646, %v5201_v38   ;;  %8163 = vrot.lane.b32.xlu0 %v11856_v13, %s8607_s29  ;;  %v5202_v13 = vld [vmem:[%s14436_s20 + $0x78] sm:$0xff]  ;;  %v8021_v38 = vunpack.i.h.bf16 %v8019_v53 }
 0xe83   :  { %v8024_v47 = vpop.permute.xlu1 %8023 }
 0xe84   :  { %7514 = vmatmul.msk.f32.gmra.mxu3 %vm677_vm3, %v15049_v26 }
 0xe89   :  { %8198 = vrot.lane.b32.xlu2 %v11880_v51, %s8603_s24 }
 0xe8a   :  { %5220 = vperm.xlu1 %7646, %v5198_v52   ;;  %8178 = vrot.lane.b32.xlu0 %v11880_v51, %s8601_s25  ;;  %v8025_v52 = vunpack.i.l.bf16 %v8024_v47 }
 0xe8b   :  { %v12053_v41 = vpop.permute.xlu2 %8043 }
 0xe8c   :  { %7515 = vmatmul.msk.f32.gmra.mxu3 %vm677_vm3, %v15050_v48 }
 0xe91   :  { %5240 = vperm.xlu2 %7634, %v5202_v13   ;;  %v15054_v13 = vld [vmem:[#allocation15_spill] sm:$0xff] }
 0xe92   :  { %5205 = vperm.xlu1 %7646, %v5195_v29   ;;  %8193 = vrot.lane.b32.xlu0 %v11905_v30, %s8603_s24  ;;  %v5196_v30 = vld [vmem:[%s14436_s20 + $0x48] sm:$0xff]  ;;  %v8026_v29 = vunpack.i.h.bf16 %v8024_v47 }
 0xe93   :  { %v8049_v5 = vpop.permute.xlu2 %8048  ;;  %v8034_v26 = vpop.permute.xlu1 %8033 }
 0xe94   :  { %v8050_v51 = vunpack.i.l.bf16 %v8049_v5  ;;  %7516 = vmatmul.msk.f32.gmra.mxu3 %vm677_vm3, %v15051_v33  ;;  %v8051_v62 = vunpack.i.h.bf16 %v8049_v5 }
 0xe96   :  { %3402 = vmatpush.msra.mxu0 %v8050_v51 }
 0xe98   :  { %3403 = vmatpush.msra.mxu0 %v8051_v62 }
 0xe99   :  { %5225 = vperm.xlu2 %7634, %v5199_v59   ;;  %v15055_v59 = vld [vmem:[#allocation16_spill] sm:$0xff] }
 0xe9a   :  { %8208 = vrot.lane.b32.xlu0 %v11893_v46, %s8603_s24  ;;  %v3317_v46 = vld [vmem:[%s14434_s12 + $0x298] sm:$0xff] }
 0xe9b   :  { %3541 = vmatmul.f32.vlgmr.msrb.gmra.mxu1 %v3317_v46  ;;  %v8054_v33 = vpop.permute.xlu1 %8053  ;;  %v8074_v53 = vpop.permute.xlu2 %8073 }
 0xe9c   :  { %7517 = vmatmul.msk.f32.gmra.mxu3 %vm677_vm3, %v15052_v55 }
 0xea1   :  { %5210 = vperm.xlu2 %7634, %v5196_v30   ;;  %v15056_v30 = vld [vmem:[#allocation17_spill] sm:$0xff] }
 0xea2   :  { %5230 = vperm.xlu0 %7640, %v5200_v27  }
 0xea3   :  { %v8014_v35 = vpop.permute.xlu0 %8013 }
 0xea4   :  { %v8015_v14 = vunpack.i.l.bf16 %v8014_v35  ;;  %7518 = vmatmul.msk.f32.gmra.mxu3 %vm677_vm3, %v15053_v4  ;;  %v8016_v32 = vunpack.i.h.bf16 %v8014_v35  ;;  %v8064_v47 = vpop.permute.xlu1 %8063 }
 0xea6   :  { %4564 = vmatpush.msra.mxu1 %v8015_v14  ;;  %v8079_v14 = vpop.permute.xlu2 %8078 }
 0xea7   :  { %v8080_v4 = vunpack.i.l.bf16 %v8079_v14  ;;  %v8081_v46 = vunpack.i.h.bf16 %v8079_v14  ;;  %v15066_v14 = vld [vmem:[#allocation171_spill] sm:$0xff] }
 0xea8   :  { %4565 = vmatpush.msra.mxu1 %v8016_v32 }
 0xeaa   :  { %5215 = vperm.xlu0 %7640, %v5197_v60   ;;  %4566 = vmatpush.msra.mxu1 %v8020_v17 }
 0xeac   :  { %v8029_v48 = vpop.permute.xlu0 %8028  ;;  %4567 = vmatpush.msra.mxu1 %v8021_v38  ;;  %7519 = vmatmul.msk.f32.gmra.mxu3 %vm677_vm3, %v15054_v13  ;;  %v15059_v38 = vld [vmem:[#allocation19_spill] sm:$0xff]  ;;  %v15061_v13 = vld [vmem:[#allocation166_spill] sm:$0xff] }
 0xead   :  { %v8030_v5 = vunpack.i.l.bf16 %v8029_v48  ;;  %v8031_v51 = vunpack.i.h.bf16 %v8029_v48  ;;  %v8055_v48 = vunpack.i.l.bf16 %v8054_v33 }
 0xeae   :  { %4568 = vmatpush.msra.mxu1 %v8025_v52  ;;  %v15060_v52 = vld [vmem:[#allocation168_spill] sm:$0xff] }
 0xeb0   :  { %4569 = vmatpush.msra.mxu1 %v8026_v29 }
 0xeb2   :  { %4570 = vmatpush.msra.mxu1 %v8030_v5  ;;  %v8056_v5 = vunpack.i.h.bf16 %v8054_v33 }
 0xeb4   :  { %v8039_v62 = vpop.permute.xlu0 %8038  ;;  %4571 = vmatpush.msra.mxu1 %v8031_v51  ;;  %7520 = vmatmul.msk.f32.gmra.mxu3 %vm677_vm3, %v15055_v59  ;;  %v15062_v51 = vld [vmem:[#allocation165_spill] sm:$0xff]  ;;  %v8075_v59 = vunpack.i.l.bf16 %v8074_v53 }
 0xeb5   :  { %v8040_v17 = vunpack.i.l.bf16 %v8039_v62 }
 0xeb6   :  { %4572 = vmatpush.msra.mxu1 %v11899_v50  ;;  %v8065_v50 = vunpack.i.l.bf16 %v8064_v47 }
 0xeb8   :  { %4573 = vmatpush.msra.mxu1 %v11895_v10  ;;  %v8066_v10 = vunpack.i.h.bf16 %v8064_v47  ;;  %v15065_v47 = vld [vmem:[#allocation163_spill] sm:$0xff] }
 0xeba   :  { %4574 = vmatpush.msra.mxu1 %v11874_v18  ;;  %v8045_v18 = vunpack.i.l.bf16 %v12053_v41 }
 0xebc   :  { %v8059_v55 = vpop.permute.xlu0 %8058  ;;  %4575 = vmatpush.msra.mxu1 %v11872_v0  ;;  %7521 = vmatmul.msk.f32.gmra.mxu3 %vm677_vm3, %v15056_v30  ;;  %v15057_v0 = vld [vmem:[#allocation18_spill] sm:$0xff] }
 0xebd   :  { %v8060_v27 = vunpack.i.l.bf16 %v8059_v55  ;;  %v8061_v35 = vunpack.i.h.bf16 %v8059_v55  ;;  %v15063_v55 = vld [vmem:[#allocation164_spill] sm:$0xff] }
 0xebe   :  { %4576 = vmatpush.msra.mxu1 %v11851_v63  ;;  %v8046_v63 = vunpack.i.h.bf16 %v12053_v41  ;;  %v8041_v41 = vunpack.i.h.bf16 %v8039_v62  ;;  %v15064_v62 = vld [vmem:[#allocation20_spill] sm:$0xff] }
 0xebf   :  { %3404 = vmatpush.msra.mxu0 %v8060_v27  ;;  %v8076_v27 = vunpack.i.h.bf16 %v8074_v53 }
 0xec0   :  { %4577 = vmatpush.msra.mxu1 %v11849_v11  ;;  %v8035_v11 = vunpack.i.l.bf16 %v8034_v26 }
 0xec1   :  { %3405 = vmatpush.msra.mxu0 %v8061_v35  ;;  %v8094_v35 = vpop.permute.xlu2 %8093 }
 0xec2   :  { %4578 = vmatpush.msra.mxu1 %v11887_v58  ;;  %v8036_v58 = vunpack.i.h.bf16 %v8034_v26  ;;  %v8084_v26 = vpop.permute.xlu1 %8083 }
 0xec3   :  { %3406 = vmatpush.msra.mxu0 %v8065_v50 }
 0xec4   :  { %4579 = vmatpush.msra.mxu1 %v11889_v20  ;;  %7522 = vmatmul.msk.f32.gmra.mxu3 %vm677_vm3, %v15057_v0  ;;  %v8069_v60 = vpop.permute.xlu0 %8068  ;;  %v15058_v20 = vld [vmem:[#allocation169_spill] sm:$0xff] }
 0xec5   :  { %3407 = vmatpush.msra.mxu0 %v8066_v10  ;;  %v8070_v50 = vunpack.i.l.bf16 %v8069_v60  ;;  %v8095_v10 = vunpack.i.l.bf16 %v8094_v35  ;;  %v8071_v0 = vunpack.i.h.bf16 %v8069_v60 }
 0xec6   :  { %4646 = vmatpush.msrb.mxu1 %v8045_v18  ;;  %v3314_v18 = vld [vmem:[%s14434_s12 + $0x280] sm:$0xff] }
 0xec7   :  { %3408 = vmatpush.msra.mxu0 %v8080_v4  ;;  %v12106_v32 = vpop.f32.mrf.mxu3  ;;  %v8096_v4 = vunpack.i.h.bf16 %v8094_v35 }
 0xec8   :  { %4647 = vmatpush.msrb.mxu1 %v8046_v63  ;;  %v15067_v63 = vld [vmem:[#allocation172_spill] sm:$0xff] }
 0xec9   :  { %3409 = vmatpush.msra.mxu0 %v8081_v46  ;;  %v15068_v46 = vld [vmem:[#allocation21_spill] sm:$0xff] }
 0xeca   :  { %4648 = vmatpush.msrb.mxu1 %v8035_v11  ;;  %v8099_v53 = vpop.permute.xlu1 %8098  ;;  %v8085_v11 = vunpack.i.l.bf16 %v8084_v26 }
 0xecb   :  { %3410 = vmatpush.msra.mxu0 %v15058_v20 }
 0xecc   :  { %4649 = vmatpush.msrb.mxu1 %v8036_v58  ;;  %7523 = vmatmul.msk.f32.gmra.mxu3 %vm677_vm3, %v15059_v38  ;;  %v8089_v30 = vpop.permute.xlu0 %8088  ;;  %v8086_v58 = vunpack.i.h.bf16 %v8084_v26  ;;  %v8101_v38 = vunpack.i.h.bf16 %v8099_v53 }
 0xecd   :  { %3411 = vmatpush.msra.mxu0 %v15060_v52  ;;  %v3319_v52 = vld [vmem:[%s14434_s12 + $0x2a8] sm:$0xff] }
 0xece   :  { %4650 = vmatpush.msrb.mxu1 %v8040_v17  ;;  %v8100_v17 = vunpack.i.l.bf16 %v8099_v53  ;;  %v3329_v53 = vld [vmem:[%s14434_s12 + $0x2f8] sm:$0xff] }
 0xecf   :  { %3412 = vmatpush.msra.mxu0 %v15061_v13  ;;  %v12113_v29 = vpop.f32.mrf.mxu3 }
 0xed0   :  { %4651 = vmatpush.msrb.mxu1 %v8041_v41  ;;  %v8090_v41 = vunpack.i.l.bf16 %v8089_v30 }
 0xed1   :  { %3413 = vmatpush.msra.mxu0 %v15062_v51  ;;  %v15069_v51 = vld [vmem:[#allocation22_spill] sm:$0xff] }
 0xed2   :  { %4652 = vmatpush.msrb.mxu1 %v8055_v48  ;;  %v8091_v48 = vunpack.i.h.bf16 %v8089_v30  ;;  %v3324_v30 = vld [vmem:[%s14434_s12 + $0x2d0] sm:$0xff] }
 0xed3   :  { %3414 = vmatpush.msra.mxu0 %v15063_v55  ;;  %v8114_v55 = vpop.permute.xlu1 %8113 }
 0xed4   :  { %4653 = vmatpush.msrb.mxu1 %v8056_v5  ;;  %7524 = vmatmul.msk.f32.gmra.mxu3 %vm677_vm3, %v15064_v62  ;;  %v8104_v20 = vpop.permute.xlu0 %8103  ;;  %v8109_v5 = vpop.permute.xlu2 %8108 }
 0xed5   :  { %3415 = vmatpush.msra.mxu0 %v15065_v47  ;;  %v8105_v13 = vunpack.i.l.bf16 %v8104_v20  ;;  %v8106_v26 = vunpack.i.h.bf16 %v8104_v20  ;;  %v8111_v62 = vunpack.i.h.bf16 %v8109_v5  ;;  %v8115_v47 = vunpack.i.l.bf16 %v8114_v55 }
 0xed6   :  { %4654 = vmatpush.msrb.mxu1 %v8075_v59  ;;  %v8110_v59 = vunpack.i.l.bf16 %v8109_v5 }
 0xed7   :  { %3416 = vmatpush.msra.mxu0 %v15066_v14  ;;  %v12121_v33 = vpop.f32.mrf.mxu3  ;;  %v15070_v14 = vld [vmem:[#allocation23_spill] sm:$0xff] }
 0xed8   :  { %4655 = vmatpush.msrb.mxu1 %v8076_v27 }
 0xed9   :  { %3417 = vmatpush.msra.mxu0 %v15067_v63 }
 0xeda   :  { %4656 = vmatpush.msrb.mxu1 %v8070_v50  ;;  %3418 = vmatmul.f32.vlgmr.msra.gmra.mxu0 %v3314_v18  ;;  %v8116_v50 = vunpack.i.h.bf16 %v8114_v55 }
 0xedb   :  { %3566 = vmatpush.msrb.mxu0 %v8095_v10 }
 0xedc   :  { %4657 = vmatpush.msrb.mxu1 %v8071_v0  ;;  %7525 = vmatmul.msk.f32.gmra.mxu3 %vm677_vm3, %v15068_v46  ;;  %v8119_v35 = vpop.permute.xlu0 %8118  ;;  %v8124_v10 = vpop.permute.xlu2 %8123 }
 0xedd   :  { %3567 = vmatpush.msrb.mxu0 %v8096_v4  ;;  %v8120_v18 = vunpack.i.l.bf16 %v8119_v35  ;;  %v8121_v0 = vunpack.i.h.bf16 %v8119_v35  ;;  %v8125_v4 = vunpack.i.l.bf16 %v8124_v10  ;;  %v8126_v46 = vunpack.i.h.bf16 %v8124_v10 }
 0xede   :  { %4658 = vmatpush.msrb.mxu1 %v8085_v11  ;;  %v8129_v11 = vpop.permute.xlu1 %8128 }
 0xedf   :  { %3568 = vmatpush.msrb.mxu0 %v8100_v17  ;;  %v12129_v60 = vpop.f32.mrf.mxu3  ;;  %v8130_v17 = vunpack.i.l.bf16 %v8129_v11 }
 0xee0   :  { %4659 = vmatpush.msrb.mxu1 %v8086_v58  ;;  %v15071_v58 = vld [vmem:[#allocation24_spill] sm:$0xff] }
 0xee1   :  { %3569 = vmatpush.msrb.mxu0 %v8101_v38  ;;  %v8131_v38 = vunpack.i.h.bf16 %v8129_v11  ;;  %v3344_v11 = vld [vmem:[%s14434_s12 + $0x370] sm:$0xff] }
 0xee2   :  { %4660 = vmatpush.msrb.mxu1 %v8090_v41  ;;  %3421 = vmatmul.f32.gmra.mxu0 %v3319_v52 }
 0xee3   :  { %3570 = vmatpush.msrb.mxu0 %v8105_v13 }
 0xee4   :  { %4661 = vmatpush.msrb.mxu1 %v8091_v48  ;;  %7526 = vmatmul.msk.f32.gmra.mxu3 %vm677_vm3, %v15069_v51  ;;  %v8134_v20 = vpop.permute.xlu0 %8133  ;;  %v3334_v48 = vld [vmem:[%s14434_s12 + $0x320] sm:$0xff]  ;;  %v8139_v13 = vpop.permute.xlu2 %8138  ;;  %v15072_v51 = vld [vmem:[#allocation25_spill] sm:$0xff] }
 0xee5   :  { %3571 = vmatpush.msrb.mxu0 %v8106_v26  ;;  %v8135_v52 = vunpack.i.l.bf16 %v8134_v20  ;;  %v8136_v5 = vunpack.i.h.bf16 %v8134_v20  ;;  %v8140_v26 = vunpack.i.l.bf16 %v8139_v13  ;;  %v8141_v55 = vunpack.i.h.bf16 %v8139_v13 }
 0xee7   :  { %3572 = vmatpush.msrb.mxu0 %v8110_v59  ;;  %v12136_v27 = vpop.f32.mrf.mxu3  ;;  %v8144_v59 = vpop.permute.xlu1 %8143 }
 0xee9   :  { %3573 = vmatpush.msrb.mxu0 %v8111_v62 }
 0xeea   :  { %3424 = vmatmul.f32.gmra.mxu0 %v3324_v30  ;;  %v8145_v30 = vunpack.i.l.bf16 %v8144_v59 }
 0xeeb   :  { %3574 = vmatpush.msrb.mxu0 %v8115_v47  ;;  %v3339_v47 = vld [vmem:[%s14434_s12 + $0x348] sm:$0xff] }
 0xeec   :  { %7527 = vmatmul.msk.f32.gmra.mxu3 %vm677_vm3, %v15070_v14  ;;  %v8149_v35 = vpop.permute.xlu0 %8148  ;;  %v8154_v10 = vpop.permute.xlu2 %8153 }
 0xeed   :  { %3575 = vmatpush.msrb.mxu0 %v8116_v50  ;;  %v8146_v50 = vunpack.i.h.bf16 %v8144_v59  ;;  %v8150_v14 = vunpack.i.l.bf16 %v8149_v35 }
 0xeef   :  { %3576 = vmatpush.msrb.mxu0 %v8120_v18  ;;  %v12143_v63 = vpop.f32.mrf.mxu3  ;;  %v15073_v18 = vld [vmem:[#allocation26_spill] sm:$0xff] }
 0xef1   :  { %3577 = vmatpush.msrb.mxu0 %v8121_v0  ;;  %v8151_v0 = vunpack.i.h.bf16 %v8149_v35 }
 0xef2   :  { %3427 = vmatmul.f32.gmra.mxu0 %v3329_v53 }
 0xef3   :  { %3578 = vmatpush.msrb.mxu0 %v8125_v4  ;;  %v8155_v4 = vunpack.i.l.bf16 %v8154_v10 }
 0xef4   :  { %7528 = vmatmul.msk.f32.gmra.mxu3 %vm677_vm3, %v15071_v58  ;;  %v8159_v58 = vpop.permute.xlu1 %8158  ;;  %v8169_v59 = vpop.permute.xlu2 %8168 }
 0xef5   :  { %3579 = vmatpush.msrb.mxu0 %v8126_v46  ;;  %v3322_v46 = vld [vmem:[%s14434_s12 + $0x2c0] sm:$0xff]  ;;  %v8160_v20 = vunpack.i.l.bf16 %v8159_v58  ;;  %v8171_v35 = vunpack.i.h.bf16 %v8169_v59 }
 0xef6   :  { %3544 = vmatmul.f32.gmra.mxu1 %v3322_v46  ;;  %v15076_v46 = vld [vmem:[#allocation29_spill] sm:$0xff] }
 0xef7   :  { %3580 = vmatpush.msrb.mxu0 %v8130_v17  ;;  %v12150_v41 = vpop.f32.mrf.mxu3  ;;  %v8156_v17 = vunpack.i.h.bf16 %v8154_v10  ;;  %v3332_v10 = vld [vmem:[%s14434_s12 + $0x310] sm:$0xff] }
 0xef9   :  { %3581 = vmatpush.msrb.mxu0 %v8131_v38  ;;  %v15074_v38 = vld [vmem:[#allocation27_spill] sm:$0xff] }
 0xefa   :  { %3430 = vmatmul.f32.gmra.mxu0 %v3334_v48  ;;  %v8161_v48 = vunpack.i.h.bf16 %v8159_v58 }
 0xefb   :  { %4605 = vmatpush.msra.mxu0 %v8135_v52  ;;  %v8164_v52 = vpop.permute.xlu0 %8163 }
 0xefc   :  { %7529 = vmatmul.msk.f32.gmra.mxu3 %vm677_vm3, %v15072_v51  ;;  %v3327_v51 = vld [vmem:[%s14434_s12 + $0x2e8] sm:$0xff] }
 0xefd   :  { %4606 = vmatpush.msra.mxu0 %v8136_v5  ;;  %v8165_v5 = vunpack.i.l.bf16 %v8164_v52 }
 0xefe   :  { %3547 = vmatmul.f32.gmra.mxu1 %v3327_v51 }
 0xeff   :  { %4607 = vmatpush.msra.mxu0 %v8140_v26  ;;  %v12157_v62 = vpop.f32.mrf.mxu3  ;;  %v3349_v26 = vld [vmem:[%s14434_s12 + $0x398] sm:$0xff] }
 0xf01   :  { %4608 = vmatpush.msra.mxu0 %v8141_v55  ;;  %v8166_v55 = vunpack.i.h.bf16 %v8164_v52 }
 0xf02   :  { %3433 = vmatmul.f32.gmra.mxu0 %v3339_v47  ;;  %v15075_v47 = vld [vmem:[#allocation28_spill] sm:$0xff] }
 0xf03   :  { %4609 = vmatpush.msra.mxu0 %v8145_v30  ;;  %v8170_v30 = vunpack.i.l.bf16 %v8169_v59  ;;  %v15077_v59 = vld [vmem:[#allocation31_spill] sm:$0xff] }
 0xf04   :  { %7530 = vmatmul.msk.f32.gmra.mxu3 %vm677_vm3, %v15073_v18  ;;  %v3318_v18 = vld [vmem:[%s14434_s12 + $0x2a0] sm:$0xff] }
 0xf05   :  { %4610 = vmatpush.msra.mxu0 %v8146_v50  ;;  %v8174_v50 = vpop.permute.xlu1 %8173 }
 0xf06   :  { %3550 = vmatmul.f32.gmra.mxu1 %v3332_v10 }
 0xf07   :  { %4611 = vmatpush.msra.mxu0 %v8150_v14  ;;  %v12164_v53 = vpop.f32.mrf.mxu3 }
 0xf09   :  { %4612 = vmatpush.msra.mxu0 %v8151_v0  ;;  %v8175_v0 = vunpack.i.l.bf16 %v8174_v50 }
 0xf0a   :  { %3436 = vmatmul.f32.gmra.mxu0 %v3344_v11  ;;  %v8176_v11 = vunpack.i.h.bf16 %v8174_v50 }
 0xf0b   :  { %4613 = vmatpush.msra.mxu0 %v8155_v4  ;;  %v8179_v4 = vpop.permute.xlu0 %8178 }
 0xf0c   :  { %7531 = vmatmul.msk.f32.gmra.mxu3 %vm677_vm3, %v15074_v38  ;;  %v8180_v58 = vunpack.i.l.bf16 %v8179_v4  ;;  %v8181_v52 = vunpack.i.h.bf16 %v8179_v4 }
 0xf0d   :  { %4614 = vmatpush.msra.mxu0 %v8156_v17  ;;  %v3337_v17 = vld [vmem:[%s14434_s12 + $0x338] sm:$0xff] }
 0xf0e   :  { %3553 = vmatmul.f32.gmra.mxu1 %v3337_v17 }
 0xf0f   :  { %4615 = vmatpush.msra.mxu0 %v8160_v20  ;;  %v12174_v13 = vpop.f32.mrf.mxu3  ;;  %v8184_v20 = vpop.permute.xlu2 %8183 }
 0xf10   :  { %v8186_v51 = vunpack.i.h.bf16 %v8184_v20 }
 0xf11   :  { %4616 = vmatpush.msra.mxu0 %v8161_v48  ;;  %v3323_v48 = vld [vmem:[%s14434_s12 + $0x2c8] sm:$0xff] }
 0xf12   :  { %3439 = vmatmul.f32.gmra.mxu0 %v3349_v26  ;;  %v8189_v26 = vpop.permute.xlu1 %8188 }
 0xf13   :  { %4617 = vmatpush.msra.mxu0 %v8165_v5  ;;  %v8185_v5 = vunpack.i.l.bf16 %v8184_v20  ;;  %v8191_v50 = vunpack.i.h.bf16 %v8189_v26 }
 0xf14   :  { %7532 = vmatmul.msk.f32.gmra.mxu3 %vm677_vm3, %v15075_v47  ;;  %v8194_v47 = vpop.permute.xlu0 %8193 }
 0xf15   :  { %4618 = vmatpush.msra.mxu0 %v8166_v55  ;;  %v8190_v55 = vunpack.i.l.bf16 %v8189_v26  ;;  %v8195_v10 = vunpack.i.l.bf16 %v8194_v47  ;;  %v8196_v4 = vunpack.i.h.bf16 %v8194_v47  ;;  %v3352_v47 = vld [vmem:[%s14434_s12 + $0x3b0] sm:$0xff] }
 0xf17   :  { %4619 = vmatpush.msra.mxu0 %v8170_v30  ;;  %v12184_v14 = vpop.f32.mrf.mxu3  ;;  %v3342_v30 = vld [vmem:[%s14434_s12 + $0x360] sm:$0xff] }
 0xf18   :  { %3556 = vmatmul.f32.gmra.mxu1 %v3342_v30 }
 0xf19   :  { %4620 = vmatpush.msra.mxu0 %v8171_v35 }
 0xf1a   :  { %3582 = vmatmul.f32.vlgmr.msrb.gmra.mxu0 %v3318_v18  ;;  %v3328_v18 = vld [vmem:[%s14434_s12 + $0x2f0] sm:$0xff]  ;;  %v8204_v17 = vpop.permute.xlu1 %8203 }
 0xf1b   :  { %4687 = vmatpush.msrb.mxu0 %v8175_v0  ;;  %v8199_v0 = vpop.permute.xlu2 %8198 }
 0xf1c   :  { %7533 = vmatmul.msk.f32.gmra.mxu3 %vm677_vm3, %v15076_v46  ;;  %v8200_v46 = vunpack.i.l.bf16 %v8199_v0  ;;  %v8209_v26 = vpop.permute.xlu0 %8208 }
 0xf1d   :  { %4688 = vmatpush.msrb.mxu0 %v8176_v11  ;;  %v15078_v11 = vld [vmem:[#allocation33_spill] sm:$0xff] }
 0xf1f   :  { %v12197_v38 = vpop.f32.mrf.mxu3  ;;  %4689 = vmatpush.msrb.mxu0 %v8180_v58  ;;  %v3347_v58 = vld [vmem:[%s14434_s12 + $0x388] sm:$0xff] }
 0xf20   :  { %3559 = vmatmul.f32.gmra.mxu1 %v3347_v58  ;;  %v3348_v58 = vld [vmem:[%s14434_s12 + $0x390] sm:$0xff] }
 0xf21   :  { %4690 = vmatpush.msrb.mxu0 %v8181_v52  ;;  %v8201_v52 = vunpack.i.h.bf16 %v8199_v0 }
 0xf22   :  { %3585 = vmatmul.f32.gmra.mxu0 %v3323_v48  ;;  %v3333_v48 = vld [vmem:[%s14434_s12 + $0x318] sm:$0xff] }
 0xf23   :  { %4691 = vmatpush.msrb.mxu0 %v8185_v5  ;;  %v8205_v5 = vunpack.i.l.bf16 %v8204_v17 }
 0xf24   :  { %7534 = vmatmul.msk.f32.gmra.mxu3 %vm677_vm3, %v15077_v59  ;;  %v15079_v59 = vld [vmem:[#allocation35_spill] sm:$0xff] }
 0xf25   :  { %4692 = vmatpush.msrb.mxu0 %v8186_v51  ;;  %v8206_v51 = vunpack.i.h.bf16 %v8204_v17  ;;  %v4488_v17 = vld [vmem:[%s14434_s12 + $0x3e8] sm:$0xff] }
 0xf27   :  { %v12207_v35 = vpop.f32.mrf.mxu3  ;;  %4693 = vmatpush.msrb.mxu0 %v8190_v55  ;;  %v8210_v55 = vunpack.i.l.bf16 %v8209_v26 }
 0xf28   :  { %3562 = vmatmul.f32.gmra.mxu1 %v3352_v47  ;;  %v15081_v47 = vld [vmem:[#allocation38_spill] sm:$0xff] }
 0xf29   :  { %4694 = vmatpush.msrb.mxu0 %v8191_v50  ;;  %v8211_v50 = vunpack.i.h.bf16 %v8209_v26 }
 0xf2a   :  { %3588 = vmatmul.f32.gmra.mxu0 %v3328_v18  ;;  %v3338_v18 = vld [vmem:[%s14434_s12 + $0x340] sm:$0xff] }
 0xf2b   :  { %4695 = vmatpush.msrb.mxu0 %v8195_v10  ;;  %v15080_v10 = vld [vmem:[#allocation36_spill] sm:$0xff] }
 0xf2c   :  { %7535 = vmatmul.msk.f32.gmra.mxu3 %vm677_vm3, %v15078_v11  ;;  %v4484_v11 = vld [vmem:[%s14434_s12 + $0x3c0] sm:$0xff] }
 0xf2d   :  { %4696 = vmatpush.msrb.mxu0 %v8196_v4  ;;  %v3343_v4 = vld [vmem:[%s14434_s12 + $0x368] sm:$0xff] }
 0xf2f   :  { %v12217_v20 = vpop.f32.mrf.mxu3  ;;  %4697 = vmatpush.msrb.mxu0 %v8200_v46 }
 0xf30   :  { %4580 = vmatmul.f32.vlgmr.msra.gmra.mxu1 %v4484_v11 }
 0xf31   :  { %4698 = vmatpush.msrb.mxu0 %v8201_v52 }
 0xf32   :  { %3591 = vmatmul.f32.gmra.mxu0 %v3333_v48  ;;  %v3353_v48 = vld [vmem:[%s14434_s12 + $0x3b8] sm:$0xff] }
 0xf33   :  { %4699 = vmatpush.msrb.mxu0 %v8205_v5  ;;  %v4492_v5 = vld [vmem:[%s14434_s12 + $0x410] sm:$0xff] }
 0xf34   :  { %7536 = vmatmul.msk.f32.gmra.mxu3 %vm677_vm3, %v15079_v59  ;;  %v4496_v59 = vld [vmem:[%s14434_s12 + $0x438] sm:$0xff] }
 0xf35   :  { %4700 = vmatpush.msrb.mxu0 %v8206_v51  ;;  %v4485_v51 = vld [vmem:[%s14434_s12 + $0x3c8] sm:$0xff] }
 0xf37   :  { %v12224_v30 = vpop.f32.mrf.mxu3  ;;  %4701 = vmatpush.msrb.mxu0 %v8210_v55 }
 0xf38   :  { %4583 = vmatmul.f32.gmra.mxu1 %v4488_v17  ;;  %v4501_v17 = vld [vmem:[%s14434_s12 + $0x468] sm:$0xff] }
 0xf39   :  { %4702 = vmatpush.msrb.mxu0 %v8211_v50  ;;  %v4489_v50 = vld [vmem:[%s14434_s12 + $0x3f0] sm:$0xff] }
 0xf3a   :  { %3594 = vmatmul.f32.gmra.mxu0 %v3338_v18  ;;  %v15082_v18 = vld [vmem:[#allocation39_spill] sm:$0xff] }
 0xf3c   :  { %7537 = vmatmul.msk.f32.gmra.mxu3 %vm677_vm3, %v15080_v10  ;;  %v4504_v10 = vld [vmem:[%s14434_s12 + $0x488] sm:$0xff] }
 0xf3f   :  { %v12234_v0 = vpop.f32.mrf.mxu3 }
 0xf40   :  { %4929 = vmatpush.msra.mxu2 %v12234_v0  ;;  %4586 = vmatmul.f32.gmra.mxu1 %v4492_v5  ;;  %v12338_v5 = vpop.f32.mrf.mxu1 }
 0xf41   :  { %15087 = vst [vmem:[#allocation167_spill] sm:$0xff] %v12338_v5  ;;  %v4498_v5 = vld [vmem:[%s14434_s12 + $0x448] sm:$0xff] }
 0xf42   :  { %4930 = vmatpush.msra.mxu2 %v12224_v30  ;;  %3597 = vmatmul.f32.gmra.mxu0 %v3343_v4 }
 0xf44   :  { %4931 = vmatpush.msra.mxu2 %v12217_v20 }
 0xf46   :  { %4932 = vmatpush.msra.mxu2 %v12207_v35 }
 0xf47   :  { %v12246_v46 = vpop.f32.mrf.mxu3 }
 0xf48   :  { %4933 = vmatpush.msra.mxu2 %v12197_v38  ;;  %4589 = vmatmul.f32.gmra.mxu1 %v4496_v59  ;;  %v15088_v59 = vld [vmem:[#allocation42_spill] sm:$0xff] }
 0xf4a   :  { %4934 = vmatpush.msra.mxu2 %v12184_v14  ;;  %3600 = vmatmul.f32.gmra.mxu0 %v3348_v58  ;;  %v15086_v58 = vld [vmem:[#allocation41_spill] sm:$0xff] }
 0xf4c   :  { %4935 = vmatpush.msra.mxu2 %v12174_v13 }
 0xf4e   :  { %4936 = vmatpush.msra.mxu2 %v12164_v53 }
 0xf4f   :  { %v12258_v52 = vpop.f32.mrf.mxu3 }
 0xf50   :  { %4937 = vmatpush.msra.mxu2 %v12157_v62 }
 0xf52   :  { %4938 = vmatpush.msra.mxu2 %v12150_v41  ;;  %3603 = vmatmul.f32.gmra.mxu0 %v3353_v48  ;;  %v4512_v48 = vld [vmem:[%s14434_s12 + $0x4d8] sm:$0xff] }
 0xf54   :  { %4939 = vmatpush.msra.mxu2 %v12143_v63 }
 0xf56   :  { %4940 = vmatpush.msra.mxu2 %v12136_v27 }
 0xf57   :  { %v12270_v26 = vpop.f32.mrf.mxu3 }
 0xf58   :  { %4941 = vmatpush.msra.mxu2 %v12129_v60 }
 0xf5a   :  { %4942 = vmatpush.msra.mxu2 %v12121_v33  ;;  %4621 = vmatmul.f32.vlgmr.msra.gmra.mxu0 %v4485_v51 }
 0xf5b   :  { %5267 = vmatpush.msra.mxu0 %v12157_v62  ;;  %v4500_v62 = vld [vmem:[%s14434_s12 + $0x460] sm:$0xff] }
 0xf5c   :  { %4943 = vmatpush.msra.mxu2 %v12113_v29  ;;  %4592 = vmatmul.f32.gmra.mxu1 %v4500_v62 }
 0xf5d   :  { %5268 = vmatpush.msra.mxu0 %v12150_v41 }
 0xf5e   :  { %4944 = vmatpush.msra.mxu2 %v12106_v32 }
 0xf5f   :  { %v12284_v55 = vpop.f32.mrf.mxu3  ;;  %4945 = vmatmul.f32.vlgmr.msra.gmra.mxu2 %v15081_v47  ;;  %5269 = vmatpush.msra.mxu0 %v12143_v63  ;;  %v4493_v63 = vld [vmem:[%s14434_s12 + $0x418] sm:$0xff]  ;;  %v4505_v47 = vld [vmem:[%s14434_s12 + $0x490] sm:$0xff] }
 0xf61   :  { %5270 = vmatpush.msra.mxu0 %v12136_v27  ;;  %v4497_v27 = vld [vmem:[%s14434_s12 + $0x440] sm:$0xff] }
 0xf62   :  { %4624 = vmatmul.f32.gmra.mxu0 %v4489_v50  ;;  %v4486_v50 = vld [vmem:[%s14434_s12 + $0x3d0] sm:$0xff] }
 0xf63   :  { %5271 = vmatpush.msra.mxu0 %v12129_v60 }
 0xf64   :  { %4595 = vmatmul.f32.gmra.mxu1 %v4504_v10  ;;  %v15091_v10 = vld [vmem:[#allocation43_spill] sm:$0xff] }
 0xf65   :  { %5272 = vmatpush.msra.mxu0 %v12121_v33  ;;  %v12309_v33 = vpop.f32.mrf.mxu0 }
 0xf66   :  { %15083 = vst [vmem:[#allocation192_spill] sm:$0xff] %v12309_v33  ;;  %v4491_v33 = vld [vmem:[%s14434_s12 + $0x400] sm:$0xff] }
 0xf67   :  { %v12297_v41 = vpop.f32.mrf.mxu3  ;;  %4948 = vmatmul.f32.gmra.mxu2 %v15082_v18  ;;  %5273 = vmatpush.msra.mxu0 %v12113_v29  ;;  %v15084_v29 = vld [vmem:[#allocation40_spill] sm:$0xff] }
 0xf69   :  { %5274 = vmatpush.msra.mxu0 %v12106_v32  ;;  %v4508_v32 = vld [vmem:[%s14434_s12 + $0x4b0] sm:$0xff] }
 0xf6a   :  { %4627 = vmatmul.f32.gmra.mxu0 %v4493_v63 }
 0xf6b   :  { %5275 = vmatpush.msra.mxu0 %v11922_v25 }
 0xf6c   :  { %4598 = vmatmul.f32.gmra.mxu1 %v4508_v32 }
 0xf6d   :  { %5276 = vmatpush.msra.mxu0 %v11929_v57  ;;  %v12325_v4 = vpop.f32.mrf.mxu0 }
 0xf6e   :  { %15085 = vst [vmem:[#allocation197_spill] sm:$0xff] %v12325_v4  ;;  %v15102_v4 = vld [vmem:[#allocation47_spill] sm:$0xff] }
 0xf6f   :  { %v12312_v60 = vpop.f32.mrf.mxu3  ;;  %4951 = vmatmul.f32.gmra.mxu2 %v15084_v29  ;;  %5277 = vmatpush.msra.mxu0 %v11936_v28  ;;  %v4509_v29 = vld [vmem:[%s14434_s12 + $0x4b8] sm:$0xff] }
 0xf71   :  { %5278 = vmatpush.msra.mxu0 %v11945_v42 }
 0xf72   :  { %4630 = vmatmul.f32.gmra.mxu0 %v4497_v27  ;;  %v4490_v27 = vld [vmem:[%s14434_s12 + $0x3f8] sm:$0xff] }
 0xf73   :  { %5279 = vmatpush.msra.mxu0 %v11956_v31  ;;  %v12351_v18 = vpop.f32.mrf.mxu1 }
 0xf74   :  { %4601 = vmatmul.f32.gmra.mxu1 %v4512_v48  ;;  %15090 = vst [vmem:[#allocation173_spill] sm:$0xff] %v12351_v18  ;;  %v15094_v48 = vld [vmem:[#allocation44_spill] sm:$0xff] }
 0xf75   :  { %5280 = vmatpush.msra.mxu0 %v11961_v40  ;;  %v12349_v62 = vpop.f32.mrf.mxu0 }
 0xf76   :  { %15089 = vst [vmem:[#allocation2_spill] sm:$0xff] %v12349_v62 }
 0xf77   :  { %v12327_v11 = vpop.f32.mrf.mxu3  ;;  %4954 = vmatmul.f32.gmra.mxu2 %v15086_v58  ;;  %5281 = vmatpush.msra.mxu0 %v11966_v45 }
 0xf79   :  { %5282 = vmatpush.msra.mxu0 %v11972_v6 }
 0xf7a   :  { %4633 = vmatmul.f32.gmra.mxu0 %v4501_v17 }
 0xf7b   :  { %v12364_v58 = vpop.f32.mrf.mxu1 }
 0xf7c   :  { %4662 = vmatmul.f32.vlgmr.msrb.gmra.mxu1 %v4486_v50  ;;  %15093 = vst [vmem:[#allocation4_spill] sm:$0xff] %v12364_v58  ;;  %v4495_v58 = vld [vmem:[%s14434_s12 + $0x428] sm:$0xff] }
 0xf7d   :  { %v12362_v32 = vpop.f32.mrf.mxu0 }
 0xf7e   :  { %15092 = vst [vmem:[#allocation3_spill] sm:$0xff] %v12362_v32  ;;  %v15177_v32 = vld [vmem:[#allocation86_spill] sm:$0xff] }
 0xf7f   :  { %v12340_v51 = vpop.f32.mrf.mxu3  ;;  %4957 = vmatmul.f32.gmra.mxu2 %v15088_v59  ;;  %v4513_v59 = vld [vmem:[%s14434_s12 + $0x4e0] sm:$0xff] }
 0xf82   :  { %4636 = vmatmul.f32.gmra.mxu0 %v4505_v47  ;;  %v4494_v47 = vld [vmem:[%s14434_s12 + $0x420] sm:$0xff] }
 0xf84   :  { %4665 = vmatmul.f32.gmra.mxu1 %v4490_v27  ;;  %v15097_v27 = vld [vmem:[#allocation45_spill] sm:$0xff] }
 0xf85   :  { %v12375_v50 = vpop.f32.mrf.mxu0 }
 0xf86   :  { %15095 = vst [vmem:[#allocation5_spill] sm:$0xff] %v12375_v50 }
 0xf87   :  { %v12353_v63 = vpop.f32.mrf.mxu3  ;;  %4960 = vmatmul.f32.gmra.mxu2 %v15091_v10  ;;  %v12377_v10 = vpop.f32.mrf.mxu1 }
 0xf88   :  { %15096 = vst [vmem:[#allocation6_spill] sm:$0xff] %v12377_v10 }
 0xf8a   :  { %4639 = vmatmul.f32.gmra.mxu0 %v4509_v29 }
 0xf8c   :  { %4668 = vmatmul.f32.gmra.mxu1 %v4494_v47 }
 0xf8d   :  { %v12392_v47 = vpop.f32.mrf.mxu0 }
 0xf8e   :  { %15099 = vst [vmem:[#allocation8_spill] sm:$0xff] %v12392_v47  ;;  %v15165_v47 = vld [vmem:[#allocation66_spill] sm:$0xff] }
 0xf8f   :  { %v12366_v17 = vpop.f32.mrf.mxu3  ;;  %4963 = vmatmul.f32.gmra.mxu2 %v15094_v48  ;;  %v4487_v48 = vld [vmem:[%s14434_s12 + $0x3d8] sm:$0xff] }
 0xf92   :  { %4642 = vmatmul.f32.gmra.mxu0 %v4513_v59  ;;  %v12390_v59 = vpop.f32.mrf.mxu1 }
 0xf93   :  { %15098 = vst [vmem:[#allocation7_spill] sm:$0xff] %v12390_v59  ;;  %v4499_v59 = vld [vmem:[%s14434_s12 + $0x450] sm:$0xff] }
 0xf94   :  { %4671 = vmatmul.f32.gmra.mxu1 %v4498_v5  ;;  %v4502_v5 = vld [vmem:[%s14434_s12 + $0x470] sm:$0xff] }
 0xf97   :  { %v12379_v29 = vpop.f32.mrf.mxu3  ;;  %4966 = vmatmul.f32.gmra.mxu2 %v15097_v27  ;;  %v15100_v27 = vld [vmem:[#allocation46_spill] sm:$0xff] }
 0xf9a   :  { %4703 = vmatmul.f32.vlgmr.msrb.gmra.mxu0 %v4487_v48  ;;  %v12407_v48 = vpop.f32.mrf.mxu1 }
 0xf9b   :  { %5308 = vmatpush.msrb.mxu0 %v12340_v51  ;;  %15101 = vst [vmem:[#allocation9_spill] sm:$0xff] %v12407_v48  ;;  %v15105_v48 = vld [vmem:[#allocation48_spill] sm:$0xff] }
 0xf9c   :  { %4674 = vmatmul.f32.gmra.mxu1 %v4502_v5  ;;  %v12419_v5 = vpop.f32.mrf.mxu0 }
 0xf9d   :  { %5309 = vmatpush.msrb.mxu0 %v12327_v11  ;;  %15103 = vst [vmem:[#allocation10_spill] sm:$0xff] %v12419_v5  ;;  %v15183_v5 = vld [vmem:[#allocation92_spill] sm:$0xff] }
 0xf9f   :  { %v12394_v18 = vpop.f32.mrf.mxu3  ;;  %4969 = vmatmul.f32.gmra.mxu2 %v15100_v27  ;;  %5310 = vmatpush.msrb.mxu0 %v12312_v60 }
 0xfa1   :  { %5311 = vmatpush.msrb.mxu0 %v12297_v41 }
 0xfa2   :  { %4706 = vmatmul.f32.gmra.mxu0 %v4491_v33  ;;  %v4506_v33 = vld [vmem:[%s14434_s12 + $0x498] sm:$0xff] }
 0xfa3   :  { %5312 = vmatpush.msrb.mxu0 %v12284_v55 }
 0xfa4   :  { %4677 = vmatmul.f32.gmra.mxu1 %v4506_v33  ;;  %v4503_v33 = vld [vmem:[%s14434_s12 + $0x478] sm:$0xff] }
 0xfa5   :  { %5313 = vmatpush.msrb.mxu0 %v12270_v26 }
 0xfa7   :  { %v12409_v27 = vpop.f32.mrf.mxu3  ;;  %4972 = vmatmul.f32.gmra.mxu2 %v15102_v4  ;;  %5314 = vmatpush.msrb.mxu0 %v12258_v52  ;;  %v12424_v4 = vpop.f32.mrf.mxu1 }
 0xfa8   :  { %15104 = vst [vmem:[#allocation11_spill] sm:$0xff] %v12424_v4 }
 0xfa9   :  { %5315 = vmatpush.msrb.mxu0 %v12246_v46 }
 0xfaa   :  { %4709 = vmatmul.f32.gmra.mxu0 %v4495_v58  ;;  %v4510_v58 = vld [vmem:[%s14434_s12 + $0x4c0] sm:$0xff] }
 0xfab   :  { %5316 = vmatpush.msrb.mxu0 %v12234_v0 }
 0xfac   :  { %4680 = vmatmul.f32.gmra.mxu1 %v4510_v58  ;;  %v15111_v58 = vld [vmem:[#allocation50_spill] sm:$0xff] }
 0xfad   :  { %5317 = vmatpush.msrb.mxu0 %v12224_v30  ;;  %v12437_v30 = vpop.f32.mrf.mxu0 }
 0xfae   :  { %15106 = vst [vmem:[#allocation12_spill] sm:$0xff] %v12437_v30  ;;  %v15178_v30 = vld [vmem:[#allocation87_spill] sm:$0xff] }
 0xfaf   :  { %v12426_v62 = vpop.f32.mrf.mxu3  ;;  %4975 = vmatmul.f32.gmra.mxu2 %v15105_v48  ;;  %5318 = vmatpush.msrb.mxu0 %v12217_v20  ;;  %v12441_v0 = vpop.f32.mrf.mxu1  ;;  %v15108_v48 = vld [vmem:[#allocation49_spill] sm:$0xff] }
 0xfb0   :  { %15107 = vst [vmem:[#allocation13_spill] sm:$0xff] %v12441_v0  ;;  %v15176_v0 = vld [vmem:[#allocation85_spill] sm:$0xff] }
 0xfb1   :  { %5319 = vmatpush.msrb.mxu0 %v12207_v35  ;;  %v4514_v35 = vld [vmem:[%s14434_s12 + $0x4e8] sm:$0xff] }
 0xfb2   :  { %4712 = vmatmul.f32.gmra.mxu0 %v4499_v59 }
 0xfb3   :  { %5320 = vmatpush.msrb.mxu0 %v12197_v38 }
 0xfb4   :  { %4683 = vmatmul.f32.gmra.mxu1 %v4514_v35  ;;  %v4511_v35 = vld [vmem:[%s14434_s12 + $0x4c8] sm:$0xff] }
 0xfb5   :  { %5321 = vmatpush.msrb.mxu0 %v12184_v14  ;;  %v12454_v14 = vpop.f32.mrf.mxu0 }
 0xfb6   :  { %15109 = vst [vmem:[#allocation14_spill] sm:$0xff] %v12454_v14 }
 0xfb7   :  { %v12443_v20 = vpop.f32.mrf.mxu3  ;;  %4978 = vmatmul.f32.gmra.mxu2 %v15108_v48  ;;  %5322 = vmatpush.msrb.mxu0 %v12174_v13  ;;  %v12456_v38 = vpop.f32.mrf.mxu1  ;;  %v4507_v13 = vld [vmem:[%s14434_s12 + $0x4a0] sm:$0xff] }
 0xfb8   :  { %15110 = vst [vmem:[#allocation15_spill] sm:$0xff] %v12456_v38 }
 0xfb9   :  { %5323 = vmatpush.msrb.mxu0 %v12164_v53 }
 0xfba   :  { %4715 = vmatmul.f32.gmra.mxu0 %v4503_v33  ;;  %v15114_v33 = vld [vmem:[#allocation51_spill] sm:$0xff] }
 0xfbd   :  { %v12470_v48 = vpop.f32.mrf.mxu0 }
 0xfbe   :  { %15113 = vst [vmem:[#allocation17_spill] sm:$0xff] %v12470_v48 }
 0xfbf   :  { %v12458_v59 = vpop.f32.mrf.mxu3  ;;  %4981 = vmatmul.f32.gmra.mxu2 %v15111_v58  ;;  %v12468_v53 = vpop.f32.mrf.mxu1  ;;  %v15115_v58 = vld [vmem:[#allocation52_spill] sm:$0xff] }
 0xfc0   :  { %5042 = vmatpush.msra.mxu1 %v12458_v59  ;;  %15112 = vst [vmem:[#allocation16_spill] sm:$0xff] %v12468_v53 }
 0xfc2   :  { %5043 = vmatpush.msra.mxu1 %v12443_v20  ;;  %4718 = vmatmul.f32.gmra.mxu0 %v4507_v13  ;;  %v4515_v13 = vld [vmem:[%s14434_s12 + $0x4f0] sm:$0xff] }
 0xfc4   :  { %5044 = vmatpush.msra.mxu1 %v12426_v62 }
 0xfc5   :  { %v12487_v14 = vpop.f32.mrf.mxu0 }
 0xfc6   :  { %5045 = vmatpush.msra.mxu1 %v12409_v27  ;;  %15117 = vst [vmem:[#allocation169_spill] sm:$0xff] %v12487_v14  ;;  %v15140_v14 = vld [vmem:[#allocation32_spill] sm:$0xff] }
 0xfc7   :  { %4984 = vmatmul.f32.gmra.mxu2 %v15114_v33  ;;  %v12485_v33 = vpop.f32.mrf.mxu1 }
 0xfc8   :  { %5046 = vmatpush.msra.mxu1 %v12394_v18  ;;  %15116 = vst [vmem:[#allocation18_spill] sm:$0xff] %v12485_v33  ;;  %v15144_v33 = vld [vmem:[#allocation34_spill] sm:$0xff] }
 0xfca   :  { %5047 = vmatpush.msra.mxu1 %v12379_v29  ;;  %4721 = vmatmul.f32.gmra.mxu0 %v4511_v35  ;;  %v15118_v35 = vld [vmem:[#allocation53_spill] sm:$0xff] }
 0xfcc   :  { %5048 = vmatpush.msra.mxu1 %v12366_v17 }
 0xfcd   :  { %v12500_v48 = vpop.f32.mrf.mxu0 }
 0xfce   :  { %5049 = vmatpush.msra.mxu1 %v12353_v63  ;;  %15120 = vst [vmem:[#allocation168_spill] sm:$0xff] %v12500_v48  ;;  %v15161_v48 = vld [vmem:[#allocation65_spill] sm:$0xff] }
 0xfcf   :  { %4987 = vmatmul.f32.gmra.mxu2 %v15115_v58  ;;  %v12498_v58 = vpop.f32.mrf.mxu1 }
 0xfd0   :  { %5050 = vmatpush.msra.mxu1 %v12340_v51  ;;  %v5155_v51 = vld [vmem:[%s14437_s11 + $0x140] sm:$0xff]  ;;  %15119 = vst [vmem:[#allocation19_spill] sm:$0xff] %v12498_v58  ;;  %v15143_v58 = vld [vmem:[#allocation60_spill] sm:$0xff] }
 0xfd2   :  { %5051 = vmatpush.msra.mxu1 %v12327_v11  ;;  %4724 = vmatmul.f32.gmra.mxu0 %v4515_v13  ;;  %v15125_v13 = vld [vmem:[#allocation55_spill] sm:$0xff] }
 0xfd4   :  { %5052 = vmatpush.msra.mxu1 %v12312_v60  ;;  %v15122_v60 = vld [vmem:[#allocation133_spill] sm:$0xff] }
 0xfd6   :  { %5053 = vmatpush.msra.mxu1 %v12297_v41  ;;  %v15121_v41 = vld [vmem:[#allocation54_spill] sm:$0xff] }
 0xfd7   :  { %4990 = vmatmul.f32.gmra.mxu2 %v15118_v35  ;;  %v15126_v35 = vld [vmem:[#allocation136_spill] sm:$0xff] }
 0xfd8   :  { %5054 = vmatpush.msra.mxu1 %v12284_v55  ;;  %v5160_v55 = vld [vmem:[%s14437_s11 + $0x168] sm:$0xff] }
 0xfd9   :  { %v12509_v11 = vpop.f32.mrf.mxu1 }
 0xfda   :  { %5055 = vmatpush.msra.mxu1 %v12270_v26  ;;  %5283 = vmatmul.f32.vlgmr.msra.gmra.mxu0 %v5155_v51  ;;  %15123 = vst [vmem:[#allocation166_spill] sm:$0xff] %v12509_v11  ;;  %v12511_v26 = vpop.f32.mrf.mxu0  ;;  %v15139_v11 = vld [vmem:[#allocation59_spill] sm:$0xff] }
 0xfdb   :  { %15124 = vst [vmem:[#allocation165_spill] sm:$0xff] %v12511_v26  ;;  %v15154_v26 = vld [vmem:[#allocation79_spill] sm:$0xff] }
 0xfdc   :  { %5056 = vmatpush.msra.mxu1 %v12258_v52 }
 0xfde   :  { %5057 = vmatpush.msra.mxu1 %v12246_v46  ;;  %v5165_v46 = vld [vmem:[%s14437_s11 + $0x190] sm:$0xff] }
 0xfdf   :  { %4993 = vmatmul.f32.gmra.mxu2 %v15121_v41  ;;  %5058 = vmatmul.f32.vlgmr.msra.gmra.mxu1 %v15122_v60  ;;  %v15129_v41 = vld [vmem:[#allocation56_spill] sm:$0xff]  ;;  %v15130_v60 = vld [vmem:[#allocation139_spill] sm:$0xff] }
 0xfe1   :  { %v12518_v52 = vpop.f32.mrf.mxu1 }
 0xfe2   :  { %5286 = vmatmul.f32.gmra.mxu0 %v5160_v55  ;;  %15127 = vst [vmem:[#allocation164_spill] sm:$0xff] %v12518_v52  ;;  %v12520_v51 = vpop.f32.mrf.mxu0  ;;  %v5170_v55 = vld [vmem:[%s14437_s11 + $0x1b8] sm:$0xff] }
 0xfe3   :  { %15128 = vst [vmem:[#allocation20_spill] sm:$0xff] %v12520_v51  ;;  %v15150_v51 = vld [vmem:[#allocation78_spill] sm:$0xff] }
 0xfe7   :  { %4996 = vmatmul.f32.gmra.mxu2 %v15125_v13  ;;  %5061 = vmatmul.f32.gmra.mxu1 %v15126_v35  ;;  %v15131_v13 = vld [vmem:[#allocation57_spill] sm:$0xff]  ;;  %v15132_v35 = vld [vmem:[#allocation142_spill] sm:$0xff] }
 0xfe9   :  { %v12532_v38 = vpop.f32.mrf.mxu1 }
 0xfea   :  { %5289 = vmatmul.f32.gmra.mxu0 %v5165_v46  ;;  %v5175_v46 = vld [vmem:[%s14437_s11 + $0x1e0] sm:$0xff]  ;;  %15133 = vst [vmem:[#allocation163_spill] sm:$0xff] %v12532_v38  ;;  %v12534_v53 = vpop.f32.mrf.mxu0  ;;  %v15180_v38 = vld [vmem:[#allocation89_spill] sm:$0xff] }
 0xfeb   :  { %15134 = vst [vmem:[#allocation171_spill] sm:$0xff] %v12534_v53 }
 0xfef   :  { %4999 = vmatmul.f32.gmra.mxu2 %v15129_v41  ;;  %5064 = vmatmul.f32.gmra.mxu1 %v15130_v60  ;;  %v15135_v41 = vld [vmem:[#allocation58_spill] sm:$0xff] }
 0xff0   :  { %v15136_v60 = vld [vmem:[#allocation30_spill] sm:$0xff] }
 0xff2   :  { %5292 = vmatmul.f32.gmra.mxu0 %v5170_v55  ;;  %v5180_v55 = vld [vmem:[%s14437_s11 + $0x208] sm:$0xff] }
 0xff7   :  { %5002 = vmatmul.f32.gmra.mxu2 %v15131_v13  ;;  %5067 = vmatmul.f32.gmra.mxu1 %v15132_v35  ;;  %v12541_v13 = vpop.f32.mrf.mxu1  ;;  %v12543_v35 = vpop.f32.mrf.mxu0 }
 0xff8   :  { %15137 = vst [vmem:[#allocation172_spill] sm:$0xff] %v12541_v13  ;;  %v15172_v13 = vld [vmem:[#allocation84_spill] sm:$0xff] }
 0xff9   :  { %15138 = vst [vmem:[#allocation21_spill] sm:$0xff] %v12543_v35  ;;  %v15175_v35 = vld [vmem:[#allocation69_spill] sm:$0xff] }
 0xffa   :  { %5295 = vmatmul.f32.gmra.mxu0 %v5175_v46  ;;  %v5185_v46 = vld [vmem:[%s14437_s11 + $0x230] sm:$0xff] }
 0xfff   :  { %5005 = vmatmul.f32.gmra.mxu2 %v15135_v41  ;;  %5070 = vmatmul.f32.gmra.mxu1 %v15136_v60  ;;  %v12550_v41 = vpop.f32.mrf.mxu1  ;;  %v12552_v60 = vpop.f32.mrf.mxu0 }
0x1000   :  { %15141 = vst [vmem:[#allocation22_spill] sm:$0xff] %v12550_v41  ;;  %v15148_v41 = vld [vmem:[#allocation37_spill] sm:$0xff] }
0x1001   :  { %15142 = vst [vmem:[#allocation23_spill] sm:$0xff] %v12552_v60  ;;  %v15149_v60 = vld [vmem:[#allocation62_spill] sm:$0xff] }
0x1002   :  { %5298 = vmatmul.f32.gmra.mxu0 %v5180_v55  ;;  %v5190_v55 = vld [vmem:[%s14437_s11 + $0x258] sm:$0xff] }
0x1007   :  { %5008 = vmatmul.f32.gmra.mxu2 %v15139_v11  ;;  %5073 = vmatmul.f32.gmra.mxu1 %v15140_v14  ;;  %v12559_v11 = vpop.f32.mrf.mxu2  ;;  %v12561_v14 = vpop.f32.mrf.mxu1 }
0x1008   :  { %15145 = vst [vmem:[#allocation24_spill] sm:$0xff] %v12561_v14  ;;  %v12563_v52 = vpop.f32.mrf.mxu0 }
0x1009   :  { %15146 = vst [vmem:[#allocation25_spill] sm:$0xff] %v12563_v52  ;;  %v15153_v52 = vld [vmem:[#allocation63_spill] sm:$0xff] }
0x100a   :  { %5301 = vmatmul.f32.gmra.mxu0 %v5185_v46  ;;  %v15147_v46 = vld [vmem:[#allocation61_spill] sm:$0xff] }
0x100f   :  { %5011 = vmatmul.f32.gmra.mxu2 %v15143_v58  ;;  %5076 = vmatmul.f32.gmra.mxu1 %v15144_v33  ;;  %v5156_v58 = vld [vmem:[%s14437_s11 + $0x148] sm:$0xff]  ;;  %v12570_v33 = vpop.f32.mrf.mxu2  ;;  %v12577_v14 = vpop.f32.mrf.mxu1 }
0x1010   :  { %15151 = vst [vmem:[#allocation26_spill] sm:$0xff] %v12577_v14  ;;  %v15157_v14 = vld [vmem:[#allocation64_spill] sm:$0xff] }
0x1012   :  { %5304 = vmatmul.f32.gmra.mxu0 %v5190_v55  ;;  %v5161_v55 = vld [vmem:[%s14437_s11 + $0x170] sm:$0xff] }
0x1017   :  { %5014 = vmatmul.f32.gmra.mxu2 %v15147_v46  ;;  %5079 = vmatmul.f32.gmra.mxu1 %v15148_v41  ;;  %v12579_v46 = vpop.f32.mrf.mxu0  ;;  %v12581_v41 = vpop.f32.mrf.mxu2 }
0x1018   :  { %15152 = vst [vmem:[#allocation27_spill] sm:$0xff] %v12579_v46 }
0x101a   :  { %5324 = vmatmul.f32.vlgmr.msrb.gmra.mxu0 %v5156_v58 }
0x101f   :  { %5017 = vmatmul.f32.gmra.mxu2 %v15149_v60  ;;  %5082 = vmatmul.f32.gmra.mxu1 %v15150_v51  ;;  %v5166_v60 = vld [vmem:[%s14437_s11 + $0x198] sm:$0xff]  ;;  %v12588_v51 = vpop.f32.mrf.mxu1  ;;  %v12590_v58 = vpop.f32.mrf.mxu0 }
0x1020   :  { %15155 = vst [vmem:[#allocation28_spill] sm:$0xff] %v12588_v51  ;;  %v12592_v50 = vpop.f32.mrf.mxu2  ;;  %v15162_v51 = vld [vmem:[#allocation81_spill] sm:$0xff] }
0x1021   :  { %15156 = vst [vmem:[#allocation29_spill] sm:$0xff] %v12590_v58 }
0x1022   :  { %5327 = vmatmul.f32.gmra.mxu0 %v5161_v55  ;;  %v15158_v55 = vld [vmem:[#allocation80_spill] sm:$0xff] }
0x1027   :  { %5020 = vmatmul.f32.gmra.mxu2 %v15153_v52  ;;  %5085 = vmatmul.f32.gmra.mxu1 %v15154_v26  ;;  %v5171_v52 = vld [vmem:[%s14437_s11 + $0x1c0] sm:$0xff]  ;;  %v12599_v26 = vpop.f32.mrf.mxu1  ;;  %v12601_v46 = vpop.f32.mrf.mxu0 }
0x1028   :  { %15159 = vst [vmem:[#allocation31_spill] sm:$0xff] %v12599_v26 }
0x1029   :  { %15160 = vst [vmem:[#allocation33_spill] sm:$0xff] %v12601_v46  ;;  %v15168_v46 = vld [vmem:[#allocation83_spill] sm:$0xff] }
0x102a   :  { %5330 = vmatmul.f32.gmra.mxu0 %v5166_v60  ;;  %v5176_v60 = vld [vmem:[%s14437_s11 + $0x1e8] sm:$0xff] }
0x102f   :  { %5023 = vmatmul.f32.gmra.mxu2 %v15157_v14  ;;  %5088 = vmatmul.f32.gmra.mxu1 %v15158_v55  ;;  %v4958_v14 = vpop.f32.mrf.mxu2  ;;  %v12608_v55 = vpop.f32.mrf.mxu1 }
0x1030   :  { %15163 = vst [vmem:[#allocation35_spill] sm:$0xff] %v12608_v55  ;;  %v12610_v58 = vpop.f32.mrf.mxu0 }
0x1031   :  { %15164 = vst [vmem:[#allocation36_spill] sm:$0xff] %v12610_v58 }
0x1032   :  { %5333 = vmatmul.f32.gmra.mxu0 %v5171_v52  ;;  %v15166_v52 = vld [vmem:[#allocation82_spill] sm:$0xff] }
0x1037   :  { %5026 = vmatmul.f32.gmra.mxu2 %v15161_v48  ;;  %5091 = vmatmul.f32.gmra.mxu1 %v15162_v51  ;;  %v5181_v48 = vld [vmem:[%s14437_s11 + $0x210] sm:$0xff]  ;;  %v4961_v26 = vpop.f32.mrf.mxu2  ;;  %v15167_v51 = vld [vmem:[#allocation67_spill] sm:$0xff]  ;;  %v12622_v55 = vpop.f32.mrf.mxu1 }
0x1038   :  { %15169 = vst [vmem:[#allocation38_spill] sm:$0xff] %v12622_v55  ;;  %v12624_v58 = vpop.f32.mrf.mxu0 }
0x1039   :  { %15170 = vst [vmem:[#allocation39_spill] sm:$0xff] %v12624_v58  ;;  %v15179_v58 = vld [vmem:[#allocation88_spill] sm:$0xff] }
0x103a   :  { %5336 = vmatmul.f32.gmra.mxu0 %v5176_v60  ;;  %v5186_v60 = vld [vmem:[%s14437_s11 + $0x238] sm:$0xff] }
0x103f   :  { %5029 = vmatmul.f32.gmra.mxu2 %v15165_v47  ;;  %5094 = vmatmul.f32.gmra.mxu1 %v15166_v52  ;;  %v4964_v47 = vpop.f32.mrf.mxu2  ;;  %v15171_v52 = vld [vmem:[#allocation68_spill] sm:$0xff] }
0x1042   :  { %5339 = vmatmul.f32.gmra.mxu0 %v5181_v48  ;;  %v5191_v48 = vld [vmem:[%s14437_s11 + $0x260] sm:$0xff] }
0x1047   :  { %5032 = vmatmul.f32.gmra.mxu2 %v15167_v51  ;;  %5097 = vmatmul.f32.gmra.mxu1 %v15168_v46  ;;  %v12631_v51 = vpop.f32.mrf.mxu1  ;;  %v12633_v46 = vpop.f32.mrf.mxu0 }
0x1048   :  { %15173 = vst [vmem:[#allocation40_spill] sm:$0xff] %v12631_v51  ;;  %v4967_v10 = vpop.f32.mrf.mxu2 }
0x1049   :  { %15174 = vst [vmem:[#allocation41_spill] sm:$0xff] %v12633_v46 }
0x104a   :  { %5342 = vmatmul.f32.gmra.mxu0 %v5186_v60 }
0x104f   :  { %5035 = vmatmul.f32.gmra.mxu2 %v15171_v52  ;;  %5100 = vmatmul.f32.gmra.mxu1 %v15172_v13 }
0x1050   :  { %v12639_v55 = vpop.f32.mrf.mxu2 }
0x1052   :  { %5345 = vmatmul.f32.gmra.mxu0 %v5191_v48 }
0x1057   :  { %5038 = vmatmul.f32.gmra.mxu2 %v15175_v35  ;;  %5103 = vmatmul.f32.gmra.mxu1 %v15176_v0  ;;  %v15181_v35 = vld [vmem:[#allocation90_spill] sm:$0xff] }
0x1058   :  { %v12643_v48 = vpop.f32.mrf.mxu2 }
0x105c   :  { %v5059_v60 = vpop.f32.mrf.mxu1 }
0x105f   :  { %5106 = vmatmul.f32.gmra.mxu1 %v15177_v32  ;;  %v15182_v32 = vld [vmem:[#allocation91_spill] sm:$0xff] }
0x1060   :  { %v12646_v0 = vpop.f32.mrf.mxu2 }
0x1064   :  { %v5062_v52 = vpop.f32.mrf.mxu1 }
0x1067   :  { %5109 = vmatmul.f32.gmra.mxu1 %v15178_v30 }
0x1068   :  { %v12649_v4 = vpop.f32.mrf.mxu2 }
0x106c   :  { %v5065_v13 = vpop.f32.mrf.mxu1 }
0x106f   :  { %5112 = vmatmul.f32.gmra.mxu1 %v15179_v58 }
0x1070   :  { %v12652_v6 = vpop.f32.mrf.mxu2 }
0x1074   :  { %v5068_v51 = vpop.f32.mrf.mxu1 }
0x1075   :  { %v5069_v40 = vadd.f32 %v5068_v51, %v12592_v50  ;;  %v15188_v50 = vld [vmem:[#allocation98_spill] sm:$0xff] }
0x1077   :  { %5115 = vmatmul.f32.gmra.mxu1 %v15180_v38 }
0x107c   :  { %v5071_v46 = vpop.f32.mrf.mxu1 }
0x107d   :  { %v5072_v31 = vadd.f32 %v5071_v46, %v4958_v14  ;;  %v15193_v14 = vld [vmem:[#allocation104_spill] sm:$0xff]  ;;  %v15195_v46 = vld [vmem:[#allocation106_spill] sm:$0xff] }
0x107f   :  { %5118 = vmatmul.f32.gmra.mxu1 %v15181_v35  ;;  %v12655_v35 = vpop.f32.mrf.mxu0 }
0x1080   :  { %15185 = vst [vmem:[#allocation42_spill] sm:$0xff] %v12655_v35 }
0x1084   :  { %v5074_v53 = vpop.f32.mrf.mxu1 }
0x1085   :  { %v5075_v2 = vadd.f32 %v5074_v53, %v4961_v26  ;;  %v5060_v53 = vadd.f32 %v5059_v60, %v12559_v11 }
0x1087   :  { %5121 = vmatmul.f32.gmra.mxu1 %v15182_v32 }
0x108c   :  { %v5077_v30 = vpop.f32.mrf.mxu1 }
0x108d   :  { %v5078_v38 = vadd.f32 %v5077_v30, %v4964_v47 }
0x108f   :  { %5124 = vmatmul.f32.gmra.mxu1 %v15183_v5  ;;  %v5066_v5 = vadd.f32 %v5065_v13, %v12581_v41 }
0x1094   :  { %v5080_v45 = vpop.f32.mrf.mxu1 }
0x1095   :  { %v5081_v58 = vadd.f32 %v5080_v45, %v4967_v10  ;;  %v15186_v45 = vld [vmem:[#allocation96_spill] sm:$0xff]  ;;  %v12662_v10 = vpop.f32.mrf.mxu2 }
0x1097   :  { %5127 = vmatmul.f32.gmra.mxu1 %v15184_v37  ;;  %5349 = vmatpush.msra.mxu0 %v5081_v58  ;;  %v5063_v37 = vadd.f32 %v5062_v52, %v12570_v33  ;;  %v15190_v33 = vld [vmem:[#allocation100_spill] sm:$0xff]  ;;  %v5172_v52 = vld [vmem:[%s14437_s11 + $0x1c8] sm:$0xff] }
0x1098   :  { %v15197_v58 = vld [vmem:[#allocation108_spill] sm:$0xff] }
0x1099   :  { %5350 = vmatpush.msra.mxu0 %v5078_v38 }
0x109b   :  { %5351 = vmatpush.msra.mxu0 %v5075_v2  ;;  %v12668_v2 = vpop.f32.mrf.mxu0 }
0x109c   :  { %v12657_v32 = vpop.f32.mrf.mxu1  ;;  %15187 = vst [vmem:[#allocation43_spill] sm:$0xff] %v12668_v2 }
0x109d   :  { %5352 = vmatpush.msra.mxu0 %v5072_v31  ;;  %v12673_v31 = vpop.f32.mrf.mxu2 }
0x109f   :  { %5130 = vmatmul.f32.gmra.mxu1 %v15186_v45  ;;  %5353 = vmatpush.msra.mxu0 %v5069_v40 }
0x10a1   :  { %5354 = vmatpush.msra.mxu0 %v5066_v5  ;;  %v5177_v5 = vld [vmem:[%s14437_s11 + $0x1f0] sm:$0xff] }
0x10a3   :  { %5355 = vmatpush.msra.mxu0 %v5063_v37  ;;  %v12679_v11 = vpop.f32.mrf.mxu0 }
0x10a4   :  { %v12666_v26 = vpop.f32.mrf.mxu1  ;;  %15189 = vst [vmem:[#allocation44_spill] sm:$0xff] %v12679_v11 }
0x10a5   :  { %5356 = vmatpush.msra.mxu0 %v5060_v53  ;;  %v15199_v53 = vld [vmem:[#allocation109_spill] sm:$0xff] }
0x10a7   :  { %5133 = vmatmul.f32.gmra.mxu1 %v15188_v50  ;;  %5357 = vmatpush.msra.mxu0 %v12458_v59  ;;  %v12688_v59 = vpop.f32.mrf.mxu2  ;;  %v5182_v50 = vld [vmem:[%s14437_s11 + $0x218] sm:$0xff] }
0x10a9   :  { %5358 = vmatpush.msra.mxu0 %v12443_v20  ;;  %v5157_v20 = vld [vmem:[%s14437_s11 + $0x150] sm:$0xff] }
0x10ab   :  { %5359 = vmatpush.msra.mxu0 %v12426_v62  ;;  %v12694_v41 = vpop.f32.mrf.mxu0 }
0x10ac   :  { %v12676_v40 = vpop.f32.mrf.mxu1  ;;  %15192 = vst [vmem:[#allocation45_spill] sm:$0xff] %v12694_v41 }
0x10ad   :  { %5360 = vmatpush.msra.mxu0 %v12409_v27  ;;  %v15191_v27 = vld [vmem:[#allocation102_spill] sm:$0xff] }
0x10af   :  { %5136 = vmatmul.f32.gmra.mxu1 %v15190_v33  ;;  %5361 = vmatpush.msra.mxu0 %v12394_v18  ;;  %v5162_v18 = vld [vmem:[%s14437_s11 + $0x178] sm:$0xff] }
0x10b1   :  { %5362 = vmatpush.msra.mxu0 %v12379_v29  ;;  %v12701_v29 = vpop.f32.mrf.mxu2 }
0x10b3   :  { %5363 = vmatpush.msra.mxu0 %v12366_v17  ;;  %v12704_v47 = vpop.f32.mrf.mxu0 }
0x10b4   :  { %v12690_v62 = vpop.f32.mrf.mxu1  ;;  %15194 = vst [vmem:[#allocation46_spill] sm:$0xff] %v12704_v47 }
0x10b5   :  { %5364 = vmatpush.msra.mxu0 %v12353_v63  ;;  %v5167_v63 = vld [vmem:[%s14437_s11 + $0x1a0] sm:$0xff] }
0x10b6   :  { %5365 = vmatmul.f32.vlgmr.msra.gmra.mxu0 %v5157_v20 }
0x10b7   :  { %5139 = vmatmul.f32.gmra.mxu1 %v15191_v27 }
0x10b9   :  { %v4997_v60 = vpop.f32.mrf.mxu2 }
0x10bb   :  { %v12715_v30 = vpop.f32.mrf.mxu0 }
0x10bc   :  { %v12699_v17 = vpop.f32.mrf.mxu1  ;;  %15196 = vst [vmem:[#allocation47_spill] sm:$0xff] %v12715_v30 }
0x10be   :  { %5368 = vmatmul.f32.gmra.mxu0 %v5162_v18  ;;  %v5187_v18 = vld [vmem:[%s14437_s11 + $0x240] sm:$0xff] }
0x10bf   :  { %5142 = vmatmul.f32.gmra.mxu1 %v15193_v14 }
0x10c1   :  { %v5000_v38 = vpop.f32.mrf.mxu2 }
0x10c3   :  { %v12721_v37 = vpop.f32.mrf.mxu0 }
0x10c4   :  { %v12709_v51 = vpop.f32.mrf.mxu1  ;;  %15198 = vst [vmem:[#allocation48_spill] sm:$0xff] %v12721_v37 }
0x10c6   :  { %5371 = vmatmul.f32.gmra.mxu0 %v5167_v63 }
0x10c7   :  { %5145 = vmatmul.f32.gmra.mxu1 %v15195_v46 }
0x10c9   :  { %v5003_v33 = vpop.f32.mrf.mxu2 }
0x10cb   :  { %v12727_v27 = vpop.f32.mrf.mxu0 }
0x10cc   :  { %v5101_v13 = vpop.f32.mrf.mxu1  ;;  %15200 = vst [vmem:[#allocation49_spill] sm:$0xff] %v12727_v27 }
0x10ce   :  { %5374 = vmatmul.f32.gmra.mxu0 %v5172_v52  ;;  %v5192_v52 = vld [vmem:[%s14437_s11 + $0x268] sm:$0xff] }
0x10cf   :  { %5148 = vmatmul.f32.gmra.mxu1 %v15197_v58 }
0x10d1   :  { %v5006_v63 = vpop.f32.mrf.mxu2 }
0x10d3   :  { %v12732_v46 = vpop.f32.mrf.mxu0 }
0x10d4   :  { %v5104_v45 = vpop.f32.mrf.mxu1 }
0x10d6   :  { %5377 = vmatmul.f32.gmra.mxu0 %v5177_v5 }
0x10d7   :  { %5151 = vmatmul.f32.gmra.mxu1 %v15199_v53 }
0x10d9   :  { %v5009_v5 = vpop.f32.mrf.mxu2 }
0x10dc   :  { %v5107_v20 = vpop.f32.mrf.mxu1 }
0x10de   :  { %5380 = vmatmul.f32.gmra.mxu0 %v5182_v50  ;;  %v12737_v50 = vpop.f32.mrf.mxu0 }
0x10e1   :  { %v5012_v35 = vpop.f32.mrf.mxu2 }
0x10e4   :  { %v5110_v14 = vpop.f32.mrf.mxu1 }
0x10e5   :  { %v5111_v54 = vadd.f32 %v5110_v14, %v4997_v60 }
0x10e6   :  { %5383 = vmatmul.f32.gmra.mxu0 %v5187_v18  ;;  %v12739_v47 = vpop.f32.mrf.mxu0 }
0x10e9   :  { %v5015_v41 = vpop.f32.mrf.mxu2 }
0x10ec   :  { %v5113_v58 = vpop.f32.mrf.mxu1 }
0x10ed   :  { %v5114_v61 = vadd.f32 %v5113_v58, %v5000_v38  ;;  %v5178_v38 = vld [vmem:[%s14437_s11 + $0x1f8] sm:$0xff] }
0x10ee   :  { %5386 = vmatmul.f32.gmra.mxu0 %v5192_v52  ;;  %v12741_v30 = vpop.f32.mrf.mxu0 }
0x10f1   :  { %v12743_v27 = vpop.f32.mrf.mxu2 }
0x10f4   :  { %v5116_v53 = vpop.f32.mrf.mxu1 }
0x10f5   :  { %v5117_v49 = vadd.f32 %v5116_v53, %v5003_v33  ;;  %v5183_v53 = vld [vmem:[%s14437_s11 + $0x220] sm:$0xff] }
0x10f6   :  { %v12745_v37 = vpop.f32.mrf.mxu0 }
0x10f9   :  { %v12747_v25 = vpop.f32.mrf.mxu2 }
0x10fc   :  { %v5119_v2 = vpop.f32.mrf.mxu1 }
0x10fd   :  { %v5120_v23 = vadd.f32 %v5119_v2, %v5006_v63 }
0x10fe   :  { %v12751_v8 = vpop.f32.mrf.mxu0 }
0x1101   :  { %v5024_v1 = vpop.f32.mrf.mxu2 }
0x1104   :  { %v5122_v11 = vpop.f32.mrf.mxu1 }
0x1105   :  { %v5123_v57 = vadd.f32 %v5122_v11, %v5009_v5 }
0x1106   :  { %v12755_v2 = vpop.f32.mrf.mxu0 }
0x110c   :  { %v5125_v18 = vpop.f32.mrf.mxu1 }
0x110d   :  { %v5126_v52 = vadd.f32 %v5125_v18, %v5012_v35  ;;  %v5105_v35 = vadd.f32 %v5104_v45, %v12688_v59  ;;  %v5090_v59 = vadd.f32 %v12676_v40, %v12646_v0  ;;  %v5163_v40 = vld [vmem:[%s14437_s11 + $0x180] sm:$0xff] }
0x1114   :  { %v5128_v28 = vpop.f32.mrf.mxu1 }
0x1115   :  { %v5129_v42 = vadd.f32 %v5128_v28, %v5015_v41  ;;  %v5108_v28 = vadd.f32 %v5107_v20, %v12701_v29  ;;  %v5158_v41 = vld [vmem:[%s14437_s11 + $0x158] sm:$0xff] }
0x1117   :  { %5390 = vmatpush.msrb.mxu0 %v5129_v42 }
0x1119   :  { %5391 = vmatpush.msrb.mxu0 %v5126_v52 }
0x111b   :  { %5392 = vmatpush.msrb.mxu0 %v5123_v57  ;;  %v5102_v57 = vadd.f32 %v5101_v13, %v12673_v31  ;;  %v12766_v31 = vpop.f32.mrf.mxu0 }
0x111c   :  { %v12749_v15 = vpop.f32.mrf.mxu1 }
0x111d   :  { %5393 = vmatpush.msrb.mxu0 %v5120_v23  ;;  %v5099_v23 = vadd.f32 %v12709_v51, %v12662_v10  ;;  %v5087_v10 = vadd.f32 %v12666_v26, %v12643_v48  ;;  %v5173_v51 = vld [vmem:[%s14437_s11 + $0x1d0] sm:$0xff] }
0x111f   :  { %5394 = vmatpush.msrb.mxu0 %v5117_v49  ;;  %v5027_v49 = vpop.f32.mrf.mxu2 }
0x1121   :  { %5395 = vmatpush.msrb.mxu0 %v5114_v61  ;;  %v5096_v61 = vadd.f32 %v12699_v17, %v12652_v6  ;;  %v5084_v6 = vadd.f32 %v12657_v32, %v12639_v55  ;;  %v5168_v55 = vld [vmem:[%s14437_s11 + $0x1a8] sm:$0xff] }
0x1123   :  { %5396 = vmatpush.msrb.mxu0 %v5111_v54  ;;  %v5093_v54 = vadd.f32 %v12690_v62, %v12649_v4  ;;  %v12775_v0 = vpop.f32.mrf.mxu0 }
0x1124   :  { %v5134_v42 = vpop.f32.mrf.mxu1 }
0x1125   :  { %5397 = vmatpush.msrb.mxu0 %v5108_v28  ;;  %v5135_v28 = vadd.f32 %v5134_v42, %v12747_v25  ;;  %v5193_v25 = vld [vmem:[%s14437_s11 + $0x270] sm:$0xff] }
0x1127   :  { %5398 = vmatpush.msrb.mxu0 %v5105_v35  ;;  %v5030_v62 = vpop.f32.mrf.mxu2 }
0x1129   :  { %5399 = vmatpush.msrb.mxu0 %v5102_v57  ;;  %v5132_v57 = vadd.f32 %v12749_v15, %v12743_v27  ;;  %v5169_v27 = vld [vmem:[%s14437_s11 + $0x1b0] sm:$0xff] }
0x112b   :  { %5400 = vmatpush.msrb.mxu0 %v5099_v23  ;;  %v12783_v17 = vpop.f32.mrf.mxu0  ;;  %v5188_v23 = vld [vmem:[%s14437_s11 + $0x248] sm:$0xff] }
0x112c   :  { %v5137_v11 = vpop.f32.mrf.mxu1 }
0x112d   :  { %5401 = vmatpush.msrb.mxu0 %v5096_v61  ;;  %v5138_v52 = vadd.f32 %v5137_v11, %v5024_v1  ;;  %v5159_v61 = vld [vmem:[%s14437_s11 + $0x160] sm:$0xff]  ;;  %v5164_v1 = vld [vmem:[%s14437_s11 + $0x188] sm:$0xff] }
0x112f   :  { %5402 = vmatpush.msrb.mxu0 %v5093_v54  ;;  %v5033_v26 = vpop.f32.mrf.mxu2  ;;  %v5179_v54 = vld [vmem:[%s14437_s11 + $0x200] sm:$0xff] }
0x1131   :  { %5403 = vmatpush.msrb.mxu0 %v5090_v59 }
0x1133   :  { %5404 = vmatpush.msrb.mxu0 %v5087_v10  ;;  %v12788_v13 = vpop.f32.mrf.mxu0  ;;  %v5184_v10 = vld [vmem:[%s14437_s11 + $0x228] sm:$0xff] }
0x1134   :  { %v5140_v4 = vpop.f32.mrf.mxu1 }
0x1135   :  { %5405 = vmatpush.msrb.mxu0 %v5084_v6  ;;  %v5141_v18 = vadd.f32 %v5140_v4, %v5027_v49  ;;  %v5174_v49 = vld [vmem:[%s14437_s11 + $0x1d8] sm:$0xff] }
0x1136   :  { %5406 = vmatmul.f32.vlgmr.msrb.gmra.mxu0 %v5158_v41  ;;  %v5189_v41 = vld [vmem:[%s14437_s11 + $0x250] sm:$0xff]  ;;  %v5194_v4 = vld [vmem:[%s14437_s11 + $0x278] sm:$0xff] }
0x1137   :  { %v5036_v29 = vpop.f32.mrf.mxu2 }
0x113b   :  { %v5334_v63 = vpop.f32.mrf.mxu0 }
0x113c   :  { %v5143_v48 = vpop.f32.mrf.mxu1 }
0x113d   :  { %v5144_v5 = vadd.f32 %v5143_v48, %v5030_v62 }
0x113e   :  { %5409 = vmatmul.f32.gmra.mxu0 %v5163_v40 }
0x113f   :  { %v5039_v45 = vpop.f32.mrf.mxu2 }
0x1143   :  { %v12797_v35 = vpop.f32.mrf.mxu0 }
0x1144   :  { %v5146_v32 = vpop.f32.mrf.mxu1 }
0x1145   :  { %v5147_v58 = vadd.f32 %v5146_v32, %v5033_v26 }
0x1146   :  { %5412 = vmatmul.f32.gmra.mxu0 %v5168_v55 }
0x114b   :  { %v5340_v15 = vpop.f32.mrf.mxu0 }
0x114c   :  { %v5149_v60 = vpop.f32.mrf.mxu1 }
0x114d   :  { %v5150_v14 = vadd.f32 %v5149_v60, %v5036_v29 }
0x114e   :  { %5415 = vmatmul.f32.gmra.mxu0 %v5173_v51 }
0x1153   :  { %v12819_v42 = vpop.f32.mrf.mxu0 }
0x1154   :  { %v5152_v33 = vpop.f32.mrf.mxu1 }
0x1155   :  { %v5153_v20 = vadd.f32 %v5152_v33, %v5039_v45  ;;  %v5236_v45 = vpop.permute.xlu1 %5235  ;;  %v5231_v33 = vpop.permute.xlu0 %5230 }
0x1156   :  { %5418 = vmatmul.f32.gmra.mxu0 %v5178_v38 }
0x1157   :  { %5439 = vmatpush.msra.mxu3 %v5153_v20 }
0x1159   :  { %5440 = vmatpush.msra.mxu3 %v5150_v14 }
0x115b   :  { %5441 = vmatpush.msra.mxu3 %v5147_v58  ;;  %v12825_v11 = vpop.f32.mrf.mxu0 }
0x115d   :  { %5442 = vmatpush.msra.mxu3 %v5144_v5  ;;  %v5221_v58 = vpop.permute.xlu1 %5220  ;;  %v5216_v5 = vpop.permute.xlu0 %5215 }
0x115e   :  { %5421 = vmatmul.f32.gmra.mxu0 %v5183_v53 }
0x115f   :  { %5443 = vmatpush.msra.mxu3 %v5141_v18  ;;  %v5291_v18 = vadd.f32 %v12739_v47, %v5216_v5 }
0x1161   :  { %5444 = vmatpush.msra.mxu3 %v5138_v52  ;;  %v5294_v52 = vadd.f32 %v12741_v30, %v5221_v58 }
0x1163   :  { %5445 = vmatpush.msra.mxu3 %v5135_v28  ;;  %v12831_v59 = vpop.f32.mrf.mxu0  ;;  %v5332_v28 = vadd.f32 %v12788_v13, %v5291_v18 }
0x1165   :  { %5446 = vmatpush.msra.mxu3 %v5132_v57  ;;  %v5335_v57 = vadd.f32 %v5334_v63, %v5294_v52 }
0x1166   :  { %5424 = vmatmul.f32.gmra.mxu0 %v5188_v23  ;;  %7538 = vmatmul.msk.f32.vlgmr.msra.gmra.mxu3 %vm677_vm3, %v5159_v61  ;;  %v5241_v23 = vpop.permute.xlu2 %5240 }
0x116b   :  { %v12837_v6 = vpop.f32.mrf.mxu0 }
0x116e   :  { %5427 = vmatmul.f32.gmra.mxu0 %v5193_v25  ;;  %7539 = vmatmul.msk.f32.gmra.mxu3 %vm677_vm3, %v5164_v1  ;;  %v5226_v47 = vpop.permute.xlu2 %5225 }
0x116f   :  { %v5297_v63 = vadd.f32 %v12745_v37, %v5226_v47  ;;  %v5303_v37 = vadd.f32 %v12755_v2, %v5236_v45 }
0x1173   :  { %v5372_v62 = vpop.f32.mrf.mxu0 }
0x1174   :  { %v5373_v61 = vadd.f32 %v5372_v62, %v5332_v28  ;;  %v5300_v62 = vadd.f32 %v12751_v8, %v5231_v33 }
0x1176   :  { %7540 = vmatmul.msk.f32.gmra.mxu3 %vm677_vm3, %v5169_v27 }
0x117b   :  { %v5375_v40 = vpop.f32.mrf.mxu0 }
0x117c   :  { %v5376_v25 = vadd.f32 %v5375_v40, %v5335_v57  ;;  %v5338_v40 = vadd.f32 %v12797_v35, %v5297_v63  ;;  %v5306_v35 = vadd.f32 %v12766_v31, %v5241_v23 }
0x117e   :  { %7541 = vmatmul.msk.f32.gmra.mxu3 %vm677_vm3, %v5174_v49 }
0x1183   :  { %v5378_v48 = vpop.f32.mrf.mxu0 }
0x1186   :  { %7542 = vmatmul.msk.f32.gmra.mxu3 %vm677_vm3, %v5179_v54 }
0x118b   :  { %v5381_v26 = vpop.f32.mrf.mxu0 }
0x118e   :  { %7543 = vmatmul.msk.f32.gmra.mxu3 %vm677_vm3, %v5184_v10 }
0x1193   :  { %v5384_v55 = vpop.f32.mrf.mxu0 }
0x1196   :  { %7544 = vmatmul.msk.f32.gmra.mxu3 %vm677_vm3, %v5189_v41 }
0x119b   :  { %v5387_v32 = vpop.f32.mrf.mxu0 }
0x119e   :  { %7545 = vmatmul.msk.f32.gmra.mxu3 %vm677_vm3, %v5194_v4 }
0x11b3   :  { %v12847_v29 = vpop.f32.mrf.mxu0 }
0x11bb   :  { %v12849_v51 = vpop.f32.mrf.mxu0 }
0x11c3   :  { %v5413_v38 = vpop.f32.mrf.mxu0 }
0x11c4   :  { %v5414_v27 = vadd.f32 %v5413_v38, %v5373_v61  ;;  %v5341_v38 = vadd.f32 %v5340_v15, %v5300_v62  ;;  %v5344_v15 = vadd.f32 %v12819_v42, %v5303_v37 }
0x11c6   :  { %v5382_v58 = vadd.f32 %v5381_v26, %v5341_v38  ;;  %v5385_v33 = vadd.f32 %v5384_v55, %v5344_v15 }
0x11cb   :  { %v5416_v14 = vpop.f32.mrf.mxu0 }
0x11cc   :  { %v5417_v49 = vadd.f32 %v5416_v14, %v5376_v25  ;;  %v5379_v14 = vadd.f32 %v5378_v48, %v5338_v40  ;;  %v5347_v48 = vadd.f32 %v12825_v11, %v5306_v35 }
0x11ce   :  { %v5388_v25 = vadd.f32 %v5387_v32, %v5347_v48 }
0x11d3   :  { %v5419_v1 = vpop.f32.mrf.mxu0 }
0x11d4   :  { %v5420_v5 = vadd.f32 %v5419_v1, %v5379_v14  ;;  %v5211_v1 = vpop.permute.xlu2 %5210 }
0x11db   :  { %v5422_v30 = vpop.f32.mrf.mxu0 }
0x11e3   :  { %v5425_v57 = vpop.f32.mrf.mxu0 }
0x11e9   :  { %v12851_v60 = vpop.f32.mrf.mxu3 }
0x11eb   :  { %v5428_v26 = vpop.f32.mrf.mxu0 }
0x11ec   :  { %v5429_v47 = vadd.f32 %v5428_v26, %v5388_v25 }
0x11f1   :  { %v12853_v20 = vpop.f32.mrf.mxu3 }
0x11f9   :  { %v5454_v53 = vpop.f32.mrf.mxu3 }
0x11fa   :  { %v12858_v10 = vadd.f32 %v5454_v53, %v5414_v27  ;;  %v5423_v53 = vadd.f32 %v5422_v30, %v5382_v58  ;;  %v5206_v27 = vpop.permute.xlu1 %5205 }
0x11fb   :  { %v5285_v30 = vadd.f32 %v12732_v46, %v5206_v27 }
0x11fd   :  { %v5326_v42 = vadd.f32 %v12775_v0, %v5285_v30 }
0x1201   :  { %v5457_v54 = vpop.f32.mrf.mxu3 }
0x1202   :  { %v12860_v41 = vadd.f32 %v5457_v54, %v5417_v49  ;;  %v5288_v49 = vadd.f32 %v12737_v50, %v5211_v1  ;;  %v5426_v54 = vadd.f32 %v5425_v57, %v5385_v33  ;;  %v5367_v50 = vadd.f32 %v12831_v59, %v5326_v42  ;;  %v5648_v42 = vld [vmem:[%s14434_s12 + $0x500] sm:$0xff] }
0x1204   :  { %v12864_v4 = vpack.i.bf16 %v12858_v10, %v12860_v41  ;;  %v5329_v2 = vadd.f32 %v12783_v17, %v5288_v49  ;;  %v5408_v46 = vadd.f32 %v12847_v29, %v5367_v50 }
0x1206   :  { %8223 = vrot.lane.b32.xlu1 %v12864_v4, %s8604_s28  ;;  %v5370_v11 = vadd.f32 %v12837_v6, %v5329_v2  ;;  %v12913_v17 = vadd.f32 %v12851_v60, %v5408_v46 }
0x1208   :  { %v5411_v32 = vadd.f32 %v12849_v51, %v5370_v11 }
0x1209   :  { %v5460_v13 = vpop.f32.mrf.mxu3 }
0x120a   :  { %v12871_v52 = vadd.f32 %v5460_v13, %v5420_v5  ;;  %v12910_v0 = vadd.f32 %v12853_v20, %v5411_v32 }
0x120c   :  { %v12917_v59 = vpack.i.bf16 %v12913_v17, %v12910_v0 }
0x1211   :  { %v5463_v18 = vpop.f32.mrf.mxu3 }
0x1212   :  { %v12873_v28 = vadd.f32 %v5463_v18, %v5423_v53 }
0x1214   :  { %v12877_v61 = vpack.i.bf16 %v12871_v52, %v12873_v28 }
0x1216   :  { %8218 = vrot.lane.b32.xlu2 %v12877_v61, %s8604_s28  ;;  %8238 = vrot.lane.b32.xlu1 %v12877_v61, %s8605_s6 }
0x1219   :  { %v5466_v8 = vpop.f32.mrf.mxu3 }
0x121a   :  { %v12890_v45 = vadd.f32 %v5466_v8, %v5426_v54 }
0x1221   :  { %v5469_v13 = vpop.f32.mrf.mxu3 }
0x1222   :  { %v12892_v31 = vadd.f32 %v5469_v13, %v5429_v47 }
0x1224   :  { %v12898_v55 = vpack.i.bf16 %v12890_v45, %v12892_v31 }
0x1226   :  { %8213 = vrot.lane.b32.xlu0 %v12898_v55, %s8604_s28  ;;  %8233 = vrot.lane.b32.xlu2 %v12898_v55, %s8605_s6 }
0x1227   :  { %8253 = vrot.lane.b32.xlu1 %v12898_v55, %s8600_s23 }
0x122e   :  { %8248 = vrot.lane.b32.xlu2 %v12917_v59, %s8605_s6  ;;  %8228 = vrot.lane.b32.xlu0 %v12917_v59, %s8604_s28 }
0x122f   :  { %8268 = vrot.lane.b32.xlu1 %v12917_v59, %s8600_s23 }
0x1236   :  { %8263 = vrot.lane.b32.xlu2 %v12864_v4, %s8600_s23  ;;  %8243 = vrot.lane.b32.xlu0 %v12864_v4, %s8605_s6 }
0x1237   :  { %8283 = vrot.lane.b32.xlu1 %v12864_v4, %s15043_s1 }
0x123e   :  { %8278 = vrot.lane.b32.xlu2 %v12877_v61, %s15043_s1  ;;  %8258 = vrot.lane.b32.xlu0 %v12877_v61, %s8600_s23 }
0x123f   :  { %8298 = vrot.lane.b32.xlu1 %v12877_v61, %s8607_s29 }
0x1246   :  { %8293 = vrot.lane.b32.xlu2 %v12898_v55, %s8607_s29  ;;  %8273 = vrot.lane.b32.xlu0 %v12898_v55, %s15043_s1 }
0x124e   :  { %8308 = vrot.lane.b32.xlu2 %v12917_v59, %s8607_s29  ;;  %8288 = vrot.lane.b32.xlu0 %v12917_v59, %s15043_s1 }
0x1256   :  { %8303 = vrot.lane.b32.xlu0 %v12864_v4, %s8607_s29 }
0x1270   :  { %v8219_v6 = vpop.permute.xlu2 %8218 }
0x1271   :  { %v8220_v58 = vunpack.i.l.bf16 %v8219_v6  ;;  %v8221_v5 = vunpack.i.h.bf16 %v8219_v6 }
0x1278   :  { %v8224_v29 = vpop.permute.xlu1 %8223 }
0x1279   :  { %v8225_v18 = vunpack.i.l.bf16 %v8224_v29  ;;  %v8226_v57 = vunpack.i.h.bf16 %v8224_v29  ;;  %v15201_v29 = vld [vmem:[#allocation174_spill] sm:$0xff] }
0x1280   :  { %v8234_v51 = vpop.permute.xlu2 %8233 }
0x1281   :  { %v8235_v60 = vunpack.i.l.bf16 %v8234_v51  ;;  %v8236_v20 = vunpack.i.h.bf16 %v8234_v51 }
0x1283   :  { %5810 = vmatpush.msra.mxu0 %v8235_v60 }
0x1285   :  { %5811 = vmatpush.msra.mxu0 %v8236_v20 }
0x1288   :  { %v8239_v23 = vpop.permute.xlu1 %8238  ;;  %v8249_v37 = vpop.permute.xlu2 %8248 }
0x1289   :  { %v8240_v63 = vunpack.i.l.bf16 %v8239_v23  ;;  %v8241_v62 = vunpack.i.h.bf16 %v8239_v23  ;;  %v8250_v25 = vunpack.i.l.bf16 %v8249_v37  ;;  %v8251_v1 = vunpack.i.h.bf16 %v8249_v37 }
0x128b   :  { %5812 = vmatpush.msra.mxu0 %v8240_v63  ;;  %v15202_v63 = vld [vmem:[#allocation178_spill] sm:$0xff] }
0x128d   :  { %5813 = vmatpush.msra.mxu0 %v8241_v62 }
0x1290   :  { %v8264_v27 = vpop.permute.xlu2 %8263 }
0x1291   :  { %v8265_v32 = vunpack.i.l.bf16 %v8264_v27  ;;  %v8266_v51 = vunpack.i.h.bf16 %v8264_v27  ;;  %v5901_v27 = vsel %vm1425_vm4, %v12910_v0, 0.0 }
0x1298   :  { %v8214_v40 = vpop.permute.xlu0 %8213  ;;  %v8279_v46 = vpop.permute.xlu2 %8278 }
0x1299   :  { %v8215_v38 = vunpack.i.l.bf16 %v8214_v40  ;;  %v8216_v14 = vunpack.i.h.bf16 %v8214_v40  ;;  %v8254_v26 = vpop.permute.xlu1 %8253  ;;  %v8280_v60 = vunpack.i.l.bf16 %v8279_v46  ;;  %v8281_v62 = vunpack.i.h.bf16 %v8279_v46  ;;  %v5652_v40 = vld [vmem:[%s14434_s12 + $0x528] sm:$0xff] }
0x129a   :  { %v8255_v54 = vunpack.i.l.bf16 %v8254_v26  ;;  %v8256_v47 = vunpack.i.h.bf16 %v8254_v26  ;;  %v5907_v46 = vsel %vm1425_vm4, %v12871_v52, 0.0 }
0x129b   :  { %5728 = vmatpush.msrb.mxu2 %v8215_v38 }
0x129d   :  { %5729 = vmatpush.msrb.mxu2 %v8216_v14 }
0x129f   :  { %5730 = vmatpush.msrb.mxu2 %v8220_v58 }
0x12a0   :  { %v8229_v53 = vpop.permute.xlu0 %8228 }
0x12a1   :  { %5731 = vmatpush.msrb.mxu2 %v8221_v5  ;;  %v8230_v8 = vunpack.i.l.bf16 %v8229_v53  ;;  %v8231_v35 = vunpack.i.h.bf16 %v8229_v53  ;;  %v8269_v30 = vpop.permute.xlu1 %8268 }
0x12a2   :  { %v8270_v20 = vunpack.i.l.bf16 %v8269_v30  ;;  %v8271_v38 = vunpack.i.h.bf16 %v8269_v30  ;;  %v5903_v30 = vsel %vm1425_vm4, %v12858_v10, 0.0 }
0x12a3   :  { %5732 = vmatpush.msrb.mxu2 %v8225_v18  ;;  %v8294_v18 = vpop.permute.xlu2 %8293 }
0x12a4   :  { %v8295_v37 = vunpack.i.l.bf16 %v8294_v18 }
0x12a5   :  { %5733 = vmatpush.msrb.mxu2 %v8226_v57 }
0x12a7   :  { %5734 = vmatpush.msrb.mxu2 %v8230_v8  ;;  %v5656_v8 = vld [vmem:[%s14434_s12 + $0x550] sm:$0xff] }
0x12a8   :  { %v8244_v15 = vpop.permute.xlu0 %8243 }
0x12a9   :  { %v8245_v48 = vunpack.i.l.bf16 %v8244_v15  ;;  %5735 = vmatpush.msrb.mxu2 %v8231_v35  ;;  %v8246_v33 = vunpack.i.h.bf16 %v8244_v15  ;;  %v8284_v23 = vpop.permute.xlu1 %8283  ;;  %v8296_v15 = vunpack.i.h.bf16 %v8294_v18  ;;  %v5676_v18 = vld [vmem:[%s14434_s12 + $0x618] sm:$0xff] }
0x12aa   :  { %v8285_v14 = vunpack.i.l.bf16 %v8284_v23  ;;  %v8286_v5 = vunpack.i.h.bf16 %v8284_v23 }
0x12ab   :  { %5736 = vmatpush.msrb.mxu2 %v12892_v31  ;;  %5814 = vmatpush.msra.mxu0 %v8245_v48 }
0x12ad   :  { %5737 = vmatpush.msrb.mxu2 %v12890_v45  ;;  %5815 = vmatpush.msra.mxu0 %v8246_v33 }
0x12af   :  { %5738 = vmatpush.msrb.mxu2 %v12873_v28  ;;  %5816 = vmatpush.msra.mxu0 %v8250_v25  ;;  %v5660_v25 = vld [vmem:[%s14434_s12 + $0x578] sm:$0xff] }
0x12b0   :  { %v8259_v49 = vpop.permute.xlu0 %8258 }
0x12b1   :  { %5739 = vmatpush.msrb.mxu2 %v12871_v52  ;;  %5817 = vmatpush.msra.mxu0 %v8251_v1  ;;  %v8260_v13 = vunpack.i.l.bf16 %v8259_v49  ;;  %v8261_v2 = vunpack.i.h.bf16 %v8259_v49  ;;  %v8299_v35 = vpop.permute.xlu1 %8298  ;;  %v8309_v49 = vpop.permute.xlu2 %8308 }
0x12b2   :  { %v8300_v48 = vunpack.i.l.bf16 %v8299_v35  ;;  %v8301_v33 = vunpack.i.h.bf16 %v8299_v35 }
0x12b3   :  { %5740 = vmatpush.msrb.mxu2 %v12860_v41  ;;  %5818 = vmatpush.msra.mxu0 %v8255_v54 }
0x12b5   :  { %5741 = vmatpush.msrb.mxu2 %v12858_v10  ;;  %5819 = vmatpush.msra.mxu0 %v8256_v47  ;;  %v5900_v47 = vsel %vm1425_vm4, %v12913_v17, 0.0 }
0x12b7   :  { %5742 = vmatpush.msrb.mxu2 %v12910_v0  ;;  %5820 = vmatpush.msra.mxu0 %v8260_v13  ;;  %v5902_v13 = vadd.f32 %v5901_v27, %v5900_v47 }
0x12b8   :  { %v8274_v11 = vpop.permute.xlu0 %8273 }
0x12b9   :  { %v8275_v50 = vunpack.i.l.bf16 %v8274_v11  ;;  %5743 = vmatpush.msrb.mxu2 %v12913_v17  ;;  %5821 = vmatpush.msra.mxu0 %v8261_v2  ;;  %v8276_v6 = vunpack.i.h.bf16 %v8274_v11  ;;  %v8310_v2 = vunpack.i.l.bf16 %v8309_v49  ;;  %v5904_v11 = vadd.f32 %v5903_v30, %v5902_v13  ;;  %v5650_v30 = vld [vmem:[%s14434_s12 + $0x510] sm:$0xff] }
0x12ba   :  { %5744 = vmatmul.f32.vlgmr.msrb.gmra.mxu2 %v5648_v42  ;;  %v5905_v42 = vsel %vm1425_vm4, %v12860_v41, 0.0 }
0x12bb   :  { %5938 = vmatpush.msra.mxu2 %v15201_v29  ;;  %5769 = vmatpush.msrb.mxu1 %v8275_v50  ;;  %v8311_v50 = vunpack.i.h.bf16 %v8309_v49 }
0x12bc   :  { %5822 = vmatpush.msra.mxu0 %v8265_v32  ;;  %v5664_v32 = vld [vmem:[%s14434_s12 + $0x5a0] sm:$0xff] }
0x12bd   :  { %5939 = vmatpush.msra.mxu2 %v15201_v29  ;;  %5770 = vmatpush.msrb.mxu1 %v8276_v6  ;;  %v5906_v6 = vadd.f32 %v5905_v42, %v5904_v11 }
0x12be   :  { %5823 = vmatpush.msra.mxu0 %v8266_v51  ;;  %v5909_v51 = vsel %vm1425_vm4, %v12873_v28, 0.0 }
0x12bf   :  { %7547 = vmatpush.msk.msrb.mxu2 %vm3622_vm6, %v15202_v63  ;;  %5771 = vmatpush.msrb.mxu1 %v8280_v60  ;;  %v5908_v60 = vadd.f32 %v5907_v46, %v5906_v6 }
0x12c0   :  { %5824 = vmatpush.msra.mxu0 %v8270_v20  ;;  %v8289_v58 = vpop.permute.xlu0 %8288  ;;  %v5911_v20 = vsel %vm1425_vm4, %v12890_v45, 0.0 }
0x12c1   :  { %5772 = vmatpush.msrb.mxu1 %v8281_v62  ;;  %v8290_v53 = vunpack.i.l.bf16 %v8289_v58  ;;  %v8291_v57 = vunpack.i.h.bf16 %v8289_v58  ;;  %v5910_v23 = vadd.f32 %v5909_v51, %v5908_v60  ;;  %v5672_v58 = vld [vmem:[%s14434_s12 + $0x5f0] sm:$0xff]  ;;  %v5654_v51 = vld [vmem:[%s14434_s12 + $0x538] sm:$0xff] }
0x12c2   :  { %5825 = vmatpush.msra.mxu0 %v8271_v38  ;;  %5747 = vmatmul.f32.gmra.mxu2 %v5652_v40  ;;  %v5668_v40 = vld [vmem:[%s14434_s12 + $0x5c8] sm:$0xff] }
0x12c3   :  { %5773 = vmatpush.msrb.mxu1 %v8285_v14  ;;  %v5912_v62 = vadd.f32 %v5911_v20, %v5910_v23  ;;  %5826 = vmatmul.f32.vlgmr.msra.gmra.mxu0 %v5650_v30 }
0x12c4   :  { %7550 = vmatpush.msk.msrb.mxu0 %vm3622_vm6, %v15202_v63  ;;  %v5913_v63 = vsel %vm1425_vm4, %v12892_v31, 0.0 }
0x12c5   :  { %5774 = vmatpush.msrb.mxu1 %v8286_v5  ;;  %v5914_v38 = vadd.f32 %v5913_v63, %v5912_v62 }
0x12c7   :  { %5775 = vmatpush.msrb.mxu1 %v8290_v53  ;;  %v5915_v14 = vrot.slane %v5914_v38, 4 }
0x12c8   :  { %v8304_v26 = vpop.permute.xlu0 %8303 }
0x12c9   :  { %5776 = vmatpush.msrb.mxu1 %v8291_v57  ;;  %v8305_v1 = vunpack.i.l.bf16 %v8304_v26  ;;  %v8306_v54 = vunpack.i.h.bf16 %v8304_v26  ;;  %v5916_v5 = vadd.f32 %v5915_v14, %v5914_v38 }
0x12ca   :  { %5750 = vmatmul.f32.gmra.mxu2 %v5656_v8 }
0x12cb   :  { %5777 = vmatpush.msrb.mxu1 %v8295_v37  ;;  %v5917_v53 = vrot.slane %v5916_v5, 2  ;;  %5829 = vmatmul.f32.gmra.mxu0 %v5654_v51 }
0x12cd   :  { %5778 = vmatpush.msrb.mxu1 %v8296_v15  ;;  %v5918_v57 = vadd.f32 %v5917_v53, %v5916_v5 }
0x12cf   :  { %5779 = vmatpush.msrb.mxu1 %v8300_v48  ;;  %v5919_v8 = vrot.slane %v5918_v57, 1 }
0x12d1   :  { %5780 = vmatpush.msrb.mxu1 %v8301_v33  ;;  %v5920_v37 = vadd.f32 %v5919_v8, %v5918_v57 }
0x12d2   :  { %5753 = vmatmul.f32.gmra.mxu2 %v5660_v25 }
0x12d3   :  { %5781 = vmatpush.msrb.mxu1 %v8305_v1 }
0x12d5   :  { %5782 = vmatpush.msrb.mxu1 %v8306_v54 }
0x12d7   :  { %5783 = vmatpush.msrb.mxu1 %v8310_v2 }
0x12d9   :  { %5784 = vmatpush.msrb.mxu1 %v8311_v50 }
0x12da   :  { %5756 = vmatmul.f32.gmra.mxu2 %v5664_v32 }
0x12e2   :  { %5759 = vmatmul.f32.gmra.mxu2 %v5668_v40 }
0x12ea   :  { %5762 = vmatmul.f32.gmra.mxu2 %v5672_v58 }
0x12f2   :  { %5765 = vmatmul.f32.gmra.mxu2 %v5676_v18  ;;  %v5658_v18 = vld [vmem:[%s14434_s12 + $0x560] sm:$0xff] }
0x12f3   :  { %5832 = vmatmul.f32.gmra.mxu0 %v5658_v18 }
0x12fa   :  { %7546 = vmatmul.msk.f32.vlgmr.msra.gmra.mxu2 %vm1425_vm4, %v5920_v37 }
0x12fb   :  { %6026 = vmatpush.msra.mxu2 %v15201_v29 }
0x12fd   :  { %6027 = vmatpush.msra.mxu2 %v15201_v29 }
0x133d   :  { %v13004_v35 = vpop.f32.mrf.mxu2 }
0x133e   :  { %15203 = vst [vmem:[#allocation50_spill] sm:$0xff] %v13004_v35  ;;  %v6041_v35 = vld [vmem:[%s14441_s16 + $0x40] sm:$0xff] }
0x1345   :  { %v13006_v15 = vpop.f32.mrf.mxu2 }
0x1346   :  { %15204 = vst [vmem:[#allocation51_spill] sm:$0xff] %v13006_v15 }
0x134d   :  { %v13008_v48 = vpop.f32.mrf.mxu2 }
0x1355   :  { %v13010_v26 = vpop.f32.mrf.mxu2 }
0x135d   :  { %v13012_v33 = vpop.f32.mrf.mxu2 }
0x1365   :  { %v13014_v25 = vpop.f32.mrf.mxu2 }
0x136d   :  { %v13016_v1 = vpop.f32.mrf.mxu2 }
0x136e   :  { %15205 = vst [vmem:[#allocation52_spill] sm:$0xff] %v13016_v1 }
0x1375   :  { %v13018_v27 = vpop.f32.mrf.mxu2 }
0x137d   :  { %v5941_v49 = vpop.f32.mrf.mxu2 }
0x137e   :  { %v5944_v54 = vmul.f32 0.001953125, %v5941_v49 }
0x1380   :  { %7548 = vmatmul.msk.f32.vlgmr.msrb.gmra.mxu2 %vm3655_vm9, %v5944_v54 }
0x1403   :  { %v5968_v29 = vpop.f32.mrf.mxu2 }
0x1404   :  { %v5971_v47 = vperm.slane %v5968_v29, 0 }
0x1406   :  { %v13025_v13 = vsub.f32 %v12913_v17, %v5971_v47  ;;  %v13028_v2 = vsub.f32 %v12910_v0, %v5971_v47  ;;  %v13031_v42 = vsub.f32 %v12858_v10, %v5971_v47  ;;  %v13034_v11 = vsub.f32 %v12860_v41, %v5971_v47 }
0x1407   :  { %v13037_v50 = vsub.f32 %v12871_v52, %v5971_v47  ;;  %v13046_v46 = vsub.f32 %v12873_v28, %v5971_v47  ;;  %v13056_v60 = vsub.f32 %v12890_v45, %v5971_v47  ;;  %v13062_v63 = vsub.f32 %v12892_v31, %v5971_v47  ;;  %v5662_v47 = vld [vmem:[%s14434_s12 + $0x588] sm:$0xff] }
0x1408   :  { %v5980_v32 = vmul.f32 %v13025_v13, %v13025_v13  ;;  %v5981_v17 = vmul.f32 %v13028_v2, %v13028_v2  ;;  %v5982_v0 = vmul.f32 %v13031_v42, %v13031_v42  ;;  %v5983_v10 = vmul.f32 %v13034_v11, %v13034_v11  ;;  %5835 = vmatmul.f32.gmra.mxu0 %v5662_v47  ;;  %v6039_v47 = vld [vmem:[%s14440_s15 + $0x70] sm:$0xff] }
0x1409   :  { %v5984_v20 = vmul.f32 %v13037_v50, %v13037_v50  ;;  %v5985_v62 = vmul.f32 %v13046_v46, %v13046_v46  ;;  %v5986_v45 = vmul.f32 %v13056_v60, %v13056_v60  ;;  %v5987_v5 = vmul.f32 %v13062_v63, %v13062_v63 }
0x140a   :  { %v5988_v41 = vsel %vm1425_vm4, %v5980_v32, 0.0  ;;  %v5989_v52 = vsel %vm1425_vm4, %v5981_v17, 0.0  ;;  %v5991_v28 = vsel %vm1425_vm4, %v5982_v0, 0.0  ;;  %v5993_v40 = vsel %vm1425_vm4, %v5983_v10, 0.0  ;;  %v5666_v10 = vld [vmem:[%s14434_s12 + $0x5b0] sm:$0xff] }
0x140b   :  { %v5990_v6 = vadd.f32 %v5989_v52, %v5988_v41  ;;  %v5995_v14 = vsel %vm1425_vm4, %v5984_v20, 0.0  ;;  %v5997_v53 = vsel %vm1425_vm4, %v5985_v62, 0.0  ;;  %v5999_v57 = vsel %vm1425_vm4, %v5986_v45, 0.0  ;;  %v5670_v41 = vld [vmem:[%s14434_s12 + $0x5d8] sm:$0xff]  ;;  %v5674_v52 = vld [vmem:[%s14434_s12 + $0x600] sm:$0xff] }
0x140c   :  { %v6001_v37 = vsel %vm1425_vm4, %v5987_v5, 0.0 }
0x140d   :  { %v5992_v23 = vadd.f32 %v5991_v28, %v5990_v6  ;;  %v5678_v6 = vld [vmem:[%s14434_s12 + $0x628] sm:$0xff]  ;;  %v13095_v28 = vpop.f32.mrf.mxu0 }
0x140e   :  { %15206 = vst [vmem:[#allocation53_spill] sm:$0xff] %v13095_v28 }
0x140f   :  { %v5994_v38 = vadd.f32 %v5993_v40, %v5992_v23 }
0x1410   :  { %5838 = vmatmul.f32.gmra.mxu0 %v5666_v10  ;;  %v6038_v10 = vld [vmem:[%s14440_s15 + $0x68] sm:$0xff] }
0x1411   :  { %v5996_v58 = vadd.f32 %v5995_v14, %v5994_v38 }
0x1413   :  { %v5998_v31 = vadd.f32 %v5997_v53, %v5996_v58 }
0x1415   :  { %v6000_v8 = vadd.f32 %v5999_v57, %v5998_v31  ;;  %v13097_v23 = vpop.f32.mrf.mxu0 }
0x1416   :  { %15207 = vst [vmem:[#allocation54_spill] sm:$0xff] %v13097_v23  ;;  %v6044_v23 = vld [vmem:[%s14441_s16 + $0x58] sm:$0xff] }
0x1417   :  { %v6002_v49 = vadd.f32 %v6001_v37, %v6000_v8 }
0x1418   :  { %5841 = vmatmul.f32.gmra.mxu0 %v5670_v41  ;;  %v6035_v41 = vld [vmem:[%s14440_s15 + $0x50] sm:$0xff] }
0x1419   :  { %v6003_v54 = vrot.slane %v6002_v49, 4 }
0x141b   :  { %v6004_v29 = vadd.f32 %v6003_v54, %v6002_v49 }
0x141d   :  { %v6005_v30 = vrot.slane %v6004_v29, 2  ;;  %v13099_v62 = vpop.f32.mrf.mxu0 }
0x141f   :  { %v6006_v32 = vadd.f32 %v6005_v30, %v6004_v29  ;;  %v6040_v30 = vld [vmem:[%s14440_s15 + $0x78] sm:$0xff] }
0x1420   :  { %5844 = vmatmul.f32.gmra.mxu0 %v5674_v52 }
0x1421   :  { %v6007_v17 = vrot.slane %v6006_v32, 1 }
0x1423   :  { %v6008_v0 = vadd.f32 %v6007_v17, %v6006_v32  ;;  %v6047_v32 = vld [vmem:[%s14441_s16 + $0x70] sm:$0xff]  ;;  %v6048_v17 = vld [vmem:[%s14441_s16 + $0x78] sm:$0xff] }
0x1425   :  { %7549 = vmatmul.msk.f32.vlgmr.msra.gmra.mxu2 %vm1425_vm4, %v6008_v0  ;;  %v6037_v0 = vld [vmem:[%s14440_s15 + $0x60] sm:$0xff] }
0x1428   :  { %5847 = vmatmul.f32.gmra.mxu0 %v5678_v6 }
0x1485   :  { %v13101_v40 = vpop.f32.mrf.mxu0 }
0x148d   :  { %v13103_v38 = vpop.f32.mrf.mxu0 }
0x1495   :  { %v13105_v45 = vpop.f32.mrf.mxu0 }
0x1496   :  { %15208 = vst [vmem:[#allocation133_spill] sm:$0xff] %v13105_v45 }
0x149d   :  { %v13107_v14 = vpop.f32.mrf.mxu0 }
0x149e   :  { %15209 = vst [vmem:[#allocation55_spill] sm:$0xff] %v13107_v14 }
0x14a5   :  { %v13109_v58 = vpop.f32.mrf.mxu0 }
0x14a8   :  { %v6029_v51 = vpop.f32.mrf.mxu2 }
0x14a9   :  { %v6032_v20 = vmul.f32 0.001953125, %v6029_v51 }
0x14ab   :  { %7551 = vmatmul.msk.f32.vlgmr.msrb.gmra.mxu0 %vm3655_vm9, %v6032_v20 }
0x1528   :  { %v6069_v5 = vpop.f32.mrf.mxu0 }
0x1529   :  { %v6070_v53 = vadd.f32 1e-05, %v6069_v5  ;;  %v6036_v5 = vld [vmem:[%s14440_s15 + $0x58] sm:$0xff] }
0x152b   :  { %8566 = vrsqrt.f32 %v6070_v53  ;;  %vm6078_vm5 = vweird.f32 %v6070_v53 }
0x1531   :  { %v8567_v31 = vpop.eup %8566 }
0x1532   :  { %v6073_v18 = vmul.f32 %v8567_v31, %v6070_v53  ;;  %vm6079_vm4 = vweird.f32 %v8567_v31  ;;  %v6033_v53 = vld [vmem:[%s14440_s15 + $0x40] sm:$0xff] }
0x1533   :  { %vm6080_vm6 = vmor %vm6078_vm5, %vm6079_vm4 }
0x1534   :  { %v6074_v57 = vmul.f32 %v8567_v31, %v6073_v18 }
0x1536   :  { %v6075_v8 = vmul.f32 0.5, %v6074_v57 }
0x1538   :  { %v6076_v37 = vsub.f32 1.5, %v6075_v8 }
0x153a   :  { %v6077_v49 = vmul.f32 %v8567_v31, %v6076_v37 }
0x153c   :  { %v6081_v54 = vsel %vm6080_vm6, %v8567_v31, %v6077_v49  ;;  %v6034_v31 = vld [vmem:[%s14440_s15 + $0x48] sm:$0xff] }
0x153d   :  { %v6082_v29 = vperm.slane %v6081_v54, 0 }
0x153f   :  { %v6089_v52 = vmul.f32 %v6082_v29, %v13056_v60  ;;  %v6090_v6 = vmul.f32 %v6082_v29, %v13062_v63  ;;  %v6087_v51 = vmul.f32 %v6082_v29, %v13037_v50  ;;  %v6088_v20 = vmul.f32 %v6082_v29, %v13046_v46  ;;  %v6045_v60 = vld [vmem:[%s14441_s16 + $0x60] sm:$0xff]  ;;  %v6046_v50 = vld [vmem:[%s14441_s16 + $0x68] sm:$0xff]  ;;  %v6043_v46 = vld [vmem:[%s14441_s16 + $0x50] sm:$0xff] }
0x1540   :  { %v6085_v63 = vmul.f32 %v6082_v29, %v13031_v42  ;;  %v6086_v18 = vmul.f32 %v6082_v29, %v13034_v11  ;;  %v6083_v57 = vmul.f32 %v6082_v29, %v13025_v13  ;;  %v6084_v8 = vmul.f32 %v6082_v29, %v13028_v2  ;;  %v6042_v42 = vld [vmem:[%s14441_s16 + $0x48] sm:$0xff] }
0x1541   :  { %v6097_v37 = vmul.f32 %v6089_v52, %v6039_v47  ;;  %v6098_v49 = vmul.f32 %v6090_v6, %v6040_v30  ;;  %v6095_v54 = vmul.f32 %v6087_v51, %v6037_v0  ;;  %v6096_v28 = vmul.f32 %v6088_v20, %v6038_v10 }
0x1542   :  { %v6093_v11 = vmul.f32 %v6085_v63, %v6035_v41  ;;  %v6094_v13 = vmul.f32 %v6086_v18, %v6036_v5  ;;  %v6091_v15 = vmul.f32 %v6083_v57, %v6033_v53  ;;  %v6092_v2 = vmul.f32 %v6084_v8, %v6034_v31  ;;  %v15212_v53 = vld [vmem:[#allocation73_spill] sm:$0xff]  ;;  %v15213_v31 = vld [vmem:[#allocation72_spill] sm:$0xff]  ;;  %v15220_v63 = vld [vmem:[#allocation194_spill] sm:$0xff] }
0x1543   :  { %v6105_v29 = vadd.f32 %v6097_v37, %v6047_v32  ;;  %v6106_v47 = vadd.f32 %v6098_v49, %v6048_v17  ;;  %v6103_v30 = vadd.f32 %v6095_v54, %v6045_v60  ;;  %v6104_v0 = vadd.f32 %v6096_v28, %v6046_v50  ;;  %v15211_v17 = vld [vmem:[#allocation110_spill] sm:$0xff]  ;;  %v15214_v60 = vld [vmem:[#allocation71_spill] sm:$0xff]  ;;  %v15221_v57 = vld [vmem:[#allocation196_spill] sm:$0xff] }
0x1544   :  { %v6101_v10 = vadd.f32 %v6093_v11, %v6043_v46  ;;  %v6102_v52 = vadd.f32 %v6094_v13, %v6044_v23  ;;  %v6099_v6 = vadd.f32 %v6091_v15, %v6041_v35  ;;  %v6100_v51 = vadd.f32 %v6092_v2, %v6042_v42  ;;  %v15210_v15 = vld [vmem:[#allocation198_spill] sm:$0xff]  ;;  %v15222_v37 = vld [vmem:[#allocation77_spill] sm:$0xff] }
0x1545   :  { %v6113_v20 = vadd.f32 %v6105_v29, %v11689_v34  ;;  %v6114_v14 = vadd.f32 %v6106_v47, %v11726_v16  ;;  %v6111_v45 = vadd.f32 %v6103_v30, %v11752_v24  ;;  %v6112_v1 = vadd.f32 %v6104_v0, %v11737_v39  ;;  %v15223_v11 = vld [vmem:[#allocation74_spill] sm:$0xff]  ;;  %v15225_v30 = vld [vmem:[#allocation195_spill] sm:$0xff] }
0x1546   :  { %v6109_v41 = vadd.f32 %v6101_v10, %v15017_v12  ;;  %v6110_v5 = vadd.f32 %v6102_v52, %v11715_v36  ;;  %v6107_v32 = vadd.f32 %v6099_v6, %v15026_v7  ;;  %v6108_v28 = vadd.f32 %v6100_v51, %v15021_v3  ;;  %v15224_v2 = vld [vmem:[#allocation70_spill] sm:$0xff]  ;;  %v6242_v51 = vld [vmem:[%s14433_s18 + $0x178] sm:$0xff] }
0x1547   :  { %v6121_v23 = vadd.f32 %v6113_v20, %v11702_v22  ;;  %v6122_v35 = vadd.f32 %v6114_v14, %v11739_v56  ;;  %v6119_v34 = vadd.f32 %v6111_v45, %v15016_v19  ;;  %v6120_v16 = vadd.f32 %v6112_v1, %v11750_v21  ;;  %v15215_v14 = vld [vmem:[#allocation76_spill] sm:$0xff]  ;;  %v15216_v45 = vld [vmem:[#allocation75_spill] sm:$0xff]  ;;  %v15226_v10 = vld [vmem:[#allocation170_spill] sm:$0xff] }
0x1548   :  { %v6117_v24 = vadd.f32 %v6109_v41, %v15025_v9  ;;  %v6118_v39 = vadd.f32 %v6110_v5, %v15020_v43  ;;  %v6115_v12 = vadd.f32 %v6107_v32, %v15032_v44  ;;  %v6116_v36 = vadd.f32 %v6108_v28, %v15210_v15  ;;  %v15217_v1 = vld [vmem:[#allocation200_spill] sm:$0xff]  ;;  %v15218_v43 = vld [vmem:[#allocation199_spill] sm:$0xff]  ;;  %v15219_v44 = vld [vmem:[#allocation193_spill] sm:$0xff] }
0x1549   :  { %v6129_v7 = vadd.f32 %v6121_v23, %v15211_v17  ;;  %v6130_v3 = vadd.f32 %v6122_v35, %v15212_v53  ;;  %v6127_v22 = vadd.f32 %v6119_v34, %v15213_v31  ;;  %v6128_v56 = vadd.f32 %v6120_v16, %v15214_v60  ;;  %v6240_v20 = vld [vmem:[%s14433_s18 + $0x168] sm:$0xff]  ;;  %v6241_v41 = vld [vmem:[%s14433_s18 + $0x170] sm:$0xff]  ;;  %v6234_v5 = vld [vmem:[%s14433_s18 + $0x138] sm:$0xff] }
0x154a   :  { %v6125_v19 = vadd.f32 %v6117_v24, %v15215_v14  ;;  %v6126_v21 = vadd.f32 %v6118_v39, %v15216_v45  ;;  %v6123_v13 = vadd.f32 %v6115_v12, %v15223_v11  ;;  %v6124_v29 = vadd.f32 %v6116_v36, %v15224_v2  ;;  %v6233_v32 = vld [vmem:[%s14433_s18 + $0x130] sm:$0xff]  ;;  %v6239_v28 = vld [vmem:[%s14433_s18 + $0x160] sm:$0xff]  ;;  %v6238_v23 = vld [vmem:[%s14433_s18 + $0x158] sm:$0xff] }
0x154b   :  { %v13190_v9 = vadd.f32 %v6129_v7, %v15217_v1  ;;  %v13193_v50 = vadd.f32 %v6130_v3, %v15218_v43  ;;  %v13196_v46 = vadd.f32 %v6127_v22, %v15219_v44  ;;  %v13199_v18 = vadd.f32 %v6128_v56, %v15220_v63  ;;  %v6237_v35 = vld [vmem:[%s14433_s18 + $0x150] sm:$0xff]  ;;  %v6232_v34 = vld [vmem:[%s14433_s18 + $0x128] sm:$0xff]  ;;  %v6231_v16 = vld [vmem:[%s14433_s18 + $0x120] sm:$0xff] }
0x154c   :  { %v13202_v8 = vadd.f32 %v6125_v19, %v15221_v57  ;;  %v13205_v49 = vadd.f32 %v6126_v21, %v15222_v37  ;;  %v13219_v0 = vadd.f32 %v6123_v13, %v15225_v30  ;;  %v13222_v52 = vadd.f32 %v6124_v29, %v15226_v10  ;;  %v6230_v24 = vld [vmem:[%s14433_s18 + $0x118] sm:$0xff]  ;;  %v6236_v39 = vld [vmem:[%s14433_s18 + $0x148] sm:$0xff]  ;;  %v6235_v12 = vld [vmem:[%s14433_s18 + $0x140] sm:$0xff] }
0x154d   :  { %v8312_v54 = vpack.i.bf16 %v13190_v9, %v13193_v50  ;;  %v8317_v42 = vpack.i.bf16 %v13196_v46, %v13199_v18  ;;  %v6228_v15 = vld [vmem:[%s14433_s18 + $0x108] sm:$0xff]  ;;  %v6229_v36 = vld [vmem:[%s14433_s18 + $0x110] sm:$0xff]  ;;  %v6227_v17 = vld [vmem:[%s14433_s18 + $0x100] sm:$0xff] }
0x154e   :  { %v8322_v47 = vpack.i.bf16 %v13202_v8, %v13205_v49  ;;  %v8327_v6 = vpack.i.bf16 %v13219_v0, %v13222_v52  ;;  %v5649_v7 = vld [vmem:[%s14434_s12 + $0x508] sm:$0xff]  ;;  %v5653_v53 = vld [vmem:[%s14434_s12 + $0x530] sm:$0xff]  ;;  %v5657_v3 = vld [vmem:[%s14434_s12 + $0x558] sm:$0xff] }
0x154f   :  { %8313 = vrot.lane.b32.xlu1 %v8312_v54, %s8604_s28  ;;  %8318 = vrot.lane.b32.xlu0 %v8317_v42, %s8604_s28  ;;  %v5661_v31 = vld [vmem:[%s14434_s12 + $0x580] sm:$0xff]  ;;  %v5665_v22 = vld [vmem:[%s14434_s12 + $0x5a8] sm:$0xff] }
0x1550   :  { %8323 = vrot.lane.b32.xlu2 %v8322_v47, %s8604_s28  ;;  %5785 = vmatmul.f32.vlgmr.msrb.gmra.mxu1 %v5649_v7  ;;  %v5669_v60 = vld [vmem:[%s14434_s12 + $0x5d0] sm:$0xff]  ;;  %v5673_v14 = vld [vmem:[%s14434_s12 + $0x5f8] sm:$0xff]  ;;  %v5677_v43 = vld [vmem:[%s14434_s12 + $0x620] sm:$0xff] }
0x1557   :  { %8333 = vrot.lane.b32.xlu0 %v8312_v54, %s8607_s29  ;;  %8328 = vrot.lane.b32.xlu1 %v8327_v6, %s8604_s28 }
0x1558   :  { %8338 = vrot.lane.b32.xlu2 %v8317_v42, %s8607_s29  ;;  %5788 = vmatmul.f32.gmra.mxu1 %v5653_v53  ;;  %v6201_v53 = vld [vmem:[%s14435_s10 + $0x230] sm:$0xff] }
0x155f   :  { %8348 = vrot.lane.b32.xlu0 %v8327_v6, %s8607_s29  ;;  %8343 = vrot.lane.b32.xlu1 %v8322_v47, %s8607_s29 }
0x1560   :  { %6320 = vperm.xlu2 %7634, %v6242_v51   ;;  %5791 = vmatmul.f32.gmra.mxu1 %v5657_v3  ;;  %v6204_v3 = vld [vmem:[%s14435_s10 + $0x248] sm:$0xff] }
0x1567   :  { %6310 = vperm.xlu0 %7640, %v6240_v20   ;;  %6315 = vperm.xlu1 %7646, %v6241_v41  }
0x1568   :  { %6280 = vperm.xlu2 %7634, %v6234_v5   ;;  %5794 = vmatmul.f32.gmra.mxu1 %v5661_v31 }
0x156f   :  { %6275 = vperm.xlu0 %7640, %v6233_v32   ;;  %6305 = vperm.xlu1 %7646, %v6239_v28  }
0x1570   :  { %6300 = vperm.xlu2 %7634, %v6238_v23   ;;  %5797 = vmatmul.f32.gmra.mxu1 %v5665_v22 }
0x1577   :  { %6295 = vperm.xlu0 %7640, %v6237_v35   ;;  %6270 = vperm.xlu1 %7646, %v6232_v34   ;;  %v6196_v35 = vld [vmem:[%s14435_s10 + $0x208] sm:$0xff] }
0x1578   :  { %6265 = vperm.xlu2 %7634, %v6231_v16   ;;  %5800 = vmatmul.f32.gmra.mxu1 %v5669_v60 }
0x157f   :  { %6260 = vperm.xlu0 %7640, %v6230_v24   ;;  %6290 = vperm.xlu1 %7646, %v6236_v39  }
0x1580   :  { %6285 = vperm.xlu2 %7634, %v6235_v12   ;;  %5803 = vmatmul.f32.gmra.mxu1 %v5673_v14  ;;  %v6206_v14 = vld [vmem:[%s14435_s10 + $0x258] sm:$0xff] }
0x1587   :  { %6250 = vperm.xlu0 %7640, %v6228_v15   ;;  %6255 = vperm.xlu1 %7646, %v6229_v36   ;;  %v6202_v15 = vld [vmem:[%s14435_s10 + $0x238] sm:$0xff] }
0x1588   :  { %6245 = vperm.xlu2 %7634, %v6227_v17   ;;  %5806 = vmatmul.f32.gmra.mxu1 %v5677_v43 }
0x158f   :  { %8358 = vrot.lane.b32.xlu0 %v12877_v61, %s8601_s25  ;;  %8353 = vrot.lane.b32.xlu1 %v12898_v55, %s8601_s25 }
0x1590   :  { %8363 = vrot.lane.b32.xlu2 %v12864_v4, %s8601_s25 }
0x1597   :  { %8368 = vrot.lane.b32.xlu0 %v12917_v59, %s8601_s25 }
0x15aa   :  { %v8324_v56 = vpop.permute.xlu2 %8323 }
0x15ab   :  { %v8325_v42 = vunpack.i.l.bf16 %v8324_v56  ;;  %v8326_v2 = vunpack.i.h.bf16 %v8324_v56  ;;  %v6203_v56 = vld [vmem:[%s14435_s10 + $0x240] sm:$0xff] }
0x15b2   :  { %v8339_v19 = vpop.permute.xlu2 %8338 }
0x15b3   :  { %v8340_v47 = vunpack.i.l.bf16 %v8339_v19  ;;  %v8341_v10 = vunpack.i.h.bf16 %v8339_v19 }
0x15ba   :  { %v13311_v11 = vpop.permute.xlu2 %6320 }
0x15c1   :  { %v8314_v45 = vpop.permute.xlu1 %8313  ;;  %v8319_v21 = vpop.permute.xlu0 %8318 }
0x15c2   :  { %v8315_v1 = vunpack.i.l.bf16 %v8314_v45  ;;  %v8316_v44 = vunpack.i.h.bf16 %v8314_v45  ;;  %v8320_v63 = vunpack.i.l.bf16 %v8319_v21  ;;  %v8321_v57 = vunpack.i.h.bf16 %v8319_v21  ;;  %v13313_v5 = vpop.permute.xlu2 %6280 }
0x15c4   :  { %6371 = vmatpush.msrb.mxu2 %v8315_v1 }
0x15c6   :  { %6372 = vmatpush.msrb.mxu2 %v8316_v44 }
0x15c8   :  { %6373 = vmatpush.msrb.mxu2 %v8320_v63 }
0x15c9   :  { %v8334_v37 = vpop.permute.xlu0 %8333  ;;  %v8329_v54 = vpop.permute.xlu1 %8328 }
0x15ca   :  { %v8335_v13 = vunpack.i.l.bf16 %v8334_v37  ;;  %6374 = vmatpush.msrb.mxu2 %v8321_v57  ;;  %v8336_v29 = vunpack.i.h.bf16 %v8334_v37  ;;  %v8330_v30 = vunpack.i.l.bf16 %v8329_v54  ;;  %v8331_v6 = vunpack.i.h.bf16 %v8329_v54  ;;  %v6205_v57 = vld [vmem:[%s14435_s10 + $0x250] sm:$0xff]  ;;  %v6208_v37 = vld [vmem:[%s14435_s10 + $0x268] sm:$0xff] }
0x15cc   :  { %6375 = vmatpush.msrb.mxu2 %v8325_v42  ;;  %6444 = vmatpush.msra.mxu1 %v8335_v13 }
0x15cd   :  { %v13396_v54 = vpop.f32.mrf.mxu1 }
0x15ce   :  { %6376 = vmatpush.msrb.mxu2 %v8326_v2  ;;  %6445 = vmatpush.msra.mxu1 %v8336_v29  ;;  %15227 = vst [vmem:[#allocation136_spill] sm:$0xff] %v13396_v54 }
0x15d0   :  { %6377 = vmatpush.msrb.mxu2 %v8330_v30  ;;  %6446 = vmatpush.msra.mxu1 %v8340_v47  ;;  %v6207_v30 = vld [vmem:[%s14435_s10 + $0x260] sm:$0xff] }
0x15d1   :  { %v8349_v51 = vpop.permute.xlu0 %8348  ;;  %v8344_v20 = vpop.permute.xlu1 %8343 }
0x15d2   :  { %v8345_v41 = vunpack.i.l.bf16 %v8344_v20  ;;  %6378 = vmatpush.msrb.mxu2 %v8331_v6  ;;  %6447 = vmatpush.msra.mxu1 %v8341_v10  ;;  %v8346_v32 = vunpack.i.h.bf16 %v8344_v20  ;;  %v8350_v28 = vunpack.i.l.bf16 %v8349_v51  ;;  %v8351_v23 = vunpack.i.h.bf16 %v8349_v51  ;;  %v6210_v10 = vld [vmem:[%s14435_s10 + $0x278] sm:$0xff]  ;;  %v6209_v51 = vld [vmem:[%s14435_s10 + $0x270] sm:$0xff]  ;;  %v6212_v20 = vld [vmem:[%s14435_s10 + $0x288] sm:$0xff] }
0x15d4   :  { %6379 = vmatpush.msrb.mxu2 %v13193_v50  ;;  %6448 = vmatpush.msra.mxu1 %v8345_v41  ;;  %v6195_v50 = vld [vmem:[%s14435_s10 + $0x200] sm:$0xff] }
0x15d5   :  { %v13405_v6 = vpop.f32.mrf.mxu1 }
0x15d6   :  { %6380 = vmatpush.msrb.mxu2 %v13190_v9  ;;  %6449 = vmatpush.msra.mxu1 %v8346_v32  ;;  %v13328_v9 = vpop.permute.xlu2 %6300  ;;  %15228 = vst [vmem:[#allocation56_spill] sm:$0xff] %v13405_v6  ;;  %v6211_v32 = vld [vmem:[%s14435_s10 + $0x280] sm:$0xff] }
0x15d8   :  { %6381 = vmatpush.msrb.mxu2 %v13199_v18  ;;  %6450 = vmatpush.msra.mxu1 %v8350_v28  ;;  %v6198_v18 = vld [vmem:[%s14435_s10 + $0x218] sm:$0xff] }
0x15d9   :  { %v13321_v34 = vpop.permute.xlu0 %6310  ;;  %v13323_v16 = vpop.permute.xlu1 %6315  ;;  %v6214_v28 = vld [vmem:[%s14435_s10 + $0x298] sm:$0xff] }
0x15da   :  { %6382 = vmatpush.msrb.mxu2 %v13196_v46  ;;  %6451 = vmatpush.msra.mxu1 %v8351_v23 }
0x15db   :  { %7552 = vmatmul.msk.f32.vlgmr.msra.gmra.mxu1 %vm677_vm3, %v6196_v35  ;;  %v6213_v35 = vld [vmem:[%s14435_s10 + $0x290] sm:$0xff] }
0x15dc   :  { %6383 = vmatpush.msrb.mxu2 %v13205_v49  ;;  %v6197_v49 = vld [vmem:[%s14435_s10 + $0x210] sm:$0xff] }
0x15dd   :  { %v13415_v41 = vpop.f32.mrf.mxu1 }
0x15de   :  { %6384 = vmatpush.msrb.mxu2 %v13202_v8  ;;  %v13344_v8 = vpop.permute.xlu2 %6265 }
0x15e0   :  { %6385 = vmatpush.msrb.mxu2 %v13222_v52  ;;  %v6200_v52 = vld [vmem:[%s14435_s10 + $0x228] sm:$0xff] }
0x15e1   :  { %v13338_v46 = vpop.permute.xlu0 %6275  ;;  %v13340_v24 = vpop.permute.xlu1 %6305 }
0x15e2   :  { %6386 = vmatpush.msrb.mxu2 %v13219_v0  ;;  %v6199_v0 = vld [vmem:[%s14435_s10 + $0x220] sm:$0xff] }
0x15e3   :  { %6387 = vmatmul.f32.vlgmr.msrb.gmra.mxu2 %v6195_v50  ;;  %7553 = vmatmul.msk.f32.gmra.mxu1 %vm677_vm3, %v6198_v18  ;;  %v6216_v50 = vld [vmem:[%s14435_s10 + $0x2a8] sm:$0xff]  ;;  %v6215_v18 = vld [vmem:[%s14435_s10 + $0x2a0] sm:$0xff] }
0x15e5   :  { %v13424_v23 = vpop.f32.mrf.mxu1 }
0x15e6   :  { %v13367_v7 = vpop.permute.xlu2 %6285 }
0x15e9   :  { %v13352_v39 = vpop.permute.xlu0 %6295  ;;  %v13354_v12 = vpop.permute.xlu1 %6270 }
0x15eb   :  { %6390 = vmatmul.f32.gmra.mxu2 %v6197_v49  ;;  %7554 = vmatmul.msk.f32.gmra.mxu1 %vm677_vm3, %v6200_v52  ;;  %v6218_v49 = vld [vmem:[%s14435_s10 + $0x2b8] sm:$0xff] }
0x15ed   :  { %v13439_v52 = vpop.f32.mrf.mxu1 }
0x15ee   :  { %v13381_v60 = vpop.permute.xlu2 %6245 }
0x15f1   :  { %v13363_v36 = vpop.permute.xlu0 %6260  ;;  %v13365_v17 = vpop.permute.xlu1 %6290 }
0x15f3   :  { %6393 = vmatmul.f32.gmra.mxu2 %v6199_v0  ;;  %7555 = vmatmul.msk.f32.gmra.mxu1 %vm677_vm3, %v6202_v15  ;;  %v6217_v0 = vld [vmem:[%s14435_s10 + $0x2b0] sm:$0xff]  ;;  %v6220_v15 = vld [vmem:[%s14435_s10 + $0x2c8] sm:$0xff] }
0x15f6   :  { %v8364_v44 = vpop.permute.xlu2 %8363 }
0x15f7   :  { %v8365_v42 = vunpack.i.l.bf16 %v8364_v44  ;;  %v8366_v2 = vunpack.i.h.bf16 %v8364_v44  ;;  %v6225_v44 = vld [vmem:[%s14435_s10 + $0x2f0] sm:$0xff] }
0x15f9   :  { %v13376_v31 = vpop.permute.xlu0 %6250  ;;  %v13378_v22 = vpop.permute.xlu1 %6255 }
0x15fb   :  { %6396 = vmatmul.f32.gmra.mxu2 %v6201_v53  ;;  %7556 = vmatmul.msk.f32.gmra.mxu1 %vm677_vm3, %v6204_v3  ;;  %v13448_v53 = vpop.f32.mrf.mxu1  ;;  %v6219_v3 = vld [vmem:[%s14435_s10 + $0x2c0] sm:$0xff] }
0x1601   :  { %v8359_v19 = vpop.permute.xlu0 %8358  ;;  %v8354_v45 = vpop.permute.xlu1 %8353 }
0x1602   :  { %v8355_v21 = vunpack.i.l.bf16 %v8354_v45  ;;  %v8356_v1 = vunpack.i.h.bf16 %v8354_v45  ;;  %v8360_v43 = vunpack.i.l.bf16 %v8359_v19  ;;  %v8361_v63 = vunpack.i.h.bf16 %v8359_v19  ;;  %v6221_v19 = vld [vmem:[%s14435_s10 + $0x2d0] sm:$0xff]  ;;  %v6224_v45 = vld [vmem:[%s14435_s10 + $0x2e8] sm:$0xff] }
0x1603   :  { %6399 = vmatmul.f32.gmra.mxu2 %v6203_v56  ;;  %7557 = vmatmul.msk.f32.gmra.mxu1 %vm677_vm3, %v6206_v14  ;;  %v6222_v56 = vld [vmem:[%s14435_s10 + $0x2d8] sm:$0xff]  ;;  %v13458_v14 = vpop.f32.mrf.mxu1 }
0x1604   :  { %5851 = vmatpush.msrb.mxu3 %v8355_v21 }
0x1606   :  { %5852 = vmatpush.msrb.mxu3 %v8356_v1  ;;  %v6223_v1 = vld [vmem:[%s14435_s10 + $0x2e0] sm:$0xff] }
0x1608   :  { %5853 = vmatpush.msrb.mxu3 %v8360_v43  ;;  %v6226_v43 = vld [vmem:[%s14435_s10 + $0x2f8] sm:$0xff] }
0x1609   :  { %v8369_v13 = vpop.permute.xlu0 %8368 }
0x160a   :  { %5854 = vmatpush.msrb.mxu3 %v8361_v63  ;;  %v8370_v29 = vunpack.i.l.bf16 %v8369_v13  ;;  %v8371_v47 = vunpack.i.h.bf16 %v8369_v13 }
0x160b   :  { %6402 = vmatmul.f32.gmra.mxu2 %v6205_v57  ;;  %7558 = vmatmul.msk.f32.gmra.mxu1 %vm677_vm3, %v6208_v37  ;;  %v13467_v21 = vpop.f32.mrf.mxu1 }
0x160c   :  { %5855 = vmatpush.msrb.mxu3 %v8365_v42 }
0x160e   :  { %5856 = vmatpush.msrb.mxu3 %v8366_v2 }
0x1610   :  { %5857 = vmatpush.msrb.mxu3 %v8370_v29 }
0x1612   :  { %5858 = vmatpush.msrb.mxu3 %v8371_v47 }
0x1613   :  { %6405 = vmatmul.f32.gmra.mxu2 %v6207_v30  ;;  %7559 = vmatmul.msk.f32.gmra.mxu1 %vm677_vm3, %v6210_v10 }
0x161b   :  { %6408 = vmatmul.f32.gmra.mxu2 %v6209_v51  ;;  %7560 = vmatmul.msk.f32.gmra.mxu1 %vm677_vm3, %v6212_v20 }
0x1623   :  { %6411 = vmatmul.f32.gmra.mxu2 %v6211_v32  ;;  %7561 = vmatmul.msk.f32.gmra.mxu1 %vm677_vm3, %v6214_v28 }
0x162b   :  { %6414 = vmatmul.f32.gmra.mxu2 %v6213_v35  ;;  %7562 = vmatmul.msk.f32.gmra.mxu1 %vm677_vm3, %v6216_v50 }
0x1633   :  { %6417 = vmatmul.f32.gmra.mxu2 %v6215_v18  ;;  %7563 = vmatmul.msk.f32.gmra.mxu1 %vm677_vm3, %v6218_v49 }
0x163b   :  { %6420 = vmatmul.f32.gmra.mxu2 %v6217_v0  ;;  %7564 = vmatmul.msk.f32.gmra.mxu1 %vm677_vm3, %v6220_v15 }
0x1643   :  { %6423 = vmatmul.f32.gmra.mxu2 %v6219_v3  ;;  %7565 = vmatmul.msk.f32.gmra.mxu1 %vm677_vm3, %v6222_v56 }
0x164b   :  { %6426 = vmatmul.f32.gmra.mxu2 %v6221_v19  ;;  %7566 = vmatmul.msk.f32.gmra.mxu1 %vm677_vm3, %v6224_v45 }
0x1653   :  { %6429 = vmatmul.f32.gmra.mxu2 %v6223_v1  ;;  %7567 = vmatmul.msk.f32.gmra.mxu1 %vm677_vm3, %v6226_v43 }
0x1658   :  { %v13479_v63 = vpop.f32.mrf.mxu1 }
0x165b   :  { %6432 = vmatmul.f32.gmra.mxu2 %v6225_v44 }
0x1660   :  { %v13481_v57 = vpop.f32.mrf.mxu1 }
0x1666   :  { %v13483_v37 = vpop.f32.mrf.mxu2 }
0x1668   :  { %v6459_v42 = vpop.f32.mrf.mxu1 }
0x166e   :  { %v13485_v13 = vpop.f32.mrf.mxu2 }
0x1670   :  { %v6462_v2 = vpop.f32.mrf.mxu1 }
0x1676   :  { %v6394_v29 = vpop.f32.mrf.mxu2 }
0x1678   :  { %v6465_v47 = vpop.f32.mrf.mxu1 }
0x167e   :  { %v6397_v30 = vpop.f32.mrf.mxu2 }
0x1680   :  { %v6468_v10 = vpop.f32.mrf.mxu1 }
0x1686   :  { %v6400_v51 = vpop.f32.mrf.mxu2 }
0x1687   :  { %v6401_v20 = vadd.f32 %v6400_v51, %v13344_v8 }
0x1688   :  { %v6471_v32 = vpop.f32.mrf.mxu1 }
0x1689   :  { %v13488_v28 = vadd.f32 %v6465_v47, %v6401_v20 }
0x168e   :  { %v6403_v35 = vpop.f32.mrf.mxu2 }
0x168f   :  { %v6404_v50 = vadd.f32 %v6403_v35, %v13354_v12 }
0x1690   :  { %v6474_v18 = vpop.f32.mrf.mxu1 }
0x1691   :  { %v13491_v49 = vadd.f32 %v6468_v10, %v6404_v50 }
0x1696   :  { %v6406_v0 = vpop.f32.mrf.mxu2 }
0x1697   :  { %v6407_v15 = vadd.f32 %v6406_v0, %v13338_v46 }
0x1698   :  { %v6477_v3 = vpop.f32.mrf.mxu1 }
0x1699   :  { %v13494_v56 = vadd.f32 %v6471_v32, %v6407_v15  ;;  %v6395_v32 = vadd.f32 %v6394_v29, %v13378_v22 }
0x169e   :  { %v6409_v19 = vpop.f32.mrf.mxu2 }
0x169f   :  { %v6410_v45 = vadd.f32 %v6409_v19, %v13313_v5  ;;  %v6398_v5 = vadd.f32 %v6397_v30, %v13363_v36  ;;  %v6460_v19 = vadd.f32 %v6459_v42, %v6395_v32 }
0x16a0   :  { %v6480_v8 = vpop.f32.mrf.mxu1 }
0x16a1   :  { %v13497_v1 = vadd.f32 %v6474_v18, %v6410_v45  ;;  %v6463_v54 = vadd.f32 %v6462_v2, %v6398_v5 }
0x16a6   :  { %v6412_v43 = vpop.f32.mrf.mxu2 }
0x16a7   :  { %v6413_v29 = vadd.f32 %v6412_v43, %v13367_v7 }
0x16a8   :  { %v6483_v44 = vpop.f32.mrf.mxu1 }
0x16ae   :  { %v6415_v47 = vpop.f32.mrf.mxu2 }
0x16b0   :  { %v6486_v12 = vpop.f32.mrf.mxu1 }
0x16b6   :  { %v6418_v51 = vpop.f32.mrf.mxu2 }
0x16b7   :  { %v6419_v10 = vadd.f32 %v6418_v51, %v13352_v39 }
0x16b8   :  { %v6489_v0 = vpop.f32.mrf.mxu1 }
0x16b9   :  { %v6484_v20 = vadd.f32 %v6483_v44, %v6419_v10  ;;  %v6416_v44 = vadd.f32 %v6415_v47, %v13365_v17 }
0x16bb   :  { %v6511_v35 = vmul.f32 0.5, %v6484_v20  ;;  %v6481_v30 = vadd.f32 %v6480_v8, %v6416_v44 }
0x16bd   :  { %8568 = vtanh.f32 %v6511_v35  ;;  %v6510_v17 = vmul.f32 0.5, %v6481_v30 }
0x16be   :  { %v6421_v50 = vpop.f32.mrf.mxu2 }
0x16bf   :  { %v6422_v46 = vadd.f32 %v6421_v50, %v13328_v9 }
0x16c0   :  { %v6492_v10 = vpop.f32.mrf.mxu1 }
0x16c1   :  { %v6487_v18 = vadd.f32 %v6486_v12, %v6422_v46  ;;  %v6478_v46 = vadd.f32 %v6477_v3, %v6413_v29 }
0x16c3   :  { %v6512_v15 = vmul.f32 0.5, %v6487_v18  ;;  %v8569_v45 = vpop.eup %8568  ;;  %v6509_v8 = vmul.f32 0.5, %v6478_v46 }
0x16c4   :  { %v6527_v51 = vadd.f32 1.0, %v8569_v45 }
0x16c5   :  { %8570 = vtanh.f32 %v6512_v15  ;;  %v6389_v15 = vadd.f32 %v13483_v37, %v13381_v60 }
0x16c6   :  { %v6424_v6 = vpop.f32.mrf.mxu2  ;;  %8572 = vtanh.f32 %v6460_v19  ;;  %v6535_v12 = vmul.f32 0.5, %v6527_v51 }
0x16c7   :  { %v6425_v39 = vadd.f32 %v6424_v6, %v13340_v24  ;;  %8574 = vtanh.f32 %v6463_v54 }
0x16c8   :  { %v6495_v3 = vpop.f32.mrf.mxu1 }
0x16c9   :  { %v6490_v9 = vadd.f32 %v6489_v0, %v6425_v39 }
0x16cb   :  { %v8571_v22 = vpop.eup %8570  ;;  %v6513_v36 = vmul.f32 0.5, %v6490_v9 }
0x16cc   :  { %v6528_v42 = vadd.f32 1.0, %v8571_v22  ;;  %v8573_v20 = vpop.eup %8572 }
0x16cd   :  { %v8575_v50 = vpop.eup %8574  ;;  %8576 = vtanh.f32 %v6513_v36  ;;  %v13507_v6 = vmul.f32 %v8573_v20, %v6535_v12 }
0x16ce   :  { %v6536_v2 = vmul.f32 0.5, %v6528_v42  ;;  %v6427_v35 = vpop.f32.mrf.mxu2  ;;  %8578 = vtanh.f32 %v6510_v17 }
0x16cf   :  { %v6428_v24 = vadd.f32 %v6427_v35, %v13321_v34  ;;  %v6392_v34 = vadd.f32 %v13485_v13, %v13376_v31  ;;  %v6454_v13 = vadd.f32 %v13479_v63, %v6389_v15  ;;  %v3360_v15 = vld [vmem:[%s14442_s19 + $0xb0] sm:$0xff] }
0x16d0   :  { %v13509_v54 = vmul.f32 %v8575_v50, %v6536_v2 }
0x16d1   :  { %v6493_v47 = vadd.f32 %v6492_v10, %v6428_v24  ;;  %v6457_v39 = vadd.f32 %v13481_v57, %v6392_v34 }
0x16d2   :  { %v13513_v7 = vpack.i.bf16 %v13507_v6, %v13509_v54 }
0x16d3   :  { %v6514_v43 = vmul.f32 0.5, %v6493_v47  ;;  %v8577_v32 = vpop.eup %8576 }
0x16d4   :  { %8388 = vrot.lane.b32.xlu0 %v13513_v7, %s8604_s28  ;;  %v6529_v18 = vadd.f32 1.0, %v8577_v32  ;;  %v8579_v45 = vpop.eup %8578 }
0x16d5   :  { %8580 = vtanh.f32 %v6514_v43  ;;  %v6526_v10 = vadd.f32 1.0, %v8579_v45  ;;  %v2167_v45 = vld [vmem:[%s14442_s19 + $0x50] sm:$0xff] }
0x16d6   :  { %v6430_v0 = vpop.f32.mrf.mxu2  ;;  %8582 = vtanh.f32 %v6509_v8  ;;  %v6537_v9 = vmul.f32 0.5, %v6529_v18  ;;  %v1221_v18 = vld [vmem:[%s14442_s19 + $0x30] sm:$0xff] }
0x16d7   :  { %v6431_v5 = vadd.f32 %v6430_v0, %v13323_v16  ;;  %8584 = vtanh.f32 %v13488_v28  ;;  %v6534_v12 = vmul.f32 0.5, %v6526_v10 }
0x16d8   :  { %8586 = vtanh.f32 %v13491_v49  ;;  %v6498_v49 = vpop.f32.mrf.mxu1 }
0x16d9   :  { %v6496_v19 = vadd.f32 %v6495_v3, %v6431_v5  ;;  %8588 = vtanh.f32 %v6457_v39  ;;  %v2171_v5 = vld [vmem:[%s14442_s19 + $0x70] sm:$0xff]  ;;  %v2168_v39 = vld [vmem:[%s14442_s19 + $0x58] sm:$0xff] }
0x16db   :  { %v8581_v44 = vpop.eup %8580  ;;  %v6515_v51 = vmul.f32 0.5, %v6496_v19  ;;  %v3359_v19 = vld [vmem:[%s14442_s19 + $0xa8] sm:$0xff] }
0x16dc   :  { %v6530_v31 = vadd.f32 1.0, %v8581_v44  ;;  %8403 = vrot.lane.b32.xlu0 %v12864_v4, %s8603_s24  ;;  %v8583_v16 = vpop.eup %8582  ;;  %v3361_v44 = vld [vmem:[%s14442_s19 + $0xb8] sm:$0xff] }
0x16dd   :  { %v8585_v28 = vpop.eup %8584  ;;  %8590 = vtanh.f32 %v6515_v51  ;;  %v6525_v29 = vadd.f32 1.0, %v8583_v16  ;;  %v5686_v51 = vld [vmem:[%s14442_s19 + $0x130] sm:$0xff]  ;;  %v1222_v16 = vld [vmem:[%s14442_s19 + $0x38] sm:$0xff] }
0x16de   :  { %v6538_v60 = vmul.f32 0.5, %v6530_v31  ;;  %v6433_v37 = vpop.f32.mrf.mxu2  ;;  %v8587_v22 = vpop.eup %8586  ;;  %v13529_v36 = vmul.f32 %v8585_v28, %v6537_v9  ;;  %8592 = vtanh.f32 %v6454_v13  ;;  %v5687_v31 = vld [vmem:[%s14442_s19 + $0x138] sm:$0xff]  ;;  %v3356_v13 = vld [vmem:[%s14442_s19 + $0x90] sm:$0xff] }
0x16df   :  { %v6434_v57 = vadd.f32 %v6433_v37, %v13311_v11  ;;  %v8589_v20 = vpop.eup %8588  ;;  %v6533_v2 = vmul.f32 0.5, %v6525_v29  ;;  %v4523_v37 = vld [vmem:[%s14442_s19 + $0xf8] sm:$0xff]  ;;  %v1219_v29 = vld [vmem:[%s14442_s19 + $0x20] sm:$0xff] }
0x16e0   :  { %v13531_v30 = vmul.f32 %v8587_v22, %v6538_v60  ;;  %v13537_v11 = vmul.f32 %v8589_v20, %v6534_v12  ;;  %v3357_v60 = vld [vmem:[%s14442_s19 + $0x98] sm:$0xff]  ;;  %v3355_v12 = vld [vmem:[%s14442_s19 + $0x88] sm:$0xff]  ;;  %v4520_v20 = vld [vmem:[%s14442_s19 + $0xe0] sm:$0xff] }
0x16e1   :  { %v6499_v4 = vadd.f32 %v6498_v49, %v6434_v57  ;;  %v6708_v49 = vld [vmem:[%s14442_s19 + $0x178] sm:$0xff] }
0x16e2   :  { %v8372_v63 = vpack.i.bf16 %v13529_v36, %v13531_v30 }
0x16e3   :  { %v6516_v42 = vmul.f32 0.5, %v6499_v4  ;;  %v8591_v35 = vpop.eup %8590  ;;  %v3358_v4 = vld [vmem:[%s14442_s19 + $0xa0] sm:$0xff] }
0x16e4   :  { %8373 = vrot.lane.b32.xlu2 %v8372_v63, %s8604_s28  ;;  %8413 = vrot.lane.b32.xlu0 %v8372_v63, %s15043_s1  ;;  %v8593_v50 = vpop.eup %8592  ;;  %v6531_v24 = vadd.f32 1.0, %v8591_v35  ;;  %v6707_v35 = vld [vmem:[%s14442_s19 + $0x170] sm:$0xff] }
0x16e5   :  { %8594 = vtanh.f32 %v6516_v42  ;;  %v13540_v46 = vmul.f32 %v8593_v50, %v6533_v2  ;;  %v1220_v2 = vld [vmem:[%s14442_s19 + $0x28] sm:$0xff] }
0x16e6   :  { %8596 = vtanh.f32 %v13494_v56  ;;  %v6539_v8 = vmul.f32 0.5, %v6531_v24 }
0x16e7   :  { %8598 = vtanh.f32 %v13497_v1  ;;  %v8422_v17 = vpack.i.bf16 %v13540_v46, %v13537_v11 }
0x16eb   :  { %v8595_v47 = vpop.eup %8594 }
0x16ec   :  { %v6532_v43 = vadd.f32 1.0, %v8595_v47  ;;  %8393 = vrot.lane.b32.xlu2 %v12877_v61, %s8603_s24  ;;  %8423 = vrot.lane.b32.xlu0 %v8422_v17, %s15043_s1  ;;  %v8597_v3 = vpop.eup %8596  ;;  %v2172_v61 = vld [vmem:[%s14442_s19 + $0x78] sm:$0xff]  ;;  %v4521_v47 = vld [vmem:[%s14442_s19 + $0xe8] sm:$0xff] }
0x16ed   :  { %v8599_v34 = vpop.eup %8598  ;;  %v13548_v56 = vmul.f32 %v8597_v3, %v6539_v8  ;;  %v4518_v8 = vld [vmem:[%s14442_s19 + $0xd0] sm:$0xff] }
0x16ee   :  { %v6540_v32 = vmul.f32 0.5, %v6532_v43 }
0x16f0   :  { %v13550_v0 = vmul.f32 %v8599_v34, %v6540_v32 }
0x16f2   :  { %v8377_v1 = vpack.i.bf16 %v13548_v56, %v13550_v0 }
0x16f4   :  { %8378 = vrot.lane.b32.xlu1 %v8377_v1, %s8604_s28  ;;  %8408 = vrot.lane.b32.xlu2 %v12917_v59, %s8603_s24  ;;  %v2169_v59 = vld [vmem:[%s14442_s19 + $0x60] sm:$0xff] }
0x16f5   :  { %8433 = vrot.lane.b32.xlu0 %v13513_v7, %s8605_s6 }
0x16fc   :  { %8383 = vrot.lane.b32.xlu1 %v12898_v55, %s8603_s24  ;;  %8418 = vrot.lane.b32.xlu2 %v13513_v7, %s15043_s1  ;;  %v2170_v55 = vld [vmem:[%s14442_s19 + $0x68] sm:$0xff] }
0x16fd   :  { %8463 = vrot.lane.b32.xlu0 %v13513_v7, %s8607_s29 }
0x1704   :  { %8428 = vrot.lane.b32.xlu2 %v8372_v63, %s8605_s6  ;;  %8398 = vrot.lane.b32.xlu1 %v8422_v17, %s8604_s28 }
0x1705   :  { %8473 = vrot.lane.b32.xlu0 %v8372_v63, %s8600_s23 }
0x170c   :  { %8438 = vrot.lane.b32.xlu2 %v8372_v63, %s8607_s29  ;;  %8443 = vrot.lane.b32.xlu1 %v8377_v1, %s15043_s1 }
0x170d   :  { %2210 = vperm.xlu0 %7640, %v2172_v61   ;;  %v4519_v61 = vld [vmem:[%s14442_s19 + $0xd8] sm:$0xff] }
0x1714   :  { %8478 = vrot.lane.b32.xlu2 %v8377_v1, %s8600_s23  ;;  %8448 = vrot.lane.b32.xlu1 %v8377_v1, %s8605_s6 }
0x1715   :  { %2200 = vperm.xlu0 %7640, %v2170_v55   ;;  %v2166_v55 = vld [vmem:[%s14442_s19 + $0x48] sm:$0xff] }
0x171c   :  { %8483 = vrot.lane.b32.xlu2 %v13513_v7, %s8600_s23  ;;  %8453 = vrot.lane.b32.xlu1 %v8377_v1, %s8607_s29  ;;  %v4522_v7 = vld [vmem:[%s14442_s19 + $0xf0] sm:$0xff] }
0x171d   :  { %2195 = vperm.xlu0 %7640, %v2169_v59   ;;  %v1216_v59 = vld [vmem:[%s14442_s19 + $0x8] sm:$0xff] }
0x1724   :  { %2205 = vperm.xlu2 %7634, %v2171_v5   ;;  %8458 = vrot.lane.b32.xlu1 %v8422_v17, %s8605_s6 }
0x1725   :  { %1255 = vperm.xlu0 %7640, %v1221_v18  }
0x172c   :  { %3394 = vperm.xlu2 %7634, %v3360_v15   ;;  %8468 = vrot.lane.b32.xlu1 %v8422_v17, %s8607_s29 }
0x172d   :  { %4556 = vperm.xlu0 %7640, %v4522_v7  }
0x1734   :  { %3389 = vperm.xlu2 %7634, %v3359_v19   ;;  %8488 = vrot.lane.b32.xlu1 %v8422_v17, %s8600_s23  ;;  %v1218_v17 = vld [vmem:[%s14442_s19 + $0x18] sm:$0xff] }
0x1735   :  { %2185 = vperm.xlu0 %7640, %v2167_v45  }
0x173c   :  { %2190 = vperm.xlu2 %7634, %v2168_v39   ;;  %3399 = vperm.xlu1 %7646, %v3361_v44  }
0x173d   :  { %5720 = vperm.xlu0 %7640, %v5686_v51  }
0x173e   :  { %v8374_v9 = vpop.permute.xlu2 %8373 }
0x173f   :  { %v8375_v5 = vunpack.i.l.bf16 %v8374_v9  ;;  %v8376_v18 = vunpack.i.h.bf16 %v8374_v9  ;;  %v5685_v9 = vld [vmem:[%s14442_s19 + $0x128] sm:$0xff] }
0x1744   :  { %5725 = vperm.xlu2 %7634, %v5687_v31   ;;  %1260 = vperm.xlu1 %7646, %v1222_v16   ;;  %v1217_v31 = vld [vmem:[%s14442_s19 + $0x10] sm:$0xff]  ;;  %v6705_v16 = vld [vmem:[%s14442_s19 + $0x160] sm:$0xff] }
0x1745   :  { %3374 = vperm.xlu0 %7640, %v3356_v13  }
0x1746   :  { %v13623_v28 = vpop.permute.xlu2 %8393  ;;  %v8389_v10 = vpop.permute.xlu0 %8388 }
0x1747   :  { %v8390_v19 = vunpack.i.l.bf16 %v8389_v10  ;;  %v8391_v44 = vunpack.i.h.bf16 %v8389_v10  ;;  %v8395_v13 = vunpack.i.l.bf16 %v13623_v28  ;;  %v8396_v10 = vunpack.i.h.bf16 %v13623_v28  ;;  %v5683_v28 = vld [vmem:[%s14442_s19 + $0x118] sm:$0xff] }
0x174c   :  { %3379 = vperm.xlu2 %7634, %v3357_v60   ;;  %4561 = vperm.xlu1 %7646, %v4523_v37  }
0x174d   :  { %6746 = vperm.xlu0 %7640, %v6708_v49  }
0x174e   :  { %v13634_v22 = vpop.permute.xlu2 %8408  ;;  %v13636_v57 = vpop.permute.xlu0 %8403 }
0x174f   :  { %v8405_v49 = vunpack.i.l.bf16 %v13636_v57 }
0x1754   :  { %1245 = vperm.xlu2 %7634, %v1219_v29   ;;  %3384 = vperm.xlu1 %7646, %v3358_v4  }
0x1755   :  { %3369 = vperm.xlu0 %7640, %v3355_v12   ;;  %v8406_v12 = vunpack.i.h.bf16 %v13636_v57  ;;  %v8411_v57 = vunpack.i.h.bf16 %v13634_v22 }
0x1756   :  { %v13647_v63 = vpop.permute.xlu2 %8418  ;;  %v13649_v42 = vpop.permute.xlu0 %8413 }
0x175c   :  { %4546 = vperm.xlu2 %7634, %v4520_v20   ;;  %1250 = vperm.xlu1 %7646, %v1220_v2   ;;  %v2165_v2 = vld [vmem:[%s14442_s19 + $0x40] sm:$0xff] }
0x175d   :  { %6741 = vperm.xlu0 %7640, %v6707_v35   ;;  %v5681_v35 = vld [vmem:[%s14442_s19 + $0x108] sm:$0xff] }
0x175e   :  { %v13660_v50 = vpop.permute.xlu2 %8428  ;;  %v13662_v24 = vpop.permute.xlu0 %8423 }
0x1764   :  { %1240 = vperm.xlu2 %7634, %v1218_v17   ;;  %4551 = vperm.xlu1 %7646, %v4521_v47   ;;  %v8410_v17 = vunpack.i.l.bf16 %v13634_v22  ;;  %v5651_v47 = vld [vmem:[%s14434_s12 + $0x518] sm:$0xff]  ;;  %v4517_v22 = vld [vmem:[%s14442_s19 + $0xc8] sm:$0xff] }
0x1765   :  { %4536 = vperm.xlu0 %7640, %v4518_v8  }
0x1766   :  { %v8379_v43 = vpop.permute.xlu1 %8378  ;;  %v13673_v3 = vpop.permute.xlu2 %8438 }
0x1767   :  { %v8380_v32 = vunpack.i.l.bf16 %v8379_v43  ;;  %v13675_v34 = vpop.permute.xlu0 %8433  ;;  %v8381_v1 = vunpack.i.h.bf16 %v8379_v43 }
0x1769   :  { %6749 = vmatpush.msra.mxu0 %v8380_v32 }
0x176b   :  { %6750 = vmatpush.msra.mxu0 %v8381_v1 }
0x176c   :  { %4541 = vperm.xlu2 %7634, %v4519_v61   ;;  %2180 = vperm.xlu1 %7646, %v2166_v55   ;;  %v5684_v55 = vld [vmem:[%s14442_s19 + $0x120] sm:$0xff] }
0x176d   :  { %1230 = vperm.xlu0 %7640, %v1216_v59   ;;  %6751 = vmatpush.msra.mxu0 %v8375_v5  ;;  %v8416_v59 = vunpack.i.h.bf16 %v13649_v42 }
0x176e   :  { %v8384_v15 = vpop.permute.xlu1 %8383  ;;  %v13686_v7 = vpop.permute.xlu2 %8478 }
0x176f   :  { %v8385_v45 = vunpack.i.l.bf16 %v8384_v15  ;;  %v13688_v39 = vpop.permute.xlu0 %8463  ;;  %6752 = vmatpush.msra.mxu0 %v8376_v18  ;;  %v8386_v51 = vunpack.i.h.bf16 %v8384_v15  ;;  %v5655_v18 = vld [vmem:[%s14434_s12 + $0x540] sm:$0xff] }
0x1771   :  { %5859 = vmatpush.msrb.mxu3 %v8385_v45  ;;  %6753 = vmatpush.msra.mxu0 %v8390_v19  ;;  %v8420_v19 = vunpack.i.l.bf16 %v13647_v63 }
0x1773   :  { %5860 = vmatpush.msrb.mxu3 %v8386_v51  ;;  %6754 = vmatpush.msra.mxu0 %v8391_v44  ;;  %v6919_v44 = vld [vmem:[%s14431_s17 + $0xb8] sm:$0xff]  ;;  %v15230_v51 = vld [vmem:[#allocation10_spill] sm:$0xff] }
0x1774   :  { %1235 = vperm.xlu2 %7634, %v1217_v31   ;;  %5715 = vperm.xlu1 %7646, %v5685_v9  }
0x1775   :  { %6731 = vperm.xlu0 %7640, %v6705_v16   ;;  %5861 = vmatpush.msrb.mxu3 %v8395_v13  ;;  %v15231_v16 = vld [vmem:[#allocation144_spill] sm:$0xff] }
0x1776   :  { %v13701_v60 = vpop.permute.xlu2 %8483  ;;  %v8399_v37 = vpop.permute.xlu1 %8398 }
0x1777   :  { %v13704_v29 = vpop.permute.xlu0 %8473  ;;  %v8400_v4 = vunpack.i.l.bf16 %v8399_v37  ;;  %5862 = vmatpush.msrb.mxu3 %v8396_v10  ;;  %v8401_v20 = vunpack.i.h.bf16 %v8399_v37 }
0x1779   :  { %5863 = vmatpush.msrb.mxu3 %v8405_v49  ;;  %6755 = vmatpush.msra.mxu0 %v8400_v4  ;;  %v8426_v49 = vunpack.i.h.bf16 %v13662_v24 }
0x177b   :  { %5864 = vmatpush.msrb.mxu3 %v8406_v12  ;;  %6756 = vmatpush.msra.mxu0 %v8401_v20  ;;  %v5659_v20 = vld [vmem:[%s14434_s12 + $0x568] sm:$0xff] }
0x177c   :  { %5705 = vperm.xlu2 %7634, %v5683_v28   ;;  %2175 = vperm.xlu1 %7646, %v2165_v2   ;;  %v15232_v28 = vld [vmem:[#allocation182_spill] sm:$0xff] }
0x177d   :  { %5695 = vperm.xlu0 %7640, %v5681_v35   ;;  %5865 = vmatpush.msrb.mxu3 %v8410_v17  ;;  %v8430_v35 = vunpack.i.l.bf16 %v13660_v50  ;;  %v15233_v17 = vld [vmem:[#allocation143_spill] sm:$0xff] }
0x177e   :  { %6757 = vmatpush.msra.mxu0 %v13550_v0  ;;  %v2206_v8 = vpop.permute.xlu2 %2205  ;;  %v8444_v43 = vpop.permute.xlu1 %8443  ;;  %v6703_v0 = vld [vmem:[%s14442_s19 + $0x150] sm:$0xff] }
0x177f   :  { %v13722_v32 = vpop.permute.xlu0 %2210  ;;  %v8445_v1 = vunpack.i.l.bf16 %v8444_v43  ;;  %5866 = vmatpush.msrb.mxu3 %v8411_v57  ;;  %v8446_v61 = vunpack.i.h.bf16 %v8444_v43  ;;  %v6916_v43 = vld [vmem:[%s14431_s17 + $0xa0] sm:$0xff] }
0x1780   :  { %6758 = vmatpush.msra.mxu0 %v13548_v56  ;;  %5867 = vmatmul.f32.vlgmr.msrb.gmra.mxu3 %v5651_v47  ;;  %v8415_v56 = vunpack.i.l.bf16 %v13649_v42  ;;  %v15229_v42 = vld [vmem:[#allocation125_spill] sm:$0xff] }
0x1781   :  { %6790 = vmatpush.msra.mxu3 %v8445_v1  ;;  %v2249_v45 = vadd.f32 %v15229_v42, %v2206_v8  ;;  %v6704_v8 = vld [vmem:[%s14442_s19 + $0x158] sm:$0xff]  ;;  %v15234_v1 = vld [vmem:[#allocation190_spill] sm:$0xff]  ;;  %v15236_v42 = vld [vmem:[#allocation11_spill] sm:$0xff] }
0x1782   :  { %6759 = vmatpush.msra.mxu0 %v13531_v30 }
0x1783   :  { %6791 = vmatpush.msra.mxu3 %v8446_v61  ;;  %v2290_v13 = vadd.f32 %v15231_v16, %v2249_v45  ;;  %v15240_v16 = vld [vmem:[#allocation171_spill] sm:$0xff] }
0x1784   :  { %6760 = vmatpush.msra.mxu0 %v13529_v36  ;;  %4531 = vperm.xlu2 %7634, %v4517_v22   ;;  %v8421_v36 = vunpack.i.h.bf16 %v13647_v63  ;;  %v6677_v63 = vld [vmem:[%s14434_s12 + $0x640] sm:$0xff]  ;;  %v6706_v22 = vld [vmem:[%s14442_s19 + $0x168] sm:$0xff] }
0x1785   :  { %6721 = vperm.xlu0 %7640, %v6703_v0   ;;  %5710 = vperm.xlu1 %7646, %v5684_v55   ;;  %v2331_v57 = vadd.f32 %v15233_v17, %v2290_v13  ;;  %v8440_v0 = vunpack.i.l.bf16 %v13673_v3  ;;  %v8435_v55 = vunpack.i.l.bf16 %v13675_v34  ;;  %v8480_v17 = vunpack.i.l.bf16 %v13686_v7 }
0x1786   :  { %6761 = vmatpush.msra.mxu0 %v13509_v54  ;;  %6792 = vmatpush.msra.mxu3 %v8415_v56  ;;  %v3395_v30 = vpop.permute.xlu2 %3394  ;;  %v8449_v5 = vpop.permute.xlu1 %8448  ;;  %v1215_v54 = vld [vmem:[%s14442_s19] sm:$0xff]  ;;  %v15235_v56 = vld [vmem:[#allocation153_spill] sm:$0xff] }
0x1787   :  { %v13742_v15 = vpop.permute.xlu0 %2200  ;;  %v3438_v31 = vadd.f32 %v15230_v51, %v3395_v30  ;;  %v8450_v9 = vunpack.i.l.bf16 %v8449_v5  ;;  %v8451_v4 = vunpack.i.h.bf16 %v8449_v5  ;;  %v8465_v51 = vunpack.i.l.bf16 %v13688_v39 }
0x1788   :  { %6762 = vmatpush.msra.mxu0 %v13507_v6  ;;  %6793 = vmatpush.msra.mxu3 %v8416_v59  ;;  %v3354_v6 = vld [vmem:[%s14442_s19 + $0x80] sm:$0xff]  ;;  %v2372_v59 = vadd.f32 %v15235_v56, %v2331_v57 }
0x1789   :  { %5870 = vmatmul.f32.gmra.mxu3 %v5655_v18  ;;  %v3479_v2 = vadd.f32 %v15232_v28, %v3438_v31  ;;  %v8441_v18 = vunpack.i.h.bf16 %v13673_v3  ;;  %v15238_v31 = vld [vmem:[#allocation161_spill] sm:$0xff] }
0x178a   :  { %6763 = vmatpush.msra.mxu0 %v13537_v11  ;;  %6794 = vmatpush.msra.mxu3 %v8420_v19  ;;  %v8425_v11 = vunpack.i.l.bf16 %v13662_v24  ;;  %v8431_v24 = vunpack.i.h.bf16 %v13660_v50  ;;  %v6680_v50 = vld [vmem:[%s14434_s12 + $0x668] sm:$0xff]  ;;  %v2413_v3 = vadd.f32 %v15238_v31, %v2372_v59  ;;  %v6918_v59 = vld [vmem:[%s14431_s17 + $0xb0] sm:$0xff]  ;;  %v8486_v31 = vunpack.i.h.bf16 %v13701_v60 }
0x178b   :  { %v3520_v61 = vadd.f32 %v15234_v1, %v3479_v2  ;;  %v8481_v1 = vunpack.i.h.bf16 %v13686_v7  ;;  %v6910_v7 = vld [vmem:[%s14431_s17 + $0x70] sm:$0xff] }
0x178c   :  { %6764 = vmatpush.msra.mxu0 %v13540_v46  ;;  %6795 = vmatpush.msra.mxu3 %v8421_v36  ;;  %v8436_v36 = vunpack.i.h.bf16 %v13675_v34  ;;  %v8466_v34 = vunpack.i.h.bf16 %v13688_v39  ;;  %v6683_v39 = vld [vmem:[%s14434_s12 + $0x690] sm:$0xff] }
0x178d   :  { %1225 = vperm.xlu2 %7634, %v1215_v54   ;;  %6997 = vperm.xlu0 %7640, %v6919_v44   ;;  %v3561_v45 = vadd.f32 %v15236_v42, %v3520_v61  ;;  %v15237_v54 = vld [vmem:[#allocation105_spill] sm:$0xff]  ;;  %v15242_v61 = vld [vmem:[#allocation39_spill] sm:$0xff] }
0x178e   :  { %3364 = vperm.xlu1 %7646, %v3354_v6   ;;  %6765 = vmatmul.f32.vlgmr.msra.gmra.mxu0 %v6677_v63  ;;  %v13765_v10 = vpop.permute.xlu2 %3389  ;;  %v8454_v37 = vpop.permute.xlu1 %8453  ;;  %v5663_v63 = vld [vmem:[%s14434_s12 + $0x590] sm:$0xff]  ;;  %v6686_v42 = vld [vmem:[%s14434_s12 + $0x6b8] sm:$0xff] }
0x178f   :  { %6831 = vmatpush.msrb.mxu0 %v8450_v9  ;;  %6796 = vmatpush.msra.mxu3 %v8425_v11  ;;  %v13768_v12 = vpop.permute.xlu0 %2195  ;;  %v8455_v46 = vunpack.i.l.bf16 %v8454_v37  ;;  %v8456_v47 = vunpack.i.h.bf16 %v8454_v37  ;;  %v15239_v11 = vld [vmem:[#allocation117_spill] sm:$0xff]  ;;  %v3602_v13 = vadd.f32 %v15240_v16, %v3561_v45 }
0x1790   :  { %v6907_v16 = vld [vmem:[%s14431_s17 + $0x58] sm:$0xff] }
0x1791   :  { %6832 = vmatpush.msrb.mxu0 %v8451_v4  ;;  %6797 = vmatpush.msra.mxu3 %v8426_v49  ;;  %v6702_v4 = vld [vmem:[%s14442_s19 + $0x148] sm:$0xff] }
0x1792   :  { %5873 = vmatmul.f32.gmra.mxu3 %v5659_v20  ;;  %v5682_v20 = vld [vmem:[%s14442_s19 + $0x110] sm:$0xff] }
0x1793   :  { %6833 = vmatpush.msrb.mxu0 %v8430_v35  ;;  %6798 = vmatpush.msra.mxu3 %v8455_v46  ;;  %v6913_v46 = vld [vmem:[%s14431_s17 + $0x88] sm:$0xff] }
0x1795   :  { %6834 = vmatpush.msrb.mxu0 %v8431_v24  ;;  %6799 = vmatpush.msra.mxu3 %v8456_v47  ;;  %v15241_v47 = vld [vmem:[#allocation163_spill] sm:$0xff] }
0x1796   :  { %6726 = vperm.xlu2 %7634, %v6704_v8   ;;  %6982 = vperm.xlu0 %7640, %v6916_v43   ;;  %v13793_v30 = vpop.permute.xlu2 %2190  ;;  %v8459_v5 = vpop.permute.xlu1 %8458  ;;  %v5667_v43 = vld [vmem:[%s14434_s12 + $0x5b8] sm:$0xff] }
0x1797   :  { %6736 = vperm.xlu1 %7646, %v6706_v22   ;;  %6768 = vmatmul.f32.gmra.mxu0 %v6680_v50  ;;  %v1256_v19 = vpop.permute.xlu0 %1255  ;;  %v8460_v6 = vunpack.i.l.bf16 %v8459_v5  ;;  %v8461_v49 = vunpack.i.h.bf16 %v8459_v5  ;;  %v8476_v5 = vunpack.i.h.bf16 %v13704_v29 }
0x1798   :  { %6835 = vmatpush.msrb.mxu0 %v8435_v55  ;;  %6800 = vmatpush.msra.mxu3 %v8440_v0  ;;  %v1323_v44 = vadd.f32 %v15237_v54, %v1256_v19  ;;  %v8475_v0 = vunpack.i.l.bf16 %v13704_v29  ;;  %v15243_v55 = vld [vmem:[#allocation38_spill] sm:$0xff]  ;;  %v15244_v19 = vld [vmem:[#allocation48_spill] sm:$0xff]  ;;  %v8485_v29 = vunpack.i.l.bf16 %v13701_v60 }
0x1799   :  { %v5680_v60 = vld [vmem:[%s14442_s19 + $0x100] sm:$0xff] }
0x179a   :  { %v1364_v9 = vadd.f32 %v15239_v11, %v1323_v44  ;;  %6836 = vmatpush.msrb.mxu0 %v8436_v36  ;;  %6801 = vmatpush.msra.mxu3 %v8441_v18  ;;  %v4516_v18 = vld [vmem:[%s14442_s19 + $0xc0] sm:$0xff]  ;;  %v6915_v11 = vld [vmem:[%s14431_s17 + $0x98] sm:$0xff] }
0x179b   :  { %5876 = vmatmul.f32.gmra.mxu3 %v5663_v63  ;;  %v5671_v44 = vld [vmem:[%s14434_s12 + $0x5e0] sm:$0xff] }
0x179c   :  { %v2424_v37 = vadd.f32 %v2413_v3, %v1364_v9  ;;  %6802 = vmatpush.msra.mxu3 %v8465_v51  ;;  %6837 = vmatpush.msrb.mxu0 %v8460_v6  ;;  %v15245_v63 = vld [vmem:[#allocation126_spill] sm:$0xff] }
0x179d   :  { %v2252_v51 = vadd.f32 %v15245_v63, %v13722_v32  ;;  %v15246_v9 = vld [vmem:[#allocation146_spill] sm:$0xff] }
0x179e   :  { %v3613_v28 = vadd.f32 %v3602_v13, %v2424_v37  ;;  %6803 = vmatpush.msra.mxu3 %v8466_v34  ;;  %6838 = vmatpush.msrb.mxu0 %v8461_v49  ;;  %v13819_v2 = vpop.permute.xlu2 %5725  ;;  %v8469_v35 = vpop.permute.xlu1 %8468  ;;  %v6689_v32 = vld [vmem:[%s14434_s12 + $0x6e0] sm:$0xff] }
0x179f   :  { %6716 = vperm.xlu2 %7634, %v6702_v4   ;;  %6967 = vperm.xlu0 %7640, %v6913_v46   ;;  %v4557_v57 = vpop.permute.xlu0 %4556  ;;  %v8470_v24 = vunpack.i.l.bf16 %v8469_v35  ;;  %v8471_v50 = vunpack.i.h.bf16 %v8469_v35  ;;  %v2293_v34 = vadd.f32 %v15246_v9, %v2252_v51  ;;  %v15247_v4 = vld [vmem:[#allocation12_spill] sm:$0xff]  ;;  %v15249_v35 = vld [vmem:[#allocation122_spill] sm:$0xff]  ;;  %v15261_v9 = vld [vmem:[#allocation187_spill] sm:$0xff] }
0x17a0   :  { %5700 = vperm.xlu1 %7646, %v5682_v20   ;;  %6771 = vmatmul.f32.gmra.mxu0 %v6683_v39  ;;  %v4600_v8 = vadd.f32 %v15241_v47, %v4557_v57  ;;  %v5675_v20 = vld [vmem:[%s14434_s12 + $0x608] sm:$0xff]  ;;  %v15248_v39 = vld [vmem:[#allocation145_spill] sm:$0xff]  ;;  %v15259_v51 = vld [vmem:[#allocation162_spill] sm:$0xff] }
0x17a1   :  { %6839 = vmatpush.msrb.mxu0 %v8480_v17  ;;  %6804 = vmatpush.msra.mxu3 %v8470_v24  ;;  %v2240_v17 = vadd.f32 %v15249_v35, %v13793_v30  ;;  %v15250_v57 = vld [vmem:[#allocation183_spill] sm:$0xff]  ;;  %v6904_v30 = vld [vmem:[%s14431_s17 + $0x40] sm:$0xff] }
0x17a2   :  { %v4641_v22 = vadd.f32 %v15242_v61, %v4600_v8  ;;  %v15251_v47 = vld [vmem:[#allocation3_spill] sm:$0xff]  ;;  %v6912_v61 = vld [vmem:[%s14431_s17 + $0x80] sm:$0xff] }
0x17a3   :  { %6840 = vmatpush.msrb.mxu0 %v8481_v1  ;;  %5879 = vmatmul.f32.gmra.mxu3 %v5667_v43  ;;  %v15252_v43 = vld [vmem:[#allocation191_spill] sm:$0xff] }
0x17a4   :  { %v4682_v56 = vadd.f32 %v15243_v55, %v4641_v22  ;;  %6805 = vmatpush.msra.mxu3 %v8471_v50  ;;  %v15253_v22 = vld [vmem:[#allocation154_spill] sm:$0xff]  ;;  %v6917_v35 = vld [vmem:[%s14431_s17 + $0xa8] sm:$0xff] }
0x17a5   :  { %6841 = vmatpush.msrb.mxu0 %v8475_v0  ;;  %v15254_v0 = vld [vmem:[#allocation135_spill] sm:$0xff] }
0x17a6   :  { %v4723_v36 = vadd.f32 %v15244_v19, %v4682_v56  ;;  %v3380_v45 = vpop.permute.xlu2 %3379  ;;  %v8489_v54 = vpop.permute.xlu1 %8488  ;;  %v2281_v55 = vadd.f32 %v15254_v0, %v2240_v17  ;;  %v6701_v56 = vld [vmem:[%s14442_s19 + $0x140] sm:$0xff]  ;;  %v6695_v17 = vld [vmem:[%s14434_s12 + $0x730] sm:$0xff] }
0x17a7   :  { %6842 = vmatpush.msrb.mxu0 %v8476_v5  ;;  %6992 = vperm.xlu2 %7634, %v6918_v59   ;;  %v8490_v3 = vunpack.i.l.bf16 %v8489_v54  ;;  %v8491_v13 = vunpack.i.h.bf16 %v8489_v54  ;;  %v3429_v8 = vadd.f32 %v15251_v47, %v3380_v45  ;;  %v6692_v59 = vld [vmem:[%s14434_s12 + $0x708] sm:$0xff]  ;;  %v15269_v0 = vld [vmem:[#allocation138_spill] sm:$0xff] }
0x17a8   :  { %6952 = vperm.xlu0 %7640, %v6910_v7   ;;  %4526 = vperm.xlu1 %7646, %v4516_v18   ;;  %v13848_v6 = vadd.f32 %v4723_v36, %v3613_v28  ;;  %v2334_v28 = vadd.f32 %v15248_v39, %v2293_v34  ;;  %v15255_v18 = vld [vmem:[#allocation179_spill] sm:$0xff]  ;;  %v15256_v36 = vld [vmem:[#allocation13_spill] sm:$0xff] }
0x17a9   :  { %6774 = vmatmul.f32.gmra.mxu0 %v6686_v42  ;;  %v3470_v19 = vadd.f32 %v15255_v18, %v3429_v8  ;;  %v15257_v45 = vld [vmem:[#allocation107_spill] sm:$0xff] }
0x17aa   :  { %6843 = vmatpush.msrb.mxu0 %v8485_v29  ;;  %v2375_v50 = vadd.f32 %v15253_v22, %v2334_v28  ;;  %v5679_v29 = vld [vmem:[%s14434_s12 + $0x630] sm:$0xff]  ;;  %v15266_v8 = vld [vmem:[#allocation99_spill] sm:$0xff] }
0x17ab   :  { %5882 = vmatmul.f32.gmra.mxu3 %v5671_v44  ;;  %v15258_v44 = vld [vmem:[#allocation134_spill] sm:$0xff]  ;;  %v3511_v34 = vadd.f32 %v15261_v9, %v3470_v19  ;;  %v7143_v28 = vld [vmem:[%s14431_s17 + $0xd0] sm:$0xff]  ;;  %v15272_v19 = vld [vmem:[#allocation41_spill] sm:$0xff] }
0x17ac   :  { %6844 = vmatpush.msrb.mxu0 %v8486_v31  ;;  %v2322_v63 = vadd.f32 %v15258_v44, %v2281_v55  ;;  %v2416_v31 = vadd.f32 %v15259_v51, %v2375_v50  ;;  %v15268_v22 = vld [vmem:[#allocation124_spill] sm:$0xff] }
0x17ad   :  { %v2246_v50 = vadd.f32 %v15268_v22, %v13742_v15  ;;  %v15275_v44 = vld [vmem:[#allocation40_spill] sm:$0xff]  ;;  %v15285_v22 = vld [vmem:[#allocation189_spill] sm:$0xff] }
0x17ae   :  { %6845 = vmatpush.msrb.mxu0 %v8490_v3  ;;  %v13866_v37 = vpop.permute.xlu2 %1245  ;;  %v3400_v49 = vpop.permute.xlu1 %3399  ;;  %v15260_v3 = vld [vmem:[#allocation118_spill] sm:$0xff]  ;;  %v6906_v51 = vld [vmem:[%s14431_s17 + $0x50] sm:$0xff] }
0x17af   :  { %6977 = vperm.xlu2 %7634, %v6915_v11   ;;  %v3441_v46 = vadd.f32 %v15247_v4, %v3400_v49  ;;  %v6909_v4 = vld [vmem:[%s14431_s17 + $0x68] sm:$0xff] }
0x17b0   :  { %6846 = vmatpush.msrb.mxu0 %v8491_v13  ;;  %6937 = vperm.xlu0 %7640, %v6907_v16   ;;  %v15262_v16 = vld [vmem:[#allocation21_spill] sm:$0xff] }
0x17b1   :  { %5690 = vperm.xlu1 %7646, %v5680_v60   ;;  %6777 = vmatmul.f32.gmra.mxu0 %v6689_v32  ;;  %v3482_v24 = vadd.f32 %v15250_v57, %v3441_v46  ;;  %v15263_v32 = vld [vmem:[#allocation123_spill] sm:$0xff]  ;;  %v15264_v46 = vld [vmem:[#allocation150_spill] sm:$0xff] }
0x17b2   :  { %v2243_v49 = vadd.f32 %v15263_v32, %v13768_v12  ;;  %v6698_v32 = vld [vmem:[%s14434_s12 + $0x758] sm:$0xff] }
0x17b3   :  { %v3523_v1 = vadd.f32 %v15252_v43, %v3482_v24  ;;  %5885 = vmatmul.f32.gmra.mxu3 %v5675_v20  ;;  %v2363_v20 = vadd.f32 %v15264_v46, %v2322_v63  ;;  %v15265_v24 = vld [vmem:[#allocation6_spill] sm:$0xff] }
0x17b4   :  { %v3552_v47 = vadd.f32 %v15265_v24, %v3511_v34  ;;  %v2284_v55 = vadd.f32 %v15269_v0, %v2243_v49  ;;  %v15282_v24 = vld [vmem:[#allocation140_spill] sm:$0xff] }
0x17b5   :  { %v3564_v42 = vadd.f32 %v15256_v36, %v3523_v1  ;;  %v15267_v1 = vld [vmem:[#allocation172_spill] sm:$0xff] }
0x17b6   :  { %v13892_v5 = vpop.permute.xlu2 %4546  ;;  %v1261_v7 = vpop.permute.xlu1 %1260 }
0x17b7   :  { %6962 = vperm.xlu2 %7634, %v6912_v61   ;;  %v1326_v54 = vadd.f32 %v15257_v45, %v1261_v7  ;;  %v3605_v13 = vadd.f32 %v15262_v16, %v3564_v42  ;;  %v15271_v7 = vld [vmem:[#allocation114_spill] sm:$0xff]  ;;  %v15273_v42 = vld [vmem:[#allocation8_spill] sm:$0xff]  ;;  %v15278_v16 = vld [vmem:[#allocation49_spill] sm:$0xff] }
0x17b8   :  { %6922 = vperm.xlu0 %7640, %v6904_v30   ;;  %v6678_v30 = vld [vmem:[%s14434_s12 + $0x648] sm:$0xff]  ;;  %v3435_v45 = vadd.f32 %v15273_v42, %v13765_v10  ;;  %v7149_v42 = vld [vmem:[%s14431_s17 + $0x100] sm:$0xff] }
0x17b9   :  { %6711 = vperm.xlu1 %7646, %v6701_v56   ;;  %6780 = vmatmul.f32.gmra.mxu0 %v6692_v59  ;;  %v1367_v11 = vadd.f32 %v15260_v3, %v1326_v54  ;;  %v15270_v56 = vld [vmem:[#allocation158_spill] sm:$0xff]  ;;  %v15274_v54 = vld [vmem:[#allocation168_spill] sm:$0xff]  ;;  %v7146_v10 = vld [vmem:[%s14431_s17 + $0xe8] sm:$0xff] }
0x17ba   :  { %v2404_v59 = vadd.f32 %v15270_v56, %v2363_v20  ;;  %v3593_v15 = vadd.f32 %v15274_v54, %v3552_v47  ;;  %v15280_v20 = vld [vmem:[#allocation101_spill] sm:$0xff]  ;;  %v15288_v56 = vld [vmem:[#allocation152_spill] sm:$0xff] }
0x17bb   :  { %v2425_v60 = vadd.f32 %v2416_v31, %v1367_v11  ;;  %5888 = vmatmul.f32.gmra.mxu3 %v5679_v29  ;;  %v15276_v31 = vld [vmem:[#allocation141_spill] sm:$0xff]  ;;  %v6679_v54 = vld [vmem:[%s14434_s12 + $0x650] sm:$0xff] }
0x17bc   :  { %v2287_v3 = vadd.f32 %v15276_v31, %v2246_v50  ;;  %v15277_v11 = vld [vmem:[#allocation137_spill] sm:$0xff]  ;;  %v15286_v50 = vld [vmem:[#allocation115_spill] sm:$0xff] }
0x17bd   :  { %v3614_v39 = vadd.f32 %v3605_v13, %v2425_v60  ;;  %v2325_v9 = vadd.f32 %v15277_v11, %v2284_v55  ;;  %v6914_v60 = vld [vmem:[%s14431_s17 + $0x90] sm:$0xff] }
0x17be   :  { %v1241_v12 = vpop.permute.xlu2 %1240  ;;  %v4562_v57 = vpop.permute.xlu1 %4561  ;;  %v2328_v47 = vadd.f32 %v15282_v24, %v2287_v3  ;;  %v15287_v55 = vld [vmem:[#allocation188_spill] sm:$0xff]  ;;  %v15293_v3 = vld [vmem:[#allocation103_spill] sm:$0xff] }
0x17bf   :  { %6947 = vperm.xlu2 %7634, %v6909_v4   ;;  %v1314_v43 = vadd.f32 %v15266_v8, %v1241_v12  ;;  %v4603_v61 = vadd.f32 %v15267_v1, %v4562_v57  ;;  %v15279_v4 = vld [vmem:[#allocation181_spill] sm:$0xff]  ;;  %v6681_v57 = vld [vmem:[%s14434_s12 + $0x670] sm:$0xff]  ;;  %v15283_v8 = vld [vmem:[#allocation151_spill] sm:$0xff] }
0x17c0   :  { %7165 = vperm.xlu0 %7640, %v7143_v28   ;;  %v3476_v46 = vadd.f32 %v15279_v4, %v3435_v45  ;;  %v1317_v28 = vadd.f32 %v15280_v20, %v13866_v37  ;;  %v15284_v1 = vld [vmem:[#allocation180_spill] sm:$0xff]  ;;  %v6911_v45 = vld [vmem:[%s14431_s17 + $0x78] sm:$0xff] }
0x17c1   :  { %6987 = vperm.xlu1 %7646, %v6917_v35   ;;  %6783 = vmatmul.f32.gmra.mxu0 %v6695_v17  ;;  %v1355_v18 = vadd.f32 %v15271_v7, %v1314_v43  ;;  %v4644_v36 = vadd.f32 %v15272_v19, %v4603_v61  ;;  %v15281_v35 = vld [vmem:[#allocation5_spill] sm:$0xff]  ;;  %v2366_v43 = vadd.f32 %v15283_v8, %v2325_v9  ;;  %v15289_v7 = vld [vmem:[#allocation159_spill] sm:$0xff] }
0x17c2   :  { %v3517_v37 = vadd.f32 %v15285_v22, %v3476_v46  ;;  %v1358_v0 = vadd.f32 %v15286_v50, %v1317_v28  ;;  %v15290_v19 = vld [vmem:[#allocation7_spill] sm:$0xff]  ;;  %v6684_v9 = vld [vmem:[%s14434_s12 + $0x698] sm:$0xff]  ;;  %v7147_v50 = vld [vmem:[%s14431_s17 + $0xf0] sm:$0xff] }
0x17c3   :  { %v2421_v29 = vadd.f32 %v2404_v59, %v1355_v18  ;;  %v4685_v63 = vadd.f32 %v15275_v44, %v4644_v36  ;;  %6806 = vmatmul.f32.vlgmr.msra.gmra.mxu3 %v6678_v30  ;;  %v7141_v30 = vld [vmem:[%s14431_s17 + $0xc0] sm:$0xff]  ;;  %v2369_v59 = vadd.f32 %v15288_v56, %v2328_v47  ;;  %v2407_v18 = vadd.f32 %v15289_v7, %v2366_v43  ;;  %v7144_v20 = vld [vmem:[%s14431_s17 + $0xd8] sm:$0xff]  ;;  %v15297_v47 = vld [vmem:[#allocation164_spill] sm:$0xff] }
0x17c4   :  { %v6687_v43 = vld [vmem:[%s14434_s12 + $0x6c0] sm:$0xff]  ;;  %v15299_v22 = vld [vmem:[#allocation35_spill] sm:$0xff] }
0x17c5   :  { %v13941_v34 = vadd.f32 %v3593_v15, %v2421_v29  ;;  %v4726_v13 = vadd.f32 %v15278_v16, %v4685_v63  ;;  %v15291_v29 = vld [vmem:[#allocation9_spill] sm:$0xff]  ;;  %v2422_v63 = vadd.f32 %v2407_v18, %v1358_v0  ;;  %v15294_v16 = vld [vmem:[#allocation160_spill] sm:$0xff]  ;;  %v15300_v0 = vld [vmem:[#allocation47_spill] sm:$0xff] }
0x17c6   :  { %v3385_v49 = vpop.permute.xlu1 %3384  ;;  %v3558_v44 = vadd.f32 %v15291_v29, %v3517_v37  ;;  %v7150_v7 = vld [vmem:[%s14431_s17 + $0x108] sm:$0xff] }
0x17c7   :  { %6932 = vperm.xlu2 %7634, %v6906_v51   ;;  %v3432_v17 = vadd.f32 %v15281_v35, %v3385_v49  ;;  %v13957_v12 = vadd.f32 %v4726_v13, %v3614_v39  ;;  %v15292_v51 = vld [vmem:[#allocation165_spill] sm:$0xff]  ;;  %v2410_v13 = vadd.f32 %v15294_v16, %v2369_v59  ;;  %v15296_v49 = vld [vmem:[#allocation20_spill] sm:$0xff]  ;;  %v6690_v59 = vld [vmem:[%s14434_s12 + $0x6e8] sm:$0xff] }
0x17c8   :  { %7180 = vperm.xlu0 %7640, %v7146_v10   ;;  %v15295_v10 = vld [vmem:[#allocation116_spill] sm:$0xff]  ;;  %v3599_v4 = vadd.f32 %v15296_v49, %v3558_v44  ;;  %v7152_v35 = vld [vmem:[%s14431_s17 + $0x118] sm:$0xff]  ;;  %v7142_v18 = vld [vmem:[%s14431_s17 + $0xc8] sm:$0xff]  ;;  %v2186_v44 = vpop.permute.xlu0 %2185 }
0x17c9   :  { %6972 = vperm.xlu1 %7646, %v6914_v60   ;;  %6786 = vmatmul.f32.gmra.mxu0 %v6698_v32  ;;  %v3473_v61 = vadd.f32 %v15284_v1, %v3432_v17  ;;  %v6908_v17 = vld [vmem:[%s14431_s17 + $0x60] sm:$0xff]  ;;  %v15298_v1 = vld [vmem:[#allocation36_spill] sm:$0xff] }
0x17cb   :  { %v3514_v39 = vadd.f32 %v15287_v55, %v3473_v61  ;;  %6809 = vmatmul.f32.gmra.mxu3 %v6681_v57  ;;  %v6682_v57 = vld [vmem:[%s14434_s12 + $0x678] sm:$0xff] }
0x17cd   :  { %v3555_v36 = vadd.f32 %v15290_v19, %v3514_v39  ;;  %v6905_v39 = vld [vmem:[%s14431_s17 + $0x48] sm:$0xff] }
0x17ce   :  { %v1251_v15 = vpop.permute.xlu1 %1250  ;;  %v6688_v19 = vld [vmem:[%s14434_s12 + $0x6c8] sm:$0xff] }
0x17cf   :  { %v3596_v31 = vadd.f32 %v15292_v51, %v3555_v36  ;;  %7155 = vperm.xlu2 %7634, %v7141_v30   ;;  %v1320_v11 = vadd.f32 %v15293_v3, %v1251_v15  ;;  %v6685_v30 = vld [vmem:[%s14434_s12 + $0x6a0] sm:$0xff]  ;;  %v6696_v15 = vld [vmem:[%s14434_s12 + $0x738] sm:$0xff] }
0x17d0   :  { %7195 = vperm.xlu0 %7640, %v7149_v42   ;;  %v6693_v42 = vld [vmem:[%s14434_s12 + $0x710] sm:$0xff]  ;;  %v6694_v51 = vld [vmem:[%s14434_s12 + $0x718] sm:$0xff]  ;;  %v14069_v16 = vpop.permute.xlu0 %5720 }
0x17d1   :  { %6957 = vperm.xlu1 %7646, %v6911_v45   ;;  %6847 = vmatmul.f32.vlgmr.msrb.gmra.mxu0 %v6679_v54  ;;  %v1361_v60 = vadd.f32 %v15295_v10, %v1320_v11  ;;  %v13991_v32 = vadd.f32 %v3596_v31, %v2422_v63  ;;  %v7145_v45 = vld [vmem:[%s14431_s17 + $0xe0] sm:$0xff]  ;;  %v6691_v54 = vld [vmem:[%s14434_s12 + $0x6f0] sm:$0xff]  ;;  %v7148_v63 = vld [vmem:[%s14431_s17 + $0xf8] sm:$0xff] }
0x17d2   :  { %v6699_v31 = vld [vmem:[%s14434_s12 + $0x760] sm:$0xff]  ;;  %v7151_v11 = vld [vmem:[%s14431_s17 + $0x110] sm:$0xff] }
0x17d3   :  { %v2423_v46 = vadd.f32 %v2410_v13, %v1361_v60  ;;  %6812 = vmatmul.f32.gmra.mxu3 %v6684_v9  ;;  %v6697_v9 = vld [vmem:[%s14434_s12 + $0x740] sm:$0xff]  ;;  %v6700_v60 = vld [vmem:[%s14434_s12 + $0x768] sm:$0xff] }
0x17d5   :  { %v3612_v28 = vadd.f32 %v3599_v4, %v2423_v46 }
0x17d6   :  { %v4552_v24 = vpop.permute.xlu1 %4551 }
0x17d7   :  { %7170 = vperm.xlu2 %7634, %v7144_v20   ;;  %v4597_v8 = vadd.f32 %v15297_v47, %v4552_v24 }
0x17d8   :  { %7210 = vperm.xlu0 %7640, %v7152_v35   ;;  %v3375_v49 = vpop.permute.xlu0 %3374 }
0x17d9   :  { %6942 = vperm.xlu1 %7646, %v6908_v17   ;;  %6850 = vmatmul.f32.gmra.mxu0 %v6682_v57  ;;  %v4638_v61 = vadd.f32 %v15298_v1, %v4597_v8 }
0x17db   :  { %v4679_v37 = vadd.f32 %v15299_v22, %v4638_v61  ;;  %6815 = vmatmul.f32.gmra.mxu3 %v6687_v43 }
0x17dd   :  { %v4720_v55 = vadd.f32 %v15300_v0, %v4679_v37 }
0x17de   :  { %v14036_v36 = vpop.permute.xlu1 %2180 }
0x17df   :  { %7185 = vperm.xlu2 %7634, %v7147_v50   ;;  %v14022_v56 = vadd.f32 %v4720_v55, %v3612_v28  ;;  %v4542_v55 = vpop.permute.xlu2 %4541 }
0x17e0   :  { %v14082_v28 = vpop.permute.xlu0 %6746 }
0x17e1   :  { %6927 = vperm.xlu1 %7646, %v6905_v39   ;;  %6853 = vmatmul.f32.gmra.mxu0 %v6685_v30  ;;  %15303 = vst [vmem:[#allocation142_spill] sm:$0xff] %v14082_v28  ;;  %v5767_v30 = vadd.f32 %v13018_v27, %v13819_v2 }
0x17e3   :  { %6818 = vmatmul.f32.gmra.mxu3 %v6690_v59 }
0x17e6   :  { %v14050_v29 = vpop.permute.xlu1 %5715 }
0x17e7   :  { %7200 = vperm.xlu2 %7634, %v7150_v7  }
0x17e8   :  { %v14090_v24 = vpop.permute.xlu0 %3369 }
0x17e9   :  { %7160 = vperm.xlu1 %7646, %v7142_v18   ;;  %6856 = vmatmul.f32.gmra.mxu0 %v6688_v19  ;;  %v5808_v19 = vadd.f32 %v13467_v21, %v5767_v30 }
0x17eb   :  { %6821 = vmatmul.f32.gmra.mxu3 %v6693_v42  ;;  %v1236_v42 = vpop.permute.xlu2 %1235 }
0x17ee   :  { %v14061_v3 = vpop.permute.xlu1 %2175 }
0x17f0   :  { %v14100_v22 = vpop.permute.xlu0 %6741 }
0x17f1   :  { %7175 = vperm.xlu1 %7646, %v7145_v45   ;;  %6859 = vmatmul.f32.gmra.mxu0 %v6691_v54  ;;  %v5849_v54 = vadd.f32 %v13109_v58, %v5808_v19  ;;  %v15312_v19 = vld [vmem:[#allocation2_spill] sm:$0xff] }
0x17f2   :  { %v3426_v28 = vadd.f32 %v15312_v19, %v3375_v49  ;;  %v15319_v49 = vld [vmem:[#allocation149_spill] sm:$0xff] }
0x17f3   :  { %6824 = vmatmul.f32.gmra.mxu3 %v6696_v15  ;;  %v5706_v2 = vpop.permute.xlu2 %5705 }
0x17f7   :  { %v14073_v10 = vpop.permute.xlu1 %5710 }
0x17f8   :  { %v4537_v39 = vpop.permute.xlu0 %4536 }
0x17f9   :  { %7190 = vperm.xlu1 %7646, %v7148_v63   ;;  %6862 = vmatmul.f32.gmra.mxu0 %v6694_v51 }
0x17fb   :  { %6827 = vmatmul.f32.gmra.mxu3 %v6699_v31 }
0x1800   :  { %v14080_v20 = vpop.permute.xlu1 %3364  ;;  %v14117_v45 = vpop.permute.xlu0 %1230 }
0x1801   :  { %7205 = vperm.xlu1 %7646, %v7151_v11   ;;  %6865 = vmatmul.f32.gmra.mxu0 %v6697_v9  ;;  %15307 = vst [vmem:[#allocation32_spill] sm:$0xff] %v14117_v45  ;;  %v15309_v11 = vld [vmem:[#allocation121_spill] sm:$0xff]  ;;  %v15324_v45 = vld [vmem:[#allocation19_spill] sm:$0xff] }
0x1802   :  { %v2237_v9 = vadd.f32 %v15309_v11, %v2186_v44 }
0x1803   :  { %v14071_v13 = vpop.f32.mrf.mxu3 }
0x1804   :  { %15301 = vst [vmem:[#allocation139_spill] sm:$0xff] %v14071_v13 }
0x1809   :  { %6868 = vmatmul.f32.gmra.mxu0 %v6700_v60  ;;  %v14088_v57 = vpop.permute.xlu1 %6736  ;;  %v14126_v60 = vpop.permute.xlu0 %6731 }
0x180b   :  { %v6766_v4 = vpop.f32.mrf.mxu0 }
0x180c   :  { %v14078_v46 = vpop.f32.mrf.mxu3 }
0x180d   :  { %15302 = vst [vmem:[#allocation57_spill] sm:$0xff] %v14078_v46 }
0x1812   :  { %v5701_v43 = vpop.permute.xlu1 %5700 }
0x1814   :  { %v14084_v35 = vpop.f32.mrf.mxu0 }
0x1815   :  { %15304 = vst [vmem:[#allocation58_spill] sm:$0xff] %v14084_v35  ;;  %v14086_v17 = vpop.f32.mrf.mxu3  ;;  %v15311_v35 = vld [vmem:[#allocation132_spill] sm:$0xff] }
0x1816   :  { %v2278_v58 = vadd.f32 %v15311_v35, %v2237_v9  ;;  %v14143_v35 = vpop.permute.xlu0 %5695 }
0x181a   :  { %v14102_v37 = vpop.permute.xlu1 %4526 }
0x181b   :  { %15305 = vst [vmem:[#allocation30_spill] sm:$0xff] %v14102_v37  ;;  %v14135_v37 = vpop.permute.xlu2 %4531 }
0x181d   :  { %v14092_v47 = vpop.f32.mrf.mxu0 }
0x181e   :  { %v14094_v8 = vpop.f32.mrf.mxu3 }
0x1823   :  { %v14114_v18 = vpop.permute.xlu1 %5690 }
0x1824   :  { %15306 = vst [vmem:[#allocation59_spill] sm:$0xff] %v14114_v18  ;;  %v15313_v18 = vld [vmem:[#allocation131_spill] sm:$0xff] }
0x1826   :  { %v14096_v1 = vpop.f32.mrf.mxu0  ;;  %v14098_v61 = vpop.f32.mrf.mxu3 }
0x182b   :  { %v6712_v27 = vpop.permute.xlu1 %6711 }
0x182c   :  { %v6767_v13 = vadd.f32 %v6766_v4, %v6712_v27  ;;  %v15317_v4 = vld [vmem:[#allocation97_spill] sm:$0xff] }
0x182d   :  { %v1311_v27 = vadd.f32 %v15317_v4, %v1236_v42  ;;  %v4591_v42 = vadd.f32 %v15324_v45, %v4542_v55  ;;  %v15325_v4 = vld [vmem:[#allocation157_spill] sm:$0xff]  ;;  %v6722_v45 = vpop.permute.xlu0 %6721 }
0x182e   :  { %v14104_v50 = vpop.f32.mrf.mxu0  ;;  %v14106_v0 = vpop.f32.mrf.mxu3 }
0x1836   :  { %v14110_v59 = vpop.f32.mrf.mxu0  ;;  %v14112_v7 = vpop.f32.mrf.mxu3 }
0x183e   :  { %v14120_v15 = vpop.f32.mrf.mxu0  ;;  %v5889_v63 = vpop.f32.mrf.mxu3 }
0x183f   :  { %v5890_v51 = vadd.f32 %v5889_v63, %v5849_v54  ;;  %v2319_v54 = vadd.f32 %v15313_v18, %v2278_v58  ;;  %v15314_v63 = vld [vmem:[#allocation177_spill] sm:$0xff]  ;;  %v15320_v18 = vld [vmem:[#allocation186_spill] sm:$0xff] }
0x1841   :  { %v14123_v31 = vadd.f32 %v5890_v51, %v13957_v12  ;;  %v3467_v12 = vadd.f32 %v15314_v63, %v3426_v28  ;;  %v15315_v51 = vld [vmem:[#allocation18_spill] sm:$0xff]  ;;  %v2360_v9 = vadd.f32 %v15319_v49, %v2319_v54  ;;  %v15321_v28 = vld [vmem:[#allocation27_spill] sm:$0xff]  ;;  %v14157_v49 = vpop.permute.xlu2 %1225 }
0x1843   :  { %15308 = vst [vmem:[#allocation60_spill] sm:$0xff] %v14123_v31  ;;  %v4588_v31 = vadd.f32 %v15315_v51, %v4537_v39  ;;  %v15322_v39 = vld [vmem:[#allocation113_spill] sm:$0xff]  ;;  %v15323_v51 = vld [vmem:[#allocation4_spill] sm:$0xff] }
0x1844   :  { %v1352_v19 = vadd.f32 %v15322_v39, %v1311_v27  ;;  %v15330_v39 = vld [vmem:[#allocation28_spill] sm:$0xff] }
0x1845   :  { %v4629_v58 = vadd.f32 %v15321_v28, %v4588_v31  ;;  %v15327_v31 = vld [vmem:[#allocation29_spill] sm:$0xff] }
0x1846   :  { %v14128_v21 = vpop.f32.mrf.mxu0  ;;  %v6807_v30 = vpop.f32.mrf.mxu3  ;;  %v4632_v27 = vadd.f32 %v15327_v31, %v4591_v42 }
0x1847   :  { %15310 = vst [vmem:[#allocation34_spill] sm:$0xff] %v14128_v21  ;;  %v6808_v46 = vadd.f32 %v6807_v30, %v6767_v13  ;;  %v5752_v21 = vadd.f32 %v13008_v48, %v5701_v43  ;;  %v3508_v30 = vadd.f32 %v15320_v18, %v3467_v12  ;;  %v2401_v48 = vadd.f32 %v15325_v4, %v2360_v9  ;;  %v15328_v18 = vld [vmem:[#allocation169_spill] sm:$0xff] }
0x1849   :  { %v5793_v63 = vadd.f32 %v13415_v41, %v5752_v21  ;;  %v2420_v54 = vadd.f32 %v2401_v48, %v1352_v19  ;;  %v5755_v21 = vadd.f32 %v13010_v26, %v5706_v2  ;;  %v4673_v19 = vadd.f32 %v15330_v39, %v4632_v27 }
0x184b   :  { %v5834_v12 = vadd.f32 %v13099_v62, %v5793_v63  ;;  %v5796_v62 = vadd.f32 %v13424_v23, %v5755_v21  ;;  %v15333_v23 = vld [vmem:[#allocation33_spill] sm:$0xff] }
0x184d   :  { %v5875_v28 = vadd.f32 %v14086_v17, %v5834_v12  ;;  %v5758_v17 = vadd.f32 %v13012_v33, %v14073_v10  ;;  %v6727_v12 = vpop.permute.xlu2 %6726 }
0x184e   :  { %v6848_v44 = vpop.f32.mrf.mxu0  ;;  %v14137_v11 = vpop.f32.mrf.mxu3  ;;  %v6776_v27 = vadd.f32 %v14096_v1, %v6727_v12  ;;  %v15341_v12 = vld [vmem:[#allocation119_spill] sm:$0xff] }
0x184f   :  { %15316 = vst [vmem:[#allocation61_spill] sm:$0xff] %v14137_v11  ;;  %v14141_v13 = vadd.f32 %v6848_v44, %v6808_v46  ;;  %v3549_v11 = vadd.f32 %v15323_v51, %v3508_v30  ;;  %v15326_v46 = vld [vmem:[#allocation26_spill] sm:$0xff]  ;;  %v15329_v30 = vld [vmem:[#allocation44_spill] sm:$0xff] }
0x1850   :  { %v4670_v43 = vadd.f32 %v15326_v46, %v4629_v58  ;;  %v6773_v58 = vadd.f32 %v14092_v47, %v6722_v45  ;;  %v15332_v46 = vld [vmem:[#allocation45_spill] sm:$0xff]  ;;  %v5837_v47 = vadd.f32 %v13101_v40, %v5796_v62  ;;  %v5761_v45 = vadd.f32 %v13014_v25, %v14050_v29 }
0x1851   :  { %15318 = vst [vmem:[#allocation37_spill] sm:$0xff] %v14141_v13  ;;  %v3590_v41 = vadd.f32 %v15328_v18, %v3549_v11  ;;  %v15331_v11 = vld [vmem:[#allocation166_spill] sm:$0xff] }
0x1852   :  { %v4711_v55 = vadd.f32 %v15329_v30, %v4670_v43  ;;  %v4594_v48 = vadd.f32 %v15331_v11, %v13892_v5  ;;  %v4714_v43 = vadd.f32 %v15332_v46, %v4673_v19  ;;  %v5799_v5 = vadd.f32 %v13439_v52, %v5758_v17  ;;  %v15340_v17 = vld [vmem:[#allocation197_spill] sm:$0xff] }
0x1853   :  { %v3609_v9 = vadd.f32 %v3590_v41, %v2420_v54 }
0x1854   :  { %v4635_v31 = vadd.f32 %v15333_v23, %v4594_v48  ;;  %v4731_v18 = vadd.f32 %v4714_v43, %v13941_v34  ;;  %v6779_v34 = vadd.f32 %v14104_v50, %v14126_v60 }
0x1855   :  { %v4730_v63 = vadd.f32 %v4711_v55, %v3609_v9  ;;  %v15334_v55 = vld [vmem:[#allocation31_spill] sm:$0xff]  ;;  %v5840_v9 = vadd.f32 %v13103_v38, %v5799_v5  ;;  %v15336_v38 = vld [vmem:[#allocation52_spill] sm:$0xff] }
0x1856   :  { %v14154_v44 = vpop.f32.mrf.mxu0  ;;  %v6813_v13 = vpop.f32.mrf.mxu3  ;;  %v4676_v33 = vadd.f32 %v15334_v55, %v4635_v31  ;;  %v5764_v29 = vadd.f32 %v15336_v38, %v14069_v16  ;;  %v15357_v38 = vld [vmem:[#allocation51_spill] sm:$0xff] }
0x1857   :  { %v6814_v51 = vadd.f32 %v6813_v13, %v6773_v58  ;;  %v5894_v26 = vadd.f32 %v5875_v28, %v4730_v63  ;;  %v5878_v13 = vadd.f32 %v14094_v8, %v5837_v47  ;;  %v15335_v8 = vld [vmem:[#allocation46_spill] sm:$0xff]  ;;  %v5881_v52 = vadd.f32 %v14098_v61, %v5840_v9  ;;  %v15338_v61 = vld [vmem:[#allocation120_spill] sm:$0xff] }
0x1858   :  { %v4717_v1 = vadd.f32 %v15335_v8, %v4676_v33  ;;  %v5802_v58 = vadd.f32 %v13448_v53, %v5761_v45  ;;  %v2234_v48 = vadd.f32 %v15338_v61, %v14036_v36  ;;  %v6782_v53 = vadd.f32 %v14110_v59, %v14088_v57  ;;  %v15343_v57 = vld [vmem:[#allocation129_spill] sm:$0xff]  ;;  %v15344_v59 = vld [vmem:[#allocation192_spill] sm:$0xff]  ;;  %v15359_v61 = vld [vmem:[#allocation59_spill] sm:$0xff] }
0x1859   :  { %v5895_v10 = vadd.f32 %v5878_v13, %v4731_v18  ;;  %v3423_v47 = vadd.f32 %v15340_v17, %v14090_v24  ;;  %v2231_v36 = vadd.f32 %v15341_v12, %v14061_v3  ;;  %v15345_v18 = vld [vmem:[#allocation176_spill] sm:$0xff]  ;;  %v15349_v8 = vld [vmem:[#allocation185_spill] sm:$0xff]  ;;  %v15366_v17 = vld [vmem:[#allocation147_spill] sm:$0xff] }
0x185a   :  { %v4732_v39 = vadd.f32 %v4717_v1, %v13991_v32  ;;  %v5805_v32 = vadd.f32 %v13458_v14, %v5764_v29  ;;  %v15367_v12 = vld [vmem:[#allocation23_spill] sm:$0xff] }
0x185b   :  { %v3464_v24 = vadd.f32 %v15345_v18, %v3423_v47 }
0x185e   :  { %v6854_v4 = vpop.f32.mrf.mxu0  ;;  %v6816_v42 = vpop.f32.mrf.mxu3 }
0x185f   :  { %v6855_v2 = vadd.f32 %v6854_v4, %v6814_v51  ;;  %v6817_v41 = vadd.f32 %v6816_v42, %v6776_v27  ;;  %v5896_v51 = vadd.f32 %v5881_v52, %v4732_v39  ;;  %v15337_v4 = vld [vmem:[#allocation133_spill] sm:$0xff]  ;;  %v3420_v27 = vadd.f32 %v15344_v59, %v14080_v20  ;;  %v15351_v52 = vld [vmem:[#allocation32_spill] sm:$0xff]  ;;  %v15354_v39 = vld [vmem:[#allocation30_spill] sm:$0xff] }
0x1860   :  { %v5843_v42 = vadd.f32 %v15337_v4, %v5802_v58  ;;  %v3505_v20 = vadd.f32 %v15349_v8, %v3464_v24  ;;  %v15358_v4 = vld [vmem:[#allocation184_spill] sm:$0xff] }
0x1861   :  { %v14173_v54 = vadd.f32 %v6855_v2, %v5894_v26  ;;  %v15339_v26 = vld [vmem:[#allocation130_spill] sm:$0xff] }
0x1862   :  { %v5884_v50 = vadd.f32 %v14106_v0, %v5843_v42  ;;  %v2275_v2 = vadd.f32 %v15339_v26, %v2234_v48  ;;  %v15342_v0 = vld [vmem:[#allocation55_spill] sm:$0xff]  ;;  %v15360_v48 = vld [vmem:[#allocation50_spill] sm:$0xff] }
0x1863   :  { %v5846_v31 = vadd.f32 %v15342_v0, %v5805_v32 }
0x1864   :  { %v5897_v16 = vadd.f32 %v5884_v50, %v14022_v56  ;;  %v2316_v14 = vadd.f32 %v15343_v57, %v2275_v2  ;;  %v6785_v56 = vadd.f32 %v14120_v15, %v14100_v22  ;;  %v15352_v22 = vld [vmem:[#allocation95_spill] sm:$0xff]  ;;  %v15361_v50 = vld [vmem:[#allocation142_spill] sm:$0xff]  ;;  %v15364_v2 = vld [vmem:[#allocation25_spill] sm:$0xff] }
0x1865   :  { %v5887_v5 = vadd.f32 %v14112_v7, %v5846_v31  ;;  %v15350_v7 = vld [vmem:[#allocation16_spill] sm:$0xff]  ;;  %v1308_v15 = vadd.f32 %v15352_v22, %v15351_v52  ;;  %v15379_v22 = vld [vmem:[#allocation14_spill] sm:$0xff] }
0x1866   :  { %v6857_v21 = vpop.f32.mrf.mxu0  ;;  %v6819_v30 = vpop.f32.mrf.mxu3  ;;  %v4585_v1 = vadd.f32 %v15350_v7, %v14135_v37  ;;  %v5746_v37 = vadd.f32 %v15360_v48, %v15359_v61  ;;  %v15369_v31 = vld [vmem:[#allocation56_spill] sm:$0xff]  ;;  %v15385_v61 = vld [vmem:[#allocation61_spill] sm:$0xff] }
0x1867   :  { %v6858_v40 = vadd.f32 %v6857_v21, %v6817_v41  ;;  %v6820_v19 = vadd.f32 %v6819_v30, %v6779_v34  ;;  %v15346_v41 = vld [vmem:[#allocation128_spill] sm:$0xff]  ;;  %v5898_v45 = vadd.f32 %v5887_v5, %v13848_v6  ;;  %v15353_v34 = vld [vmem:[#allocation127_spill] sm:$0xff]  ;;  %v5749_v6 = vadd.f32 %v15357_v38, %v14143_v35 }
0x1868   :  { %v2272_v21 = vadd.f32 %v15346_v41, %v2231_v36  ;;  %v15347_v30 = vld [vmem:[#allocation148_spill] sm:$0xff]  ;;  %v15372_v41 = vld [vmem:[#allocation17_spill] sm:$0xff] }
0x1869   :  { %v14184_v28 = vadd.f32 %v6858_v40, %v5895_v10  ;;  %v2357_v55 = vadd.f32 %v15347_v30, %v2316_v14  ;;  %v15348_v10 = vld [vmem:[#allocation175_spill] sm:$0xff]  ;;  %v5790_v57 = vadd.f32 %v15369_v31, %v5749_v6  ;;  %v15383_v6 = vld [vmem:[#allocation57_spill] sm:$0xff] }
0x186a   :  { %v3461_v40 = vadd.f32 %v15348_v10, %v3420_v27  ;;  %v2313_v58 = vadd.f32 %v15353_v34, %v2272_v21  ;;  %v15370_v27 = vld [vmem:[#allocation167_spill] sm:$0xff]  ;;  %v15375_v10 = vld [vmem:[#allocation22_spill] sm:$0xff] }
0x186b   :  { %v15380_v34 = vld [vmem:[#allocation58_spill] sm:$0xff]  ;;  %v6893_v31 = vld [vmem:[%s14443_s13 + $0x28] sm:$0xff] }
0x186c   :  { %v3502_v42 = vadd.f32 %v15358_v4, %v3461_v40  ;;  %v2354_v47 = vadd.f32 %v15366_v17, %v2313_v58  ;;  %v15384_v4 = vld [vmem:[#allocation42_spill] sm:$0xff] }
0x186e   :  { %v6860_v62 = vpop.f32.mrf.mxu0  ;;  %v6822_v63 = vpop.f32.mrf.mxu3  ;;  %v3543_v5 = vadd.f32 %v15370_v27, %v3502_v42  ;;  %v6897_v27 = vld [vmem:[%s14443_s13 + $0x48] sm:$0xff] }
0x186f   :  { %v6861_v25 = vadd.f32 %v6860_v62, %v6820_v19  ;;  %v6823_v60 = vadd.f32 %v6822_v63, %v6782_v53  ;;  %v15355_v19 = vld [vmem:[#allocation15_spill] sm:$0xff]  ;;  %v15362_v53 = vld [vmem:[#allocation34_spill] sm:$0xff] }
0x1870   :  { %v4582_v62 = vadd.f32 %v15355_v19, %v15354_v39  ;;  %v6788_v32 = vadd.f32 %v15362_v53, %v15361_v50  ;;  %v15381_v39 = vld [vmem:[#allocation53_spill] sm:$0xff] }
0x1871   :  { %v14195_v11 = vadd.f32 %v6861_v25, %v5896_v51  ;;  %v15356_v51 = vld [vmem:[#allocation156_spill] sm:$0xff] }
0x1872   :  { %v2398_v25 = vadd.f32 %v15356_v51, %v2357_v55  ;;  %v4623_v36 = vadd.f32 %v15367_v12, %v4582_v62  ;;  %v15374_v55 = vld [vmem:[#allocation155_spill] sm:$0xff]  ;;  %v6883_v12 = vmax.f32 %v14184_v28, 0.0 }
0x1873   :  { %v15382_v51 = vld [vmem:[#allocation43_spill] sm:$0xff] }
0x1874   :  { %v4664_v40 = vadd.f32 %v15375_v10, %v4623_v36  ;;  %v6889_v28 = vld [vmem:[%s14443_s13 + $0x8] sm:$0xff] }
0x1876   :  { %v6863_v46 = vpop.f32.mrf.mxu0  ;;  %v6825_v23 = vpop.f32.mrf.mxu3  ;;  %v4705_v42 = vadd.f32 %v15384_v4, %v4664_v40 }
0x1877   :  { %v6864_v43 = vadd.f32 %v6863_v46, %v6823_v60  ;;  %v6826_v3 = vadd.f32 %v6825_v23, %v6785_v56  ;;  %v15363_v60 = vld [vmem:[#allocation173_spill] sm:$0xff]  ;;  %v4626_v46 = vadd.f32 %v15364_v2, %v4585_v1  ;;  %v15371_v56 = vld [vmem:[#allocation136_spill] sm:$0xff]  ;;  %v15378_v1 = vld [vmem:[#allocation54_spill] sm:$0xff] }
0x1878   :  { %v3546_v26 = vadd.f32 %v15363_v60, %v3505_v20  ;;  %v15368_v23 = vld [vmem:[#allocation93_spill] sm:$0xff]  ;;  %v5787_v18 = vadd.f32 %v15371_v56, %v5746_v37  ;;  %v6717_v20 = vpop.permute.xlu2 %6716  ;;  %v5831_v52 = vadd.f32 %v15378_v1, %v5790_v57  ;;  %v6894_v57 = vld [vmem:[%s14443_s13 + $0x30] sm:$0xff] }
0x1879   :  { %v14210_v13 = vadd.f32 %v6864_v43, %v5897_v16  ;;  %v15365_v16 = vld [vmem:[#allocation112_spill] sm:$0xff]  ;;  %v1305_v0 = vadd.f32 %v15368_v23, %v14157_v49  ;;  %v15377_v49 = vld [vmem:[#allocation111_spill] sm:$0xff]  ;;  %v6770_v58 = vadd.f32 %v15380_v34, %v6717_v20  ;;  %v6899_v56 = vld [vmem:[%s14443_s13 + $0x58] sm:$0xff]  ;;  %v6988_v34 = vpop.permute.xlu1 %6987 }
0x187a   :  { %v1349_v43 = vadd.f32 %v15365_v16, %v1308_v15  ;;  %v3587_v21 = vadd.f32 %v15372_v41, %v3546_v26  ;;  %v3584_v15 = vadd.f32 %v15379_v22, %v3543_v5  ;;  %v5828_v19 = vadd.f32 %v15381_v39, %v5787_v18  ;;  %v6898_v5 = vld [vmem:[%s14443_s13 + $0x50] sm:$0xff]  ;;  %v6900_v18 = vld [vmem:[%s14443_s13 + $0x60] sm:$0xff] }
0x187b   :  { %v1346_v8 = vadd.f32 %v15377_v49, %v1305_v0  ;;  %v6811_v48 = vadd.f32 %v15385_v61, %v6770_v58  ;;  %v6885_v2 = vmax.f32 %v14210_v13, 0.0  ;;  %v6888_v13 = vld [vmem:[%s14443_s13] sm:$0xff]  ;;  %v6902_v41 = vld [vmem:[%s14443_s13 + $0x70] sm:$0xff] }
0x187c   :  { %v2419_v14 = vadd.f32 %v2398_v25, %v1349_v43  ;;  %v6884_v43 = vmax.f32 %v14195_v11, 0.0  ;;  %v6891_v11 = vld [vmem:[%s14443_s13 + $0x18] sm:$0xff]  ;;  %v6892_v0 = vld [vmem:[%s14443_s13 + $0x20] sm:$0xff] }
0x187d   :  { %v6852_v26 = vadd.f32 %v14154_v44, %v6811_v48 }
0x187e   :  { %v6866_v33 = vpop.f32.mrf.mxu0  ;;  %v6828_v29 = vpop.f32.mrf.mxu3  ;;  %v3608_v7 = vadd.f32 %v3587_v21, %v2419_v14  ;;  %v6895_v14 = vld [vmem:[%s14443_s13 + $0x38] sm:$0xff] }
0x187f   :  { %v6867_v9 = vadd.f32 %v6866_v33, %v6826_v3  ;;  %v6829_v35 = vadd.f32 %v6828_v29, %v6788_v32  ;;  %v15373_v3 = vld [vmem:[#allocation24_spill] sm:$0xff]  ;;  %v2395_v33 = vadd.f32 %v15374_v55, %v2354_v47  ;;  %v5872_v29 = vadd.f32 %v15383_v6, %v5831_v52  ;;  %v15386_v32 = vld [vmem:[#allocation139_spill] sm:$0xff]  ;;  %v6903_v21 = vld [vmem:[%s14443_s13 + $0x78] sm:$0xff]  ;;  %v6998_v52 = vpop.permute.xlu0 %6997 }
0x1880   :  { %v4667_v30 = vadd.f32 %v15373_v3, %v4626_v46  ;;  %v5869_v60 = vadd.f32 %v15386_v32, %v5828_v19  ;;  %v6993_v22 = vpop.permute.xlu2 %6992 }
0x1881   :  { %v6878_v63 = vadd.f32 %v6867_v9, %v5898_v45  ;;  %v15376_v45 = vld [vmem:[#allocation60_spill] sm:$0xff]  ;;  %v2418_v38 = vadd.f32 %v2395_v33, %v1346_v8 }
0x1882   :  { %v4708_v25 = vadd.f32 %v15382_v51, %v4667_v30 }
0x1883   :  { %v6886_v37 = vmax.f32 %v6878_v63, 0.0  ;;  %v3607_v53 = vadd.f32 %v3584_v15, %v2418_v38  ;;  %v15387_v63 = vld [vmem:[#allocation37_spill] sm:$0xff] }
0x1884   :  { %v4729_v50 = vadd.f32 %v4708_v25, %v3608_v7 }
0x1885   :  { %v4728_v16 = vadd.f32 %v4705_v42, %v3607_v53 }
0x1886   :  { %v6869_v59 = vpop.f32.mrf.mxu0  ;;  %v5893_v46 = vadd.f32 %v5872_v29, %v4729_v50 }
0x1887   :  { %v6870_v24 = vadd.f32 %v6869_v59, %v6829_v35  ;;  %v5892_v17 = vadd.f32 %v5869_v60, %v4728_v16  ;;  %v6882_v35 = vmax.f32 %v14173_v54, 0.0  ;;  %v6890_v54 = vld [vmem:[%s14443_s13 + $0x10] sm:$0xff]  ;;  %v6896_v59 = vld [vmem:[%s14443_s13 + $0x40] sm:$0xff]  ;;  %v6983_v58 = vpop.permute.xlu0 %6982 }
0x1888   :  { %v6873_v47 = vadd.f32 %v6852_v26, %v5893_v46  ;;  %v6978_v19 = vpop.permute.xlu2 %6977 }
0x1889   :  { %v6879_v9 = vadd.f32 %v6870_v24, %v15376_v45  ;;  %v6872_v36 = vadd.f32 %v15387_v63, %v5892_v17  ;;  %v6901_v24 = vld [vmem:[%s14443_s13 + $0x68] sm:$0xff] }
0x188a   :  { %v6881_v23 = vmax.f32 %v6873_v47, 0.0 }
0x188b   :  { %v6887_v62 = vmax.f32 %v6879_v9, 0.0  ;;  %v6880_v44 = vmax.f32 %v6872_v36, 0.0 }
0x188d   :  { %7056 = vmatpush.msrb.mxu3 %v6887_v62  ;;  %v6973_v62 = vpop.permute.xlu1 %6972 }
0x188f   :  { %7057 = vmatpush.msrb.mxu3 %v6886_v37  ;;  %v6968_v51 = vpop.permute.xlu0 %6967 }
0x1890   :  { %v6963_v42 = vpop.permute.xlu2 %6962 }
0x1891   :  { %7058 = vmatpush.msrb.mxu3 %v6885_v2 }
0x1893   :  { %7059 = vmatpush.msrb.mxu3 %v6884_v43 }
0x1895   :  { %7060 = vmatpush.msrb.mxu3 %v6883_v12  ;;  %v6958_v37 = vpop.permute.xlu1 %6957 }
0x1897   :  { %7061 = vmatpush.msrb.mxu3 %v6882_v35  ;;  %v6953_v32 = vpop.permute.xlu0 %6952 }
0x1898   :  { %v6948_v17 = vpop.permute.xlu2 %6947 }
0x1899   :  { %7062 = vmatpush.msrb.mxu3 %v6881_v23 }
0x189b   :  { %7063 = vmatpush.msrb.mxu3 %v6880_v44 }
0x189c   :  { %7568 = vmatmul.msk.f32.vlgmr.msrb.gmra.mxu3 %vm677_vm3, %v6888_v13 }
0x189d   :  { %v6943_v63 = vpop.permute.xlu1 %6942 }
0x189f   :  { %v6938_v23 = vpop.permute.xlu0 %6937 }
0x18a4   :  { %7569 = vmatmul.msk.f32.gmra.mxu3 %vm677_vm3, %v6889_v28 }
0x18ac   :  { %7570 = vmatmul.msk.f32.gmra.mxu3 %vm677_vm3, %v6890_v54 }
0x18b4   :  { %7571 = vmatmul.msk.f32.gmra.mxu3 %vm677_vm3, %v6891_v11 }
0x18bc   :  { %7572 = vmatmul.msk.f32.gmra.mxu3 %vm677_vm3, %v6892_v0 }
0x18c4   :  { %7573 = vmatmul.msk.f32.gmra.mxu3 %vm677_vm3, %v6893_v31  ;;  %v6933_v31 = vpop.permute.xlu2 %6932 }
0x18cc   :  { %7574 = vmatmul.msk.f32.gmra.mxu3 %vm677_vm3, %v6894_v57 }
0x18d4   :  { %7575 = vmatmul.msk.f32.gmra.mxu3 %vm677_vm3, %v6895_v14 }
0x18dc   :  { %7576 = vmatmul.msk.f32.gmra.mxu3 %vm677_vm3, %v6896_v59  ;;  %v6928_v59 = vpop.permute.xlu1 %6927 }
0x18e4   :  { %7577 = vmatmul.msk.f32.gmra.mxu3 %vm677_vm3, %v6897_v27 }
0x18ec   :  { %7578 = vmatmul.msk.f32.gmra.mxu3 %vm677_vm3, %v6898_v5 }
0x18f4   :  { %7579 = vmatmul.msk.f32.gmra.mxu3 %vm677_vm3, %v6899_v56  ;;  %v6923_v56 = vpop.permute.xlu0 %6922 }
0x18fc   :  { %7580 = vmatmul.msk.f32.gmra.mxu3 %vm677_vm3, %v6900_v18 }
0x1904   :  { %7581 = vmatmul.msk.f32.gmra.mxu3 %vm677_vm3, %v6901_v24 }
0x190c   :  { %7582 = vmatmul.msk.f32.gmra.mxu3 %vm677_vm3, %v6902_v41 }
0x1914   :  { %7583 = vmatmul.msk.f32.gmra.mxu3 %vm677_vm3, %v6903_v21 }
0x191f   :  { %v14334_v3 = vpop.f32.mrf.mxu3 }
0x1920   :  { %v7066_v18 = vadd.f32 %v14334_v3, %v6923_v56  ;;  %v7131_v3 = vld [vmem:[%s14444_s14 + $0x10] sm:$0xff] }
0x1922   :  { %v7113_v21 = vmax.f32 %v7066_v18, 0.0 }
0x1927   :  { %v14336_v30 = vpop.f32.mrf.mxu3 }
0x1928   :  { %v7069_v27 = vadd.f32 %v14336_v30, %v6928_v59  ;;  %v7130_v30 = vld [vmem:[%s14444_s14 + $0x8] sm:$0xff] }
0x192a   :  { %v7114_v41 = vmax.f32 %v7069_v27, 0.0 }
0x192f   :  { %v7071_v55 = vpop.f32.mrf.mxu3 }
0x1930   :  { %v7072_v57 = vadd.f32 %v7071_v55, %v6933_v31  ;;  %v7129_v55 = vld [vmem:[%s14444_s14] sm:$0xff] }
0x1932   :  { %v7115_v24 = vmax.f32 %v7072_v57, 0.0 }
0x1937   :  { %v7074_v33 = vpop.f32.mrf.mxu3 }
0x1938   :  { %v7075_v11 = vadd.f32 %v7074_v33, %v6938_v23  ;;  %v7132_v33 = vld [vmem:[%s14444_s14 + $0x18] sm:$0xff] }
0x193a   :  { %v7116_v5 = vmax.f32 %v7075_v11, 0.0 }
0x193f   :  { %v7077_v10 = vpop.f32.mrf.mxu3 }
0x1940   :  { %v7078_v28 = vadd.f32 %v7077_v10, %v6943_v63  ;;  %v7133_v10 = vld [vmem:[%s14444_s14 + $0x20] sm:$0xff] }
0x1942   :  { %v7117_v14 = vmax.f32 %v7078_v28, 0.0 }
0x1947   :  { %v7080_v40 = vpop.f32.mrf.mxu3 }
0x1948   :  { %v7081_v44 = vadd.f32 %v7080_v40, %v6948_v17  ;;  %v7134_v40 = vld [vmem:[%s14444_s14 + $0x28] sm:$0xff] }
0x194a   :  { %v7118_v0 = vmax.f32 %v7081_v44, 0.0 }
0x194f   :  { %v7083_v45 = vpop.f32.mrf.mxu3 }
0x1950   :  { %v7084_v36 = vadd.f32 %v7083_v45, %v6953_v32  ;;  %v7135_v45 = vld [vmem:[%s14444_s14 + $0x30] sm:$0xff] }
0x1952   :  { %v7119_v54 = vmax.f32 %v7084_v36, 0.0 }
0x1957   :  { %v7086_v9 = vpop.f32.mrf.mxu3 }
0x1958   :  { %v7087_v47 = vadd.f32 %v7086_v9, %v6958_v37  ;;  %v7136_v9 = vld [vmem:[%s14444_s14 + $0x38] sm:$0xff] }
0x195a   :  { %v7120_v13 = vmax.f32 %v7087_v47, 0.0 }
0x195f   :  { %v7089_v49 = vpop.f32.mrf.mxu3 }
0x1960   :  { %v7090_v16 = vadd.f32 %v7089_v49, %v6963_v42  ;;  %v7137_v49 = vld [vmem:[%s14444_s14 + $0x40] sm:$0xff] }
0x1962   :  { %v7121_v35 = vmax.f32 %v7090_v16, 0.0 }
0x1967   :  { %v7092_v8 = vpop.f32.mrf.mxu3 }
0x1968   :  { %v7093_v2 = vadd.f32 %v7092_v8, %v6968_v51  ;;  %v7138_v8 = vld [vmem:[%s14444_s14 + $0x48] sm:$0xff] }
0x196a   :  { %v7122_v12 = vmax.f32 %v7093_v2, 0.0 }
0x196f   :  { %v7095_v20 = vpop.f32.mrf.mxu3 }
0x1970   :  { %v7096_v60 = vadd.f32 %v7095_v20, %v6973_v62  ;;  %v7139_v20 = vld [vmem:[%s14444_s14 + $0x50] sm:$0xff] }
0x1972   :  { %v7123_v43 = vmax.f32 %v7096_v60, 0.0 }
0x1977   :  { %v7098_v7 = vpop.f32.mrf.mxu3 }
0x1978   :  { %v7099_v50 = vadd.f32 %v7098_v7, %v6978_v19  ;;  %v7140_v7 = vld [vmem:[%s14444_s14 + $0x58] sm:$0xff] }
0x197a   :  { %v7124_v46 = vmax.f32 %v7099_v50, 0.0 }
0x197f   :  { %v7101_v1 = vpop.f32.mrf.mxu3 }
0x1980   :  { %v7102_v61 = vadd.f32 %v7101_v1, %v6983_v58  ;;  %v7156_v1 = vpop.permute.xlu2 %7155 }
0x1982   :  { %v7125_v26 = vmax.f32 %v7102_v61, 0.0 }
0x1987   :  { %v7104_v15 = vpop.f32.mrf.mxu3 }
0x1988   :  { %v7105_v29 = vadd.f32 %v7104_v15, %v6988_v34  ;;  %v7161_v15 = vpop.permute.xlu1 %7160  ;;  %v7171_v51 = vpop.permute.xlu2 %7170 }
0x198a   :  { %v7126_v53 = vmax.f32 %v7105_v29, 0.0 }
0x198f   :  { %v7107_v39 = vpop.f32.mrf.mxu3 }
0x1990   :  { %v7108_v38 = vadd.f32 %v7107_v39, %v6993_v22  ;;  %v7166_v39 = vpop.permute.xlu0 %7165  ;;  %v7186_v37 = vpop.permute.xlu2 %7185 }
0x1992   :  { %v7127_v48 = vmax.f32 %v7108_v38, 0.0 }
0x1997   :  { %v7110_v25 = vpop.f32.mrf.mxu3 }
0x1998   :  { %v7111_v6 = vadd.f32 %v7110_v25, %v6998_v52  ;;  %v7181_v42 = vpop.permute.xlu0 %7180 }
0x199a   :  { %v7128_v4 = vmax.f32 %v7111_v6, 0.0  ;;  %v7176_v6 = vpop.permute.xlu1 %7175 }
0x199c   :  { %7213 = vmatpush.msrb.mxu1 %v7128_v4 }
0x199e   :  { %7214 = vmatpush.msrb.mxu1 %v7127_v48 }
0x19a0   :  { %7215 = vmatpush.msrb.mxu1 %v7126_v53  ;;  %v7196_v2 = vpop.permute.xlu0 %7195 }
0x19a2   :  { %7216 = vmatpush.msrb.mxu1 %v7125_v26  ;;  %v7191_v32 = vpop.permute.xlu1 %7190 }
0x19a4   :  { %7217 = vmatpush.msrb.mxu1 %v7124_v46 }
0x19a6   :  { %7218 = vmatpush.msrb.mxu1 %v7123_v43  ;;  %v7201_v43 = vpop.permute.xlu2 %7200 }
0x19a8   :  { %7219 = vmatpush.msrb.mxu1 %v7122_v12 }
0x19aa   :  { %7220 = vmatpush.msrb.mxu1 %v7121_v35  ;;  %v7206_v12 = vpop.permute.xlu1 %7205  ;;  %v7211_v35 = vpop.permute.xlu0 %7210 }
0x19ac   :  { %7221 = vmatpush.msrb.mxu1 %v7120_v13 }
0x19ae   :  { %7222 = vmatpush.msrb.mxu1 %v7119_v54 }
0x19b0   :  { %7223 = vmatpush.msrb.mxu1 %v7118_v0 }
0x19b2   :  { %7224 = vmatpush.msrb.mxu1 %v7117_v14 }
0x19b4   :  { %7225 = vmatpush.msrb.mxu1 %v7116_v5 }
0x19b6   :  { %7226 = vmatpush.msrb.mxu1 %v7115_v24 }
0x19b8   :  { %7227 = vmatpush.msrb.mxu1 %v7114_v41 }
0x19ba   :  { %7228 = vmatpush.msrb.mxu1 %v7113_v21 }
0x19bb   :  { %7229 = vmatmul.f32.vlgmr.msrb.gmra.mxu1 %v7129_v55 }
0x19c3   :  { %7232 = vmatmul.f32.gmra.mxu1 %v7130_v30 }
0x19cb   :  { %7235 = vmatmul.f32.gmra.mxu1 %v7131_v3 }
0x19d3   :  { %7238 = vmatmul.f32.gmra.mxu1 %v7132_v33 }
0x19db   :  { %7241 = vmatmul.f32.gmra.mxu1 %v7133_v10 }
0x19e3   :  { %7244 = vmatmul.f32.gmra.mxu1 %v7134_v40 }
0x19eb   :  { %7247 = vmatmul.f32.gmra.mxu1 %v7135_v45 }
0x19f3   :  { %7250 = vmatmul.f32.gmra.mxu1 %v7136_v9 }
0x19fb   :  { %7253 = vmatmul.f32.gmra.mxu1 %v7137_v49 }
0x1a03   :  { %7256 = vmatmul.f32.gmra.mxu1 %v7138_v8 }
0x1a0b   :  { %7259 = vmatmul.f32.gmra.mxu1 %v7139_v20 }
0x1a13   :  { %7262 = vmatmul.f32.gmra.mxu1 %v7140_v7 }
0x1a38   :  { %v7230_v52 = vpop.f32.mrf.mxu1 }
0x1a39   :  { %v7231_v22 = vadd.f32 %v7230_v52, %v7156_v1 }
0x1a3b   :  { %7266 = vst.msk [vmem:[%s14445_s21] sm:$0xff] %vm3655_vm9, %v7231_v22 }
0x1a40   :  { %v7233_v34 = vpop.f32.mrf.mxu1 }
0x1a41   :  { %v7234_v58 = vadd.f32 %v7233_v34, %v7161_v15 }
0x1a43   :  { %7267 = vst.msk [vmem:[%s14445_s21 + $0x8] sm:$0xff] %vm3655_vm9, %v7234_v58 }
0x1a48   :  { %v7236_v19 = vpop.f32.mrf.mxu1 }
0x1a49   :  { %v7237_v62 = vadd.f32 %v7236_v19, %v7166_v39 }
0x1a4b   :  { %7268 = vst.msk [vmem:[%s14445_s21 + $0x10] sm:$0xff] %vm3655_vm9, %v7237_v62 }
0x1a50   :  { %v7239_v25 = vpop.f32.mrf.mxu1 }
0x1a51   :  { %v7240_v38 = vadd.f32 %v7239_v25, %v7171_v51 }
0x1a53   :  { %7269 = vst.msk [vmem:[%s14445_s21 + $0x18] sm:$0xff] %vm3655_vm9, %v7240_v38 }
0x1a58   :  { %v7242_v29 = vpop.f32.mrf.mxu1 }
0x1a59   :  { %v7243_v4 = vadd.f32 %v7242_v29, %v7176_v6 }
0x1a5b   :  { %7270 = vst.msk [vmem:[%s14445_s21 + $0x20] sm:$0xff] %vm3655_vm9, %v7243_v4 }
0x1a60   :  { %v7245_v61 = vpop.f32.mrf.mxu1 }
0x1a61   :  { %v7246_v48 = vadd.f32 %v7245_v61, %v7181_v42 }
0x1a63   :  { %7271 = vst.msk [vmem:[%s14445_s21 + $0x28] sm:$0xff] %vm3655_vm9, %v7246_v48 }
0x1a68   :  { %v7248_v50 = vpop.f32.mrf.mxu1 }
0x1a69   :  { %v7249_v53 = vadd.f32 %v7248_v50, %v7186_v37 }
0x1a6b   :  { %7272 = vst.msk [vmem:[%s14445_s21 + $0x30] sm:$0xff] %vm3655_vm9, %v7249_v53 }
0x1a70   :  { %v7251_v60 = vpop.f32.mrf.mxu1 }
0x1a71   :  { %v7252_v26 = vadd.f32 %v7251_v60, %v7191_v32 }
0x1a73   :  { %7273 = vst.msk [vmem:[%s14445_s21 + $0x38] sm:$0xff] %vm3655_vm9, %v7252_v26 }
0x1a78   :  { %v7254_v46 = vpop.f32.mrf.mxu1 }
0x1a79   :  { %v7255_v16 = vadd.f32 %v7254_v46, %v7196_v2 }
0x1a7b   :  { %7274 = vst.msk [vmem:[%s14445_s21 + $0x40] sm:$0xff] %vm3655_vm9, %v7255_v16 }
0x1a80   :  { %v7257_v17 = vpop.f32.mrf.mxu1 }
0x1a81   :  { %v7258_v47 = vadd.f32 %v7257_v17, %v7201_v43 }
0x1a83   :  { %7275 = vst.msk [vmem:[%s14445_s21 + $0x48] sm:$0xff] %vm3655_vm9, %v7258_v47 }
0x1a88   :  { %v7260_v63 = vpop.f32.mrf.mxu1 }
0x1a89   :  { %v7261_v36 = vadd.f32 %v7260_v63, %v7206_v12 }
0x1a8b   :  { %7276 = vst.msk [vmem:[%s14445_s21 + $0x50] sm:$0xff] %vm3655_vm9, %v7261_v36 }
0x1a90   :  { %v7263_v23 = vpop.f32.mrf.mxu1 }
0x1a91   :  { %v7264_v44 = vadd.f32 %v7263_v23, %v7211_v35 }
0x1a93   :  { %7277 = vst.msk [vmem:[%s14445_s21 + $0x58] sm:$0xff] %vm3655_vm9, %v7264_v44 }

</bundles_post_ra>
